<compile_context>
chip_gen: v6e
topology: v6e:2x2x1
jax: 0.10.0
libtpu: 0.0.40
codegen_flags: <defaults>
</compile_context>

<pallas_src>
import functools

import jax
import jax.numpy as jnp
from jax import lax
from jax.experimental import pallas as pl
from jax.experimental.pallas import tpu as pltpu


# ----------------------------------------------------------------------------
# Glue (plain JAX): N:M sparsity, BN folding, padding / dtype prep
# ----------------------------------------------------------------------------
def apply_nm_sparsity(w_oihw, n_keep, m_group):
    """Mirror Sparse_NHWC: OIHW->OHWI, groups of M consecutive input channels,
    keep the N largest |w| per group."""
    w_ohwi = jnp.transpose(w_oihw, (0, 2, 3, 1))
    flat = w_ohwi.reshape(-1, m_group)
    g = flat.shape[0]
    idx = jnp.argsort(jnp.abs(flat), axis=1)[:, : m_group - n_keep]
    mask = jnp.ones_like(flat).at[jnp.arange(g)[:, None], idx].set(0.0)
    w_sp = (flat * mask).reshape(w_ohwi.shape)
    return jnp.transpose(w_sp, (0, 3, 1, 2))


def fold_bn(gamma, beta, mean, var, eps=1e-5):
    scale = gamma / jnp.sqrt(var + eps)
    bias = beta - mean * scale
    return scale, bias


def _round_up(v, m):
    return (v + m - 1) // m * m


def prepare_params(params):
    """Sparsify, fold BN scale into conv weights, pad channels to lane width
    (128) and cast matmul operands to bf16 (biases stay f32)."""
    n_sp, m_sp = params["N"], params["M"]
    w1 = apply_nm_sparsity(params["w1"], n_sp, m_sp)[:, :, 0, 0]     # (Cmid, Cin)
    w2 = apply_nm_sparsity(params["w2"], n_sp, m_sp)                 # (Cmid, Cmid, 3, 3)
    w3 = apply_nm_sparsity(params["w3"], n_sp, m_sp)[:, :, 0, 0]     # (Cout, Cmid)
    s1, b1 = fold_bn(*params["bn1"])
    s2, b2 = fold_bn(*params["bn2"])
    s3, b3 = fold_bn(*params["bn3"])

    cmid, cin = w1.shape
    cout = w3.shape[0]
    cin_p, cmid_p, cout_p = (_round_up(c, 128) for c in (cin, cmid, cout))

    def pad2(a, r, c):
        return jnp.pad(a, ((0, r - a.shape[0]), (0, c - a.shape[1])))

    def padb(b, c):
        return jnp.pad(b, (0, c - b.shape[0])).reshape(1, c).astype(jnp.float32)

    w1f = pad2((w1 * s1[:, None]).T, cin_p, cmid_p).astype(jnp.bfloat16)
    w3f = pad2((w3 * s3[:, None]).T, cmid_p, cout_p).astype(jnp.bfloat16)

    w2f = jnp.transpose(w2 * s2[:, None, None, None], (2, 3, 1, 0))  # OIHW -> HWIO
    w2f = jnp.pad(w2f, ((0, 0), (0, 0), (0, cmid_p - cmid), (0, cmid_p - cmid)))
    w2f = w2f.astype(jnp.bfloat16)

    return dict(
        cin=cin, cmid=cmid, cout=cout,
        cin_p=cin_p, cmid_p=cmid_p, cout_p=cout_p,
        w1=w1f, b1=padb(b1, cmid_p),
        w2_hwio=w2f,
        # packed per tap-row dh: rows [kw*Cmid_p:(kw+1)*Cmid_p] hold w2[kh=dh, kw];
        # pairs with the lane-concatenated W-shift scratch inside the kernel.
        w2=w2f.reshape(3, 3 * cmid_p, cmid_p), b2=padb(b2, cmid_p),
        w3=w3f, b3=padb(b3, cout_p),
    )


# ----------------------------------------------------------------------------
# Fused bottleneck kernel (one grid step = b_tile images)
# ----------------------------------------------------------------------------
def _bottleneck_kernel(x_ref, w1_ref, b1_ref, w2_ref, b2_ref, w3_ref, b3_ref,
                       o_ref, t1s_ref, *, h, w, b_tile):
    hw = h * w
    cin_p = x_ref.shape[2]
    cmid_p = w2_ref.shape[2]
    cp3 = 3 * cmid_p
    rows = t1s_ref.shape[0]                  # = b_tile*(hw + w) + w
    m = b_tile * hw + (b_tile - 1) * w       # M rows of the conv2 / conv3 matmuls

    # conv1 (1x1) + bn1 (scale pre-folded) + relu -- one MXU matmul, all images
    x = x_ref[...].reshape(b_tile * hw, cin_p)                      # bf16
    t1 = jnp.dot(x, w1_ref[...], preferred_element_type=jnp.float32)
    t1 = jnp.maximum(t1 + b1_ref[...], 0.0)
    t1_c = t1.astype(jnp.bfloat16)                                  # kw=1 tap

    # In-kernel wrap-column masks (no HBM mask inputs): col == j of pixel (h, j).
    col = lax.broadcasted_iota(jnp.int32, (b_tile * hw, cmid_p), 0) % w
    zero = jnp.zeros_like(t1_c)
    t1_l = jnp.where(col != w - 1, t1_c, zero)                      # kw=0 tap (j-1)
    t1_r = jnp.where(col != 0, t1_c, zero)                          # kw=2 tap (j+1)

    # Stage the three W-shift variants channel-concatenated in one scratch with
    # a one-H-row zero halo / separator between images.  The +/-1 W shift is
    # realized by the store row offset (wrap columns already masked to zero),
    # so each conv2 matmul below reads one contiguous (m, 3*Cmid_p) slab.
    for k in range(b_tile + 1):              # zero halo / separator bands first
        lo = max(k * (hw + w) - 1, 0)
        hi = min(k * (hw + w) + w + 1, rows)
        t1s_ref[lo:hi, :] = jnp.zeros((hi - lo, cp3), jnp.bfloat16)
    for b in range(b_tile):
        base = w + b * (hw + w)
        sl = slice(b * hw, (b + 1) * hw)
        t1s_ref[base + 1:base + 1 + hw, 0:cmid_p] = t1_l[sl]
        t1s_ref[base:base + hw, cmid_p:2 * cmid_p] = t1_c[sl]
        t1s_ref[base - 1:base - 1 + hw, 2 * cmid_p:cp3] = t1_r[sl]

    # conv2 (3x3, pad=1, stride=1) + bn2 + relu -- 3 matmuls with K = 3*Cmid_p
    acc = jnp.dot(t1s_ref[0:m, :], w2_ref[0], preferred_element_type=jnp.float32)
    acc = acc + jnp.dot(t1s_ref[w:w + m, :], w2_ref[1],
                        preferred_element_type=jnp.float32)
    acc = acc + jnp.dot(t1s_ref[2 * w:2 * w + m, :], w2_ref[2],
                        preferred_element_type=jnp.float32)
    t2 = jnp.maximum(acc + b2_ref[...], 0.0).astype(jnp.bfloat16)

    # conv3 (1x1) + bn3 + identity residual + relu (downsample=None); bf16 out
    y = jnp.dot(t2, w3_ref[...], preferred_element_type=jnp.float32)
    for b in range(b_tile):
        r0 = b * (hw + w)                    # skip junk separator rows of y
        yb = (y[r0:r0 + hw] + b3_ref[...]
              + x[b * hw:(b + 1) * hw].astype(jnp.float32))
        o_ref[b] = jnp.maximum(yb, 0.0).astype(jnp.bfloat16)


def bottleneck_forward_nhwc(x_nhwc_p, prep, *, b_tile=1):
    """Core fused block.  `x_nhwc_p`: (N, H, W, Cin_p) bf16, channels padded to
    a multiple of 128.  Returns (N, H, W, Cout_p) bf16 padded NHWC -- the
    recommended inter-block interface when chaining bottlenecks."""
    n, h, w, cin_p = x_nhwc_p.shape
    assert x_nhwc_p.dtype == jnp.bfloat16
    assert cin_p == prep["cin_p"]
    assert n % b_tile == 0, "batch must be divisible by b_tile"
    cmid_p, cout_p = prep["cmid_p"], prep["cout_p"]
    hw = h * w
    rows = b_tile * (hw + w) + w
    m = b_tile * hw + (b_tile - 1) * w
    x2 = x_nhwc_p.reshape(n, hw, cin_p)

    wbytes = 2 * (cin_p * cmid_p + 9 * cmid_p * cmid_p + cmid_p * cout_p)
    flops = 2 * n * hw * (cin_p * cmid_p + 9 * cmid_p * cmid_p + cmid_p * cout_p)
    bytes_accessed = n * hw * (cin_p + cout_p) * 2 + wbytes

    # Actual VMEM working set (x/out blocks double-buffered, weights worst-case
    # double-buffered, shift scratch, f32/bf16 temporaries) with 2x headroom;
    # stays well under v7x's 64 MiB physical VMEM.
    vmem_need = (2 * b_tile * hw * (cin_p + cout_p) * 2
                 + 2 * wbytes
                 + rows * 3 * cmid_p * 2
                 + m * cmid_p * 4 * 4 + m * 3 * cmid_p * 2)
    vmem_limit = int(min(48 * 2 ** 20, max(24 * 2 ** 20, 2 * vmem_need)))

    kernel = functools.partial(_bottleneck_kernel, h=h, w=w, b_tile=b_tile)

    def call(single_buffer_weights):
        # grid-invariant operands only need one VMEM buffer
        wkw = ({"pipeline_mode": pl.Buffered(1)} if single_buffer_weights else {})
        grid_spec = pltpu.PrefetchScalarGridSpec(
            num_scalar_prefetch=0,
            grid=(n // b_tile,),
            in_specs=[
                pl.BlockSpec((b_tile, hw, cin_p), lambda i: (i, 0, 0)),          # x
                pl.BlockSpec((cin_p, cmid_p), lambda i: (0, 0), **wkw),          # w1
                pl.BlockSpec((1, cmid_p), lambda i: (0, 0), **wkw),              # b1
                pl.BlockSpec((3, 3 * cmid_p, cmid_p), lambda i: (0, 0, 0), **wkw),  # w2
                pl.BlockSpec((1, cmid_p), lambda i: (0, 0), **wkw),              # b2
                pl.BlockSpec((cmid_p, cout_p), lambda i: (0, 0), **wkw),         # w3
                pl.BlockSpec((1, cout_p), lambda i: (0, 0), **wkw),              # b3
            ],
            out_specs=pl.BlockSpec((b_tile, hw, cout_p), lambda i: (i, 0, 0)),
            scratch_shapes=[pltpu.VMEM((rows, 3 * cmid_p), jnp.bfloat16)],
        )
        out = pl.pallas_call(
            kernel,
            out_shape=jax.ShapeDtypeStruct((n, hw, cout_p), jnp.bfloat16),
            grid_spec=grid_spec,
            compiler_params=pltpu.CompilerParams(
                dimension_semantics=("parallel",),
                vmem_limit_bytes=vmem_limit,
            ),
            cost_estimate=pl.CostEstimate(flops=flops, transcendentals=0,
                                          bytes_accessed=bytes_accessed),
        )(x2, prep["w1"], prep["b1"], prep["w2"], prep["b2"], prep["w3"], prep["b3"])
        return jax.block_until_ready(out)

    try:
        out = call(True)
    except Exception:   # pipeline_mode=Buffered(1) unsupported -> default buffering
        out = call(False)
    return out.reshape(n, h, w, cout_p)


def bottleneck_forward(x_nchw, params, stride=1, *, b_tile=1):
    """Module-compatible wrapper: NCHW f32 in, NCHW bf16 out (identity residual)."""
    # TODO(synk): stride != 1 / external `downsample` module not modelled (the
    # PyTorch module with downsample=None also requires identity shapes).
    if stride != 1:
        raise NotImplementedError("stride != 1 requires the downsample module")
    prep = prepare_params(params)
    n, cin, h, w = x_nchw.shape
    assert cin == prep["cin"] and prep["cout"] == cin, \
        "identity residual requires inplanes == planes * 4"
    x = jnp.transpose(x_nchw, (0, 2, 3, 1))                           # NCHW -> NHWC
    x = jnp.pad(x, ((0, 0), (0, 0), (0, 0), (0, prep["cin_p"] - cin)))
    out = bottleneck_forward_nhwc(x.astype(jnp.bfloat16), prep, b_tile=b_tile)
    out = out[..., :cin]                                              # drop channel pad
    return jnp.transpose(out, (0, 3, 1, 2))                           # NHWC -> NCHW


# ----------------------------------------------------------------------------
# References
# ----------------------------------------------------------------------------
def reference_prepared(x_nchw, params):
    """Same preprocessing (sparsify + BN-fold + pad + bf16) but conv math via
    XLA einsum/conv -- tight check of the Pallas kernel arithmetic."""
    prep = prepare_params(params)
    n, cin, h, w = x_nchw.shape
    x = jnp.transpose(x_nchw, (0, 2, 3, 1))
    x = jnp.pad(x, ((0, 0), (0, 0), (0, 0), (0, prep["cin_p"] - cin)))
    x = x.astype(jnp.bfloat16)
    t1 = jnp.einsum("nhwc,cd->nhwd", x, prep["w1"],
                    preferred_element_type=jnp.float32)
    t1 = jnp.maximum(t1 + prep["b1"], 0.0).astype(jnp.bfloat16)
    t2 = lax.conv_general_dilated(
        t1, prep["w2_hwio"], (1, 1), ((1, 1), (1, 1)),
        dimension_numbers=("NHWC", "HWIO", "NHWC"),
        preferred_element_type=jnp.float32)
    t2 = jnp.maximum(t2 + prep["b2"], 0.0).astype(jnp.bfloat16)
    y = jnp.einsum("nhwc,cd->nhwd", t2, prep["w3"],
                   preferred_element_type=jnp.float32)
    y = jnp.maximum(y + prep["b3"] + x.astype(jnp.float32), 0.0)
    return jnp.transpose(y[..., :cin], (0, 3, 1, 2))


def reference_fp32(x, params):
    """Module semantics in pure f32 (unfolded BN) -- loose sanity check (the
    Pallas kernel runs bf16 matmuls and emits bf16)."""
    def conv(a, wt, s, pad):
        return lax.conv_general_dilated(
            a, wt, (s, s), pad, dimension_numbers=("NCHW", "OIHW", "NCHW"))

    def bn(a, p):
        sc, bi = fold_bn(*p)
        return a * sc[None, :, None, None] + bi[None, :, None, None]

    n_sp, m_sp = params["N"], params["M"]
    w1 = apply_nm_sparsity(params["w1"], n_sp, m_sp)
    w2 = apply_nm_sparsity(params["w2"], n_sp, m_sp)
    w3 = apply_nm_sparsity(params["w3"], n_sp, m_sp)
    out = jax.nn.relu(bn(conv(x, w1, 1, "VALID"), params["bn1"]))
    out = jax.nn.relu(bn(conv(out, w2, 1, ((1, 1), (1, 1))), params["bn2"]))
    out = bn(conv(out, w3, 1, "VALID"), params["bn3"])
    return jax.nn.relu(out + x)


# ----------------------------------------------------------------------------
# Deterministic parameters + smoke test
# ----------------------------------------------------------------------------
def init_bn(key, c):
    k1, k2, k3, k4 = jax.random.split(key, 4)
    gamma = jax.random.uniform(k1, (c,), jnp.float32, 0.5, 1.5)
    beta = 0.1 * jax.random.normal(k2, (c,), jnp.float32)
    mean = 0.1 * jax.random.normal(k3, (c,), jnp.float32)
    var = jax.random.uniform(k4, (c,), jnp.float32, 0.5, 1.5)
    return gamma, beta, mean, var


if __name__ == "__main__":
    planes = 4
    inplanes = planes * 4          # expansion=4, identity residual (downsample=None)
    batch, spatial = 2, 16

    key = jax.random.PRNGKey(0)
    ks = jax.random.split(key, 7)
    params = {
        "N": 2, "M": 4,
        "w1": 0.1 * jax.random.normal(ks[0], (planes, inplanes, 1, 1), jnp.float32),
        "w2": 0.1 * jax.random.normal(ks[1], (planes, planes, 3, 3), jnp.float32),
        "w3": 0.1 * jax.random.normal(ks[2], (planes * 4, planes, 1, 1), jnp.float32),
        "bn1": init_bn(ks[3], planes),
        "bn2": init_bn(ks[4], planes),
        "bn3": init_bn(ks[5], planes * 4),
    }
    x = jax.random.normal(ks[6], (batch, inplanes, spatial, spatial), jnp.float32)

    ref_tight = jax.block_until_ready(reference_prepared(x, params))
    ref_loose = jax.block_until_ready(reference_fp32(x, params))

    for b_tile in (1, 2):          # b_tile=2: two images share one grid step
        out = jax.block_until_ready(bottleneck_forward(x, params, b_tile=b_tile))
        assert out.shape == (batch, planes * 4, spatial, spatial), out.shape
        o32 = out.astype(jnp.float32)

        err_t = float(jnp.max(jnp.abs(o32 - ref_tight)))
        assert jnp.allclose(o32, ref_tight, rtol=1.5e-2, atol=1.5e-2), (b_tile, err_t)

        err_l = float(jnp.max(jnp.abs(o32 - ref_loose)))
        assert jnp.allclose(o32, ref_loose, rtol=7e-2, atol=7e-2), (b_tile, err_l)

    print("KERNEL_OK")
</pallas_src>

<mosaic_0001>
module attributes {stable_mosaic.version = 11 : i64} {
  func.func @_bottleneck_kernel(%arg0: i32, %arg1: memref<1x256x128xbf16, #tpu.memory_space<vmem>>, %arg2: memref<128x128xbf16, #tpu.memory_space<vmem>>, %arg3: memref<1x128xf32, #tpu.memory_space<vmem>>, %arg4: memref<3x384x128xbf16, #tpu.memory_space<vmem>>, %arg5: memref<1x128xf32, #tpu.memory_space<vmem>>, %arg6: memref<128x128xbf16, #tpu.memory_space<vmem>>, %arg7: memref<1x128xf32, #tpu.memory_space<vmem>>, %arg8: memref<1x256x128xbf16, #tpu.memory_space<vmem>>, %arg9: memref<288x384xbf16, #tpu.memory_space<vmem>>) attributes {dimension_semantics = [#tpu.dimension_semantics<parallel>], iteration_bounds = array<i64: 2>, scalar_prefetch = 0 : i64, scratch_operands = 1 : i64, tpu.core_type = #tpu.core_type<tc>, window_params = [{transform_indices = @transform_0, window_bounds = array<i64: 1, 256, 128>}, {pipeline_mode = #tpu.pipeline_mode<synchronous>, transform_indices = @transform_1, window_bounds = array<i64: 128, 128>}, {pipeline_mode = #tpu.pipeline_mode<synchronous>, transform_indices = @transform_2, window_bounds = array<i64: 1, 128>}, {pipeline_mode = #tpu.pipeline_mode<synchronous>, transform_indices = @transform_3, window_bounds = array<i64: 3, 384, 128>}, {pipeline_mode = #tpu.pipeline_mode<synchronous>, transform_indices = @transform_4, window_bounds = array<i64: 1, 128>}, {pipeline_mode = #tpu.pipeline_mode<synchronous>, transform_indices = @transform_5, window_bounds = array<i64: 128, 128>}, {pipeline_mode = #tpu.pipeline_mode<synchronous>, transform_indices = @transform_6, window_bounds = array<i64: 1, 128>}, {transform_indices = @transform_7, window_bounds = array<i64: 1, 256, 128>}]} {
    %c0 = arith.constant 0 : index
    %c0_0 = arith.constant 0 : index
    %c0_1 = arith.constant 0 : index
    %0 = vector.load %arg1[%c0, %c0_0, %c0_1] : memref<1x256x128xbf16, #tpu.memory_space<vmem>>, vector<1x256x128xbf16>
    %1 = vector.shape_cast %0 : vector<1x256x128xbf16> to vector<256x128xbf16>
    %c0_2 = arith.constant 0 : index
    %c0_3 = arith.constant 0 : index
    %2 = vector.load %arg2[%c0_2, %c0_3] : memref<128x128xbf16, #tpu.memory_space<vmem>>, vector<128x128xbf16>
    %cst = arith.constant dense<0.000000e+00> : vector<256x128xf32>
    %3 = tpu.matmul %1, %2, %cst {dimension_numbers = #tpu.dot_dimension_numbers<[1], [0], [0], [1], [0, 0, 1, 1], [], []>} : vector<256x128xbf16>, vector<128x128xbf16>, vector<256x128xf32> -> vector<256x128xf32>
    %c0_4 = arith.constant 0 : index
    %c0_5 = arith.constant 0 : index
    %4 = vector.load %arg3[%c0_4, %c0_5] : memref<1x128xf32, #tpu.memory_space<vmem>>, vector<1x128xf32>
    %5 = vector.broadcast %4 : vector<1x128xf32> to vector<256x128xf32>
    %6 = arith.addf %3, %5 : vector<256x128xf32>
    %cst_6 = arith.constant 0.000000e+00 : f32
    %7 = vector.broadcast %cst_6 : f32 to vector<256x128xf32>
    %8 = arith.maximumf %6, %7 : vector<256x128xf32>
    %9 = arith.truncf %8 : vector<256x128xf32> to vector<256x128xbf16>
    %10 = tpu.iota {dimensions = array<i32: 0>} : vector<256x128xi32>
    %c16_i32 = arith.constant 16 : i32
    %c0_i32 = arith.constant 0 : i32
    %11 = arith.cmpi eq, %c16_i32, %c0_i32 : i32
    %c1_i32 = arith.constant 1 : i32
    %12 = arith.select %11, %c1_i32, %c16_i32 : i32
    %13 = vector.broadcast %12 : i32 to vector<256x128xi32>
    %14 = arith.remsi %10, %13 : vector<256x128xi32>
    %c0_i32_7 = arith.constant 0 : i32
    %15 = vector.broadcast %c0_i32_7 : i32 to vector<256x128xi32>
    %16 = arith.cmpi ne, %14, %15 : vector<256x128xi32>
    %c0_i32_8 = arith.constant 0 : i32
    %17 = vector.broadcast %c0_i32_8 : i32 to vector<256x128xi32>
    %18 = arith.cmpi slt, %14, %17 : vector<256x128xi32>
    %c0_i32_9 = arith.constant 0 : i32
    %19 = arith.cmpi slt, %12, %c0_i32_9 : i32
    %20 = vector.broadcast %19 : i1 to vector<256x128xi1>
    %21 = vector.broadcast %20 : vector<256x128xi1> to vector<256x128xi1>
    %22 = arith.xori %18, %21 : vector<256x128xi1>
    %23 = arith.andi %22, %16 : vector<256x128xi1>
    %24 = vector.broadcast %12 : i32 to vector<256x128xi32>
    %25 = arith.addi %14, %24 : vector<256x128xi32>
    %26 = arith.select %23, %25, %14 : vector<256x128xi1>, vector<256x128xi32>
    %cst_10 = arith.constant 0.000000e+00 : bf16
    %27 = vector.broadcast %cst_10 : bf16 to vector<256x128xbf16>
    %c15_i32 = arith.constant 15 : i32
    %28 = vector.broadcast %c15_i32 : i32 to vector<256x128xi32>
    %29 = arith.cmpi ne, %26, %28 : vector<256x128xi32>
    %30 = arith.select %29, %9, %27 : vector<256x128xi1>, vector<256x128xbf16>
    %c0_i32_11 = arith.constant 0 : i32
    %31 = vector.broadcast %c0_i32_11 : i32 to vector<256x128xi32>
    %32 = arith.cmpi ne, %26, %31 : vector<256x128xi32>
    %33 = arith.select %32, %9, %27 : vector<256x128xi1>, vector<256x128xbf16>
    %cst_12 = arith.constant 0.000000e+00 : bf16
    %34 = vector.broadcast %cst_12 : bf16 to vector<17x384xbf16>
    %c0_13 = arith.constant 0 : index
    %c0_14 = arith.constant 0 : index
    %35 = vector.load %arg9[%c0_13, %c0_14] : memref<288x384xbf16, #tpu.memory_space<vmem>>, vector<17x384xbf16>
    tpu.vector_store %arg9[%c0_13, %c0_14], %34 {strides = array<i32>} : memref<288x384xbf16, #tpu.memory_space<vmem>>, vector<17x384xbf16>,
    %cst_15 = arith.constant 0.000000e+00 : bf16
    %36 = vector.broadcast %cst_15 : bf16 to vector<17x384xbf16>
    %c271 = arith.constant 271 : index
    %c0_16 = arith.constant 0 : index
    %37 = vector.load %arg9[%c271, %c0_16] : memref<288x384xbf16, #tpu.memory_space<vmem>>, vector<17x384xbf16>
    tpu.vector_store %arg9[%c271, %c0_16], %36 {strides = array<i32>} : memref<288x384xbf16, #tpu.memory_space<vmem>>, vector<17x384xbf16>,
    %c17 = arith.constant 17 : index
    %c0_17 = arith.constant 0 : index
    %38 = vector.load %arg9[%c17, %c0_17] : memref<288x384xbf16, #tpu.memory_space<vmem>>, vector<256x128xbf16>
    tpu.vector_store %arg9[%c17, %c0_17], %30 {strides = array<i32>} : memref<288x384xbf16, #tpu.memory_space<vmem>>, vector<256x128xbf16>,
    %c16 = arith.constant 16 : index
    %c128 = arith.constant 128 : index
    %39 = vector.load %arg9[%c16, %c128] : memref<288x384xbf16, #tpu.memory_space<vmem>>, vector<256x128xbf16>
    tpu.vector_store %arg9[%c16, %c128], %9 {strides = array<i32>} : memref<288x384xbf16, #tpu.memory_space<vmem>>, vector<256x128xbf16>,
    %c15 = arith.constant 15 : index
    %c256 = arith.constant 256 : index
    %40 = vector.load %arg9[%c15, %c256] : memref<288x384xbf16, #tpu.memory_space<vmem>>, vector<256x128xbf16>
    tpu.vector_store %arg9[%c15, %c256], %33 {strides = array<i32>} : memref<288x384xbf16, #tpu.memory_space<vmem>>, vector<256x128xbf16>,
    %c0_18 = arith.constant 0 : index
    %c0_19 = arith.constant 0 : index
    %41 = vector.load %arg9[%c0_18, %c0_19] : memref<288x384xbf16, #tpu.memory_space<vmem>>, vector<256x384xbf16>
    %c0_20 = arith.constant 0 : index
    %c0_21 = arith.constant 0 : index
    %c0_22 = arith.constant 0 : index
    %42 = vector.load %arg4[%c0_20, %c0_21, %c0_22] : memref<3x384x128xbf16, #tpu.memory_space<vmem>>, vector<1x384x128xbf16>
    %43 = vector.shape_cast %42 : vector<1x384x128xbf16> to vector<384x128xbf16>
    %cst_23 = arith.constant dense<0.000000e+00> : vector<256x128xf32>
    %44 = tpu.matmul %41, %43, %cst_23 {dimension_numbers = #tpu.dot_dimension_numbers<[1], [0], [0], [1], [0, 0, 1, 1], [], []>} : vector<256x384xbf16>, vector<384x128xbf16>, vector<256x128xf32> -> vector<256x128xf32>
    %c16_24 = arith.constant 16 : index
    %c0_25 = arith.constant 0 : index
    %45 = vector.load %arg9[%c16_24, %c0_25] : memref<288x384xbf16, #tpu.memory_space<vmem>>, vector<256x384xbf16>
    %c1 = arith.constant 1 : index
    %c0_26 = arith.constant 0 : index
    %c0_27 = arith.constant 0 : index
    %46 = vector.load %arg4[%c1, %c0_26, %c0_27] : memref<3x384x128xbf16, #tpu.memory_space<vmem>>, vector<1x384x128xbf16>
    %47 = vector.shape_cast %46 : vector<1x384x128xbf16> to vector<384x128xbf16>
    %cst_28 = arith.constant dense<0.000000e+00> : vector<256x128xf32>
    %48 = tpu.matmul %45, %47, %cst_28 {dimension_numbers = #tpu.dot_dimension_numbers<[1], [0], [0], [1], [0, 0, 1, 1], [], []>} : vector<256x384xbf16>, vector<384x128xbf16>, vector<256x128xf32> -> vector<256x128xf32>
    %49 = arith.addf %44, %48 : vector<256x128xf32>
    %c32 = arith.constant 32 : index
    %c0_29 = arith.constant 0 : index
    %50 = vector.load %arg9[%c32, %c0_29] : memref<288x384xbf16, #tpu.memory_space<vmem>>, vector<256x384xbf16>
    %c2 = arith.constant 2 : index
    %c0_30 = arith.constant 0 : index
    %c0_31 = arith.constant 0 : index
    %51 = vector.load %arg4[%c2, %c0_30, %c0_31] : memref<3x384x128xbf16, #tpu.memory_space<vmem>>, vector<1x384x128xbf16>
    %52 = vector.shape_cast %51 : vector<1x384x128xbf16> to vector<384x128xbf16>
    %cst_32 = arith.constant dense<0.000000e+00> : vector<256x128xf32>
    %53 = tpu.matmul %50, %52, %cst_32 {dimension_numbers = #tpu.dot_dimension_numbers<[1], [0], [0], [1], [0, 0, 1, 1], [], []>} : vector<256x384xbf16>, vector<384x128xbf16>, vector<256x128xf32> -> vector<256x128xf32>
    %54 = arith.addf %49, %53 : vector<256x128xf32>
    %c0_33 = arith.constant 0 : index
    %c0_34 = arith.constant 0 : index
    %55 = vector.load %arg5[%c0_33, %c0_34] : memref<1x128xf32, #tpu.memory_space<vmem>>, vector<1x128xf32>
    %56 = vector.broadcast %55 : vector<1x128xf32> to vector<256x128xf32>
    %57 = arith.addf %54, %56 : vector<256x128xf32>
    %cst_35 = arith.constant 0.000000e+00 : f32
    %58 = vector.broadcast %cst_35 : f32 to vector<256x128xf32>
    %59 = arith.maximumf %57, %58 : vector<256x128xf32>
    %60 = arith.truncf %59 : vector<256x128xf32> to vector<256x128xbf16>
    %c0_36 = arith.constant 0 : index
    %c0_37 = arith.constant 0 : index
    %61 = vector.load %arg6[%c0_36, %c0_37] : memref<128x128xbf16, #tpu.memory_space<vmem>>, vector<128x128xbf16>
    %cst_38 = arith.constant dense<0.000000e+00> : vector<256x128xf32>
    %62 = tpu.matmul %60, %61, %cst_38 {dimension_numbers = #tpu.dot_dimension_numbers<[1], [0], [0], [1], [0, 0, 1, 1], [], []>} : vector<256x128xbf16>, vector<128x128xbf16>, vector<256x128xf32> -> vector<256x128xf32>
    %c0_39 = arith.constant 0 : index
    %c0_40 = arith.constant 0 : index
    %63 = vector.load %arg7[%c0_39, %c0_40] : memref<1x128xf32, #tpu.memory_space<vmem>>, vector<1x128xf32>
    %64 = vector.broadcast %63 : vector<1x128xf32> to vector<256x128xf32>
    %65 = arith.addf %62, %64 : vector<256x128xf32>
    %66 = arith.extf %1 : vector<256x128xbf16> to vector<256x128xf32>
    %67 = arith.addf %65, %66 : vector<256x128xf32>
    %cst_41 = arith.constant 0.000000e+00 : f32
    %68 = vector.broadcast %cst_41 : f32 to vector<256x128xf32>
    %69 = arith.maximumf %67, %68 : vector<256x128xf32>
    %70 = arith.truncf %69 : vector<256x128xf32> to vector<256x128xbf16>
    %c0_42 = arith.constant 0 : index
    %c0_43 = arith.constant 0 : index
    %c0_44 = arith.constant 0 : index
    %71 = vector.load %arg8[%c0_42, %c0_43, %c0_44] : memref<1x256x128xbf16, #tpu.memory_space<vmem>>, vector<1x256x128xbf16>
    %72 = vector.shape_cast %71 : vector<1x256x128xbf16> to vector<256x128xbf16>
    %73 = vector.shape_cast %70 : vector<256x128xbf16> to vector<1x256x128xbf16>
    tpu.vector_store %arg8[%c0_42, %c0_43, %c0_44], %73 {strides = array<i32>} : memref<1x256x128xbf16, #tpu.memory_space<vmem>>, vector<1x256x128xbf16>,
    return
  }
  func.func @transform_0(%arg0: i32) -> (i32, i32, i32) {
    %c0_i32 = arith.constant 0 : i32
    %c0_i32_0 = arith.constant 0 : i32
    %c0_i32_1 = arith.constant 0 : i32
    return %arg0, %c0_i32, %c0_i32_0 : i32, i32, i32
  }
  func.func @transform_1(%arg0: i32) -> (i32, i32) {
    %c0_i32 = arith.constant 0 : i32
    %c0_i32_0 = arith.constant 0 : i32
    %c0_i32_1 = arith.constant 0 : i32
    return %c0_i32, %c0_i32_0 : i32, i32
  }
  func.func @transform_2(%arg0: i32) -> (i32, i32) {
    %c0_i32 = arith.constant 0 : i32
    %c0_i32_0 = arith.constant 0 : i32
    %c0_i32_1 = arith.constant 0 : i32
    return %c0_i32, %c0_i32_0 : i32, i32
  }
  func.func @transform_3(%arg0: i32) -> (i32, i32, i32) {
    %c0_i32 = arith.constant 0 : i32
    %c0_i32_0 = arith.constant 0 : i32
    %c0_i32_1 = arith.constant 0 : i32
    %c0_i32_2 = arith.constant 0 : i32
    return %c0_i32, %c0_i32_0, %c0_i32_1 : i32, i32, i32
  }
  func.func @transform_4(%arg0: i32) -> (i32, i32) {
    %c0_i32 = arith.constant 0 : i32
    %c0_i32_0 = arith.constant 0 : i32
    %c0_i32_1 = arith.constant 0 : i32
    return %c0_i32, %c0_i32_0 : i32, i32
  }
  func.func @transform_5(%arg0: i32) -> (i32, i32) {
    %c0_i32 = arith.constant 0 : i32
    %c0_i32_0 = arith.constant 0 : i32
    %c0_i32_1 = arith.constant 0 : i32
    return %c0_i32, %c0_i32_0 : i32, i32
  }
  func.func @transform_6(%arg0: i32) -> (i32, i32) {
    %c0_i32 = arith.constant 0 : i32
    %c0_i32_0 = arith.constant 0 : i32
    %c0_i32_1 = arith.constant 0 : i32
    return %c0_i32, %c0_i32_0 : i32, i32
  }
  func.func @transform_7(%arg0: i32) -> (i32, i32, i32) {
    %c0_i32 = arith.constant 0 : i32
    %c0_i32_0 = arith.constant 0 : i32
    %c0_i32_1 = arith.constant 0 : i32
    return %arg0, %c0_i32, %c0_i32_0 : i32, i32, i32
  }
}

module attributes {stable_mosaic.version = 11 : i64} {
  func.func @_bottleneck_kernel(%arg0: i32, %arg1: memref<1x256x128xbf16, #tpu.memory_space<vmem>>, %arg2: memref<128x128xbf16, #tpu.memory_space<vmem>>, %arg3: memref<1x128xf32, #tpu.memory_space<vmem>>, %arg4: memref<3x384x128xbf16, #tpu.memory_space<vmem>>, %arg5: memref<1x128xf32, #tpu.memory_space<vmem>>, %arg6: memref<128x128xbf16, #tpu.memory_space<vmem>>, %arg7: memref<1x128xf32, #tpu.memory_space<vmem>>, %arg8: memref<1x256x128xbf16, #tpu.memory_space<vmem>>, %arg9: memref<288x384xbf16, #tpu.memory_space<vmem>>) attributes {dimension_semantics = [#tpu.dimension_semantics<parallel>], iteration_bounds = array<i64: 2>, scalar_prefetch = 0 : i64, scratch_operands = 1 : i64, tpu.core_type = #tpu.core_type<tc>, window_params = [{transform_indices = @transform_0, window_bounds = array<i64: 1, 256, 128>}, {pipeline_mode = #tpu.pipeline_mode<synchronous>, transform_indices = @transform_1, window_bounds = array<i64: 128, 128>}, {pipeline_mode = #tpu.pipeline_mode<synchronous>, transform_indices = @transform_2, window_bounds = array<i64: 1, 128>}, {pipeline_mode = #tpu.pipeline_mode<synchronous>, transform_indices = @transform_3, window_bounds = array<i64: 3, 384, 128>}, {pipeline_mode = #tpu.pipeline_mode<synchronous>, transform_indices = @transform_4, window_bounds = array<i64: 1, 128>}, {pipeline_mode = #tpu.pipeline_mode<synchronous>, transform_indices = @transform_5, window_bounds = array<i64: 128, 128>}, {pipeline_mode = #tpu.pipeline_mode<synchronous>, transform_indices = @transform_6, window_bounds = array<i64: 1, 128>}, {transform_indices = @transform_7, window_bounds = array<i64: 1, 256, 128>}]} {
    %c0 = arith.constant 0 : index
    %c0_0 = arith.constant 0 : index
    %c0_1 = arith.constant 0 : index
    %0 = vector.load %arg1[%c0, %c0_0, %c0_1] : memref<1x256x128xbf16, #tpu.memory_space<vmem>>, vector<1x256x128xbf16>
    %1 = vector.shape_cast %0 : vector<1x256x128xbf16> to vector<256x128xbf16>
    %c0_2 = arith.constant 0 : index
    %c0_3 = arith.constant 0 : index
    %2 = vector.load %arg2[%c0_2, %c0_3] : memref<128x128xbf16, #tpu.memory_space<vmem>>, vector<128x128xbf16>
    %cst = arith.constant dense<0.000000e+00> : vector<256x128xf32>
    %3 = tpu.matmul %1, %2, %cst {dimension_numbers = #tpu.dot_dimension_numbers<[1], [0], [0], [1], [0, 0, 1, 1], [], []>} : vector<256x128xbf16>, vector<128x128xbf16>, vector<256x128xf32> -> vector<256x128xf32>
    %c0_4 = arith.constant 0 : index
    %c0_5 = arith.constant 0 : index
    %4 = vector.load %arg3[%c0_4, %c0_5] : memref<1x128xf32, #tpu.memory_space<vmem>>, vector<1x128xf32>
    %5 = vector.broadcast %4 : vector<1x128xf32> to vector<256x128xf32>
    %6 = arith.addf %3, %5 : vector<256x128xf32>
    %cst_6 = arith.constant 0.000000e+00 : f32
    %7 = vector.broadcast %cst_6 : f32 to vector<256x128xf32>
    %8 = arith.maximumf %6, %7 : vector<256x128xf32>
    %9 = arith.truncf %8 : vector<256x128xf32> to vector<256x128xbf16>
    %10 = tpu.iota {dimensions = array<i32: 0>} : vector<256x128xi32>
    %c16_i32 = arith.constant 16 : i32
    %c0_i32 = arith.constant 0 : i32
    %11 = arith.cmpi eq, %c16_i32, %c0_i32 : i32
    %c1_i32 = arith.constant 1 : i32
    %12 = arith.select %11, %c1_i32, %c16_i32 : i32
    %13 = vector.broadcast %12 : i32 to vector<256x128xi32>
    %14 = arith.remsi %10, %13 : vector<256x128xi32>
    %c0_i32_7 = arith.constant 0 : i32
    %15 = vector.broadcast %c0_i32_7 : i32 to vector<256x128xi32>
    %16 = arith.cmpi ne, %14, %15 : vector<256x128xi32>
    %c0_i32_8 = arith.constant 0 : i32
    %17 = vector.broadcast %c0_i32_8 : i32 to vector<256x128xi32>
    %18 = arith.cmpi slt, %14, %17 : vector<256x128xi32>
    %c0_i32_9 = arith.constant 0 : i32
    %19 = arith.cmpi slt, %12, %c0_i32_9 : i32
    %20 = vector.broadcast %19 : i1 to vector<256x128xi1>
    %21 = vector.broadcast %20 : vector<256x128xi1> to vector<256x128xi1>
    %22 = arith.xori %18, %21 : vector<256x128xi1>
    %23 = arith.andi %22, %16 : vector<256x128xi1>
    %24 = vector.broadcast %12 : i32 to vector<256x128xi32>
    %25 = arith.addi %14, %24 : vector<256x128xi32>
    %26 = arith.select %23, %25, %14 : vector<256x128xi1>, vector<256x128xi32>
    %cst_10 = arith.constant 0.000000e+00 : bf16
    %27 = vector.broadcast %cst_10 : bf16 to vector<256x128xbf16>
    %c15_i32 = arith.constant 15 : i32
    %28 = vector.broadcast %c15_i32 : i32 to vector<256x128xi32>
    %29 = arith.cmpi ne, %26, %28 : vector<256x128xi32>
    %30 = arith.select %29, %9, %27 : vector<256x128xi1>, vector<256x128xbf16>
    %c0_i32_11 = arith.constant 0 : i32
    %31 = vector.broadcast %c0_i32_11 : i32 to vector<256x128xi32>
    %32 = arith.cmpi ne, %26, %31 : vector<256x128xi32>
    %33 = arith.select %32, %9, %27 : vector<256x128xi1>, vector<256x128xbf16>
    %cst_12 = arith.constant 0.000000e+00 : bf16
    %34 = vector.broadcast %cst_12 : bf16 to vector<17x384xbf16>
    %c0_13 = arith.constant 0 : index
    %c0_14 = arith.constant 0 : index
    %35 = vector.load %arg9[%c0_13, %c0_14] : memref<288x384xbf16, #tpu.memory_space<vmem>>, vector<17x384xbf16>
    tpu.vector_store %arg9[%c0_13, %c0_14], %34 {strides = array<i32>} : memref<288x384xbf16, #tpu.memory_space<vmem>>, vector<17x384xbf16>,
    %cst_15 = arith.constant 0.000000e+00 : bf16
    %36 = vector.broadcast %cst_15 : bf16 to vector<17x384xbf16>
    %c271 = arith.constant 271 : index
    %c0_16 = arith.constant 0 : index
    %37 = vector.load %arg9[%c271, %c0_16] : memref<288x384xbf16, #tpu.memory_space<vmem>>, vector<17x384xbf16>
    tpu.vector_store %arg9[%c271, %c0_16], %36 {strides = array<i32>} : memref<288x384xbf16, #tpu.memory_space<vmem>>, vector<17x384xbf16>,
    %c17 = arith.constant 17 : index
    %c0_17 = arith.constant 0 : index
    %38 = vector.load %arg9[%c17, %c0_17] : memref<288x384xbf16, #tpu.memory_space<vmem>>, vector<256x128xbf16>
    tpu.vector_store %arg9[%c17, %c0_17], %30 {strides = array<i32>} : memref<288x384xbf16, #tpu.memory_space<vmem>>, vector<256x128xbf16>,
    %c16 = arith.constant 16 : index
    %c128 = arith.constant 128 : index
    %39 = vector.load %arg9[%c16, %c128] : memref<288x384xbf16, #tpu.memory_space<vmem>>, vector<256x128xbf16>
    tpu.vector_store %arg9[%c16, %c128], %9 {strides = array<i32>} : memref<288x384xbf16, #tpu.memory_space<vmem>>, vector<256x128xbf16>,
    %c15 = arith.constant 15 : index
    %c256 = arith.constant 256 : index
    %40 = vector.load %arg9[%c15, %c256] : memref<288x384xbf16, #tpu.memory_space<vmem>>, vector<256x128xbf16>
    tpu.vector_store %arg9[%c15, %c256], %33 {strides = array<i32>} : memref<288x384xbf16, #tpu.memory_space<vmem>>, vector<256x128xbf16>,
    %c0_18 = arith.constant 0 : index
    %c0_19 = arith.constant 0 : index
    %41 = vector.load %arg9[%c0_18, %c0_19] : memref<288x384xbf16, #tpu.memory_space<vmem>>, vector<256x384xbf16>
    %c0_20 = arith.constant 0 : index
    %c0_21 = arith.constant 0 : index
    %c0_22 = arith.constant 0 : index
    %42 = vector.load %arg4[%c0_20, %c0_21, %c0_22] : memref<3x384x128xbf16, #tpu.memory_space<vmem>>, vector<1x384x128xbf16>
    %43 = vector.shape_cast %42 : vector<1x384x128xbf16> to vector<384x128xbf16>
    %cst_23 = arith.constant dense<0.000000e+00> : vector<256x128xf32>
    %44 = tpu.matmul %41, %43, %cst_23 {dimension_numbers = #tpu.dot_dimension_numbers<[1], [0], [0], [1], [0, 0, 1, 1], [], []>} : vector<256x384xbf16>, vector<384x128xbf16>, vector<256x128xf32> -> vector<256x128xf32>
    %c16_24 = arith.constant 16 : index
    %c0_25 = arith.constant 0 : index
    %45 = vector.load %arg9[%c16_24, %c0_25] : memref<288x384xbf16, #tpu.memory_space<vmem>>, vector<256x384xbf16>
    %c1 = arith.constant 1 : index
    %c0_26 = arith.constant 0 : index
    %c0_27 = arith.constant 0 : index
    %46 = vector.load %arg4[%c1, %c0_26, %c0_27] : memref<3x384x128xbf16, #tpu.memory_space<vmem>>, vector<1x384x128xbf16>
    %47 = vector.shape_cast %46 : vector<1x384x128xbf16> to vector<384x128xbf16>
    %cst_28 = arith.constant dense<0.000000e+00> : vector<256x128xf32>
    %48 = tpu.matmul %45, %47, %cst_28 {dimension_numbers = #tpu.dot_dimension_numbers<[1], [0], [0], [1], [0, 0, 1, 1], [], []>} : vector<256x384xbf16>, vector<384x128xbf16>, vector<256x128xf32> -> vector<256x128xf32>
    %49 = arith.addf %44, %48 : vector<256x128xf32>
    %c32 = arith.constant 32 : index
    %c0_29 = arith.constant 0 : index
    %50 = vector.load %arg9[%c32, %c0_29] : memref<288x384xbf16, #tpu.memory_space<vmem>>, vector<256x384xbf16>
    %c2 = arith.constant 2 : index
    %c0_30 = arith.constant 0 : index
    %c0_31 = arith.constant 0 : index
    %51 = vector.load %arg4[%c2, %c0_30, %c0_31] : memref<3x384x128xbf16, #tpu.memory_space<vmem>>, vector<1x384x128xbf16>
    %52 = vector.shape_cast %51 : vector<1x384x128xbf16> to vector<384x128xbf16>
    %cst_32 = arith.constant dense<0.000000e+00> : vector<256x128xf32>
    %53 = tpu.matmul %50, %52, %cst_32 {dimension_numbers = #tpu.dot_dimension_numbers<[1], [0], [0], [1], [0, 0, 1, 1], [], []>} : vector<256x384xbf16>, vector<384x128xbf16>, vector<256x128xf32> -> vector<256x128xf32>
    %54 = arith.addf %49, %53 : vector<256x128xf32>
    %c0_33 = arith.constant 0 : index
    %c0_34 = arith.constant 0 : index
    %55 = vector.load %arg5[%c0_33, %c0_34] : memref<1x128xf32, #tpu.memory_space<vmem>>, vector<1x128xf32>
    %56 = vector.broadcast %55 : vector<1x128xf32> to vector<256x128xf32>
    %57 = arith.addf %54, %56 : vector<256x128xf32>
    %cst_35 = arith.constant 0.000000e+00 : f32
    %58 = vector.broadcast %cst_35 : f32 to vector<256x128xf32>
    %59 = arith.maximumf %57, %58 : vector<256x128xf32>
    %60 = arith.truncf %59 : vector<256x128xf32> to vector<256x128xbf16>
    %c0_36 = arith.constant 0 : index
    %c0_37 = arith.constant 0 : index
    %61 = vector.load %arg6[%c0_36, %c0_37] : memref<128x128xbf16, #tpu.memory_space<vmem>>, vector<128x128xbf16>
    %cst_38 = arith.constant dense<0.000000e+00> : vector<256x128xf32>
    %62 = tpu.matmul %60, %61, %cst_38 {dimension_numbers = #tpu.dot_dimension_numbers<[1], [0], [0], [1], [0, 0, 1, 1], [], []>} : vector<256x128xbf16>, vector<128x128xbf16>, vector<256x128xf32> -> vector<256x128xf32>
    %c0_39 = arith.constant 0 : index
    %c0_40 = arith.constant 0 : index
    %63 = vector.load %arg7[%c0_39, %c0_40] : memref<1x128xf32, #tpu.memory_space<vmem>>, vector<1x128xf32>
    %64 = vector.broadcast %63 : vector<1x128xf32> to vector<256x128xf32>
    %65 = arith.addf %62, %64 : vector<256x128xf32>
    %66 = arith.extf %1 : vector<256x128xbf16> to vector<256x128xf32>
    %67 = arith.addf %65, %66 : vector<256x128xf32>
    %cst_41 = arith.constant 0.000000e+00 : f32
    %68 = vector.broadcast %cst_41 : f32 to vector<256x128xf32>
    %69 = arith.maximumf %67, %68 : vector<256x128xf32>
    %70 = arith.truncf %69 : vector<256x128xf32> to vector<256x128xbf16>
    %c0_42 = arith.constant 0 : index
    %c0_43 = arith.constant 0 : index
    %c0_44 = arith.constant 0 : index
    %71 = vector.load %arg8[%c0_42, %c0_43, %c0_44] : memref<1x256x128xbf16, #tpu.memory_space<vmem>>, vector<1x256x128xbf16>
    %72 = vector.shape_cast %71 : vector<1x256x128xbf16> to vector<256x128xbf16>
    %73 = vector.shape_cast %70 : vector<256x128xbf16> to vector<1x256x128xbf16>
    tpu.vector_store %arg8[%c0_42, %c0_43, %c0_44], %73 {strides = array<i32>} : memref<1x256x128xbf16, #tpu.memory_space<vmem>>, vector<1x256x128xbf16>,
    return
  }
  func.func @transform_0(%arg0: i32) -> (i32, i32, i32) {
    %c0_i32 = arith.constant 0 : i32
    %c0_i32_0 = arith.constant 0 : i32
    %c0_i32_1 = arith.constant 0 : i32
    return %arg0, %c0_i32, %c0_i32_0 : i32, i32, i32
  }
  func.func @transform_1(%arg0: i32) -> (i32, i32) {
    %c0_i32 = arith.constant 0 : i32
    %c0_i32_0 = arith.constant 0 : i32
    %c0_i32_1 = arith.constant 0 : i32
    return %c0_i32, %c0_i32_0 : i32, i32
  }
  func.func @transform_2(%arg0: i32) -> (i32, i32) {
    %c0_i32 = arith.constant 0 : i32
    %c0_i32_0 = arith.constant 0 : i32
    %c0_i32_1 = arith.constant 0 : i32
    return %c0_i32, %c0_i32_0 : i32, i32
  }
  func.func @transform_3(%arg0: i32) -> (i32, i32, i32) {
    %c0_i32 = arith.constant 0 : i32
    %c0_i32_0 = arith.constant 0 : i32
    %c0_i32_1 = arith.constant 0 : i32
    %c0_i32_2 = arith.constant 0 : i32
    return %c0_i32, %c0_i32_0, %c0_i32_1 : i32, i32, i32
  }
  func.func @transform_4(%arg0: i32) -> (i32, i32) {
    %c0_i32 = arith.constant 0 : i32
    %c0_i32_0 = arith.constant 0 : i32
    %c0_i32_1 = arith.constant 0 : i32
    return %c0_i32, %c0_i32_0 : i32, i32
  }
  func.func @transform_5(%arg0: i32) -> (i32, i32) {
    %c0_i32 = arith.constant 0 : i32
    %c0_i32_0 = arith.constant 0 : i32
    %c0_i32_1 = arith.constant 0 : i32
    return %c0_i32, %c0_i32_0 : i32, i32
  }
  func.func @transform_6(%arg0: i32) -> (i32, i32) {
    %c0_i32 = arith.constant 0 : i32
    %c0_i32_0 = arith.constant 0 : i32
    %c0_i32_1 = arith.constant 0 : i32
    return %c0_i32, %c0_i32_0 : i32, i32
  }
  func.func @transform_7(%arg0: i32) -> (i32, i32, i32) {
    %c0_i32 = arith.constant 0 : i32
    %c0_i32_0 = arith.constant 0 : i32
    %c0_i32_1 = arith.constant 0 : i32
    return %arg0, %c0_i32, %c0_i32_0 : i32, i32, i32
  }
}

</mosaic_0001>

<bundles_post_ra>
// kernel: tpu_custom_call.1
= control target key start
LH: loop header
LB: loop body
LE: loop exit
PB: predicated region body
PF: predicated region fallthrough
CT: control target
= control target key end

     0   :  { %s9497_s0 = inlined_call_operand.hbm [shape: bf16[2,256,128], index: 0, kind: input, shape index: {}]   ;;  %s9498_s1 = inlined_call_operand.hbm [shape: bf16[128,128], index: 1, kind: input, shape index: {}]   ;;  %s9499_s2 = inlined_call_operand.vmem [shape: f32[1,128], index: 2, kind: input, shape index: {}]   ;;  %s9500_s3 = inlined_call_operand.hbm [shape: bf16[3,384,128], index: 3, kind: input, shape index: {}]   ;;  %s9501_s4 = inlined_call_operand.vmem [shape: f32[1,128], index: 4, kind: input, shape index: {}]   ;;  %s9502_s5 = inlined_call_operand.hbm [shape: bf16[128,128], index: 5, kind: input, shape index: {}]   ;;  %s9503_s6 = inlined_call_operand.vmem [shape: f32[1,128], index: 6, kind: input, shape index: {}]   ;;  %s9504_s7 = inlined_call_operand.hbm [shape: bf16[2,256,128], index: 7, kind: output, shape index: {}]  }
   0x1   :  { %9527 = sst [smem:[#allocation30_spill]] %s9498_s1 }
   0x2   :  { %12 = vsyncpa [#allocation4], 0 }
   0x3   :  { %14 = vsyncpa [#allocation4 + $0x1], 0 }
   0x4   :  { %15 = vsyncpa [#allocation7], 0 }
   0x5   :  { %16 = vsyncpa [#allocation10], 0 }
   0x6   :  { %17 = vsyncpa [#allocation5], 0 }
   0x7   :  { %19 = vsyncpa [#allocation5 + $0x1], 0  ;;  %s7373_s24 = smov 0   ;;  %s7375_s25 = smov 0  }
   0x8   :  { %s7377_s26 = smov 0   ;;  %s7379_s27 = smov 0  }
   0x9 LB: > { %s7394_s28 = sadd.s32 4294967295, %s7320_s27   ;;  %s5541_s29 = sadd.s32 4294967294, %s7320_s27   ;;  %s7320_s27 = sphi %s7379_s27, %s9759_s27   ;;  %s7316_s26 = sphi %s7377_s26, %s9758_s26   ;;  %s7312_s25 = sphi %s7375_s25, %s9757_s25   ;;  %s7308_s24 = sphi %s7373_s24, %s9756_s24  }
   0xa   : > { %p45_p0 = scmp.ne.s32.totalorder %s7312_s25, %s7308_s24  ;;  %p9505_p1 = scmp.eq.s32.totalorder %s7394_s28, 0 }
   0xb   : > { %p195_p2 = scmp.eq.s32.totalorder %s7394_s28, 1  ;;  %p201_p3 = scmp.eq.s32.totalorder %s5541_s29, 1 }
   0xc   : > { %p7403_p4 = por %p9505_p1, %p45_p0  ;;  %p5542_p5 = scmp.ge.s32.totalorder %s7320_s27, 1 }
   0xd   : > { %p7408_p6 = por %p201_p3, %p45_p0  ;;  %p208_p7 = scmp.lt.s32.totalorder %s7320_s27, 3 }
   0xe   : > { %s9528_s30 = scalar_select %p7403_p4, 1, 0 }
   0xf   : > { %s9529_s8 = scalar_select %p7408_p6, 1, 0 }
  0x10   : > { %p7413_p8 = pnand %p5542_p5, %p208_p7  ;;  %s7322_s10 = smov [#allocation6]  }
  0x11   : > { %s220_s11 = sshll.u32 %s7322_s10, 4  ;;  %s7323_s13 = smov [#allocation8]   ;;  %s221_s11 = int_to_ptr.vmem [resolvable:$true] %s220_s11 }
  0x12   : > { %s9530_s9 = scalar_select %p7413_p8, 1, 0 }
  0x13   : > { %p6816_p9 = pneg %p7413_p8  ;;  %s236_s14 = sshll.u32 %s7323_s13, 4  ;;  %s237_s14 = int_to_ptr.vmem [resolvable:$true] %s236_s14 }
  0x14   : > { %s7324_s15 = smov [#allocation9]   ;;  %s7153_s17 = scalar_lea.vmem %s221_s11, 1024 }
  0x15   : > { %p7422_p11 = pnand %p6816_p9, %p9505_p1  ;;  %s252_s16 = sshll.u32 %s7324_s15, 4  ;;  %s253_s16 = int_to_ptr.vmem [resolvable:$true] %s252_s16 }
  0x16   : > { %p7154_p13 = scmp.ne.s32.totalorder %s221_s11, %s7153_s17  ;;  %p7161_p5 = scmp.lt.s32.totalorder %s221_s11, %s221_s11 }
  0x17   : > { %p7144_p12 = pneg %p7422_p11  ;;  %p7162_p7 = scmp.lt.s32.totalorder %s7153_s17, %s7153_s17 }
  0x19   : > { %p7156_p0 = pnand %p7154_p13, %p7144_p12  ;;  %p7163_p9 = por %p7162_p7, %p7161_p5 }
  0x1b   : > { %p7157_p3 = pneg %p7156_p0 }
  0x1d   : > { %p7164_p10 = pnand %p7163_p9, %p7157_p3 }
  0x1f   : > { %7167 = shalt.err (!%p7164_p10)
}
  0x20   : > { %s9506_s18 = smov 64   ;;  %s9507_s19 = smov 4  }
  0x21   : > { %s9532_s1 = sld [smem:[#allocation30_spill]]  ;;  %s7179_s22 = scalar_lea.vmem %s237_s14, 9216 }
  0x22   : > { %p7180_p13 = scmp.ne.s32.totalorder %s237_s14, %s7179_s22  ;;  %p7187_p3 = scmp.lt.s32.totalorder %s237_s14, %s237_s14 }
  0x23   : > { %p7188_p10 = scmp.lt.s32.totalorder %s7179_s22, %s7179_s22 }
  0x24   : > { %p7182_p0 = pnand %p7180_p13, %p7144_p12 }
  0x25   : > { %p7189_p7 = por %p7188_p10, %p7187_p3 }
  0x26   : > { %p7183_p5 = pneg %p7182_p0 }
  0x27   : > { %6819 = dma.hbm_to_vmem [thread:$0]  (!%p7422_p11), %s9532_s1, 1024, %s221_s11, [#allocation7], %s9506_s18, %s9506_s18, %s9507_s19  }
  0x28   : > { %p7190_p9 = pnand %p7189_p7, %p7183_p5 }
  0x2a   : > { %7193 = shalt.err (!%p7190_p9)
}
  0x2b   : > { %6822 = dma.hbm_to_vmem [thread:$0]  (!%p7422_p11), %s9500_s3, 9216, %s237_s14, [#allocation7], %s9506_s18, %s9506_s18, %s9507_s19  }
  0x2c   : > { %s7205_s10 = scalar_lea.vmem %s253_s16, 1024  ;;  %p7213_p3 = scmp.lt.s32.totalorder %s253_s16, %s253_s16 }
  0x2d   : > { %p7206_p1 = scmp.ne.s32.totalorder %s253_s16, %s7205_s10  ;;  %p7214_p5 = scmp.lt.s32.totalorder %s7205_s10, %s7205_s10 }
  0x2f   : > { %p7208_p13 = pnand %p7206_p1, %p7144_p12  ;;  %p7215_p10 = por %p7214_p5, %p7213_p3 }
  0x31   : > { %p7209_p0 = pneg %p7208_p13 }
  0x33   : > { %p7216_p7 = pnand %p7215_p10, %p7209_p0 }
  0x35   : > { %7219 = shalt.err (!%p7216_p7)
}
  0x36   : > { %6825 = dma.hbm_to_vmem [thread:$0]  (!%p7422_p11), %s9502_s5, 1024, %s253_s16, [#allocation10], %s9506_s18, %s9506_s18, %s9507_s19  }
  0x37   : > { %s7462_s14 = sadd.s32 1, %s7320_s27   ;;  %s32_s15 = sadd.s32 1, %s7316_s26 }
  0x38   : > { %s29_s12 = ssub.s32 %s7320_s27, %s7462_s14  ;;  %p39_p12 = scmp.ne.s32.totalorder %s7316_s26, %s7312_s25 }
  0x39   : > { %p30_p1 = scmp.eq.s32.totalorder %s29_s12, 0  ;;  %p40_p9 = scmp.eq.s32.totalorder %s7320_s27, 0 }
  0x3a   : > { %p6837_p13 = scmp.lt.s32.totalorder %s7320_s27, 2  ;;  %p7476_p3 = por %p195_p2, %p39_p12 }
  0x3b   : > { %s7472_s17 = scalar_select %p30_p1, %s7316_s26, %s32_s15  }
  0x3c   : > { %p41_p0 = por %p40_p9, %p39_p12  ;;  %s269_s21 = sand.u32 1, %s7316_s26  }
  0x3d   : > { %s9533_s20 = scalar_select %p7476_p3, 1, 0 }
  0x3e   : > { %s5927_s22 = sshll.u32 %s7320_s27, 11  ;;  %s5547_s16 = sshll.u32 %s269_s21, 7 }
  0x3f   : > { %s7485_s10 = scalar_lea.hbm %s9497_s0, %s5927_s22  ;;  %s273_s11 = scalar_lea.vmem [#allocation3], %s5547_s16 }
  0x40   : > { %s280_s13 = sshll.u32 %s273_s11, 4  ;;  %p7487_p11 = pnand %p6837_p13, %p41_p0  ;;  %s7491_s13 = int_to_ptr.vmem [resolvable:$true] %s280_s13 }
  0x41   : > { %s7493_s15 = scalar_lea.sflag [#allocation4], %s269_s21  ;;  %s7220_s18 = scalar_lea.hbm %s7485_s10, 2048 }
  0x42   : > { %p7221_p2 = scmp.ne.s32.totalorder %s7485_s10, %s7220_s18  ;;  %p7222_p5 = pneg %p7487_p11 }
  0x43   : > { %s7225_s16 = scalar_lea.hbm %s9497_s0, 4096  ;;  %p7226_p1 = scmp.lt.s32.totalorder %s7485_s10, %s9497_s0 }
  0x44   : > { %p7223_p10 = pnand %p7222_p5, %p7221_p2  ;;  %p7227_p12 = scmp.lt.s32.totalorder %s7225_s16, %s7220_s18 }
  0x46   : > { %p7224_p7 = pneg %p7223_p10  ;;  %p7228_p9 = por %p7227_p12, %p7226_p1 }
  0x48   : > { %p7229_p13 = pnand %p7228_p9, %p7224_p7 }
  0x4a   : > { %7232 = shalt.err (!%p7229_p13)
}
  0x4b   : > { %s7233_s21 = scalar_lea.vmem %s7491_s13, 2048  ;;  %s7327_s19 = smov [#allocation3]  }
  0x4c   : > { %p7234_p0 = scmp.ne.s32.totalorder %s7491_s13, %s7233_s21  ;;  %s7238_s1 = sshll.u32 %s7327_s19, 4  ;;  %s7239_s1 = int_to_ptr.vmem [resolvable:$false] %s7238_s1 }
  0x4d   : > { %s7240_s22 = scalar_lea.vmem %s7239_s1, 4096  ;;  %p7241_p10 = scmp.lt.s32.totalorder %s7491_s13, %s7239_s1 }
  0x4e   : > { %p7236_p6 = pnand %p7234_p0, %p7222_p5  ;;  %p7242_p3 = scmp.lt.s32.totalorder %s7240_s22, %s7233_s21 }
  0x50   : > { %p7237_p2 = pneg %p7236_p6  ;;  %p7243_p4 = por %p7242_p3, %p7241_p10 }
  0x52   : > { %p7244_p8 = pnand %p7243_p4, %p7237_p2 }
  0x54   : > { %7247 = shalt.err (!%p7244_p8)
}
  0x55   : > { %s9535_s18 = smov 4   ;;  %s9536_s23 = smov 64  }
  0x56   : > { %6829 = dma.hbm_to_vmem [thread:$0]  (!%p7487_p11), %s7485_s10, 2048, %s7491_s13, %s7493_s15, %s9536_s23, %s9536_s23, %s9535_s18  }
  0x57   : > { %p9537_p6 = scmp.ne.s32.totalorder %s9530_s9, 0 }
  0x59   : > { %292 = sbr.rel (%p9537_p6) target bundleno = 1153 (0x481), region = 48 }
  0x5e   : > { %s7520_s19 = sand.u32 1, %s7312_s25   ;;  %p9538_p4 = scmp.ne.s32.totalorder %s9528_s30, 0 }
  0x5f   : > { %s5551_s1 = sshll.u32 %s7520_s19, 7  ;;  %s295_s16 = scalar_lea.sflag [#allocation4], %s7520_s19 }
  0x60   : > { %s7526_s12 = scalar_lea.vmem [#allocation3], %s5551_s1 }
  0x61   : > { %7291 = dma.done.wait (%p9538_p4), %s295_s16, 2048  }
  0x62   : > { %7293 = vsyncadd (%p9538_p4), %s295_s16, 4294965248  ;;  %p9539_p8 = scmp.eq.s32.totalorder %s7394_s28, 0 }
  0x64   : > { %7295 = dma.done.wait (%p9539_p8), [#allocation7], 10240   ;;  %p9540_p3 = pmov %p9539_p8 }
  0x66   : > { %7297 = vsyncadd (%p9540_p3), [#allocation7], 4294957056  ;;  %p9541_p11 = pmov %p9540_p3 }
  0x67   : > { %p9542_p5 = pmov %p9540_p3 }
  0x68   : > { %7299 = dma.done.wait (%p9541_p11), [#allocation10], 1024  }
  0x69   : > { %7301 = vsyncadd (%p9542_p5), [#allocation10], 4294966272  ;;  %v6883_v0 = vld [vmem:[#allocation6 + $0x38] sm:$0xff]   ;;  %v6884_v1 = vld [vmem:[#allocation6 + $0x30] sm:$0xff]   ;;  %vm1525_vm0 = vcmask 1040384   ;;  %vm1528_vm2 = vcmask 1044484   ;;  %v752_v57 = vlaneseq }
  0x6a   : > { %6544 = vmatprep.subr.bf16.mxu0 %v6883_v0  ;;  %6784 = vmatprep.subr.bf16.mxu1 %v6883_v0  ;;  %v6885_v2 = vld [vmem:[#allocation6 + $0x28] sm:$0xff]   ;;  %v6886_v3 = vld [vmem:[#allocation6 + $0x20] sm:$0xff]   ;;  %v6887_v6 = vld [vmem:[#allocation6 + $0x18] sm:$0xff]   ;;  %vm9511_vm1 = vsmask.f32 256  ;;  %v9543_v26 = vmov 0 }
  0x6b   : > { %6545 = vmatpush3.bf16.msra.mxu0 %v6883_v0  ;;  %6792 = vmatpush3.bf16.msra.mxu1 %v6883_v0  ;;  %v344_v4 = vld [vmem:[%s7526_s12] sm:$0xff]   ;;  %v6888_v7 = vld [vmem:[#allocation6 + $0x10] sm:$0xff]   ;;  %v6889_v8 = vld [vmem:[#allocation6 + $0x8] sm:$0xff]   ;;  %vm1529_vm3 = vsmask.f32 4352  ;;  %v7328_v29 = vmov 0  }
  0x6c   : > { %6546 = vmatprep.subr.bf16.mxu0 %v6884_v1  ;;  %6785 = vmatprep.subr.bf16.mxu1 %v6884_v1  ;;  %v360_v5 = vld [vmem:[%s7526_s12 + $0x40] sm:$0xff]   ;;  %v346_v10 = vld [vmem:[%s7526_s12 + $0x8] sm:$0xff]   ;;  %v348_v11 = vld [vmem:[%s7526_s12 + $0x10] sm:$0xff]   ;;  %1521 = vst [vmem:[#allocation2] sm:$0xff] %v7328_v29  ;;  %vm1538_vm7 = vcmask 1043459   ;;  %v9546_v38 = vmov 0 }
  0x6d   : > { %6560 = vmatprep.mubr.bf16.mxu0 %v344_v4  ;;  %6576 = vmatprep.mubr.bf16.mxu1 %v360_v5  ;;  %v6890_v9 = vld [vmem:[#allocation6] sm:$0xff]   ;;  %v362_v12 = vld [vmem:[%s7526_s12 + $0x48] sm:$0xff]   ;;  %v364_v13 = vld [vmem:[%s7526_s12 + $0x50] sm:$0xff]   ;;  %1522 = vst [vmem:[#allocation2 + $0x8] sm:$0xf] %v7328_v29  ;;  %v7577_v58 = vshrl.u32 %v752_v57, 7 }
  0x6e   : > { %v350_v14 = vld [vmem:[%s7526_s12 + $0x18] sm:$0xff]   ;;  %v352_v15 = vld [vmem:[%s7526_s12 + $0x20] sm:$0xff]   ;;  %v354_v18 = vld [vmem:[%s7526_s12 + $0x28] sm:$0xff]   ;;  %1524 = vst [vmem:[#allocation2 + $0x14] sm:$0xf] %v7328_v29  ;;  %vm7329_vm12 = vmmov 1  }
  0x6f   : > { %6547 = vmatpush3.bf16.msra.mxu0 %v6884_v1  ;;  %6793 = vmatpush3.bf16.msra.mxu1 %v6884_v1  ;;  %v366_v16 = vld [vmem:[%s7526_s12 + $0x58] sm:$0xff]   ;;  %v368_v17 = vld [vmem:[%s7526_s12 + $0x60] sm:$0xff]   ;;  %v356_v19 = vld [vmem:[%s7526_s12 + $0x30] sm:$0xff]   ;;  %1551 = vst [vmem:[#allocation2 + $0x198] sm:$0xff] %v7328_v29  ;;  %vm1539_vm8 = vsmask.f32 7950 }
  0x70   : > { %6548 = vmatprep.subr.bf16.mxu0 %v6885_v2  ;;  %6786 = vmatprep.subr.bf16.mxu1 %v6885_v2  ;;  %v370_v20 = vld [vmem:[%s7526_s12 + $0x68] sm:$0xff]   ;;  %v372_v21 = vld [vmem:[%s7526_s12 + $0x70] sm:$0xff]   ;;  %v358_v22 = vld [vmem:[%s7526_s12 + $0x38] sm:$0xff]   ;;  %1552 = vst [vmem:[#allocation2 + $0x1a0] sm:$0xf] %v7328_v29  ;;  %v756_v60 = vadd.s32 24, %v7577_v58 }
  0x71   : > { %v374_v23 = vld [vmem:[%s7526_s12 + $0x78] sm:$0xff]   ;;  %vm7557_vm4 = vmand %vm1525_vm0, %vm9511_vm1  ;;  %v6909_v27 = vld [vmem:[#allocation8 + $0x130] sm:$0xff]   ;;  %1554 = vst [vmem:[#allocation2 + $0x1ac] sm:$0xf] %v7328_v29  ;;  %v755_v61 = vadd.s32 16, %v7577_v58  ;;  %v754_v62 = vadd.s32 8, %v7577_v58 }
  0x72   : > { %v6907_v24 = vld [vmem:[#allocation8 + $0x138] sm:$0xff]   ;;  %v9544_v26 = vsel %vm7557_vm4, 4294967295, %v9543_v26  ;;  %vm1530_vm5 = vmand %vm1528_vm2, %vm1529_vm3  ;;  %v1532_v28 = vld [vmem:[#allocation2 + $0x18] sm:$0x11]  ;;  %9548 = vst [vmem:[#allocation17_spill] sm:$0xff] %v7577_v58  ;;  %v760_v63 = vadd.s32 56, %v7577_v58 }
  0x73   : > { %6549 = vmatpush3.bf16.msra.mxu0 %v6885_v2  ;;  %6794 = vmatpush3.bf16.msra.mxu1 %v6885_v2  ;;  %v6908_v25 = vld [vmem:[#allocation8 + $0xf8] sm:$0xff]   ;;  %9545 = vst [vmem:[#allocation16_spill] sm:$0xff] %v9544_v26  ;;  %vm1531_vm6 = vmor %vm1530_vm5, %vm7557_vm4  ;;  %v6910_v31 = vld [vmem:[#allocation8 + $0xf0] sm:$0xff]   ;;  %v810_v0 = vand.u32 15, %v756_v60  ;;  %v759_v1 = vadd.s32 48, %v7577_v58  ;;  %v758_v2 = vadd.s32 40, %v7577_v58 }
  0x74   : > { %6550 = vmatprep.subr.bf16.mxu0 %v6886_v3  ;;  %6787 = vmatprep.subr.bf16.mxu1 %v6886_v3  ;;  %v1533_v30 = vsel %vm1531_vm6, 0, %v1532_v28  ;;  %v6911_v32 = vld [vmem:[#allocation8 + $0x178] sm:$0xff]   ;;  %v6912_v33 = vld [vmem:[#allocation8 + $0x128] sm:$0xff]   ;;  %v6914_v35 = vld [vmem:[#allocation8 + $0x170] sm:$0xff]   ;;  %v757_v4 = vadd.s32 32, %v7577_v58  ;;  %v796_v5 = vand.u32 15, %v754_v62 }
  0x75   : > { %1534 = vst [vmem:[#allocation2 + $0x18] sm:$0x11] %v1533_v30  ;;  %v6913_v34 = vld [vmem:[#allocation8 + $0xe8] sm:$0xff]   ;;  %v1535_v36 = vld [vmem:[#allocation2 + $0x20] sm:$0x1]  ;;  %vm7571_vm9 = vmand %vm1538_vm7, %vm1539_vm8  ;;  %vm7592_vm10 = vcmp.ne.s32.totalorder %v810_v0, 15 }
  0x76   : > { %v1536_v37 = vsel %vm7557_vm4, 0, %v1535_v36  ;;  %v9547_v38 = vsel %vm7571_vm9, 4294967295, %v9546_v38  ;;  %v1548_v39 = vld [vmem:[#allocation2 + $0x194] sm:$0x8]  ;;  %v6917_v43 = vld [vmem:[#allocation8 + $0x168] sm:$0xff]   ;;  %v6918_v44 = vld [vmem:[#allocation8 + $0x118] sm:$0xff]  }
  0x77   : > { %6551 = vmatpush3.bf16.msra.mxu0 %v6886_v3  ;;  %6795 = vmatpush3.bf16.msra.mxu1 %v6886_v3  ;;  %1537 = vst [vmem:[#allocation2 + $0x20] sm:$0x1] %v1536_v37  ;;  %v1549_v40 = vsel %vm7571_vm9, 0, %v1548_v39  ;;  %v6915_v41 = vld [vmem:[#allocation8 + $0x120] sm:$0xff]   ;;  %v6919_v45 = vld [vmem:[#allocation8 + $0xd8] sm:$0xff]   ;;  %v6921_v47 = vld [vmem:[#allocation8 + $0x110] sm:$0xff]  }
  0x78   : > { %6552 = vmatprep.subr.bf16.mxu0 %v6887_v6  ;;  %6788 = vmatprep.subr.bf16.mxu1 %v6887_v6  ;;  %1550 = vst [vmem:[#allocation2 + $0x194] sm:$0x8] %v1549_v40  ;;  %v6916_v42 = vld [vmem:[#allocation8 + $0xe0] sm:$0xff]   ;;  %v6922_v48 = vld [vmem:[#allocation8 + $0xd0] sm:$0xff]   ;;  %v6923_v49 = vld [vmem:[#allocation8 + $0x158] sm:$0xff]   ;;  %v803_v3 = vand.u32 15, %v755_v61 }
  0x79   : > { %v6920_v46 = vld [vmem:[#allocation8 + $0x160] sm:$0xff]   ;;  %v6924_v50 = vld [vmem:[#allocation8 + $0x108] sm:$0xff]   ;;  %v6926_v52 = vld [vmem:[#allocation8 + $0x150] sm:$0xff]   ;;  %vm7606_vm14 = vcmp.ne.s32.totalorder %v796_v5, 15  ;;  %v765_v30 = vadd.s32 96, %v7577_v58  ;;  %v771_v36 = vadd.s32 144, %v7577_v58 }
  0x7a   : > { %v6925_v51 = vld [vmem:[#allocation8 + $0xc8] sm:$0xff]   ;;  %v6927_v53 = vld [vmem:[#allocation8 + $0x100] sm:$0xff]   ;;  %v7579_v59 = vld [vmem:[#allocation8 + $0xb8] sm:$0xff]   ;;  %vm7597_vm11 = vcmp.ne.s32.totalorder %v803_v3, 0  ;;  %v769_v40 = vadd.s32 128, %v7577_v58  ;;  %v776_v57 = vadd.s32 184, %v7577_v58 }
  0x7b   : > { %6553 = vmatpush3.bf16.msra.mxu0 %v6887_v6  ;;  %6796 = vmatpush3.bf16.msra.mxu1 %v6887_v6  ;;  %v6928_v54 = vld [vmem:[#allocation8 + $0xc0] sm:$0xff]   ;;  %v6929_v55 = vld [vmem:[#allocation8 + $0x148] sm:$0xff]   ;;  %v764_v6 = vadd.s32 88, %v7577_v58  ;;  %vm7602_vm13 = vmpackc.low %vm7329_vm12, %vm7329_vm12  ;;  %v9583_v61 = vmov 0  ;;  %s9391_s22 = scalar_lea.vmem [#allocation11], %s5551_s1  ;;  %s5992_s18 = sshll.u32 %s7394_s28, 11 }
  0x7c   : > { %6554 = vmatprep.subr.bf16.mxu0 %v6888_v7  ;;  %6789 = vmatprep.subr.bf16.mxu1 %v6888_v7  ;;  %v6936_v56 = vld [vmem:[#allocation8 + $0x140] sm:$0xff]   ;;  %vm9579_vm4 = vmpackc.low %vm7592_vm10, %vm7592_vm10  ;;  %s5439_s23 = sshll.u32 %s9391_s22, 4  ;;  %s5426_s30 = scalar_lea.sflag [#allocation5], %s7520_s19  ;;  %s9452_s23 = int_to_ptr.vmem [resolvable:$true] %s5439_s23 }
  0x7d   : > { %v2576_v26 = vld [vmem:[#allocation2 + $0x14] sm:$0x8]  ;;  %s7248_s9 = scalar_lea.vmem %s9452_s23, 2048  ;;  %p9753_p1 = scmp.ne.s32.totalorder %s9533_s20, 0 }
  0x7e   : > { %p7249_p7 = scmp.ne.s32.totalorder %s9452_s23, %s7248_s9  ;;  %s7330_s28 = smov [#allocation11]  }
  0x7f   : > { %6555 = vmatpush3.bf16.msra.mxu0 %v6888_v7  ;;  %6797 = vmatpush3.bf16.msra.mxu1 %v6888_v7  ;;  %v789_v7 = vand.u32 15, %v7577_v58  ;;  %s7252_s10 = sshll.u32 %s7330_s28, 4  ;;  %s7253_s10 = int_to_ptr.vmem [resolvable:$false] %s7252_s10 }
  0x80   : > { %6556 = vmatprep.subr.bf16.mxu0 %v6889_v8  ;;  %6790 = vmatprep.subr.bf16.mxu1 %v6889_v8  ;;  %p7250_p12 = pnand %p7249_p7, %p9753_p1  ;;  %s7254_s13 = scalar_lea.vmem %s7253_s10, 4096 }
  0x81   : > { %vm7614_vm0 = vcmp.ne.s32.totalorder %v789_v7, 0  ;;  %p7255_p13 = scmp.lt.s32.totalorder %s9452_s23, %s7253_s10  ;;  %p7256_p0 = scmp.lt.s32.totalorder %s7254_s13, %s7248_s9 }
  0x82   : > { %p7251_p9 = pneg %p7250_p12 }
  0x83   : > { %6557 = vmatpush3.bf16.msra.mxu0 %v6889_v8  ;;  %6798 = vmatpush3.bf16.msra.mxu1 %v6889_v8  ;;  %v838_v8 = vand.u32 15, %v760_v63  ;;  %p7257_p2 = por %p7256_p0, %p7255_p13 }
  0x84   : > { %6558 = vmatprep.subr.bf16.mxu0 %v6890_v9  ;;  %6791 = vmatprep.subr.bf16.mxu1 %v6890_v9 }
  0x85   : > { %vm7618_vm2 = vcmp.ne.s32.totalorder %v838_v8, 15  ;;  %v950_v8 = vand.u32 15, %v776_v57  ;;  %p7258_p10 = pnand %p7257_p2, %p7251_p9 }
  0x87   : > { %6559 = vmatpush3.bf16.msra.mxu0 %v6890_v9  ;;  %6799 = vmatpush3.bf16.msra.mxu1 %v6890_v9  ;;  %v763_v9 = vadd.s32 80, %v7577_v58 }
  0x88   : > { %6112 = vmatprep.subr.bf16.mxu1 %v6907_v24  ;;  %6592 = vmatprep.subr.bf16.mxu0 %v6911_v32  ;;  %v768_v24 = vadd.s32 120, %v7577_v58 }
  0x8a   : > { %6561 = vmatmul.mubr.bf16.vlgmr.msra.gmra.mxu0 %v346_v10  ;;  %6577 = vmatmul.mubr.bf16.vlgmr.msra.gmra.mxu1 %v362_v12  ;;  %v824_v12 = vand.u32 15, %v758_v2  ;;  %v894_v39 = vand.u32 15, %v768_v24 }
  0x8b   : > { %6564 = vmatprep.mubr.bf16.mxu0 %v348_v11  ;;  %6580 = vmatprep.mubr.bf16.mxu1 %v364_v13  ;;  %v831_v11 = vand.u32 15, %v759_v1  ;;  %v762_v13 = vadd.s32 72, %v7577_v58 }
  0x8c   : > { %6113 = vmatpush3.bf16.msra.mxu1 %v6908_v25  ;;  %6593 = vmatpush3.bf16.msra.mxu0 %v6911_v32  ;;  %vm7630_vm6 = vcmp.ne.s32.totalorder %v824_v12, 15 }
  0x8d   : > { %6114 = vmatprep.subr.bf16.mxu1 %v6909_v27  ;;  %6594 = vmatprep.subr.bf16.mxu0 %v6914_v35  ;;  %vm7626_vm5 = vcmp.ne.s32.totalorder %v831_v11, 0  ;;  %v852_v28 = vand.u32 15, %v762_v13  ;;  %v779_v13 = vadd.s32 208, %v7577_v58 }
  0x8f   : > { %vm7668_vm7 = vcmp.ne.s32.totalorder %v852_v28, 15 }
  0x90   : > { %6115 = vmatpush3.bf16.msra.mxu1 %v6910_v31  ;;  %6595 = vmatpush3.bf16.msra.mxu0 %v6914_v35  ;;  %v971_v31 = vand.u32 15, %v779_v13 }
  0x91   : > { %6116 = vmatprep.subr.bf16.mxu1 %v6912_v33  ;;  %6596 = vmatprep.subr.bf16.mxu0 %v6917_v43  ;;  %v766_v33 = vadd.s32 104, %v7577_v58 }
  0x92   : > { %6565 = vmatmul.mubr.bf16.gmra.mxu0 %v350_v14  ;;  %6581 = vmatmul.mubr.bf16.gmra.mxu1 %v366_v16  ;;  %v761_v16 = vadd.s32 64, %v7577_v58 }
  0x93   : > { %6568 = vmatprep.mubr.bf16.mxu0 %v352_v15  ;;  %6584 = vmatprep.mubr.bf16.mxu1 %v368_v17  ;;  %v817_v15 = vand.u32 15, %v757_v4  ;;  %v780_v4 = vadd.s32 216, %v7577_v58 }
  0x94   : > { %6117 = vmatpush3.bf16.msra.mxu1 %v6913_v34  ;;  %6597 = vmatpush3.bf16.msra.mxu0 %v6917_v43  ;;  %v845_v32 = vand.u32 15, %v761_v16  ;;  %v9567_v34 = vmov 0  ;;  %v770_v43 = vadd.s32 136, %v7577_v58 }
  0x95   : > { %6118 = vmatprep.subr.bf16.mxu1 %v6915_v41  ;;  %6598 = vmatprep.subr.bf16.mxu0 %v6920_v46  ;;  %vm7638_vm8 = vcmp.ne.s32.totalorder %v817_v15, 0  ;;  %v9571_v41 = vmov 0  ;;  %v978_v24 = vand.u32 15, %v780_v4 }
  0x96   : > { %v9572_v41 = vsel %vm7668_vm7, 4294967295, %v9571_v41  ;;  %vm7676_vm3 = vcmp.ne.s32.totalorder %v845_v32, 0  ;;  %vm9582_vm7 = vmpackc.low %vm7597_vm11, %vm7597_vm11 }
  0x97   : > { %v7724_v60 = vsel %vm9582_vm7, 65537, %v7328_v29  ;;  %vm9586_vm11 = vmpackc.low %vm7614_vm0, %vm7614_vm0 }
  0x98   : > { %6119 = vmatpush3.bf16.msra.mxu1 %v6916_v42  ;;  %6599 = vmatpush3.bf16.msra.mxu0 %v6920_v46  ;;  %v873_v42 = vand.u32 15, %v765_v30  ;;  %v772_v46 = vadd.s32 152, %v7577_v58  ;;  %v7747_v0 = vsel %vm9586_vm11, 65537, %v7328_v29  ;;  %vm9595_vm7 = vmpackc.low %vm7618_vm2, %vm7618_vm2 }
  0x99   : > { %6120 = vmatprep.subr.bf16.mxu1 %v6918_v44  ;;  %6600 = vmatprep.subr.bf16.mxu0 %v6923_v49  ;;  %v7793_v14 = vsel %vm9595_vm7, 65537, %v7328_v29  ;;  %vm9597_vm0 = vmpackc.low %vm7630_vm6, %vm7630_vm6 }
  0x9a   : > { %6569 = vmatmul.mubr.bf16.gmra.mxu0 %v354_v18  ;;  %6585 = vmatmul.mubr.bf16.gmra.mxu1 %v370_v20  ;;  %v767_v20 = vadd.s32 112, %v7577_v58  ;;  %vm7713_vm15 = vcmp.ne.s32.totalorder %v873_v42, 0  ;;  %v922_v62 = vand.u32 15, %v772_v46  ;;  %v7809_v16 = vsel %vm9597_vm0, 65537, %v7328_v29 }
  0x9b   : > { %6572 = vmatprep.mubr.bf16.mxu0 %v356_v19  ;;  %6588 = vmatprep.mubr.bf16.mxu1 %v372_v21  ;;  %v866_v19 = vand.u32 15, %v764_v6 }
  0x9c   : > { %6121 = vmatpush3.bf16.msra.mxu1 %v6919_v45  ;;  %6601 = vmatpush3.bf16.msra.mxu0 %v6923_v49  ;;  %v887_v35 = vand.u32 15, %v767_v20  ;;  %v880_v45 = vand.u32 15, %v766_v33  ;;  %v773_v49 = vadd.s32 160, %v7577_v58 }
  0x9d   : > { %6122 = vmatprep.subr.bf16.mxu1 %v6921_v47  ;;  %6602 = vmatprep.subr.bf16.mxu0 %v6926_v52  ;;  %vm7646_vm1 = vcmp.ne.s32.totalorder %v866_v19, 15 }
  0x9e   : > { %v9568_v34 = vsel %vm7646_vm1, 4294967295, %v9567_v34  ;;  %vm7684_vm9 = vcmp.ne.s32.totalorder %v887_v35, 0  ;;  %vm7697_vm1 = vcmp.ne.s32.totalorder %v894_v39, 15  ;;  %vm7729_vm10 = vcmp.ne.s32.totalorder %v880_v45, 15  ;;  %v7952_v45 = vld [vmem:[%s9499_s2] ss:$0 sm:$0xff] }
  0x9f   : > { %v9584_v61 = vsel %vm7729_vm10, 4294967295, %v9583_v61  ;;  %v929_v2 = vand.u32 15, %v773_v49  ;;  %vm9596_vm10 = vmpackc.low %vm7626_vm5, %vm7626_vm5  ;;  %vm9601_vm6 = vnez %v9568_v34 }
  0xa0   : > { %6123 = vmatpush3.bf16.msra.mxu1 %v6922_v48  ;;  %6603 = vmatpush3.bf16.msra.mxu0 %v6926_v52  ;;  %v915_v48 = vand.u32 15, %v771_v36  ;;  %v901_v52 = vand.u32 15, %v769_v40  ;;  %v7801_v15 = vsel %vm9596_vm10, 65537, %v7328_v29  ;;  %vm9600_vm5 = vmpackc.low %vm7638_vm8, %vm7638_vm8  ;;  %vm7868_vm8 = vcmp.ne.s32.totalorder %v950_v8, 15 }
  0xa1   : > { %6124 = vmatprep.subr.bf16.mxu1 %v6924_v50  ;;  %6604 = vmatprep.subr.bf16.mxu0 %v6929_v55  ;;  %v7692_v50 = vsel %vm7602_vm13, 65537, %v7328_v29  ;;  %vm9585_vm13 = vmpackc.low %vm7606_vm14, %vm7606_vm14  ;;  %vm7779_vm14 = vcmp.ne.s32.totalorder %v922_v62, 15  ;;  %vm7814_vm7 = vcmp.ne.s32.totalorder %v929_v2, 0  ;;  %v7824_v18 = vsel %vm9600_vm5, 65537, %v7328_v29 }
  0xa2   : > { %6573 = vmatmul.mubr.bf16.gmra.mxu0 %v358_v22  ;;  %6589 = vmatmul.mubr.bf16.gmra.mxu1 %v374_v23  ;;  %v859_v23 = vand.u32 15, %v763_v9  ;;  %v7739_v63 = vsel %vm9585_vm13, 65537, %v7328_v29  ;;  %vm7761_vm13 = vcmp.ne.s32.totalorder %v901_v52, 0  ;;  %v5598_v6 = vcombine.low %v7724_v60, %v7692_v50  ;;  %vm9602_vm10 = vmpackc.low %vm9601_vm6, %vm9601_vm6 }
  0xa3   : > { %v774_v9 = vadd.s32 168, %v7577_v58  ;;  %v5581_v10 = vcombine.low %v7692_v50, %v7739_v63  ;;  %v5597_v11 = vcombine.low %v7747_v0, %v7692_v50  ;;  %vm1393_vm2 = vmpackc.low %vm7761_vm13, %vm7761_vm13  ;;  %v7832_v19 = vsel %vm9602_vm10, 65537, %v7328_v29 }
  0xa4   : > { %6125 = vmatpush3.bf16.msra.mxu1 %v6925_v51  ;;  %6605 = vmatpush3.bf16.msra.mxu0 %v6929_v55  ;;  %vm7660_vm12 = vcmp.ne.s32.totalorder %v859_v23, 0  ;;  %vm9606_vm6 = vnez %v9572_v41  ;;  %v5584_v27 = vcombine.low %v7692_v50, %v7793_v14  ;;  %vm7972_vm13 = vcmp.ne.s32.totalorder %v971_v31, 0 }
  0xa5   : > { %6126 = vmatprep.subr.bf16.mxu1 %v6927_v53  ;;  %6606 = vmatprep.subr.bf16.mxu0 %v6936_v56  ;;  %v775_v53 = vadd.s32 176, %v7577_v58  ;;  %vm9603_vm0 = vmpackc.low %vm7660_vm12, %vm7660_vm12  ;;  %v936_v25 = vand.u32 15, %v774_v9 }
  0xa6   : > { %v7840_v20 = vsel %vm9603_vm0, 65537, %v7328_v29  ;;  %vm9607_vm10 = vmpackc.low %vm9606_vm6, %vm9606_vm6 }
  0xa7   : > { %v943_v5 = vand.u32 15, %v775_v53  ;;  %v7855_v22 = vsel %vm9607_vm10, 65537, %v7328_v29  ;;  %vm9608_vm12 = vmpackc.low %vm7676_vm3, %vm7676_vm3  ;;  %vm9614_vm3 = vnez %v9584_v61 }
  0xa8   : > { %6127 = vmatpush3.bf16.msra.mxu1 %v6928_v54  ;;  %6607 = vmatpush3.bf16.msra.mxu0 %v6936_v56  ;;  %v7708_v54 = vsel %vm9579_vm4, 65537, %v7328_v29  ;;  %v908_v56 = vand.u32 15, %v770_v43  ;;  %vm7752_vm4 = vcmp.ne.s32.totalorder %v915_v48, 0  ;;  %v7863_v23 = vsel %vm9608_vm12, 65537, %v7328_v29  ;;  %vm1220_vm0 = vmpackc.low %vm7779_vm14, %vm7779_vm14 }
  0xa9   : > { %6640 = vmatprep.subr.bf16.mxu1 %v7579_v59  ;;  %v5582_v3 = vcombine.low %v7692_v50, %v7708_v54  ;;  %vm7845_vm5 = vcmp.ne.s32.totalorder %v943_v5, 0  ;;  %vm9611_vm6 = vmpackc.low %vm7684_vm9, %vm7684_vm9  ;;  %v7943_v43 = vsel %vm1393_vm2, 65537, %v7328_v29  ;;  %v7962_v47 = vsel %vm1220_vm0, 65537, %v7328_v29 }
  0xaa   : > { %vm7770_vm11 = vcmp.ne.s32.totalorder %v908_v56, 15  ;;  %v7893_v35 = vsel %vm9611_vm6, 65537, %v7328_v29  ;;  %vm1399_vm10 = vmpackc.low %vm7845_vm5, %vm7845_vm5  ;;  %vm8001_vm2 = vcmp.ne.s16.totalorder %v5598_v6, 0  ;;  %vm8025_vm0 = vcmp.ne.s16.totalorder %v5581_v10, 0 }
  0xab   : > { %vm9612_vm12 = vmpackc.low %vm7697_vm1, %vm7697_vm1  ;;  %v7987_v53 = vsel %vm1399_vm10, 65537, %v7328_v29  ;;  %vm1196_vm10 = vcmp.ne.s32.totalorder %v978_v24, 15 }
  0xac   : > { %v7908_v39 = vsel %vm9612_vm12, 65537, %v7328_v29  ;;  %vm9613_vm9 = vmpackc.low %vm7713_vm15, %vm7713_vm15  ;;  %vm1635_vm12 = vsmask.f32 4368 }
  0xad   : > { %v7916_v40 = vsel %vm9613_vm9, 65537, %v7328_v29  ;;  %vm1224_vm6 = vmpackc.low %vm7868_vm8, %vm7868_vm8  ;;  %vm7945_vm8 = vcmp.ne.s32.totalorder %v936_v25, 15 }
  0xae   : > { %vm9615_vm1 = vmpackc.low %vm9614_vm3, %vm9614_vm3  ;;  %v7979_v52 = vsel %vm1224_vm6, 65537, %v7328_v29  ;;  %vm8029_vm3 = vcmp.ne.s16.totalorder %v5597_v11, 0  ;;  %vm2221_vm6 = vsmask.f32 3328 }
  0xaf   : > { %v7927_v41 = vsel %vm9615_vm1, 65537, %v7328_v29  ;;  %vm9616_vm15 = vmpackc.low %vm7752_vm4, %vm7752_vm4  ;;  %vm2222_vm1 = vsmask.f32 7440 }
  0xb0   : > { %v7935_v42 = vsel %vm9616_vm15, 65537, %v7328_v29  ;;  %vm9619_vm4 = vmpackc.low %vm7770_vm11, %vm7770_vm11  ;;  %vm7997_vm11 = vcmp.ne.s16.totalorder %v5582_v3, 0  ;;  %vm1957_vm15 = vcmask 1043456  }
  0xb1   : > { %v7970_v48 = vsel %vm9619_vm4, 65537, %v7328_v29  ;;  %vm9622_vm14 = vmpackc.low %vm7814_vm7, %vm7814_vm7  ;;  %vm9634_vm4 = vsmask.f32 256 }
  0xb2   : > { %v7995_v54 = vsel %vm9622_vm14, 65537, %v7328_v29  ;;  %vm1222_vm7 = vmpackc.low %vm7945_vm8, %vm7945_vm8  ;;  %vm1958_vm8 = vsmask.f32 7938 }
  0xb3   : > { %9623 = vst [vmem:[#allocation18_spill] sm:$0xff] %v7995_v54  ;;  %vm1403_vm5 = vmpackc.low %vm7972_vm13, %vm7972_vm13  ;;  %v8047_v11 = vsel %vm1222_vm7, 65537, %v7328_v29 }
  0xb4   : > { %vm1228_vm9 = vmpackc.low %vm1196_vm10, %vm1196_vm10 }
  0xb5   : > { %vm8103_vm13 = vmor %vm9634_vm4, %vm1635_vm12 }
  0xb6   : > { %vm8124_vm14 = vmor %vm2221_vm6, %vm2222_vm1 }
 0x14a   : > { %v6562_v55 = vpop.f32.mrf.mxu0  ;;  %v6578_v1 = vpop.f32.mrf.mxu1 }
 0x14b   : > { %v586_v0 = vadd.f32 %v6562_v55, %v7952_v45  ;;  %v650_v8 = vadd.f32 %v6578_v1, %v7952_v45  ;;  %v8059_v1 = vadd.s32 192, %v7577_v58 }
 0x14c   : > { %v577_v5 = vpop.f32.mrf.mxu0  ;;  %v641_v21 = vpop.f32.mrf.mxu1 }
 0x14d   : > { %v706_v17 = vmax.f32 %v586_v0, 0.0  ;;  %v578_v10 = vadd.f32 %v7952_v45, %v577_v5  ;;  %v722_v31 = vmax.f32 %v650_v8, 0.0  ;;  %v642_v55 = vadd.f32 %v7952_v45, %v641_v21 }
 0x14e   : > { %v6563_v25 = vpop.f32.mrf.mxu0  ;;  %v8056_v0 = vsel %vm1403_vm5, 65537, %v7328_v29  ;;  %v6579_v4 = vpop.f32.mrf.mxu1 }
 0x14f   : > { %9632 = vst [vmem:[#allocation19_spill] sm:$0xff] %v8056_v0  ;;  %v5930_v44 = vpack.c.bf16 %v706_v17, %v706_v17  ;;  %v704_v5 = vmax.f32 %v578_v10, 0.0  ;;  %v589_v13 = vadd.f32 %v6563_v25, %v7952_v45  ;;  %v5946_v21 = vpack.c.bf16 %v722_v31, %v722_v31 }
 0x150   : > { %v580_v8 = vpop.f32.mrf.mxu0  ;;  %v8062_v12 = vmax.f32 %v642_v55, 0.0  ;;  %v653_v9 = vadd.f32 %v6579_v4, %v7952_v45  ;;  %v644_v61 = vpop.f32.mrf.mxu1  ;;  %v8069_v25 = vsel %vm1228_vm9, 65537, %v7328_v29 }
 0x151   : > { %2111 = vst [vmem:[#allocation2 + $0x34] sm:$0xf] %v5930_v44  ;;  %v5928_v63 = vpack.c.bf16 %v704_v5, %v704_v5  ;;  %v707_v3 = vmax.f32 %v589_v13, 0.0  ;;  %v581_v10 = vadd.f32 %v7952_v45, %v580_v8  ;;  %9633 = vst [vmem:[#allocation20_spill] sm:$0xff] %v8069_v25  ;;  %v645_v29 = vadd.f32 %v7952_v45, %v644_v61 }
 0x152   : > { %v6566_v24 = vpop.f32.mrf.mxu0  ;;  %2127 = vst [vmem:[#allocation2 + $0xf4] sm:$0xf] %v5946_v21  ;;  %v5944_v55 = vpack.c.bf16 %v8062_v12, %v8062_v12  ;;  %v723_v60 = vmax.f32 %v653_v9, 0.0 }
 0x153   : > { %2109 = vst [vmem:[#allocation2 + $0x1c] sm:$0xf] %v5928_v63  ;;  %v737_v44 = vpack.c.bf16 %v707_v3, %v706_v17  ;;  %v5931_v13 = vpack.c.bf16 %v707_v3, %v707_v3  ;;  %v705_v8 = vmax.f32 %v581_v10, 0.0  ;;  %v602_v62 = vadd.f32 %v6566_v24, %v7952_v45 }
 0x154   : > { %v593_v21 = vpop.f32.mrf.mxu0  ;;  %2125 = vst [vmem:[#allocation2 + $0xdc] sm:$0xf] %v5944_v55  ;;  %v8078_v46 = vpack.c.bf16 %v723_v60, %v722_v31  ;;  %v5947_v9 = vpack.c.bf16 %v723_v60, %v723_v60  ;;  %v6582_v60 = vpop.f32.mrf.mxu1 }
 0x155   : > { %v1330_v63 = vsel %vm7997_vm11, %v737_v44, 0  ;;  %v1506_v3 = vsel %vm8001_vm2, %v737_v44, 0  ;;  %2112 = vst [vmem:[#allocation2 + $0x40] sm:$0xf] %v5931_v13  ;;  %v736_v17 = vpack.c.bf16 %v705_v8, %v704_v5  ;;  %v5929_v61 = vpack.c.bf16 %v705_v8, %v705_v8  ;;  %vm8130_vm11 = vmand %vm1957_vm15, %vm1958_vm8 }
 0x156   : > { %v5615_v10 = vcombine.low %v1330_v63, %v1330_v63  ;;  %v5616_v24 = vcombine.high %v1330_v63, %v1330_v63  ;;  %v5679_v55 = vcombine.low %v1506_v3, %v1506_v3  ;;  %v5680_v31 = vcombine.high %v1506_v3, %v1506_v3  ;;  %v8086_v49 = vpop.f32.mrf.mxu0  ;;  %2128 = vst [vmem:[#allocation2 + $0x100] sm:$0xf] %v5947_v9 }
 0x157   : > { %v1329_v56 = vsel %vm8025_vm0, %v736_v17, 0  ;;  %v1505_v57 = vsel %vm8029_vm3, %v736_v17, 0  ;;  %2110 = vst [vmem:[#allocation2 + $0x28] sm:$0xf] %v5929_v61  ;;  %v8092_v44 = vmax.f32 %v645_v29, 0.0  ;;  %v8095_v5 = vadd.f32 %v6582_v60, %v7952_v45 }
 0x158   : > { %v1655_v13 = vshrl.u32 %v5615_v10, 16  ;;  %v1658_v8 = vshll.u32 %v5615_v10, 16  ;;  %v1664_v63 = vshrl.u32 %v5616_v24, 16  ;;  %v1667_v3 = vshll.u32 %v5616_v24, 16  ;;  %v8097_v37 = vpop.f32.mrf.mxu0 }
 0x159   : > { %v2244_v4 = vshll.u32 %v5679_v55, 16  ;;  %v2248_v51 = vshrl.u32 %v5679_v55, 16  ;;  %v2254_v9 = vshll.u32 %v5680_v31, 16  ;;  %v2258_v2 = vshrl.u32 %v5680_v31, 16 }
 0x15a   : > { %v1657_v6 = vrot.slane %v1655_v13, 7  ;;  %v8099_v36 = vrot.slane %v1664_v63, 7  ;;  %v5613_v7 = vcombine.low %v1329_v56, %v1329_v56  ;;  %v5614_v17 = vcombine.high %v1329_v56, %v1329_v56  ;;  %v6570_v32 = vpop.f32.mrf.mxu0 }
 0x15b   : > { %v8107_v61 = vrot.slane %v2244_v4, 5  ;;  %v2250_v10 = vrot.slane %v2248_v51, 4  ;;  %v8109_v24 = vrot.slane %v2254_v9, 5  ;;  %v8111_v55 = vrot.slane %v2258_v2, 4 }
 0x15c   : > { %v1662_v31 = vrot.slane %v1657_v6, 4  ;;  %v1669_v60 = vor.u32 %v1667_v3, %v8099_v36  ;;  %v8114_v13 = vmax.f32 %v602_v62, 0.0  ;;  %v594_v56 = vadd.f32 %v7952_v45, %v593_v21 }
 0x15d   : > { %v1660_v63 = vor.u32 %v1658_v8, %v1657_v6  ;;  %v2251_v34 = vor.u32 %v2250_v10, %v8107_v61  ;;  %v1638_v4 = vshrl.u32 %v5613_v7, 16  ;;  %v1641_v62 = vshll.u32 %v5613_v7, 16 }
 0x15e   : > { %v1670_v51 = vsel %vm8103_vm13, %v1662_v31, %v1669_v60  ;;  %v1646_v3 = vshrl.u32 %v5614_v17, 16  ;;  %v5677_v21 = vcombine.low %v1505_v57, %v1505_v57  ;;  %v1649_v6 = vshll.u32 %v5614_v17, 16  ;;  %v1960_v31 = vld [vmem:[#allocation2 + $0x18] sm:$0xf] }
 0x15f   : > { %1965 = vst [vmem:[#allocation2 + $0x3c] sm:$0xf] %v1670_v51  ;;  %v2252_v8 = vrot.slane %v2251_v34, 4  ;;  %v1640_v9 = vrot.slane %v1638_v4, 7  ;;  %v5678_v10 = vcombine.high %v1505_v57, %v1505_v57  ;;  %v5934_v7 = vpack.c.bf16 %v8114_v13, %v8114_v13 }
 0x160   : > { %v1648_v33 = vrot.slane %v1646_v3, 7  ;;  %v2225_v60 = vshll.u32 %v5677_v21, 16  ;;  %v2228_v28 = vshrl.u32 %v5677_v21, 16  ;;  %vm8139_vm2 = vcmp.ne.s16.totalorder %v5584_v27, 0 }
 0x161   : > { %v9643_v57 = vcombine.low %v7801_v15, %v7692_v50  ;;  %v9646_v4 = vcombine.low %v7692_v50, %v7809_v16  ;;  %v2257_v14 = vsel %vm8124_vm14, %v2252_v8, %v8109_v24  ;;  %v1643_v27 = vor.u32 %v1641_v62, %v1640_v9  ;;  %v609_v15 = vpop.f32.mrf.mxu0  ;;  %2115 = vst [vmem:[#allocation2 + $0x64] sm:$0xf] %v5934_v7 }
 0x162   : > { %v1644_v3 = vrot.slane %v1640_v9, 4  ;;  %v2234_v21 = vshll.u32 %v5678_v10, 16  ;;  %2581 = vst [vmem:[#allocation2 + $0x38] sm:$0xf] %v2257_v14  ;;  %v1653_v58 = vrot.slane %v1648_v33, 4  ;;  %v2227_v0 = vrot.slane %v2225_v60, 5 }
 0x163   : > { %vm8146_vm7 = vcmp.ne.s16.totalorder %v9643_v57, 0  ;;  %vm8153_vm5 = vcmp.ne.s16.totalorder %v9646_v4, 0  ;;  %v1651_v57 = vor.u32 %v1649_v6, %v1648_v33  ;;  %v2230_v25 = vrot.slane %v2228_v28, 4 }
 0x164   : > { %v9649_v16 = vcombine.low %v7824_v18, %v7692_v50  ;;  %v1961_v62 = vsel %vm8130_vm11, %v1643_v27, %v1960_v31  ;;  %v2236_v8 = vrot.slane %v2234_v21, 5  ;;  %v2238_v9 = vshrl.u32 %v5678_v10, 16  ;;  %v6571_v31 = vpop.f32.mrf.mxu0 }
 0x165   : > { %v708_v54 = vmax.f32 %v594_v56, 0.0  ;;  %v1652_v6 = vsel %vm8103_vm13, %v1644_v3, %v1651_v57  ;;  %v1661_v28 = vsel %vm8103_vm13, %v1653_v58, %v1660_v63  ;;  %1962 = vst [vmem:[#allocation2 + $0x18] sm:$0xf] %v1961_v62  ;;  %v2231_v33 = vor.u32 %v2230_v25, %v2227_v0 }
 0x166   : > { %vm8163_vm0 = vcmp.ne.s16.totalorder %v9649_v16, 0  ;;  %vm9652_vm3 = vnez %v9547_v38  ;;  %1963 = vst [vmem:[#allocation2 + $0x24] sm:$0xf] %v1652_v6  ;;  %1964 = vst [vmem:[#allocation2 + $0x30] sm:$0xf] %v1661_v28  ;;  %v2240_v60 = vrot.slane %v2238_v9, 4  ;;  %v605_v10 = vadd.f32 %v8086_v49, %v7952_v45 }
 0x167   : > { %v2577_v18 = vsel %vm9652_vm3, %v2227_v0, %v2576_v26  ;;  %v5932_v30 = vpack.c.bf16 %v708_v54, %v708_v54  ;;  %v597_v56 = vadd.f32 %v7952_v45, %v8097_v37  ;;  %v2232_v7 = vrot.slane %v2231_v33, 4 }
 0x168   : > { %2578 = vst [vmem:[#allocation2 + $0x14] sm:$0x8] %v2577_v18  ;;  %v618_v58 = vadd.f32 %v6570_v32, %v7952_v45  ;;  %v610_v25 = vadd.f32 %v7952_v45, %v609_v15  ;;  %v621_v63 = vadd.f32 %v6571_v31, %v7952_v45  ;;  %v1671_v26 = vrot.slane %v8099_v36, 4 }
 0x169   : > { %v2241_v0 = vor.u32 %v2240_v60, %v2236_v8  ;;  %2113 = vst [vmem:[#allocation2 + $0x4c] sm:$0xf] %v5932_v30  ;;  %v711_v14 = vmax.f32 %v605_v10, 0.0  ;;  %v709_v27 = vmax.f32 %v597_v56, 0.0  ;;  %v9653_v49 = vcombine.low %v7692_v50, %v7832_v19  ;;  %v6932_v56 = vld [vmem:[#allocation2 + $0x1c] ss:$12 sps:$4 sm:$0xff]  }
 0x16a   : > { %v2237_v32 = vsel %vm8124_vm14, %v2232_v7, %v2236_v8  ;;  %v714_v37 = vmax.f32 %v618_v58, 0.0  ;;  %v8192_v21 = vmax.f32 %v610_v25, 0.0  ;;  %v8194_v15 = vmax.f32 %v621_v63, 0.0  ;;  %v6944_v25 = vld [vmem:[#allocation8 + $0xb0] sm:$0xff]   ;;  %v6961_v63 = vld [vmem:[#allocation8 + $0x78] sm:$0xff]   ;;  %3211 = vmatprep.mubr.bf16.mxu1 %v6932_v56 }
 0x16b   : > { %vm8186_vm10 = vcmp.ne.s16.totalorder %v9653_v49, 0  ;;  %v2242_v57 = vrot.slane %v2241_v0, 4  ;;  %2579 = vst [vmem:[#allocation2 + $0x20] sm:$0xf] %v2237_v32  ;;  %v739_v16 = vpack.c.bf16 %v711_v14, %v8114_v13  ;;  %v5935_v62 = vpack.c.bf16 %v711_v14, %v711_v14  ;;  %6248 = vmatprep.subr.bf16.mxu0 %v6961_v63 }
 0x16c   : > { %v738_v9 = vpack.c.bf16 %v709_v27, %v708_v54  ;;  %v9656_v19 = vor.u32 %v8111_v55, %v8109_v24  ;;  %v5933_v28 = vpack.c.bf16 %v709_v27, %v709_v27  ;;  %v5938_v33 = vpack.c.bf16 %v714_v37, %v714_v37 }
 0x16d   : > { %v5936_v8 = vpack.c.bf16 %v8192_v21, %v8192_v21  ;;  %v2247_v18 = vsel %vm8124_vm14, %v2242_v57, %v8107_v61  ;;  %v1332_v60 = vsel %vm8139_vm2, %v739_v16, 0  ;;  %v1508_v54 = vsel %vm8146_vm7, %v739_v16, 0  ;;  %2116 = vst [vmem:[#allocation2 + $0x70] sm:$0xf] %v5935_v62  ;;  %v6930_v17 = vld [vmem:[#allocation2 + $0x18] ss:$12 sps:$4 sm:$0xff]  }
 0x16e   : > { %v8200_v6 = vrot.slane %v9656_v19, 4  ;;  %v1331_v24 = vsel %vm8153_vm5, %v738_v9, 0  ;;  %2580 = vst [vmem:[#allocation2 + $0x2c] sm:$0xf] %v2247_v18  ;;  %v5619_v55 = vcombine.low %v1332_v60, %v1332_v60  ;;  %v5620_v13 = vcombine.high %v1332_v60, %v1332_v60  ;;  %2114 = vst [vmem:[#allocation2 + $0x58] sm:$0xf] %v5933_v28  ;;  %v612_v19 = vpop.f32.mrf.mxu0  ;;  %3212 = vmatmul.mubr.bf16.vlgmr.msra.gmra.mxu1 %v6930_v17 }
 0x16f   : > { %v5683_v30 = vcombine.low %v1508_v54, %v1508_v54  ;;  %v5684_v10 = vcombine.high %v1508_v54, %v1508_v54  ;;  %2119 = vst [vmem:[#allocation2 + $0x94] sm:$0xf] %v5938_v33  ;;  %2117 = vst [vmem:[#allocation2 + $0x7c] sm:$0xf] %v5936_v8  ;;  %v9657_v61 = vcombine.low %v7840_v20, %v7692_v50  ;;  %v1507_v51 = vsel %vm8163_vm0, %v738_v9, 0 }
 0x170   : > { %v5617_v31 = vcombine.low %v1331_v24, %v1331_v24  ;;  %v5618_v7 = vcombine.high %v1331_v24, %v1331_v24  ;;  %v741_v58 = vpack.c.bf16 %v8194_v15, %v714_v37  ;;  %v1691_v0 = vshrl.u32 %v5619_v55, 16  ;;  %v6934_v20 = vld [vmem:[#allocation2 + $0x34] ss:$12 sps:$4 sm:$0xff]   ;;  %6641 = vmatpush3.bf16.msra.mxu1 %v7579_v59 }
 0x171   : > { %vm8216_vm12 = vcmp.ne.s16.totalorder %v9657_v61, 0  ;;  %v1694_v14 = vshll.u32 %v5619_v55, 16  ;;  %v1700_v27 = vshrl.u32 %v5620_v13, 16  ;;  %v1703_v49 = vshll.u32 %v5620_v13, 16  ;;  %3219 = vmatprep.mubr.bf16.mxu1 %v6934_v20  ;;  %6642 = vmatprep.subr.bf16.mxu1 %v6944_v25 }
 0x172   : > { %v2284_v32 = vshll.u32 %v5683_v30, 16  ;;  %v2288_v57 = vshrl.u32 %v5683_v30, 16  ;;  %v2294_v16 = vshll.u32 %v5684_v10, 16  ;;  %v2298_v62 = vshrl.u32 %v5684_v10, 16 }
 0x173   : > { %v1693_v4 = vrot.slane %v1691_v0, 7  ;;  %v8223_v9 = vrot.slane %v1700_v27, 7  ;;  %v1673_v28 = vshrl.u32 %v5617_v31, 16  ;;  %v1676_v37 = vshll.u32 %v5617_v31, 16 }
 0x174   : > { %v8226_v33 = vrot.slane %v2284_v32, 5  ;;  %v2290_v8 = vrot.slane %v2288_v57, 4  ;;  %v8228_v18 = vrot.slane %v2294_v16, 5  ;;  %v8230_v60 = vrot.slane %v2298_v62, 4  ;;  %6643 = vmatpush3.bf16.msra.mxu1 %v6944_v25 }
 0x175   : > { %v1698_v54 = vrot.slane %v1693_v4, 4  ;;  %v1705_v24 = vor.u32 %v1703_v49, %v8223_v9  ;;  %v1334_v55 = vsel %vm8186_vm10, %v741_v58, 0  ;;  %v8236_v13 = vadd.f32 %v7952_v45, %v612_v19  ;;  %v6937_v17 = vld [vmem:[#allocation2 + $0x20] ss:$12 sps:$4 sm:$0xff]  }
 0x176   : > { %v1696_v30 = vor.u32 %v1694_v14, %v1693_v4  ;;  %v2291_v59 = vor.u32 %v2290_v8, %v8226_v33  ;;  %v1675_v10 = vrot.slane %v1673_v28, 7  ;;  %v1682_v61 = vshrl.u32 %v5618_v7, 16  ;;  %6608 = vmatprep.mubr.bf16.mxu0 %v6937_v17  ;;  %v6939_v14 = vld [vmem:[#allocation2 + $0x30] ss:$12 sps:$4 sm:$0xff]  }
 0x177   : > { %v1706_v56 = vsel %vm8103_vm13, %v1698_v54, %v1705_v24  ;;  %v1685_v31 = vshll.u32 %v5618_v7, 16  ;;  %v5681_v63 = vcombine.low %v1507_v51, %v1507_v51  ;;  %v5682_v0 = vcombine.high %v1507_v51, %v1507_v51  ;;  %3220 = vmatmul.mubr.bf16.gmra.mxu1 %v6939_v14  ;;  %v6972_v17 = vld [vmem:[#allocation8 + $0xa0] sm:$0xff]  }
 0x178   : > { %1969 = vst [vmem:[#allocation2 + $0x6c] sm:$0xf] %v1706_v56  ;;  %v2292_v27 = vrot.slane %v2291_v59, 4  ;;  %v2301_v3 = vor.u32 %v8230_v60, %v8228_v18  ;;  %v1678_v49 = vor.u32 %v1676_v37, %v1675_v10  ;;  %v1680_v20 = vrot.slane %v1675_v10, 4 }
 0x179   : > { %v1684_v32 = vrot.slane %v1682_v61, 7  ;;  %v2264_v57 = vshll.u32 %v5681_v63, 16  ;;  %v2268_v16 = vshrl.u32 %v5681_v63, 16  ;;  %v2274_v62 = vshll.u32 %v5682_v0, 16 }
 0x17a   : > { %v2297_v7 = vsel %vm8124_vm14, %v2292_v27, %v8228_v18  ;;  %v1679_v51 = vsel %vm8103_vm13, %v1671_v26, %v1678_v49  ;;  %v2278_v25 = vshrl.u32 %v5682_v0, 16  ;;  %v1510_v19 = vsel %vm8216_vm12, %v741_v58, 0 }
 0x17b   : > { %2585 = vst [vmem:[#allocation2 + $0x68] sm:$0xf] %v2297_v7  ;;  %v1687_v4 = vor.u32 %v1685_v31, %v1684_v32  ;;  %v1689_v28 = vrot.slane %v1684_v32, 4  ;;  %1966 = vst [vmem:[#allocation2 + $0x48] sm:$0xf] %v1679_v51  ;;  %v2266_v37 = vrot.slane %v2264_v57, 5  ;;  %v9660_v60 = vcombine.low %v7692_v50, %v7855_v22 }
 0x17c   : > { %v2270_v8 = vrot.slane %v2268_v16, 4  ;;  %v9663_v36 = vcombine.low %v7863_v23, %v7692_v50  ;;  %v2276_v34 = vrot.slane %v2274_v62, 5  ;;  %v2280_v58 = vrot.slane %v2278_v25, 4  ;;  %v6955_v23 = vld [vmem:[#allocation8 + $0xa8] sm:$0xff]  }
 0x17d   : > { %vm8255_vm9 = vcmp.ne.s16.totalorder %v9660_v60, 0  ;;  %v5623_v54 = vcombine.low %v1334_v55, %v1334_v55  ;;  %v5624_v24 = vcombine.high %v1334_v55, %v1334_v55  ;;  %v1688_v59 = vsel %vm8103_vm13, %v1680_v20, %v1687_v4  ;;  %v6574_v20 = vpop.f32.mrf.mxu0  ;;  %6644 = vmatprep.subr.bf16.mxu1 %v6955_v23 }
 0x17e   : > { %vm8262_vm1 = vcmp.ne.s16.totalorder %v9663_v36, 0  ;;  %v1697_v22 = vsel %vm8103_vm13, %v1689_v28, %v1696_v30  ;;  %v2267_v10 = vsel %vm8124_vm14, %v8200_v6, %v2266_v37  ;;  %v2271_v61 = vor.u32 %v2270_v8, %v2266_v37  ;;  %1967 = vst [vmem:[#allocation2 + $0x54] sm:$0xf] %v1688_v59  ;;  %6645 = vmatpush3.bf16.msra.mxu1 %v6955_v23 }
 0x17f   : > { %1968 = vst [vmem:[#allocation2 + $0x60] sm:$0xf] %v1697_v22  ;;  %v2281_v56 = vor.u32 %v2280_v58, %v2276_v34  ;;  %2582 = vst [vmem:[#allocation2 + $0x44] sm:$0xf] %v2267_v10  ;;  %v1727_v31 = vshrl.u32 %v5623_v54, 16  ;;  %v1730_v63 = vshll.u32 %v5623_v54, 16  ;;  %v5939_v49 = vpack.c.bf16 %v8194_v15, %v8194_v15  ;;  %6646 = vmatprep.subr.bf16.mxu1 %v6972_v17  ;;  %v625_v36 = vpop.f32.mrf.mxu0 }
 0x180   : > { %v1736_v55 = vshrl.u32 %v5624_v24, 16  ;;  %v2272_v0 = vrot.slane %v2271_v61, 4  ;;  %v1739_v27 = vshll.u32 %v5624_v24, 16  ;;  %v5687_v30 = vcombine.low %v1510_v19, %v1510_v19  ;;  %v6966_v24 = vld [vmem:[#allocation8 + $0x70] sm:$0xff]  }
 0x181   : > { %v2282_v14 = vrot.slane %v2281_v56, 4  ;;  %v1729_v6 = vrot.slane %v1727_v31, 7  ;;  %v5688_v57 = vcombine.high %v1510_v19, %v1510_v19  ;;  %2120 = vst [vmem:[#allocation2 + $0xa0] sm:$0xf] %v5939_v49  ;;  %v713_v51 = vmax.f32 %v8236_v13, 0.0 }
 0x182   : > { %v8275_v32 = vrot.slane %v1736_v55, 7  ;;  %v2277_v16 = vsel %vm8124_vm14, %v2272_v0, %v2276_v34  ;;  %v2324_v62 = vshll.u32 %v5687_v30, 16  ;;  %v2328_v7 = vshrl.u32 %v5687_v30, 16  ;;  %6647 = vmatpush3.bf16.msra.mxu1 %v6972_v17  ;;  %v6940_v55 = vld [vmem:[#allocation2 + $0x4c] ss:$12 sps:$4 sm:$0xff]   ;;  %v6575_v30 = vpop.f32.mrf.mxu0 }
 0x183   : > { %v1707_v15 = vrot.slane %v8223_v9, 4  ;;  %v2287_v25 = vsel %vm8124_vm14, %v2282_v14, %v8226_v33  ;;  %2583 = vst [vmem:[#allocation2 + $0x50] sm:$0xf] %v2277_v16  ;;  %v1734_v4 = vrot.slane %v1729_v6, 4  ;;  %v8285_v28 = vrot.slane %v2301_v3, 4  ;;  %v6962_v33 = vld [vmem:[#allocation8 + $0x38] sm:$0xff]   ;;  %3227 = vmatprep.mubr.bf16.mxu1 %v6940_v55 }
 0x184   : > { %v1741_v19 = vor.u32 %v1739_v27, %v8275_v32  ;;  %2584 = vst [vmem:[#allocation2 + $0x5c] sm:$0xf] %v2287_v25  ;;  %v8287_v37 = vrot.slane %v2324_v62, 5  ;;  %v2330_v8 = vrot.slane %v2328_v7, 4  ;;  %v2334_v60 = vshll.u32 %v5688_v57, 16  ;;  %v6971_v55 = vld [vmem:[#allocation8 + $0x28] sm:$0xff]  }
 0x185   : > { %v2338_v34 = vshrl.u32 %v5688_v57, 16  ;;  %v740_v58 = vpack.c.bf16 %v713_v51, %v8192_v21  ;;  %v5937_v54 = vpack.c.bf16 %v713_v51, %v713_v51  ;;  %v8292_v59 = vor.u32 %v1730_v63, %v1729_v6  ;;  %v6981_v16 = vld [vmem:[#allocation8 + $0x18] sm:$0xff]  }
 0x186   : > { %v1742_v13 = vsel %vm8103_vm13, %v1734_v4, %v1741_v19  ;;  %v2331_v3 = vor.u32 %v2330_v8, %v8287_v37  ;;  %v8295_v22 = vrot.slane %v2334_v60, 5  ;;  %v634_v10 = vadd.f32 %v6574_v20, %v7952_v45  ;;  %v6938_v21 = vld [vmem:[#allocation2 + $0x38] ss:$12 sps:$4 sm:$0xff]   ;;  %v6945_v20 = vld [vmem:[#allocation2 + $0x48] ss:$12 sps:$4 sm:$0xff]  }
 0x187   : > { %1973 = vst [vmem:[#allocation2 + $0x9c] sm:$0xf] %v1742_v13  ;;  %v9666_v61 = vcombine.low %v7692_v50, %v7962_v47  ;;  %v8305_v56 = vrot.slane %v2338_v34, 4  ;;  %v1333_v17 = vsel %vm8255_vm9, %v740_v58, 0  ;;  %v1509_v31 = vsel %vm8262_vm1, %v740_v58, 0  ;;  %6609 = vmatmul.mubr.bf16.vlgmr.msra.gmra.mxu0 %v6938_v21  ;;  %v6967_v4 = vld [vmem:[#allocation8 + $0x30] sm:$0xff]   ;;  %3228 = vmatmul.mubr.bf16.gmra.mxu1 %v6945_v20 }
 0x188   : > { %2118 = vst [vmem:[#allocation2 + $0x88] sm:$0xf] %v5937_v54  ;;  %v626_v63 = vadd.f32 %v7952_v45, %v625_v36  ;;  %v2332_v0 = vrot.slane %v2331_v3, 4  ;;  %v5621_v27 = vcombine.low %v1333_v17, %v1333_v17  ;;  %v5622_v47 = vcombine.high %v1333_v17, %v1333_v17  ;;  %6249 = vmatpush3.bf16.msra.mxu0 %v6962_v33  ;;  %v6970_v36 = vld [vmem:[#allocation8 + $0x68] sm:$0xff]  }
 0x189   : > { %vm8301_vm8 = vcmp.ne.s16.totalorder %v9666_v61, 0  ;;  %v5685_v49 = vcombine.low %v1509_v31, %v1509_v31  ;;  %v2341_v14 = vor.u32 %v8305_v56, %v8295_v22  ;;  %v5686_v6 = vcombine.high %v1509_v31, %v1509_v31  ;;  %6250 = vmatprep.subr.bf16.mxu0 %v6966_v24 }
 0x18a   : > { %v8314_v18 = vmax.f32 %v634_v10, 0.0  ;;  %v637_v26 = vadd.f32 %v6575_v30, %v7952_v45  ;;  %v9669_v57 = vcombine.low %v7692_v50, %v7908_v39  ;;  %v9672_v62 = vcombine.low %v7893_v35, %v7692_v50  ;;  %v6946_v39 = vld [vmem:[#allocation2 + $0x64] ss:$12 sps:$4 sm:$0xff]   ;;  %v628_v30 = vpop.f32.mrf.mxu0 }
 0x18b   : > { %v9675_v51 = vcombine.low %v7935_v42, %v7692_v50  ;;  %v2337_v19 = vsel %vm8124_vm14, %v2332_v0, %v8295_v22  ;;  %v1709_v35 = vshrl.u32 %v5621_v27, 16  ;;  %v1712_v8 = vshll.u32 %v5621_v27, 16  ;;  %3235 = vmatprep.mubr.bf16.mxu1 %v6946_v39  ;;  %v6942_v61 = vld [vmem:[#allocation2 + $0x50] ss:$12 sps:$4 sm:$0xff]   ;;  %v6991_v0 = vld [vmem:[#allocation8 + $0x98] sm:$0xff]  }
 0x18c   : > { %vm8320_vm4 = vcmp.ne.s16.totalorder %v9669_v57, 0  ;;  %vm8327_vm11 = vcmp.ne.s16.totalorder %v9672_v62, 0  ;;  %v1718_v60 = vshrl.u32 %v5622_v47, 16  ;;  %2589 = vst [vmem:[#allocation2 + $0x98] sm:$0xf] %v2337_v19  ;;  %v1721_v42 = vshll.u32 %v5622_v47, 16  ;;  %6251 = vmatpush3.bf16.msra.mxu0 %v6967_v4  ;;  %6612 = vmatprep.mubr.bf16.mxu0 %v6942_v61 }
 0x18d   : > { %vm8334_vm2 = vcmp.ne.s16.totalorder %v9675_v51, 0  ;;  %v2304_v13 = vshll.u32 %v5685_v49, 16  ;;  %v2308_v34 = vshrl.u32 %v5685_v49, 16  ;;  %v8341_v58 = vmax.f32 %v626_v63, 0.0  ;;  %6252 = vmatprep.subr.bf16.mxu0 %v6970_v36  ;;  %v6976_v51 = vld [vmem:[#allocation8 + $0x60] sm:$0xff]   ;;  %6648 = vmatprep.subr.bf16.mxu1 %v6991_v0 }
 0x18e   : > { %v1711_v54 = vrot.slane %v1709_v35, 7  ;;  %v1720_v33 = vrot.slane %v1718_v60, 7  ;;  %v2314_v3 = vshll.u32 %v5686_v6, 16  ;;  %v2318_v10 = vshrl.u32 %v5686_v6, 16  ;;  %v6950_v60 = vld [vmem:[#allocation2 + $0x60] ss:$12 sps:$4 sm:$0xff]   ;;  %6649 = vmatpush3.bf16.msra.mxu1 %v6991_v0 }
 0x18f   : > { %v2306_v21 = vrot.slane %v2304_v13, 5  ;;  %v2310_v17 = vrot.slane %v2308_v34, 4  ;;  %v5942_v31 = vpack.c.bf16 %v8314_v18, %v8314_v18  ;;  %v5940_v24 = vpack.c.bf16 %v8341_v58, %v8341_v58  ;;  %v6977_v13 = vld [vmem:[#allocation8 + $0x20] sm:$0xff]   ;;  %3236 = vmatmul.mubr.bf16.gmra.mxu1 %v6950_v60  ;;  %v6951_v60 = vld [vmem:[#allocation2 + $0x7c] ss:$12 sps:$4 sm:$0xff]  }
 0x190   : > { %v1714_v27 = vor.u32 %v1712_v8, %v1711_v54  ;;  %v1716_v63 = vrot.slane %v1711_v54, 4  ;;  %v1723_v47 = vor.u32 %v1721_v42, %v1720_v33  ;;  %v1725_v49 = vrot.slane %v1720_v33, 4  ;;  %6253 = vmatpush3.bf16.msra.mxu0 %v6971_v55  ;;  %v6980_v33 = vld [vmem:[#allocation8 + $0x58] sm:$0xff]   ;;  %3243 = vmatprep.mubr.bf16.mxu1 %v6951_v60  ;;  %v6996_v60 = vld [vmem:[#allocation8] sm:$0xff]  }
 0x191   : > { %v9678_v20 = vcombine.low %v7692_v50, %v7927_v41  ;;  %v9681_v57 = vcombine.low %v7916_v40, %v7692_v50  ;;  %v2307_v39 = vsel %vm8124_vm14, %v8285_v28, %v2306_v21  ;;  %v2311_v4 = vor.u32 %v2310_v17, %v2306_v21  ;;  %2123 = vst [vmem:[#allocation2 + $0xc4] sm:$0xf] %v5942_v31 }
 0x192   : > { %v2316_v41 = vrot.slane %v2314_v3, 5  ;;  %v2320_v19 = vrot.slane %v2318_v10, 4  ;;  %2121 = vst [vmem:[#allocation2 + $0xac] sm:$0xf] %v5940_v24  ;;  %v1715_v40 = vsel %vm8103_vm13, %v1707_v15, %v1714_v27  ;;  %v1724_v35 = vsel %vm8103_vm13, %v1716_v63, %v1723_v47  ;;  %2586 = vst [vmem:[#allocation2 + $0x74] sm:$0xf] %v2307_v39  ;;  %6254 = vmatprep.subr.bf16.mxu0 %v6976_v51 }
 0x193   : > { %vm8350_vm7 = vcmp.ne.s16.totalorder %v9678_v20, 0  ;;  %vm8357_vm5 = vcmp.ne.s16.totalorder %v9681_v57, 0  ;;  %v1733_v8 = vsel %vm8103_vm13, %v1725_v49, %v8292_v59  ;;  %v719_v28 = vmax.f32 %v637_v26, 0.0  ;;  %1970 = vst [vmem:[#allocation2 + $0x78] sm:$0xf] %v1715_v40  ;;  %v6986_v51 = vld [vmem:[#allocation8 + $0x10] sm:$0xff]  }
 0x194   : > { %1971 = vst [vmem:[#allocation2 + $0x84] sm:$0xf] %v1724_v35  ;;  %1972 = vst [vmem:[#allocation2 + $0x90] sm:$0xf] %v1733_v8  ;;  %v2312_v36 = vrot.slane %v2311_v4, 4  ;;  %v2321_v42 = vor.u32 %v2320_v19, %v2316_v41  ;;  %v629_v9 = vadd.f32 %v7952_v45, %v628_v30  ;;  %v1338_v15 = vsel %vm8301_vm8, %v8078_v46, 0  ;;  %6255 = vmatpush3.bf16.msra.mxu0 %v6977_v13 }
 0x195   : > { %v1743_v34 = vrot.slane %v8275_v32, 4  ;;  %v743_v59 = vpack.c.bf16 %v719_v28, %v8314_v18  ;;  %v5943_v26 = vpack.c.bf16 %v719_v28, %v719_v28  ;;  %v8379_v54 = vcombine.low %v1338_v15, %v1338_v15  ;;  %6256 = vmatprep.subr.bf16.mxu0 %v6980_v33  ;;  %v6989_v19 = vld [vmem:[#allocation8 + $0x48] sm:$0xff]  }
 0x196   : > { %v8384_v45 = vrot.slane %v2341_v14, 4  ;;  %v2317_v23 = vsel %vm8124_vm14, %v2312_v36, %v2316_v41  ;;  %v2322_v3 = vrot.slane %v2321_v42, 4  ;;  %v717_v10 = vmax.f32 %v629_v9, 0.0 }
 0x197   : > { %2587 = vst [vmem:[#allocation2 + $0x80] sm:$0xf] %v2317_v23  ;;  %v1336_v18 = vsel %vm8320_vm4, %v743_v59, 0  ;;  %v1512_v61 = vsel %vm8327_vm11, %v743_v59, 0  ;;  %2124 = vst [vmem:[#allocation2 + $0xd0] sm:$0xf] %v5943_v26  ;;  %v8416_v6 = vcombine.high %v1338_v15, %v1338_v15 }
 0x198   : > { %v8395_v21 = vsel %vm8334_vm2, %v8078_v46, 0  ;;  %v1799_v22 = vshrl.u32 %v8379_v54, 16  ;;  %v2327_v56 = vsel %vm8124_vm14, %v2322_v3, %v8287_v37  ;;  %v5627_v14 = vcombine.low %v1336_v18, %v1336_v18  ;;  %v6985_v46 = vld [vmem:[#allocation8 + $0x50] sm:$0xff]   ;;  %6257 = vmatpush3.bf16.msra.mxu0 %v6981_v16 }
 0x199   : > { %v5628_v17 = vcombine.high %v1336_v18, %v1336_v18  ;;  %v5691_v31 = vcombine.low %v1512_v61, %v1512_v61  ;;  %2588 = vst [vmem:[#allocation2 + $0x8c] sm:$0xf] %v2327_v56  ;;  %v5692_v7 = vcombine.high %v1512_v61, %v1512_v61  ;;  %v742_v24 = vpack.c.bf16 %v717_v10, %v8341_v58  ;;  %v6943_v57 = vld [vmem:[#allocation2 + $0x68] ss:$12 sps:$4 sm:$0xff]   ;;  %v7000_v15 = vld [vmem:[#allocation8 + $0x90] sm:$0xff]  }
 0x19a   : > { %v5941_v55 = vpack.c.bf16 %v717_v10, %v717_v10  ;;  %v1802_v25 = vshll.u32 %v8379_v54, 16  ;;  %v1763_v0 = vshrl.u32 %v5627_v14, 16  ;;  %v1766_v27 = vshll.u32 %v5627_v14, 16  ;;  %6613 = vmatmul.mubr.bf16.gmra.mxu0 %v6943_v57  ;;  %6258 = vmatprep.subr.bf16.mxu0 %v6985_v46  ;;  %v6957_v23 = vld [vmem:[#allocation2 + $0x94] ss:$12 sps:$4 sm:$0xff]   ;;  %v8443_v57 = vpop.f32.mrf.mxu1 }
 0x19b   : > { %v1772_v63 = vshrl.u32 %v5628_v17, 16  ;;  %v1775_v47 = vshll.u32 %v5628_v17, 16  ;;  %v2364_v49 = vshll.u32 %v5691_v31, 16  ;;  %v2368_v37 = vshrl.u32 %v5691_v31, 16  ;;  %v6956_v62 = vld [vmem:[#allocation2 + $0x78] ss:$12 sps:$4 sm:$0xff]   ;;  %6650 = vmatprep.subr.bf16.mxu1 %v7000_v15 }
 0x19c   : > { %v2374_v30 = vshll.u32 %v5692_v7, 16  ;;  %v2378_v20 = vshrl.u32 %v5692_v7, 16  ;;  %2122 = vst [vmem:[#allocation2 + $0xb8] sm:$0xf] %v5941_v55  ;;  %v1765_v39 = vrot.slane %v1763_v0, 7  ;;  %v1335_v58 = vsel %vm8350_vm7, %v742_v24, 0  ;;  %3244 = vmatmul.mubr.bf16.gmra.mxu1 %v6956_v62  ;;  %6259 = vmatpush3.bf16.msra.mxu0 %v6986_v51 }
 0x19d   : > { %v8403_v4 = vrot.slane %v1772_v63, 7  ;;  %v1511_v41 = vsel %vm8357_vm5, %v742_v24, 0  ;;  %v8409_v40 = vrot.slane %v2364_v49, 5  ;;  %v2370_v35 = vrot.slane %v2368_v37, 4  ;;  %3251 = vmatprep.mubr.bf16.mxu1 %v6957_v23  ;;  %v6990_v24 = vld [vmem:[#allocation8 + $0x8] sm:$0xff]   ;;  %6260 = vmatprep.subr.bf16.mxu0 %v6989_v19 }
 0x19e   : > { %v8411_v8 = vrot.slane %v2374_v30, 5  ;;  %v8413_v28 = vrot.slane %v2378_v20, 4  ;;  %v1770_v36 = vrot.slane %v1765_v39, 4  ;;  %v8418_v9 = vrot.slane %v1799_v22, 7  ;;  %6651 = vmatpush3.bf16.msra.mxu1 %v7000_v15 }
 0x19f   : > { %v1777_v42 = vor.u32 %v1775_v47, %v8403_v4  ;;  %v1768_v13 = vor.u32 %v1766_v27, %v1765_v39  ;;  %v2371_v59 = vor.u32 %v2370_v35, %v8409_v40  ;;  %v5625_v26 = vcombine.low %v1335_v58, %v1335_v58 }
 0x1a0   : > { %v5626_v33 = vcombine.high %v1335_v58, %v1335_v58  ;;  %v1779_v10 = vrot.slane %v8403_v4, 4  ;;  %v5689_v18 = vcombine.low %v1511_v41, %v1511_v41  ;;  %v5690_v61 = vcombine.high %v1511_v41, %v1511_v41  ;;  %v6948_v56 = vld [vmem:[#allocation2 + $0x80] ss:$12 sps:$4 sm:$0xff]   ;;  %6261 = vmatpush3.bf16.msra.mxu0 %v6990_v24 }
 0x1a1   : > { %v1778_v3 = vsel %vm8103_vm13, %v1770_v36, %v1777_v42  ;;  %v2372_v22 = vrot.slane %v2371_v59, 4  ;;  %v2381_v14 = vor.u32 %v8413_v28, %v8411_v8  ;;  %v1745_v17 = vshrl.u32 %v5625_v26, 16  ;;  %6616 = vmatprep.mubr.bf16.mxu0 %v6948_v56  ;;  %v6963_v59 = vld [vmem:[#allocation2 + $0x90] ss:$12 sps:$4 sm:$0xff]  }
 0x1a2   : > { %1977 = vst [vmem:[#allocation2 + $0xcc] sm:$0xf] %v1778_v3  ;;  %v1748_v31 = vshll.u32 %v5625_v26, 16  ;;  %v9684_v16 = vcombine.low %v7692_v50, %v7970_v48  ;;  %v1754_v55 = vshrl.u32 %v5626_v33, 16  ;;  %v1757_v46 = vshll.u32 %v5626_v33, 16  ;;  %v6995_v48 = vld [vmem:[#allocation8 + $0x40] sm:$0xff]  }
 0x1a3   : > { %v2344_v0 = vshll.u32 %v5689_v18, 16  ;;  %v2348_v27 = vshrl.u32 %v5689_v18, 16  ;;  %v9687_v63 = vcombine.low %v7943_v43, %v7692_v50  ;;  %v2377_v49 = vsel %vm8124_vm14, %v2372_v22, %v8411_v8  ;;  %6262 = vmatprep.subr.bf16.mxu0 %v6995_v48  ;;  %v8455_v18 = vpop.f32.mrf.mxu1 }
 0x1a4   : > { %vm8429_vm0 = vcmp.ne.s16.totalorder %v9684_v16, 0  ;;  %v1747_v37 = vrot.slane %v1745_v17, 7  ;;  %v2354_v30 = vshll.u32 %v5690_v61, 16  ;;  %v2358_v20 = vshrl.u32 %v5690_v61, 16  ;;  %2593 = vst [vmem:[#allocation2 + $0xc8] sm:$0xf] %v2377_v49  ;;  %3252 = vmatmul.mubr.bf16.gmra.mxu1 %v6963_v59  ;;  %6263 = vmatpush3.bf16.msra.mxu0 %v6996_v60 }
 0x1a5   : > { %vm8436_vm10 = vcmp.ne.s16.totalorder %v9687_v63, 0  ;;  %v1756_v51 = vrot.slane %v1754_v55, 7  ;;  %v2346_v43 = vrot.slane %v2344_v0, 5  ;;  %v2350_v39 = vrot.slane %v2348_v27, 4 }
 0x1a6   : > { %v1806_v58 = vrot.slane %v8418_v9, 4  ;;  %v1750_v41 = vor.u32 %v1748_v31, %v1747_v37  ;;  %v1752_v19 = vrot.slane %v1747_v37, 4  ;;  %v2356_v35 = vrot.slane %v2354_v30, 5 }
 0x1a7   : > { %v2360_v28 = vrot.slane %v2358_v20, 4  ;;  %v1759_v8 = vor.u32 %v1757_v46, %v1756_v51  ;;  %v1761_v36 = vrot.slane %v1756_v51, 4  ;;  %v2347_v42 = vsel %vm8124_vm14, %v8384_v45, %v2346_v43 }
 0x1a8   : > { %v2351_v62 = vor.u32 %v2350_v39, %v2346_v43  ;;  %v1751_v26 = vsel %vm8103_vm13, %v1743_v34, %v1750_v41  ;;  %2590 = vst [vmem:[#allocation2 + $0xa4] sm:$0xf] %v2347_v42  ;;  %v1808_v23 = vshrl.u32 %v8416_v6, 16  ;;  %v1811_v3 = vshll.u32 %v8416_v6, 16  ;;  %v6964_v42 = vld [vmem:[#allocation2 + $0xac] ss:$12 sps:$4 sm:$0xff]  }
 0x1a9   : > { %v2361_v33 = vor.u32 %v2360_v28, %v2356_v35  ;;  %v1760_v61 = vsel %vm8103_vm13, %v1752_v19, %v1759_v8  ;;  %v1769_v45 = vsel %vm8103_vm13, %v1761_v36, %v1768_v13  ;;  %1974 = vst [vmem:[#allocation2 + $0xa8] sm:$0xf] %v1751_v26  ;;  %v5695_v32 = vcombine.low %v8395_v21, %v8395_v21  ;;  %v7007_v28 = vld [vmem:[#allocation8 + $0x88] sm:$0xff]  }
 0x1aa   : > { %v2352_v56 = vrot.slane %v2351_v62, 4  ;;  %1975 = vst [vmem:[#allocation2 + $0xb4] sm:$0xf] %v1760_v61  ;;  %1976 = vst [vmem:[#allocation2 + $0xc0] sm:$0xf] %v1769_v45  ;;  %v8463_v15 = vrot.slane %v1808_v23, 7  ;;  %v5696_v6 = vcombine.high %v8395_v21, %v8395_v21  ;;  %v744_v22 = vpack.c.bf16 %v8092_v44, %v8062_v12  ;;  %v8479_v12 = vpop.f32.mrf.mxu1  ;;  %6652 = vmatprep.subr.bf16.mxu1 %v7007_v28 }
 0x1ab   : > { %v2362_v34 = vrot.slane %v2361_v33, 4  ;;  %v2404_v17 = vshll.u32 %v5695_v32, 16  ;;  %v2408_v31 = vshrl.u32 %v5695_v32, 16  ;;  %v5945_v16 = vpack.c.bf16 %v8092_v44, %v8092_v44  ;;  %3259 = vmatprep.mubr.bf16.mxu1 %v6964_v42  ;;  %6653 = vmatpush3.bf16.msra.mxu1 %v7007_v28 }
 0x1ac   : > { %v2357_v13 = vsel %vm8124_vm14, %v2352_v56, %v2356_v35  ;;  %v8473_v24 = vrot.slane %v2381_v14, 4  ;;  %v1813_v21 = vor.u32 %v1811_v3, %v8463_v15  ;;  %v2414_v46 = vshll.u32 %v5696_v6, 16  ;;  %v6586_v35 = vpop.f32.mrf.mxu1 }
 0x1ad   : > { %v2367_v55 = vsel %vm8124_vm14, %v2362_v34, %v8409_v40  ;;  %2591 = vst [vmem:[#allocation2 + $0xb0] sm:$0xf] %v2357_v13  ;;  %v8481_v0 = vrot.slane %v2404_v17, 5  ;;  %v2410_v27 = vrot.slane %v2408_v31, 4  ;;  %v2418_v63 = vshrl.u32 %v5696_v6, 16 }
 0x1ae   : > { %2592 = vst [vmem:[#allocation2 + $0xbc] sm:$0xf] %v2367_v55  ;;  %v1337_v44 = vsel %vm8429_vm0, %v744_v22, 0  ;;  %2126 = vst [vmem:[#allocation2 + $0xe8] sm:$0xf] %v5945_v16  ;;  %v1814_v14 = vsel %vm8103_vm13, %v1806_v58, %v1813_v21  ;;  %v8487_v48 = vrot.slane %v2414_v46, 5  ;;  %v1804_v60 = vor.u32 %v1802_v25, %v8418_v9  ;;  %v673_v17 = vpop.f32.mrf.mxu1 }
 0x1af   : > { %v1513_v40 = vsel %vm8436_vm10, %v744_v22, 0  ;;  %v5629_v49 = vcombine.low %v1337_v44, %v1337_v44  ;;  %1981 = vst [vmem:[#allocation2 + $0xfc] sm:$0xf] %v1814_v14  ;;  %v2411_v37 = vor.u32 %v2410_v27, %v8481_v0  ;;  %v8492_v30 = vrot.slane %v2418_v63, 4  ;;  %v6949_v39 = vld [vmem:[#allocation2 + $0x98] ss:$12 sps:$4 sm:$0xff]  }
 0x1b0   : > { %v5630_v20 = vcombine.high %v1337_v44, %v1337_v44  ;;  %v5693_v51 = vcombine.low %v1513_v40, %v1513_v40  ;;  %v9690_v7 = vand.u32 15, %v8059_v1  ;;  %v5694_v19 = vcombine.high %v1513_v40, %v1513_v40  ;;  %6617 = vmatmul.mubr.bf16.gmra.mxu0 %v6949_v39  ;;  %v9702_v21 = vld [vmem:[#allocation18_spill] sm:$0xff] }
 0x1b1   : > { %v1781_v58 = vshrl.u32 %v5629_v49, 16  ;;  %v1784_v41 = vshll.u32 %v5629_v49, 16  ;;  %v8501_v47 = vmax.f32 %v8095_v5, 0.0  ;;  %v2412_v8 = vrot.slane %v2411_v37, 4  ;;  %v6973_v23 = vld [vmem:[#allocation2 + $0xa8] ss:$12 sps:$4 sm:$0xff]  }
 0x1b2   : > { %vm8496_vm12 = vcmp.ne.s32.totalorder %v9690_v7, 0  ;;  %v1790_v36 = vshrl.u32 %v5630_v20, 16  ;;  %v1793_v1 = vshll.u32 %v5630_v20, 16  ;;  %v2384_v59 = vshll.u32 %v5693_v51, 16  ;;  %3260 = vmatmul.mubr.bf16.gmra.mxu1 %v6973_v23  ;;  %v6974_v49 = vld [vmem:[#allocation2 + $0xc4] ss:$12 sps:$4 sm:$0xff]  }
 0x1b3   : > { %v1783_v62 = vrot.slane %v1781_v58, 7  ;;  %v2388_v26 = vshrl.u32 %v5693_v51, 16  ;;  %v2394_v33 = vshll.u32 %v5694_v19, 16  ;;  %v2417_v5 = vsel %vm8124_vm14, %v2412_v8, %v8487_v48  ;;  %3267 = vmatprep.mubr.bf16.mxu1 %v6974_v49  ;;  %vm1401_vm11 = vmpackc.low %vm8496_vm12, %vm8496_vm12 }
 0x1b4   : > { %v2421_v3 = vor.u32 %v8492_v30, %v8487_v48  ;;  %v1792_v54 = vrot.slane %v1790_v36, 7  ;;  %v2398_v25 = vshrl.u32 %v5694_v19, 16  ;;  %v9693_v9 = vcombine.low %v7692_v50, %v7979_v52  ;;  %2597 = vst [vmem:[#allocation2 + $0xf8] sm:$0xf] %v2417_v5  ;;  %v9706_v48 = vld [vmem:[#allocation20_spill] sm:$0xff] }
 0x1b5   : > { %v9696_v45 = vcombine.low %v7987_v53, %v7692_v50  ;;  %v9699_v32 = vcombine.low %v7692_v50, %v8047_v11  ;;  %v1786_v52 = vor.u32 %v1784_v41, %v1783_v62  ;;  %v1788_v6 = vrot.slane %v1783_v62, 4  ;;  %v6953_v27 = vld [vmem:[#allocation2 + $0xb0] ss:$12 sps:$4 sm:$0xff]   ;;  %v6587_v41 = vpop.f32.mrf.mxu1 }
 0x1b6   : > { %vm8514_vm9 = vcmp.ne.s16.totalorder %v9693_v9, 0  ;;  %v2386_v22 = vrot.slane %v2384_v59, 5  ;;  %v2390_v13 = vrot.slane %v2388_v26, 4  ;;  %v1795_v53 = vor.u32 %v1793_v1, %v1792_v54  ;;  %6620 = vmatprep.mubr.bf16.mxu0 %v6953_v27  ;;  %v8582_v9 = vld [vmem:[#allocation2] sm:$0xff] }
 0x1b7   : > { %vm8521_vm1 = vcmp.ne.s16.totalorder %v9696_v45, 0  ;;  %vm8528_vm8 = vcmp.ne.s16.totalorder %v9699_v32, 0  ;;  %v1797_v31 = vrot.slane %v1792_v54, 4  ;;  %v2396_v16 = vrot.slane %v2394_v33, 5 }
 0x1b8   : > { %v2400_v55 = vrot.slane %v2398_v25, 4  ;;  %v9703_v11 = vcombine.low %v9702_v21, %v7692_v50  ;;  %v1787_v63 = vsel %vm8103_vm13, %v1779_v10, %v1786_v52  ;;  %v2387_v44 = vsel %vm8124_vm14, %v8473_v24, %v2386_v22  ;;  %v8555_v10 = vld [vmem:[%s9499_s2] ss:$0 sm:$0xff] }
 0x1b9   : > { %v2391_v14 = vor.u32 %v2390_v13, %v2386_v22  ;;  %v5950_v40 = vpack.c.bf16 %v8501_v47, %v8501_v47  ;;  %v1796_v37 = vsel %vm8103_vm13, %v1788_v6, %v1795_v53  ;;  %v1805_v20 = vsel %vm8103_vm13, %v1797_v31, %v1804_v60  ;;  %1978 = vst [vmem:[#allocation2 + $0xd8] sm:$0xf] %v1787_v63 }
 0x1ba   : > { %vm8535_vm4 = vcmp.ne.s16.totalorder %v9703_v11, 0  ;;  %v2401_v4 = vor.u32 %v2400_v55, %v2396_v16  ;;  %2594 = vst [vmem:[#allocation2 + $0xd4] sm:$0xf] %v2387_v44  ;;  %v658_v24 = vadd.f32 %v8555_v10, %v8443_v57  ;;  %1979 = vst [vmem:[#allocation2 + $0xe4] sm:$0xf] %v1796_v37  ;;  %v669_v7 = vadd.f32 %v8555_v10, %v8455_v18  ;;  %v9710_v44 = vld [vmem:[#allocation19_spill] sm:$0xff] }
 0x1bb   : > { %1980 = vst [vmem:[#allocation2 + $0xf0] sm:$0xf] %v1805_v20  ;;  %v2392_v51 = vrot.slane %v2391_v14, 4  ;;  %2131 = vst [vmem:[#allocation2 + $0x124] sm:$0xf] %v5950_v40  ;;  %v661_v39 = vadd.f32 %v8555_v10, %v8479_v12  ;;  %v682_v58 = vadd.f32 %v8555_v10, %v6586_v35  ;;  %v674_v60 = vadd.f32 %v8555_v10, %v673_v17 }
 0x1bc   : > { %v2402_v19 = vrot.slane %v2401_v4, 4  ;;  %v724_v28 = vmax.f32 %v658_v24, 0.0  ;;  %v685_v57 = vadd.f32 %v8555_v10, %v6587_v41  ;;  %v727_v36 = vmax.f32 %v669_v7, 0.0  ;;  %v6982_v18 = vld [vmem:[#allocation2 + $0xc0] ss:$12 sps:$4 sm:$0xff]  }
 0x1bd   : > { %v2397_v8 = vsel %vm8124_vm14, %v2392_v51, %v2396_v16  ;;  %v725_v1 = vmax.f32 %v661_v39, 0.0  ;;  %v730_v42 = vmax.f32 %v682_v58, 0.0  ;;  %v8574_v62 = vmax.f32 %v674_v60, 0.0  ;;  %3268 = vmatmul.mubr.bf16.gmra.mxu1 %v6982_v18  ;;  %v8619_v16 = vld [vmem:[#allocation2 + $0xdc] ss:$12 sps:$4 sm:$0xff]  }
 0x1be   : > { %v2407_v12 = vsel %vm8124_vm14, %v2402_v19, %v8481_v0  ;;  %2595 = vst [vmem:[#allocation2 + $0xe0] sm:$0xf] %v2397_v8  ;;  %v5948_v35 = vpack.c.bf16 %v724_v28, %v724_v28  ;;  %v8576_v59 = vmax.f32 %v685_v57, 0.0  ;;  %v747_v26 = vpack.c.bf16 %v727_v36, %v8501_v47  ;;  %v6993_v40 = vld [vmem:[#allocation2 + $0xf4] ss:$12 sps:$4 sm:$0xff]   ;;  %3275 = vmatprep.mubr.bf16.mxu1 %v8619_v16 }
 0x1bf   : > { %2596 = vst [vmem:[#allocation2 + $0xec] sm:$0xf] %v2407_v12  ;;  %v5951_v33 = vpack.c.bf16 %v727_v36, %v727_v36  ;;  %v746_v23 = vpack.c.bf16 %v725_v1, %v724_v28  ;;  %v5949_v5 = vpack.c.bf16 %v725_v1, %v725_v1  ;;  %v1815_v54 = vrot.slane %v8463_v15, 4 }
 0x1c0   : > { %2129 = vst [vmem:[#allocation2 + $0x10c] sm:$0xf] %v5948_v35  ;;  %v5954_v25 = vpack.c.bf16 %v730_v42, %v730_v42  ;;  %v5952_v0 = vpack.c.bf16 %v8574_v62, %v8574_v62  ;;  %v8590_v47 = vsel %vm1401_vm11, 65537, %v8582_v9  ;;  %v8595_v45 = vrot.slane %v2421_v3, 4 }
 0x1c1   : > { %v1340_v32 = vsel %vm8514_vm9, %v747_v26, 0  ;;  %v1516_v52 = vsel %vm8521_vm1, %v747_v26, 0  ;;  %2132 = vst [vmem:[#allocation2 + $0x130] sm:$0xf] %v5951_v33  ;;  %v1339_v6 = vsel %vm8528_vm8, %v746_v23, 0  ;;  %v9707_v30 = vcombine.low %v7692_v50, %v9706_v48 }
 0x1c2   : > { %2130 = vst [vmem:[#allocation2 + $0x118] sm:$0xf] %v5949_v5  ;;  %v5635_v43 = vcombine.low %v1340_v32, %v1340_v32  ;;  %v5636_v22 = vcombine.high %v1340_v32, %v1340_v32  ;;  %v5699_v13 = vcombine.low %v1516_v52, %v1516_v52  ;;  %v5700_v17 = vcombine.high %v1516_v52, %v1516_v52  ;;  %v8610_v61 = vld [vmem:[#allocation2 + $0xc8] ss:$12 sps:$4 sm:$0xff]   ;;  %v6992_v55 = vld [vmem:[#allocation2 + $0xd8] ss:$12 sps:$4 sm:$0xff]  }
 0x1c3   : > { %2135 = vst [vmem:[#allocation2 + $0x154] sm:$0xf] %v5954_v25  ;;  %2133 = vst [vmem:[#allocation2 + $0x13c] sm:$0xf] %v5952_v0  ;;  %vm8606_vm2 = vcmp.ne.s16.totalorder %v9707_v30, 0  ;;  %v1515_v56 = vsel %vm8535_vm4, %v746_v23, 0  ;;  %v5633_v34 = vcombine.low %v1339_v6, %v1339_v6  ;;  %v8615_v53 = vpack.c.bf16 %v8576_v59, %v730_v42  ;;  %6621 = vmatmul.mubr.bf16.gmra.mxu0 %v8610_v61 }
 0x1c4   : > { %v5609_v31 = vcombine.low %v8590_v47, %v7692_v50  ;;  %v1835_v21 = vshrl.u32 %v5635_v43, 16  ;;  %v1844_v11 = vshrl.u32 %v5636_v22, 16  ;;  %v1847_v27 = vshll.u32 %v5636_v22, 16  ;;  %v7014_v42 = vld [vmem:[#allocation8 + $0x80] sm:$0xff]  }
 0x1c5   : > { %v5634_v63 = vcombine.high %v1339_v6, %v1339_v6  ;;  %v9711_v14 = vcombine.low %v9710_v44, %v7692_v50  ;;  %v2444_v49 = vshll.u32 %v5699_v13, 16  ;;  %v2448_v37 = vshrl.u32 %v5699_v13, 16  ;;  %3276 = vmatmul.mubr.bf16.gmra.mxu1 %v6992_v55  ;;  %6654 = vmatprep.subr.bf16.mxu1 %v7014_v42  ;;  %v676_v55 = vpop.f32.mrf.mxu1 }
 0x1c6   : > { %v2454_v20 = vshll.u32 %v5700_v17, 16  ;;  %v2458_v4 = vshrl.u32 %v5700_v17, 16  ;;  %v1837_v24 = vrot.slane %v1835_v21, 7  ;;  %v8630_v51 = vrot.slane %v1844_v11, 7  ;;  %v8634_v60 = vld [vmem:[#allocation2 + $0xe0] ss:$12 sps:$4 sm:$0xff]   ;;  %3283 = vmatprep.mubr.bf16.mxu1 %v6993_v40  ;;  %6655 = vmatpush3.bf16.msra.mxu1 %v7014_v42 }
 0x1c7   : > { %vm8624_vm7 = vcmp.ne.s16.totalorder %v9711_v14, 0  ;;  %v1817_v7 = vshrl.u32 %v5633_v34, 16  ;;  %v5697_v39 = vcombine.low %v1515_v56, %v1515_v56  ;;  %v1838_v58 = vshll.u32 %v5635_v43, 16  ;;  %6624 = vmatprep.mubr.bf16.mxu0 %v8634_v60  ;;  %v8655_v21 = vld [vmem:[#allocation2 + $0xf0] ss:$12 sps:$4 sm:$0xff]   ;;  %v6590_v46 = vpop.f32.mrf.mxu1  ;;  %v8677_v42 = vld [vmem:[#allocation8 + $0x238] sm:$0xff]  }
 0x1c8   : > { %v8632_v41 = vrot.slane %v2444_v49, 5  ;;  %v2450_v19 = vrot.slane %v2448_v37, 4  ;;  %v1820_v28 = vshll.u32 %v5633_v34, 16  ;;  %v1842_v57 = vrot.slane %v1837_v24, 4  ;;  %6688 = vmatprep.subr.bf16.mxu0 %v8677_v42 }
 0x1c9   : > { %v1849_v8 = vor.u32 %v1847_v27, %v8630_v51  ;;  %v8637_v36 = vrot.slane %v2454_v20, 5  ;;  %v5698_v1 = vcombine.high %v1515_v56, %v1515_v56  ;;  %v8640_v12 = vrot.slane %v2458_v4, 4 }
 0x1ca   : > { %v2451_v18 = vor.u32 %v2450_v19, %v8632_v41  ;;  %v1819_v35 = vrot.slane %v1817_v7, 7  ;;  %v1826_v26 = vshrl.u32 %v5634_v63, 16  ;;  %v1829_v23 = vshll.u32 %v5634_v63, 16 }
 0x1cb   : > { %v1850_v33 = vsel %vm8103_vm13, %v1842_v57, %v1849_v8  ;;  %v2424_v5 = vshll.u32 %v5697_v39, 16  ;;  %v2428_v25 = vshrl.u32 %v5697_v39, 16  ;;  %v1840_v0 = vor.u32 %v1838_v58, %v1837_v24 }
 0x1cc   : > { %1985 = vst [vmem:[#allocation2 + $0x12c] sm:$0xf] %v1850_v33  ;;  %v2452_v32 = vrot.slane %v2451_v18, 4  ;;  %v1822_v52 = vor.u32 %v1820_v28, %v1819_v35  ;;  %v1824_v6 = vrot.slane %v1819_v35, 4  ;;  %v1828_v43 = vrot.slane %v1826_v26, 7  ;;  %v9714_v35 = vld [vmem:[#allocation17_spill] sm:$0xff] }
 0x1cd   : > { %v2426_v22 = vrot.slane %v2424_v5, 5  ;;  %v2430_v13 = vrot.slane %v2428_v25, 4  ;;  %v2434_v17 = vshll.u32 %v5698_v1, 16  ;;  %v2438_v56 = vshrl.u32 %v5698_v1, 16  ;;  %3284 = vmatmul.mubr.bf16.gmra.mxu1 %v8655_v21  ;;  %v7020_v1 = vld [vmem:[#allocation8 + $0x1f8] sm:$0xff]  }
 0x1ce   : > { %v2457_v48 = vsel %vm8124_vm14, %v2452_v32, %v8637_v36  ;;  %v1823_v30 = vsel %vm8103_vm13, %v1815_v54, %v1822_v52  ;;  %v1342_v34 = vsel %vm8606_vm2, %v8615_v53, 0  ;;  %v1831_v11 = vor.u32 %v1829_v23, %v1828_v43  ;;  %6384 = vmatprep.subr.bf16.mxu1 %v7020_v1 }
 0x1cf   : > { %2601 = vst [vmem:[#allocation2 + $0x128] sm:$0xf] %v2457_v48  ;;  %v1833_v27 = vrot.slane %v1828_v43, 4  ;;  %1982 = vst [vmem:[#allocation2 + $0x108] sm:$0xf] %v1823_v30  ;;  %v2427_v63 = vsel %vm8124_vm14, %v8595_v45, %v2426_v22  ;;  %v2431_v15 = vor.u32 %v2430_v13, %v2426_v22  ;;  %v2436_v44 = vrot.slane %v2434_v17, 5 }
 0x1d0   : > { %v2440_v14 = vrot.slane %v2438_v56, 4  ;;  %2598 = vst [vmem:[#allocation2 + $0x104] sm:$0xf] %v2427_v63  ;;  %v1518_v54 = vsel %vm8624_vm7, %v8615_v53, 0  ;;  %v5639_v3 = vcombine.low %v1342_v34, %v1342_v34  ;;  %v1832_v40 = vsel %vm8103_vm13, %v1824_v6, %v1831_v11 }
 0x1d1   : > { %v1841_v49 = vsel %vm8103_vm13, %v1833_v27, %v1840_v0  ;;  %v2432_v37 = vrot.slane %v2431_v15, 4  ;;  %v5640_v20 = vcombine.high %v1342_v34, %v1342_v34  ;;  %v2461_v45 = vor.u32 %v8640_v12, %v8637_v36  ;;  %1983 = vst [vmem:[#allocation2 + $0x114] sm:$0xf] %v1832_v40  ;;  %v689_v0 = vpop.f32.mrf.mxu1  ;;  %v8707_v34 = vld [vmem:[#allocation2 + $0x10c] ss:$12 sps:$4 sm:$0xff]  }
 0x1d2   : > { %1984 = vst [vmem:[#allocation2 + $0x120] sm:$0xf] %v1841_v49  ;;  %v2441_v4 = vor.u32 %v2440_v14, %v2436_v44  ;;  %v1871_v24 = vshrl.u32 %v5639_v3, 16  ;;  %v5955_v53 = vpack.c.bf16 %v8576_v59, %v8576_v59  ;;  %v5703_v19 = vcombine.low %v1518_v54, %v1518_v54  ;;  %3291 = vmatprep.mubr.bf16.mxu1 %v8707_v34  ;;  %v8720_v40 = vld [vmem:[#allocation2 + $0x124] ss:$12 sps:$4 sm:$0xff]  }
 0x1d3   : > { %v2437_v7 = vsel %vm8124_vm14, %v2432_v37, %v2436_v44  ;;  %v1880_v39 = vshrl.u32 %v5640_v20, 16  ;;  %v1883_v58 = vshll.u32 %v5640_v20, 16  ;;  %v8674_v8 = vcombine.high %v1518_v54, %v1518_v54  ;;  %v6591_v63 = vpop.f32.mrf.mxu1 }
 0x1d4   : > { %v2442_v28 = vrot.slane %v2441_v4, 4  ;;  %2599 = vst [vmem:[#allocation2 + $0x110] sm:$0xf] %v2437_v7  ;;  %v1873_v57 = vrot.slane %v1871_v24, 7  ;;  %2136 = vst [vmem:[#allocation2 + $0x160] sm:$0xf] %v5955_v53  ;;  %v677_v36 = vadd.f32 %v8555_v10, %v676_v55  ;;  %v698_v30 = vadd.f32 %v8555_v10, %v6590_v46 }
 0x1d5   : > { %v8679_v18 = vrot.slane %v1880_v39, 7  ;;  %v2484_v59 = vshll.u32 %v5703_v19, 16  ;;  %v2488_v12 = vshrl.u32 %v5703_v19, 16  ;;  %v778_v26 = vadd.s32 200, %v9714_v35  ;;  %v692_v38 = vpop.f32.mrf.mxu1 }
 0x1d6   : > { %v2447_v33 = vsel %vm8124_vm14, %v2442_v28, %v8632_v41  ;;  %v1878_v23 = vrot.slane %v1873_v57, 4  ;;  %v2494_v5 = vshll.u32 %v8674_v8, 16  ;;  %vm8689_vm5 = vcmp.ne.s16.totalorder %v5609_v31, 0 }
 0x1d7   : > { %2600 = vst [vmem:[#allocation2 + $0x11c] sm:$0xf] %v2447_v33  ;;  %v1874_v32 = vshll.u32 %v5639_v3, 16  ;;  %v1885_v52 = vor.u32 %v1883_v58, %v8679_v18  ;;  %v8695_v6 = vrot.slane %v2484_v59, 5  ;;  %v2490_v41 = vrot.slane %v2488_v12, 4 }
 0x1d8   : > { %v1851_v43 = vrot.slane %v8630_v51, 4  ;;  %v8698_v22 = vrot.slane %v2461_v45, 4  ;;  %v729_v47 = vmax.f32 %v677_v36, 0.0  ;;  %v964_v31 = vand.u32 15, %v778_v26  ;;  %v8700_v13 = vld [vmem:[#allocation2 + $0xf8] ss:$12 sps:$4 sm:$0xff]  }
 0x1d9   : > { %v1886_v17 = vsel %vm8103_vm13, %v1878_v23, %v1885_v52  ;;  %v2491_v48 = vor.u32 %v2490_v41, %v8695_v6  ;;  %v690_v56 = vadd.f32 %v8555_v10, %v689_v0  ;;  %v8709_v55 = vrot.slane %v2494_v5, 5  ;;  %6625 = vmatmul.mubr.bf16.gmra.mxu0 %v8700_v13  ;;  %v8713_v15 = vld [vmem:[#allocation2 + $0x108] ss:$12 sps:$4 sm:$0xff]   ;;  %v8743_v0 = vld [vmem:[#allocation2 + $0x120] ss:$12 sps:$4 sm:$0xff]  }
 0x1da   : > { %1989 = vst [vmem:[#allocation2 + $0x15c] sm:$0xf] %v1886_v17  ;;  %v748_v11 = vpack.c.bf16 %v729_v47, %v8574_v62  ;;  %vm1194_vm0 = vcmp.ne.s32.totalorder %v964_v31, 15  ;;  %v5953_v27 = vpack.c.bf16 %v729_v47, %v729_v47  ;;  %v8715_v44 = vor.u32 %v1874_v32, %v1873_v57  ;;  %3292 = vmatmul.mubr.bf16.gmra.mxu1 %v8713_v15 }
 0x1db   : > { %v2492_v14 = vrot.slane %v2491_v48, 4  ;;  %v2498_v54 = vshrl.u32 %v8674_v8, 16  ;;  %vm1226_vm10 = vmpackc.low %vm1194_vm0, %vm1194_vm0  ;;  %v701_v3 = vadd.f32 %v8555_v10, %v6591_v63  ;;  %v734_v37 = vmax.f32 %v698_v30, 0.0  ;;  %3299 = vmatprep.mubr.bf16.mxu1 %v8720_v40 }
 0x1dc   : > { %v1258_v62 = vsel %vm1226_vm10, 65537, %v8582_v9  ;;  %v1517_v49 = vsel %vm8689_vm5, %v748_v11, 0  ;;  %2134 = vst [vmem:[#allocation2 + $0x148] sm:$0xf] %v5953_v27  ;;  %v8725_v20 = vmax.f32 %v690_v56, 0.0  ;;  %v783_v58 = vadd.s32 240, %v9714_v35 }
 0x1dd   : > { %v2497_v45 = vsel %vm8124_vm14, %v2492_v14, %v8709_v55  ;;  %v5593_v4 = vcombine.low %v7692_v50, %v1258_v62  ;;  %v5701_v24 = vcombine.low %v1517_v49, %v1517_v49  ;;  %v5702_v53 = vcombine.high %v1517_v49, %v1517_v49 }
 0x1de   : > { %2605 = vst [vmem:[#allocation2 + $0x158] sm:$0xf] %v2497_v45  ;;  %v5958_v46 = vpack.c.bf16 %v734_v37, %v734_v37  ;;  %v5956_v7 = vpack.c.bf16 %v8725_v20, %v8725_v20  ;;  %v8735_v39 = vmax.f32 %v701_v3, 0.0  ;;  %v8738_v19 = vld [vmem:[#allocation2 + $0x110] ss:$12 sps:$4 sm:$0xff]   ;;  %v784_v26 = vadd.s32 248, %v9714_v35 }
 0x1df   : > { %vm1325_vm12 = vcmp.ne.s16.totalorder %v5593_v4, 0  ;;  %v2464_v28 = vshll.u32 %v5701_v24, 16  ;;  %v2468_v57 = vshrl.u32 %v5701_v24, 16  ;;  %v2474_v36 = vshll.u32 %v5702_v53, 16  ;;  %6628 = vmatprep.mubr.bf16.mxu0 %v8738_v19 }
 0x1e0   : > { %v1341_v1 = vsel %vm1325_vm12, %v748_v11, 0  ;;  %v2478_v59 = vshrl.u32 %v5702_v53, 16  ;;  %2139 = vst [vmem:[#allocation2 + $0x184] sm:$0xf] %v5958_v46  ;;  %2137 = vst [vmem:[#allocation2 + $0x16c] sm:$0xf] %v5956_v7  ;;  %v751_v12 = vpack.c.bf16 %v8735_v39, %v734_v37 }
 0x1e1   : > { %v5637_v33 = vcombine.low %v1341_v1, %v1341_v1  ;;  %v5638_v23 = vcombine.high %v1341_v1, %v1341_v1  ;;  %v2466_v5 = vrot.slane %v2464_v28, 5  ;;  %v2470_v25 = vrot.slane %v2468_v57, 4  ;;  %v1545_v46 = vld [vmem:[#allocation2 + $0x18c] sm:$0x88] }
 0x1e2   : > { %v2476_v32 = vrot.slane %v2474_v36, 5  ;;  %v2480_v52 = vrot.slane %v2478_v59, 4  ;;  %v999_v41 = vand.u32 15, %v783_v58  ;;  %v1006_v47 = vand.u32 15, %v784_v26  ;;  %3300 = vmatmul.mubr.bf16.gmra.mxu1 %v8743_v0 }
 0x1e3   : > { %v1853_v31 = vshrl.u32 %v5637_v33, 16  ;;  %v1856_v17 = vshll.u32 %v5637_v33, 16  ;;  %v1862_v48 = vshrl.u32 %v5638_v23, 16  ;;  %v1865_v30 = vshll.u32 %v5638_v23, 16 }
 0x1e4   : > { %v2467_v56 = vsel %vm8124_vm14, %v8698_v22, %v2466_v5  ;;  %v2471_v11 = vor.u32 %v2470_v25, %v2466_v5  ;;  %v2481_v27 = vor.u32 %v2480_v52, %v2476_v32  ;;  %vm1200_vm9 = vcmp.ne.s32.totalorder %v1006_v47, 15 }
 0x1e5   : > { %v1855_v63 = vrot.slane %v1853_v31, 7  ;;  %v1864_v14 = vrot.slane %v1862_v48, 7  ;;  %2602 = vst [vmem:[#allocation2 + $0x134] sm:$0xf] %v2467_v56  ;;  %vm1232_vm1 = vmpackc.low %vm1200_vm9, %vm1200_vm9  ;;  %vm8749_vm8 = vcmp.ne.s32.totalorder %v999_v41, 0  ;;  %vm1541_vm4 = vcmask 1047559  }
 0x1e6   : > { %v2472_v62 = vrot.slane %v2471_v11, 4  ;;  %v2482_v49 = vrot.slane %v2481_v27, 4  ;;  %v1264_v37 = vsel %vm1232_vm1, 65537, %v8582_v9  ;;  %vm1407_vm11 = vmpackc.low %vm8749_vm8, %vm8749_vm8  ;;  %vm1542_vm2 = vsmask.f32 7966 }
 0x1e7   : > { %v1858_v22 = vor.u32 %v1856_v17, %v1855_v63  ;;  %v1860_v45 = vrot.slane %v1855_v63, 4  ;;  %v1867_v4 = vor.u32 %v1865_v30, %v1864_v14  ;;  %v1869_v24 = vrot.slane %v1864_v14, 4  ;;  %vm8757_vm7 = vmand %vm1541_vm4, %vm1542_vm2  ;;  %v1994_v30 = vld [vmem:[#allocation2 + $0x198] sm:$0x1] }
 0x1e8   : > { %v2477_v7 = vsel %vm8124_vm14, %v2472_v62, %v2476_v32  ;;  %v2487_v58 = vsel %vm8124_vm14, %v2482_v49, %v8695_v6  ;;  %v5596_v28 = vcombine.low %v7692_v50, %v1264_v37  ;;  %v1439_v57 = vsel %vm1407_vm11, 65537, %v8582_v9  ;;  %vm1544_vm5 = vmor %vm8757_vm7, %vm9652_vm3 }
 0x1e9   : > { %v1859_v36 = vsel %vm8103_vm13, %v1851_v43, %v1858_v22  ;;  %v1868_v1 = vsel %vm8103_vm13, %v1860_v45, %v1867_v4  ;;  %v1877_v6 = vsel %vm8103_vm13, %v1869_v24, %v8715_v44  ;;  %2603 = vst [vmem:[#allocation2 + $0x140] sm:$0xf] %v2477_v7  ;;  %2604 = vst [vmem:[#allocation2 + $0x14c] sm:$0xf] %v2487_v58  ;;  %v1546_v51 = vsel %vm1544_vm5, 0, %v1545_v46 }
 0x1ea   : > { %v5612_v59 = vcombine.low %v1439_v57, %v7692_v50  ;;  %1986 = vst [vmem:[#allocation2 + $0x138] sm:$0xf] %v1859_v36  ;;  %1987 = vst [vmem:[#allocation2 + $0x144] sm:$0xf] %v1868_v1  ;;  %vm1328_vm3 = vcmp.ne.s16.totalorder %v5596_v28, 0  ;;  %v5959_v43 = vpack.c.bf16 %v8735_v39, %v8735_v39  ;;  %v781_v33 = vadd.s32 224, %v9714_v35 }
 0x1eb   : > { %1988 = vst [vmem:[#allocation2 + $0x150] sm:$0xf] %v1877_v6  ;;  %v1344_v26 = vsel %vm1328_vm3, %v751_v12, 0  ;;  %1547 = vst [vmem:[#allocation2 + $0x18c] sm:$0x88] %v1546_v51  ;;  %v782_v44 = vadd.s32 232, %v9714_v35  ;;  %v693_v32 = vadd.f32 %v8555_v10, %v692_v38 }
 0x1ec   : > { %vm1504_vm0 = vcmp.ne.s16.totalorder %v5612_v59, 0  ;;  %v8786_v5 = vcombine.low %v1344_v26, %v1344_v26  ;;  %v5644_v25 = vcombine.high %v1344_v26, %v1344_v26  ;;  %2140 = vst [vmem:[#allocation2 + $0x190] sm:$0xf] %v5959_v43  ;;  %v8789_v52 = vld [vmem:[#allocation2 + $0x128] ss:$12 sps:$4 sm:$0xff]   ;;  %v8793_v41 = vrot.slane %v2498_v54, 4  ;;  %vm8804_vm9 = vmand %vm1957_vm15, %vm2221_vm6 }
 0x1ed   : > { %v1520_v23 = vsel %vm1504_vm0, %v751_v12, 0  ;;  %v992_v31 = vand.u32 15, %v782_v44  ;;  %v985_v12 = vand.u32 15, %v781_v33  ;;  %6629 = vmatmul.mubr.bf16.gmra.mxu0 %v8789_v52  ;;  %v733_v8 = vmax.f32 %v693_v32, 0.0  ;;  %v2611_v7 = vld [vmem:[#allocation2 + $0x194] sm:$0xf] }
 0x1ee   : > { %v5707_v39 = vcombine.low %v1520_v23, %v1520_v23  ;;  %v5708_v47 = vcombine.high %v1520_v23, %v1520_v23  ;;  %v1907_v17 = vshrl.u32 %v8786_v5, 16  ;;  %v1916_v48 = vshrl.u32 %v5644_v25, 16  ;;  %v8809_v28 = vld [vmem:[#allocation2 + $0x13c] ss:$12 sps:$4 sm:$0xff]   ;;  %v9723_v36 = vld [vmem:[#allocation16_spill] sm:$0xff] }
 0x1ef   : > { %v1919_v35 = vshll.u32 %v5644_v25, 16  ;;  %vm1198_vm10 = vcmp.ne.s32.totalorder %v992_v31, 15  ;;  %vm1373_vm1 = vcmp.ne.s32.totalorder %v985_v12, 0  ;;  %vm9724_vm8 = vnez %v9723_v36  ;;  %3307 = vmatprep.mubr.bf16.mxu1 %v8809_v28  ;;  %v8822_v44 = vld [vmem:[#allocation2 + $0x154] ss:$12 sps:$4 sm:$0xff]  }
 0x1f0   : > { %v2524_v56 = vshll.u32 %v5707_v39, 16  ;;  %v2528_v11 = vshrl.u32 %v5707_v39, 16  ;;  %v2534_v10 = vshll.u32 %v5708_v47, 16  ;;  %v2538_v27 = vshrl.u32 %v5708_v47, 16  ;;  %vm1230_vm12 = vmpackc.low %vm1198_vm10, %vm1198_vm10  ;;  %v8799_v4 = vld [vmem:[#allocation2 + $0x140] ss:$12 sps:$4 sm:$0xff]  }
 0x1f1   : > { %v1909_v63 = vrot.slane %v1907_v17, 7  ;;  %v1918_v14 = vrot.slane %v1916_v48, 7  ;;  %v1262_v58 = vsel %vm1230_vm12, 65537, %v8582_v9  ;;  %vm1405_vm4 = vmpackc.low %vm1373_vm1, %vm1373_vm1  ;;  %v5957_v59 = vpack.c.bf16 %v733_v8, %v733_v8  ;;  %6632 = vmatprep.mubr.bf16.mxu0 %v8799_v4  ;;  %v8817_v38 = vld [vmem:[#allocation2 + $0x138] ss:$12 sps:$4 sm:$0xff]  }
 0x1f2   : > { %v8797_v54 = vrot.slane %v2524_v56, 5  ;;  %v2530_v3 = vrot.slane %v2528_v11, 4  ;;  %v2536_v62 = vrot.slane %v2534_v10, 5  ;;  %v2540_v49 = vrot.slane %v2538_v27, 4  ;;  %3308 = vmatmul.mubr.bf16.gmra.mxu1 %v8817_v38 }
 0x1f3   : > { %v1914_v37 = vrot.slane %v1909_v63, 4  ;;  %v1921_v22 = vor.u32 %v1919_v35, %v1918_v14  ;;  %v1923_v45 = vrot.slane %v1918_v14, 4  ;;  %v5595_v6 = vcombine.low %v7692_v50, %v1262_v58  ;;  %2138 = vst [vmem:[#allocation2 + $0x178] sm:$0xf] %v5957_v59  ;;  %3315 = vmatprep.mubr.bf16.mxu1 %v8822_v44 }
 0x1f4   : > { %v2531_v24 = vor.u32 %v2530_v3, %v8797_v54  ;;  %v2541_v53 = vor.u32 %v2540_v49, %v2536_v62  ;;  %v750_v26 = vpack.c.bf16 %v733_v8, %v8725_v20  ;;  %v1437_v33 = vsel %vm1405_vm4, 65537, %v8582_v9  ;;  %v8835_v8 = vld [vmem:[#allocation2 + $0x150] ss:$12 sps:$4 sm:$0xff]  }
 0x1f5   : > { %v1922_v57 = vsel %vm8103_vm13, %v1914_v37, %v1921_v22  ;;  %v1995_v1 = vsel %vm9724_vm8, %v1923_v45, %v1994_v30  ;;  %vm1327_vm6 = vcmp.ne.s16.totalorder %v5595_v6, 0  ;;  %v5611_v23 = vcombine.low %v1437_v33, %v7692_v50 }
 0x1f6   : > { %1993 = vst [vmem:[#allocation2 + $0x18c] sm:$0xf] %v1922_v57  ;;  %1996 = vst [vmem:[#allocation2 + $0x198] sm:$0x1] %v1995_v1  ;;  %v2532_v51 = vrot.slane %v2531_v24, 4  ;;  %v2542_v43 = vrot.slane %v2541_v53, 4  ;;  %v2501_v25 = vor.u32 %v8793_v41, %v8709_v55 }
 0x1f7   : > { %v1343_v39 = vsel %vm1327_vm6, %v750_v26, 0  ;;  %v1910_v47 = vshll.u32 %v8786_v5, 16  ;;  %vm1503_vm15 = vcmp.ne.s16.totalorder %v5611_v23, 0  ;;  %v1887_v12 = vrot.slane %v8679_v18, 4 }
 0x1f8   : > { %v2537_v32 = vsel %vm8124_vm14, %v2532_v51, %v2536_v62  ;;  %v2612_v20 = vsel %vm8804_vm9, %v2542_v43, %v2611_v7  ;;  %v5641_v50 = vcombine.low %v1343_v39, %v1343_v39  ;;  %v5642_v31 = vcombine.high %v1343_v39, %v1343_v39  ;;  %v7019_v39 = vld [vmem:[#allocation2 + $0x8] ss:$12 sps:$4 sm:$0xff]  }
 0x1f9   : > { %2609 = vst [vmem:[#allocation2 + $0x188] sm:$0xf] %v2537_v32  ;;  %2613 = vst [vmem:[#allocation2 + $0x194] sm:$0xf] %v2612_v20  ;;  %v1519_v17 = vsel %vm1503_vm15, %v750_v26, 0  ;;  %v2502_v11 = vrot.slane %v2501_v25, 4  ;;  %v1912_v10 = vor.u32 %v1910_v47, %v1909_v63  ;;  %v5782_v32 = vcombine.high %v8582_v9, %v8582_v9 }
 0x1fa   : > { %v1889_v48 = vshrl.u32 %v5641_v50, 16  ;;  %v1892_v35 = vshll.u32 %v5641_v50, 16  ;;  %v1898_v55 = vshrl.u32 %v5642_v31, 16  ;;  %v1901_v41 = vshll.u32 %v5642_v31, 16  ;;  %3316 = vmatmul.mubr.bf16.gmra.mxu1 %v8835_v8  ;;  %v8851_v29 = vld [vmem:[#allocation2 + $0x16c] ss:$12 sps:$4 sm:$0xff]  }
 0x1fb   : > { %v5705_v30 = vcombine.low %v1519_v17, %v1519_v17  ;;  %v5706_v56 = vcombine.high %v1519_v17, %v1519_v17  ;;  %3323 = vmatprep.mubr.bf16.mxu1 %v8851_v29  ;;  %v8858_v25 = vld [vmem:[#allocation2 + $0x184] ss:$12 sps:$4 sm:$0xff]   ;;  %v5781_v47 = vcombine.low %v8582_v9, %v8582_v9  ;;  %v7021_v50 = vld [vmem:[#allocation8 + $0x1b8] sm:$0xff]   ;;  %v7026_v9 = vld [vmem:[#allocation8 + $0x1a8] sm:$0xff]  }
 0x1fc   : > { %v1891_v27 = vrot.slane %v1889_v48, 7  ;;  %v1900_v14 = vrot.slane %v1898_v55, 7  ;;  %v7023_v31 = vld [vmem:[#allocation8 + $0x1f0] sm:$0xff]  }
 0x1fd   : > { %v2504_v5 = vshll.u32 %v5705_v30, 16  ;;  %v2508_v3 = vshrl.u32 %v5705_v30, 16  ;;  %v2514_v62 = vshll.u32 %v5706_v56, 16  ;;  %v2518_v49 = vshrl.u32 %v5706_v56, 16  ;;  %v7027_v17 = vld [vmem:[#allocation8 + $0x230] sm:$0xff]   ;;  %v7032_v30 = vld [vmem:[#allocation8 + $0x228] sm:$0xff]  }
 0x1fe   : > { %v1894_v37 = vor.u32 %v1892_v35, %v1891_v27  ;;  %v1896_v22 = vrot.slane %v1891_v27, 4  ;;  %v1903_v45 = vor.u32 %v1901_v41, %v1900_v14  ;;  %v1905_v24 = vrot.slane %v1900_v14, 4  ;;  %v7098_v48 = vld [vmem:[#allocation2 + $0x20] ss:$12 sps:$4 sm:$0xff]   ;;  %v7099_v35 = vld [vmem:[#allocation2 + $0x1c] ss:$12 sps:$4 sm:$0xff]  }
 0x1ff   : > { %v2506_v53 = vrot.slane %v2504_v5, 5  ;;  %v2510_v18 = vrot.slane %v2508_v3, 4  ;;  %v2516_v46 = vrot.slane %v2514_v62, 5  ;;  %v2520_v7 = vrot.slane %v2518_v49, 4  ;;  %v7024_v55 = vld [vmem:[#allocation8 + $0x1b0] sm:$0xff]   ;;  %v7028_v56 = vld [vmem:[#allocation8 + $0x1e0] sm:$0xff]  }
 0x200   : > { %v1895_v63 = vsel %vm8103_vm13, %v1887_v12, %v1894_v37  ;;  %v1904_v58 = vsel %vm8103_vm13, %v1896_v22, %v1903_v45  ;;  %v1913_v57 = vsel %vm8103_vm13, %v1905_v24, %v1912_v10  ;;  %v7100_v41 = vld [vmem:[#allocation2 + $0x38] ss:$12 sps:$4 sm:$0xff]   ;;  %v7102_v27 = vld [vmem:[#allocation2 + $0x50] ss:$12 sps:$4 sm:$0xff]   ;;  %v7103_v14 = vld [vmem:[#allocation2 + $0x34] ss:$12 sps:$4 sm:$0xff]  }
 0x201   : > { %1990 = vst [vmem:[#allocation2 + $0x168] sm:$0xf] %v1895_v63  ;;  %1991 = vst [vmem:[#allocation2 + $0x174] sm:$0xf] %v1904_v58  ;;  %v2507_v36 = vsel %vm8124_vm14, %v2502_v11, %v2506_v53  ;;  %v2511_v1 = vor.u32 %v2510_v18, %v2506_v53  ;;  %v2521_v6 = vor.u32 %v2520_v7, %v2516_v46  ;;  %v7025_v12 = vld [vmem:[#allocation8 + $0x1e8] sm:$0xff]   ;;  %v7037_v11 = vld [vmem:[#allocation8 + $0x220] sm:$0xff]  }
 0x202   : > { %1992 = vst [vmem:[#allocation2 + $0x180] sm:$0xf] %v1913_v57  ;;  %2606 = vst [vmem:[#allocation2 + $0x164] sm:$0xf] %v2507_v36  ;;  %v7101_v10 = vld [vmem:[#allocation2 + $0x18] ss:$12 sps:$4 sm:$0xff]  }
 0x203   : > { %v2512_v59 = vrot.slane %v2511_v1, 4  ;;  %v2522_v51 = vrot.slane %v2521_v6, 4  ;;  %v7104_v5 = vld [vmem:[#allocation2 + $0x68] ss:$12 sps:$4 sm:$0xff]   ;;  %v7033_v37 = vld [vmem:[#allocation8 + $0x1d0] sm:$0xff]   ;;  %v7035_v7 = vld [vmem:[#allocation8 + $0x1c8] sm:$0xff]  }
 0x204   : > { %v7030_v3 = vld [vmem:[#allocation8 + $0x1d8] sm:$0xff]   ;;  %v7044_v22 = vld [vmem:[#allocation8 + $0x210] sm:$0xff]   ;;  %v7105_v45 = vld [vmem:[#allocation2 + $0x30] ss:$12 sps:$4 sm:$0xff]  }
 0x205   : > { %v2517_v43 = vsel %vm8124_vm14, %v2512_v59, %v2516_v46  ;;  %v2527_v26 = vsel %vm8124_vm14, %v2522_v51, %v8797_v54  ;;  %v6988_v54 = vld [vmem:[#allocation2 + $0x188] ss:$12 sps:$4 sm:$0xff]   ;;  %v7106_v24 = vld [vmem:[#allocation2 + $0x80] ss:$12 sps:$4 sm:$0xff]   ;;  %v7108_v18 = vld [vmem:[#allocation2 + $0x98] ss:$12 sps:$4 sm:$0xff]  }
 0x206   : > { %2607 = vst [vmem:[#allocation2 + $0x170] sm:$0xf] %v2517_v43  ;;  %2608 = vst [vmem:[#allocation2 + $0x17c] sm:$0xf] %v2527_v26  ;;  %v7038_v62 = vld [vmem:[#allocation8 + $0x218] sm:$0xff]   ;;  %v7034_v46 = vld [vmem:[#allocation8 + $0x190] sm:$0xff]  }
 0x207   : > { %v7031_v49 = vld [vmem:[#allocation8 + $0x198] sm:$0xff]   ;;  %v7045_v63 = vld [vmem:[#allocation8 + $0x208] sm:$0xff]   ;;  %v7039_v57 = vld [vmem:[#allocation8 + $0x1c0] sm:$0xff]  }
 0x208   : > { %v8855_v23 = vld [vmem:[#allocation2 + $0x168] ss:$12 sps:$4 sm:$0xff]   ;;  %v7107_v53 = vld [vmem:[#allocation2 + $0x4c] ss:$12 sps:$4 sm:$0xff]   ;;  %v7110_v6 = vld [vmem:[#allocation2 + $0xb0] ss:$12 sps:$4 sm:$0xff]  }
 0x209   : > { %v8853_v33 = vld [vmem:[#allocation2 + $0x158] ss:$12 sps:$4 sm:$0xff]   ;;  %3324 = vmatmul.mubr.bf16.gmra.mxu1 %v8855_v23  ;;  %v8868_v20 = vld [vmem:[#allocation2 + $0x180] ss:$12 sps:$4 sm:$0xff]   ;;  %v7050_v36 = vld [vmem:[#allocation8 + $0x200] sm:$0xff]  }
 0x20a   : > { %6633 = vmatmul.mubr.bf16.gmra.mxu0 %v8853_v33  ;;  %3331 = vmatprep.mubr.bf16.mxu1 %v8858_v25  ;;  %v7036_v58 = vld [vmem:[#allocation8 + $0x188] sm:$0xff]   ;;  %v7109_v1 = vld [vmem:[#allocation2 + $0x48] ss:$12 sps:$4 sm:$0xff]   ;;  %v7111_v59 = vld [vmem:[#allocation2 + $0x64] ss:$12 sps:$4 sm:$0xff]  }
 0x20b   : > { %v7040_v51 = vld [vmem:[#allocation8 + $0x180] sm:$0xff]   ;;  %v7112_v43 = vld [vmem:[#allocation2 + $0x60] ss:$12 sps:$4 sm:$0xff]  }
 0x20d   : > { %v8863_v2 = vld [vmem:[#allocation2 + $0x170] ss:$12 sps:$4 sm:$0xff]  }
 0x20e   : > { %6636 = vmatprep.mubr.bf16.mxu0 %v8863_v2 }
 0x211   : > { %3332 = vmatmul.mubr.bf16.gmra.mxu1 %v8868_v20 }
 0x212   : > { %6637 = vmatmul.mubr.bf16.gmra.mxu0 %v6988_v54  ;;  %6656 = vmatprep.mubr.bf16.mxu1 %v7019_v39  ;;  %v7113_v54 = vld [vmem:[#allocation2 + $0x7c] ss:$12 sps:$4 sm:$0xff]  }
 0x213   : > { %3693 = vmatprep.mubr.bf16.mxu0 %v5782_v32 }
 0x219   : > { %6657 = vmatmul.mubr.bf16.vlgmr.msra.gmra.mxu1 %v7098_v48  ;;  %v8880_v48 = vld [vmem:[#allocation2 + $0x94] ss:$12 sps:$4 sm:$0xff]  }
 0x21a   : > { %3694 = vmatmul.mubr.bf16.vlgmr.msra.gmra.mxu0 %v5781_v47  ;;  %6385 = vmatpush3.bf16.msra.mxu1 %v7021_v50 }
 0x21b   : > { %3701 = vmatprep.mubr.bf16.mxu0 %v7099_v35  ;;  %6660 = vmatprep.mubr.bf16.mxu1 %v7100_v41 }
 0x21c   : > { %6689 = vmatpush3.bf16.msra.mxu0 %v8677_v42  ;;  %6386 = vmatprep.subr.bf16.mxu1 %v7023_v31  ;;  %v7029_v42 = vld [vmem:[#allocation8 + $0x1a0] sm:$0xff]   ;;  %v7114_v31 = vld [vmem:[#allocation2 + $0x78] ss:$12 sps:$4 sm:$0xff]  }
 0x21d   : > { %6690 = vmatprep.subr.bf16.mxu0 %v7027_v17 }
 0x21e   : > { %6387 = vmatpush3.bf16.msra.mxu1 %v7024_v55 }
 0x21f   : > { %6388 = vmatprep.subr.bf16.mxu1 %v7025_v12  ;;  %v8884_v12 = vld [vmem:[#allocation2 + $0x90] ss:$12 sps:$4 sm:$0xff]  }
 0x220   : > { %6691 = vmatpush3.bf16.msra.mxu0 %v7027_v17 }
 0x221   : > { %6692 = vmatprep.subr.bf16.mxu0 %v7032_v30  ;;  %6661 = vmatmul.mubr.bf16.gmra.mxu1 %v7102_v27 }
 0x222   : > { %3702 = vmatmul.mubr.bf16.gmra.mxu0 %v7101_v10  ;;  %6664 = vmatprep.mubr.bf16.mxu1 %v7104_v5  ;;  %v8894_v10 = vld [vmem:[#allocation2 + $0xa8] ss:$12 sps:$4 sm:$0xff]  }
 0x223   : > { %3709 = vmatprep.mubr.bf16.mxu0 %v7103_v14  ;;  %6389 = vmatpush3.bf16.msra.mxu1 %v7026_v9 }
 0x224   : > { %6693 = vmatpush3.bf16.msra.mxu0 %v7032_v30  ;;  %6390 = vmatprep.subr.bf16.mxu1 %v7028_v56  ;;  %v8888_v30 = vld [vmem:[#allocation2 + $0xac] ss:$12 sps:$4 sm:$0xff]  }
 0x225   : > { %6694 = vmatprep.subr.bf16.mxu0 %v7037_v11 }
 0x227   : > { %6391 = vmatpush3.bf16.msra.mxu1 %v7029_v42 }
 0x228   : > { %6695 = vmatpush3.bf16.msra.mxu0 %v7037_v11  ;;  %6392 = vmatprep.subr.bf16.mxu1 %v7030_v3 }
 0x229   : > { %6696 = vmatprep.subr.bf16.mxu0 %v7038_v62  ;;  %6665 = vmatmul.mubr.bf16.gmra.mxu1 %v7106_v24 }
 0x22a   : > { %3710 = vmatmul.mubr.bf16.gmra.mxu0 %v7105_v45  ;;  %6668 = vmatprep.mubr.bf16.mxu1 %v7108_v18 }
 0x22b   : > { %3717 = vmatprep.mubr.bf16.mxu0 %v7107_v53  ;;  %6393 = vmatpush3.bf16.msra.mxu1 %v7031_v49  ;;  %v7041_v49 = vld [vmem:[#allocation2 + $0x30] ss:$12 sps:$4 sm:$0xff]  }
 0x22c   : > { %6697 = vmatpush3.bf16.msra.mxu0 %v7038_v62  ;;  %6394 = vmatprep.subr.bf16.mxu1 %v7033_v37 }
 0x22d   : > { %6698 = vmatprep.subr.bf16.mxu0 %v7044_v22 }
 0x22e   : > { %v6128_v26 = vpop.f32.mrf.mxu1 }
 0x22f   : > { %6395 = vmatpush3.bf16.msra.mxu1 %v7034_v46 }
 0x230   : > { %6699 = vmatpush3.bf16.msra.mxu0 %v7044_v22  ;;  %6396 = vmatprep.subr.bf16.mxu1 %v7035_v7  ;;  %v6129_v32 = vpop.f32.mrf.mxu1  ;;  %v7049_v22 = vld [vmem:[#allocation2 + $0x4c] ss:$12 sps:$4 sm:$0xff]  }
 0x231   : > { %6700 = vmatprep.subr.bf16.mxu0 %v7045_v63  ;;  %6669 = vmatmul.mubr.bf16.gmra.mxu1 %v7110_v6  ;;  %v6130_v39 = vadd.f32 %v6129_v32, %v6128_v26 }
 0x232   : > { %3718 = vmatmul.mubr.bf16.gmra.mxu0 %v7109_v1  ;;  %6672 = vmatprep.mubr.bf16.mxu1 %v8610_v61  ;;  %v6131_v47 = vpop.f32.mrf.mxu1  ;;  %v8913_v1 = vld [vmem:[#allocation2 + $0xd8] ss:$12 sps:$4 sm:$0xff]  }
 0x233   : > { %3725 = vmatprep.mubr.bf16.mxu0 %v7111_v59  ;;  %6397 = vmatpush3.bf16.msra.mxu1 %v7036_v58  ;;  %v8918_v59 = vld [vmem:[#allocation2 + $0xf4] ss:$12 sps:$4 sm:$0xff]  }
 0x234   : > { %6701 = vmatpush3.bf16.msra.mxu0 %v7045_v63  ;;  %6398 = vmatprep.subr.bf16.mxu1 %v7039_v57  ;;  %v6132_v61 = vpop.f32.mrf.mxu1  ;;  %v7047_v63 = vld [vmem:[#allocation2 + $0x48] ss:$12 sps:$4 sm:$0xff]   ;;  %v7055_v57 = vld [vmem:[#allocation2 + $0x64] ss:$12 sps:$4 sm:$0xff]  }
 0x235   : > { %6702 = vmatprep.subr.bf16.mxu0 %v7050_v36  ;;  %v8877_v50 = vadd.f32 %v6132_v61, %v6131_v47  ;;  %v7053_v47 = vld [vmem:[#allocation2 + $0x60] ss:$12 sps:$4 sm:$0xff]  }
 0x237   : > { %6399 = vmatpush3.bf16.msra.mxu1 %v7040_v51  ;;  %v6134_v17 = vpop.f32.mrf.mxu1 }
 0x238   : > { %6703 = vmatpush3.bf16.msra.mxu0 %v7050_v36 }
 0x239   : > { %6673 = vmatmul.mubr.bf16.gmra.mxu1 %v8634_v60  ;;  %v6135_v60 = vpop.f32.mrf.mxu1 }
 0x23a   : > { %3726 = vmatmul.mubr.bf16.gmra.mxu0 %v7112_v43  ;;  %6676 = vmatprep.mubr.bf16.mxu1 %v8700_v13  ;;  %v6136_v35 = vadd.f32 %v6135_v60, %v6134_v17 }
 0x23b   : > { %3733 = vmatprep.mubr.bf16.mxu0 %v7113_v54  ;;  %v6137_v13 = vpop.f32.mrf.mxu1 }
 0x23d   : > { %v6138_v55 = vpop.f32.mrf.mxu1 }
 0x23e   : > { %v6139_v41 = vadd.f32 %v6138_v55, %v6137_v13 }
 0x241   : > { %6677 = vmatmul.mubr.bf16.gmra.mxu1 %v8738_v19 }
 0x242   : > { %3734 = vmatmul.mubr.bf16.gmra.mxu0 %v7114_v31  ;;  %6680 = vmatprep.mubr.bf16.mxu1 %v8789_v52  ;;  %v7043_v52 = vld [vmem:[#allocation2 + $0x34] ss:$12 sps:$4 sm:$0xff]   ;;  %v7060_v31 = vld [vmem:[#allocation2 + $0x7c] ss:$12 sps:$4 sm:$0xff]  }
 0x243   : > { %3741 = vmatprep.mubr.bf16.mxu0 %v8880_v48 }
 0x247   : > { %v6610_v19 = vpop.f32.mrf.mxu0  ;;  %v6140_v11 = vpop.f32.mrf.mxu1 }
 0x248   : > { %v8892_v9 = vadd.f32 %v6610_v19, %v6136_v35 }
 0x249   : > { %6681 = vmatmul.mubr.bf16.gmra.mxu1 %v8799_v4  ;;  %v3374_v56 = vpop.f32.mrf.mxu0  ;;  %v8900_v4 = vld [vmem:[#allocation2 + $0xc4] ss:$12 sps:$4 sm:$0xff]   ;;  %v6141_v14 = vpop.f32.mrf.mxu1 }
 0x24a   : > { %3742 = vmatmul.mubr.bf16.gmra.mxu0 %v8884_v12  ;;  %6684 = vmatprep.mubr.bf16.mxu1 %v8853_v33  ;;  %v8898_v27 = vadd.f32 %v6130_v39, %v3374_v56  ;;  %v6142_v42 = vadd.f32 %v6141_v14, %v6140_v11 }
 0x24b   : > { %3749 = vmatprep.mubr.bf16.mxu0 %v8888_v30  ;;  %v6611_v33 = vpop.f32.mrf.mxu0  ;;  %v6143_v3 = vpop.f32.mrf.mxu1 }
 0x24c   : > { %v8903_v5 = vadd.f32 %v6611_v33, %v6139_v41  ;;  %v7058_v41 = vld [vmem:[#allocation2 + $0x78] ss:$12 sps:$4 sm:$0xff]  }
 0x24d   : > { %v6144_v62 = vpop.f32.mrf.mxu1  ;;  %v8911_v18 = vpop.f32.mrf.mxu0 }
 0x24e   : > { %v8905_v37 = vadd.f32 %v6144_v62, %v6143_v3 }
 0x24f   : > { %v6146_v45 = vpop.f32.mrf.mxu1 }
 0x251   : > { %6685 = vmatmul.mubr.bf16.gmra.mxu1 %v8863_v2  ;;  %v8907_v2 = vld [vmem:[#allocation2 + $0xc0] ss:$12 sps:$4 sm:$0xff]   ;;  %v6147_v24 = vpop.f32.mrf.mxu1 }
 0x252   : > { %3750 = vmatmul.mubr.bf16.gmra.mxu0 %v8894_v10  ;;  %4528 = vmatprep.mubr.bf16.mxu1 %v7043_v52  ;;  %v6148_v53 = vadd.f32 %v6147_v24, %v6146_v45 }
 0x253   : > { %3757 = vmatprep.mubr.bf16.mxu0 %v8900_v4  ;;  %v6149_v46 = vpop.f32.mrf.mxu1 }
 0x255   : > { %v6150_v7 = vpop.f32.mrf.mxu1 }
 0x256   : > { %v6151_v58 = vadd.f32 %v6150_v7, %v6149_v46 }
 0x259   : > { %4529 = vmatmul.mubr.bf16.vlgmr.msra.gmra.mxu1 %v7041_v49 }
 0x25a   : > { %3758 = vmatmul.mubr.bf16.gmra.mxu0 %v8907_v2  ;;  %4536 = vmatprep.mubr.bf16.mxu1 %v7049_v22  ;;  %v6614_v36 = vpop.f32.mrf.mxu0 }
 0x25b   : > { %3765 = vmatprep.mubr.bf16.mxu0 %v8619_v16  ;;  %v8916_v6 = vadd.f32 %v6614_v36, %v6148_v53 }
 0x25c   : > { %v3390_v16 = vpop.f32.mrf.mxu0  ;;  %v6152_v43 = vpop.f32.mrf.mxu1 }
 0x25d   : > { %v8921_v51 = vadd.f32 %v6142_v42, %v3390_v16 }
 0x25e   : > { %v6615_v26 = vpop.f32.mrf.mxu0  ;;  %v6153_v32 = vpop.f32.mrf.mxu1 }
 0x25f   : > { %v8923_v54 = vadd.f32 %v6615_v26, %v6151_v58  ;;  %v6154_v39 = vadd.f32 %v6153_v32, %v6152_v43 }
 0x260   : > { %v6155_v61 = vpop.f32.mrf.mxu1  ;;  %v8929_v19 = vpop.f32.mrf.mxu0 }
 0x261   : > { %4537 = vmatmul.mubr.bf16.gmra.mxu1 %v7047_v63 }
 0x262   : > { %3766 = vmatmul.mubr.bf16.gmra.mxu0 %v8913_v1  ;;  %4544 = vmatprep.mubr.bf16.mxu1 %v7055_v57  ;;  %v6156_v17 = vpop.f32.mrf.mxu1 }
 0x263   : > { %3773 = vmatprep.mubr.bf16.mxu0 %v8918_v59  ;;  %v8927_v60 = vadd.f32 %v6156_v17, %v6155_v61 }
 0x264   : > { %v6158_v35 = vpop.f32.mrf.mxu1 }
 0x266   : > { %v6159_v13 = vpop.f32.mrf.mxu1 }
 0x267   : > { %v6160_v55 = vadd.f32 %v6159_v13, %v6158_v35 }
 0x268   : > { %v6161_v52 = vpop.f32.mrf.mxu1 }
 0x269   : > { %4545 = vmatmul.mubr.bf16.gmra.mxu1 %v7053_v47 }
 0x26a   : > { %3774 = vmatmul.mubr.bf16.gmra.mxu0 %v8655_v21  ;;  %4552 = vmatprep.mubr.bf16.mxu1 %v7060_v31  ;;  %v6162_v56 = vpop.f32.mrf.mxu1 }
 0x26b   : > { %3781 = vmatprep.mubr.bf16.mxu0 %v8707_v34  ;;  %v6163_v21 = vadd.f32 %v6162_v56, %v6161_v52 }
 0x270   : > { %v6618_v11 = vpop.f32.mrf.mxu0 }
 0x271   : > { %4553 = vmatmul.mubr.bf16.gmra.mxu1 %v7058_v41  ;;  %v8934_v33 = vadd.f32 %v6618_v11, %v6160_v55  ;;  %v7046_v55 = vld [vmem:[#allocation2 + $0x38] ss:$12 sps:$4 sm:$0xff]  }
 0x272   : > { %3782 = vmatmul.mubr.bf16.gmra.mxu0 %v8713_v15  ;;  %4560 = vmatprep.mubr.bf16.mxu1 %v8880_v48  ;;  %v3406_v14 = vpop.f32.mrf.mxu0  ;;  %v6164_v3 = vpop.f32.mrf.mxu1 }
 0x273   : > { %3789 = vmatprep.mubr.bf16.mxu0 %v8720_v40  ;;  %v8936_v42 = vadd.f32 %v6154_v39, %v3406_v14  ;;  %v7051_v14 = vld [vmem:[#allocation2 + $0x50] ss:$12 sps:$4 sm:$0xff]  }
 0x274   : > { %v6619_v62 = vpop.f32.mrf.mxu0  ;;  %v6165_v22 = vpop.f32.mrf.mxu1 }
 0x275   : > { %v8938_v49 = vadd.f32 %v6619_v62, %v6163_v21  ;;  %v6166_v45 = vadd.f32 %v6165_v22, %v6164_v3  ;;  %v7052_v3 = vld [vmem:[#allocation2 + $0x68] ss:$12 sps:$4 sm:$0xff]   ;;  %v7124_v22 = vld [vmem:[#allocation2 + $0xf0] ss:$12 sps:$4 sm:$0xff]  }
 0x276   : > { %v6167_v48 = vpop.f32.mrf.mxu1  ;;  %v8946_v7 = vpop.f32.mrf.mxu0 }
 0x278   : > { %v6168_v24 = vpop.f32.mrf.mxu1 }
 0x279   : > { %4561 = vmatmul.mubr.bf16.gmra.mxu1 %v8884_v12  ;;  %v8944_v53 = vadd.f32 %v6168_v24, %v6167_v48 }
 0x27a   : > { %3790 = vmatmul.mubr.bf16.gmra.mxu0 %v8743_v0  ;;  %4568 = vmatprep.mubr.bf16.mxu1 %v8888_v30 }
 0x27b   : > { %3797 = vmatprep.mubr.bf16.mxu0 %v8809_v28 }
 0x27d   : > { %v6170_v46 = vpop.f32.mrf.mxu1 }
 0x27f   : > { %v6171_v63 = vpop.f32.mrf.mxu1 }
 0x280   : > { %v6172_v58 = vadd.f32 %v6171_v63, %v6170_v46 }
 0x281   : > { %4569 = vmatmul.mubr.bf16.gmra.mxu1 %v8894_v10  ;;  %v6173_v12 = vpop.f32.mrf.mxu1 }
 0x282   : > { %3798 = vmatmul.mubr.bf16.gmra.mxu0 %v8817_v38  ;;  %4576 = vmatprep.mubr.bf16.mxu1 %v8900_v4  ;;  %v7123_v4 = vld [vmem:[#allocation2 + $0xdc] ss:$12 sps:$4 sm:$0xff]  }
 0x283   : > { %3805 = vmatprep.mubr.bf16.mxu0 %v8822_v44  ;;  %v6622_v57 = vpop.f32.mrf.mxu0  ;;  %v6174_v36 = vpop.f32.mrf.mxu1 }
 0x284   : > { %v8952_v30 = vadd.f32 %v6622_v57, %v6172_v58  ;;  %v6175_v43 = vadd.f32 %v6174_v36, %v6173_v12  ;;  %v7056_v57 = vld [vmem:[#allocation2 + $0x80] ss:$12 sps:$4 sm:$0xff]   ;;  %v7057_v36 = vld [vmem:[#allocation2 + $0x98] ss:$12 sps:$4 sm:$0xff]  }
 0x285   : > { %v3422_v16 = vpop.f32.mrf.mxu0  ;;  %v6176_v32 = vpop.f32.mrf.mxu1 }
 0x286   : > { %v8954_v26 = vadd.f32 %v6166_v45, %v3422_v16 }
 0x287   : > { %v6623_v39 = vpop.f32.mrf.mxu0  ;;  %v6177_v61 = vpop.f32.mrf.mxu1 }
 0x288   : > { %v8956_v47 = vadd.f32 %v6623_v39, %v6175_v43  ;;  %v6178_v10 = vadd.f32 %v6177_v61, %v6176_v32 }
 0x289   : > { %4577 = vmatmul.mubr.bf16.gmra.mxu1 %v8907_v2  ;;  %v6179_v31 = vpop.f32.mrf.mxu1  ;;  %v8966_v56 = vpop.f32.mrf.mxu0 }
 0x28a   : > { %3806 = vmatmul.mubr.bf16.gmra.mxu0 %v8835_v8  ;;  %4584 = vmatprep.mubr.bf16.mxu1 %v7123_v4  ;;  %v7062_v4 = vld [vmem:[#allocation2 + $0xc8] ss:$12 sps:$4 sm:$0xff]  }
 0x28b   : > { %3813 = vmatprep.mubr.bf16.mxu0 %v8851_v29  ;;  %v6180_v17 = vpop.f32.mrf.mxu1 }
 0x28c   : > { %v8961_v35 = vadd.f32 %v6180_v17, %v6179_v31 }
 0x28d   : > { %v6182_v13 = vpop.f32.mrf.mxu1 }
 0x28f   : > { %v6183_v41 = vpop.f32.mrf.mxu1 }
 0x290   : > { %v6184_v52 = vadd.f32 %v6183_v41, %v6182_v13  ;;  %v7063_v41 = vld [vmem:[#allocation2 + $0xe0] ss:$12 sps:$4 sm:$0xff]  }
 0x291   : > { %4585 = vmatmul.mubr.bf16.gmra.mxu1 %v8913_v1  ;;  %v6185_v2 = vpop.f32.mrf.mxu1 }
 0x292   : > { %3814 = vmatmul.mubr.bf16.gmra.mxu0 %v8855_v23  ;;  %4592 = vmatprep.mubr.bf16.mxu1 %v8918_v59 }
 0x293   : > { %6704 = vmatprep.mubr.bf16.mxu0 %v7046_v55  ;;  %v6186_v21 = vpop.f32.mrf.mxu1 }
 0x294   : > { %v6187_v11 = vadd.f32 %v6186_v21, %v6185_v2  ;;  %v7064_v2 = vld [vmem:[#allocation2 + $0xf8] ss:$12 sps:$4 sm:$0xff]  }
 0x299   : > { %v6626_v62 = vpop.f32.mrf.mxu0  ;;  %4593 = vmatmul.mubr.bf16.gmra.mxu1 %v7124_v22 }
 0x29a   : > { %6705 = vmatmul.mubr.bf16.vlgmr.msra.gmra.mxu0 %v7051_v14  ;;  %v8968_v45 = vadd.f32 %v6626_v62, %v6184_v52  ;;  %4600 = vmatprep.mubr.bf16.mxu1 %v8707_v34  ;;  %v6188_v1 = vpop.f32.mrf.mxu1  ;;  %v7066_v62 = vld [vmem:[#allocation2 + $0x128] ss:$12 sps:$4 sm:$0xff]  }
 0x29b   : > { %6708 = vmatprep.mubr.bf16.mxu0 %v7052_v3  ;;  %v3438_v48 = vpop.f32.mrf.mxu0 }
 0x29c   : > { %v8971_v24 = vadd.f32 %v6178_v10, %v3438_v48  ;;  %v6189_v46 = vpop.f32.mrf.mxu1  ;;  %v7061_v10 = vld [vmem:[#allocation2 + $0xb0] ss:$12 sps:$4 sm:$0xff]  }
 0x29d   : > { %v6627_v59 = vpop.f32.mrf.mxu0  ;;  %v6190_v58 = vadd.f32 %v6189_v46, %v6188_v1  ;;  %v7067_v46 = vld [vmem:[#allocation2 + $0x140] ss:$12 sps:$4 sm:$0xff]  }
 0x29e   : > { %v8973_v63 = vadd.f32 %v6627_v59, %v6187_v11  ;;  %v6191_v12 = vpop.f32.mrf.mxu1 }
 0x29f   : > { %v8979_v31 = vpop.f32.mrf.mxu0 }
 0x2a0   : > { %v6192_v16 = vpop.f32.mrf.mxu1 }
 0x2a1   : > { %4601 = vmatmul.mubr.bf16.gmra.mxu1 %v8713_v15  ;;  %v8976_v43 = vadd.f32 %v6192_v16, %v6191_v12  ;;  %v7069_v16 = vld [vmem:[#allocation2 + $0x170] ss:$12 sps:$4 sm:$0xff]  }
 0x2a2   : > { %6709 = vmatmul.mubr.bf16.gmra.mxu0 %v7056_v57  ;;  %4608 = vmatprep.mubr.bf16.mxu1 %v8720_v40  ;;  %v6194_v34 = vpop.f32.mrf.mxu1 }
 0x2a3   : > { %6712 = vmatprep.mubr.bf16.mxu0 %v7057_v36 }
 0x2a4   : > { %v6195_v32 = vpop.f32.mrf.mxu1 }
 0x2a5   : > { %v6196_v39 = vadd.f32 %v6195_v32, %v6194_v34  ;;  %v7070_v34 = vld [vmem:[#allocation2 + $0x188] ss:$12 sps:$4 sm:$0xff]   ;;  %v7125_v32 = vld [vmem:[#allocation2] sm:$0xff] }
 0x2a6   : > { %v6197_v61 = vpop.f32.mrf.mxu1 }
 0x2a8   : > { %v6198_v17 = vpop.f32.mrf.mxu1 }
 0x2a9   : > { %4609 = vmatmul.mubr.bf16.gmra.mxu1 %v8743_v0  ;;  %v6199_v13 = vadd.f32 %v6198_v17, %v6197_v61 }
 0x2aa   : > { %6713 = vmatmul.mubr.bf16.gmra.mxu0 %v7061_v10  ;;  %4616 = vmatprep.mubr.bf16.mxu1 %v8809_v28  ;;  %v7065_v28 = vld [vmem:[#allocation2 + $0x110] ss:$12 sps:$4 sm:$0xff]  }
 0x2ab   : > { %6716 = vmatprep.mubr.bf16.mxu0 %v7062_v4 }
 0x2ad   : > { %v6630_v15 = vpop.f32.mrf.mxu0 }
 0x2ae   : > { %v8983_v55 = vadd.f32 %v6630_v15, %v6196_v39 }
 0x2af   : > { %v3454_v40 = vpop.f32.mrf.mxu0 }
 0x2b0   : > { %v8985_v52 = vadd.f32 %v6190_v58, %v3454_v40  ;;  %v7071_v40 = vld [vmem:[#allocation2 + $0x1a0] ss:$12 sps:$4 sm:$0xff]  }
 0x2b1   : > { %v6631_v21 = vpop.f32.mrf.mxu0  ;;  %4617 = vmatmul.mubr.bf16.gmra.mxu1 %v8817_v38 }
 0x2b2   : > { %6717 = vmatmul.mubr.bf16.gmra.mxu0 %v7063_v41  ;;  %v8988_v11 = vadd.f32 %v6631_v21, %v6199_v13  ;;  %4624 = vmatprep.mubr.bf16.mxu1 %v8822_v44  ;;  %v6200_v0 = vpop.f32.mrf.mxu1  ;;  %v7068_v44 = vld [vmem:[#allocation2 + $0x158] ss:$12 sps:$4 sm:$0xff]  }
 0x2b3   : > { %6720 = vmatprep.mubr.bf16.mxu0 %v7064_v2  ;;  %v8997_v36 = vpop.f32.mrf.mxu0  ;;  %v7072_v2 = vld [vmem:[#allocation9 + $0x38] sm:$0xff]  }
 0x2b4   : > { %v6201_v14 = vpop.f32.mrf.mxu1  ;;  %6736 = vmatprep.subr.bf16.mxu0 %v7072_v2 }
 0x2b5   : > { %v6202_v3 = vadd.f32 %v6201_v14, %v6200_v0  ;;  %6737 = vmatpush3.bf16.msra.mxu0 %v7072_v2 }
 0x2b6   : > { %v6203_v22 = vpop.f32.mrf.mxu1 }
 0x2b8   : > { %v6204_v48 = vpop.f32.mrf.mxu1 }
 0x2b9   : > { %4625 = vmatmul.mubr.bf16.gmra.mxu1 %v8835_v8  ;;  %v8993_v1 = vadd.f32 %v6204_v48, %v6203_v22 }
 0x2ba   : > { %6721 = vmatmul.mubr.bf16.gmra.mxu0 %v7065_v28  ;;  %4632 = vmatprep.mubr.bf16.mxu1 %v8851_v29  ;;  %v6206_v38 = vpop.f32.mrf.mxu1  ;;  %v4043_v29 = vld [vmem:[#allocation2 + $0x198] sm:$0xff] }
 0x2bb   : > { %6724 = vmatprep.mubr.bf16.mxu0 %v7066_v62  ;;  %v5854_v39 = vcombine.high %v4043_v29, %v7125_v32  ;;  %v5853_v14 = vcombine.low %v4043_v29, %v7125_v32 }
 0x2bc   : > { %v6207_v59 = vpop.f32.mrf.mxu1 }
 0x2bd   : > { %v6208_v58 = vadd.f32 %v6207_v59, %v6206_v38 }
 0x2be   : > { %v6209_v12 = vpop.f32.mrf.mxu1 }
 0x2c0   : > { %v6210_v57 = vpop.f32.mrf.mxu1 }
 0x2c1   : > { %4633 = vmatmul.mubr.bf16.gmra.mxu1 %v8855_v23  ;;  %v6211_v8 = vadd.f32 %v6210_v57, %v6209_v12  ;;  %v7074_v12 = vld [vmem:[#allocation9 + $0x28] sm:$0xff]  }
 0x2c2   : > { %6725 = vmatmul.mubr.bf16.gmra.mxu0 %v7067_v46  ;;  %4640 = vmatprep.mubr.bf16.mxu1 %v8858_v25 }
 0x2c3   : > { %6728 = vmatprep.mubr.bf16.mxu0 %v7068_v44 }
 0x2c9   : > { %v6212_v10 = vpop.f32.mrf.mxu1  ;;  %4641 = vmatmul.mubr.bf16.gmra.mxu1 %v8868_v20 }
 0x2ca   : > { %v6634_v61 = vpop.f32.mrf.mxu0  ;;  %6729 = vmatmul.mubr.bf16.gmra.mxu0 %v7069_v16  ;;  %4648 = vmatprep.mubr.bf16.mxu1 %v5854_v39  ;;  %v7075_v39 = vld [vmem:[#allocation9 + $0x20] sm:$0xff]  }
 0x2cb   : > { %6732 = vmatprep.mubr.bf16.mxu0 %v7070_v34  ;;  %v9000_v4 = vadd.f32 %v6634_v61, %v6208_v58  ;;  %v6213_v25 = vpop.f32.mrf.mxu1 }
 0x2cc   : > { %v3470_v23 = vpop.f32.mrf.mxu0  ;;  %v6214_v13 = vadd.f32 %v6213_v25, %v6212_v10 }
 0x2cd   : > { %v9002_v17 = vadd.f32 %v6202_v3, %v3470_v23  ;;  %v6215_v41 = vpop.f32.mrf.mxu1  ;;  %v7073_v3 = vld [vmem:[#allocation9 + $0x30] sm:$0xff]  }
 0x2ce   : > { %v6635_v15 = vpop.f32.mrf.mxu0  ;;  %6738 = vmatprep.subr.bf16.mxu0 %v7073_v3 }
 0x2cf   : > { %v9004_v21 = vadd.f32 %v6635_v15, %v6211_v8  ;;  %v6216_v28 = vpop.f32.mrf.mxu1  ;;  %6739 = vmatpush3.bf16.msra.mxu0 %v7073_v3 }
 0x2d0   : > { %v9006_v0 = vpop.f32.mrf.mxu0  ;;  %v9008_v20 = vadd.f32 %v6216_v28, %v6215_v41  ;;  %6740 = vmatprep.subr.bf16.mxu0 %v7074_v12  ;;  %v3378_v28 = vadd.f32 %v8877_v50, %v8911_v18 }
 0x2d1   : > { %v6218_v22 = vpop.f32.mrf.mxu1  ;;  %4649 = vmatmul.mubr.bf16.gmra.mxu1 %v5853_v14 }
 0x2d2   : > { %v6638_v62 = vpop.f32.mrf.mxu0  ;;  %6733 = vmatmul.mubr.bf16.gmra.mxu0 %v7071_v40  ;;  %v7076_v40 = vld [vmem:[#allocation9 + $0x18] sm:$0xff]  }
 0x2d3   : > { %v6219_v38 = vpop.f32.mrf.mxu1  ;;  %6741 = vmatpush3.bf16.msra.mxu0 %v7074_v12 }
 0x2d4   : > { %v3486_v48 = vpop.f32.mrf.mxu0  ;;  %v6220_v46 = vadd.f32 %v6219_v38, %v6218_v22  ;;  %6742 = vmatprep.subr.bf16.mxu0 %v7075_v39  ;;  %v7077_v38 = vld [vmem:[#allocation9 + $0x10] sm:$0xff]  }
 0x2d5   : > { %v9010_v59 = vadd.f32 %v6214_v13, %v3486_v48  ;;  %v6221_v44 = vpop.f32.mrf.mxu1 }
 0x2d6   : > { %v6639_v58 = vpop.f32.mrf.mxu0  ;;  %v9012_v57 = vadd.f32 %v6638_v62, %v6220_v46 }
 0x2d7   : > { %v6222_v29 = vpop.f32.mrf.mxu1  ;;  %6743 = vmatpush3.bf16.msra.mxu0 %v7075_v39 }
 0x2d8   : > { %v9014_v8 = vpop.f32.mrf.mxu0  ;;  %v6223_v16 = vadd.f32 %v6222_v29, %v6221_v44  ;;  %6744 = vmatprep.subr.bf16.mxu0 %v7076_v40 }
 0x2d9   : > { %v6658_v32 = vpop.f32.mrf.mxu1 }
 0x2da   : > { %v6264_v34 = vpop.f32.mrf.mxu0  ;;  %v9016_v61 = vadd.f32 %v6639_v58, %v6223_v16 }
 0x2db   : > { %v3856_v23 = vpop.f32.mrf.mxu1  ;;  %6745 = vmatpush3.bf16.msra.mxu0 %v7076_v40  ;;  %v7079_v40 = vld [vmem:[#allocation9] sm:$0xff]  }
 0x2dc   : > { %v6265_v10 = vpop.f32.mrf.mxu0  ;;  %6746 = vmatprep.subr.bf16.mxu0 %v7077_v38 }
 0x2dd   : > { %v6266_v25 = vadd.f32 %v6265_v10, %v6264_v34  ;;  %v6659_v15 = vpop.f32.mrf.mxu1  ;;  %v7078_v34 = vld [vmem:[#allocation9 + $0x8] sm:$0xff]  }
 0x2de   : > { %v6267_v13 = vpop.f32.mrf.mxu0 }
 0x2df   : > { %v3696_v41 = vadd.f32 %v6266_v25, %v8898_v27  ;;  %v3859_v14 = vpop.f32.mrf.mxu1  ;;  %6747 = vmatpush3.bf16.msra.mxu0 %v7077_v38 }
 0x2e0   : > { %v6268_v2 = vpop.f32.mrf.mxu0  ;;  %6748 = vmatprep.subr.bf16.mxu0 %v7078_v34 }
 0x2e1   : > { %v6269_v62 = vadd.f32 %v6268_v2, %v6267_v13  ;;  %v9021_v22 = vadd.f32 %v3856_v23, %v3696_v41  ;;  %v6662_v48 = vpop.f32.mrf.mxu1 }
 0x2e2   : > { %v6270_v3 = vpop.f32.mrf.mxu0 }
 0x2e3   : > { %v3699_v46 = vadd.f32 %v6269_v62, %v3378_v28  ;;  %v3872_v44 = vpop.f32.mrf.mxu1  ;;  %6749 = vmatpush3.bf16.msra.mxu0 %v7078_v34 }
 0x2e4   : > { %v6271_v58 = vpop.f32.mrf.mxu0  ;;  %6750 = vmatprep.subr.bf16.mxu0 %v7079_v40 }
 0x2e5   : > { %v6272_v12 = vadd.f32 %v6271_v58, %v6270_v3  ;;  %v9023_v29 = vadd.f32 %v3859_v14, %v3699_v46  ;;  %v6663_v16 = vpop.f32.mrf.mxu1  ;;  %v3394_v58 = vadd.f32 %v8905_v37, %v8929_v19 }
 0x2e6   : > { %v6273_v27 = vpop.f32.mrf.mxu0 }
 0x2e7   : > { %v3704_v50 = vadd.f32 %v6272_v12, %v8892_v9  ;;  %v3875_v39 = vpop.f32.mrf.mxu1  ;;  %6751 = vmatpush3.bf16.msra.mxu0 %v7079_v40 }
 0x2e8   : > { %v6274_v18 = vpop.f32.mrf.mxu0 }
 0x2e9   : > { %v6275_v10 = vadd.f32 %v6274_v18, %v6273_v27  ;;  %v9026_v23 = vadd.f32 %v6658_v32, %v3704_v50  ;;  %v6666_v13 = vpop.f32.mrf.mxu1 }
 0x2ea   : > { %v6276_v25 = vpop.f32.mrf.mxu0 }
 0x2eb   : > { %v3707_v41 = vadd.f32 %v6275_v10, %v8903_v5  ;;  %v3888_v14 = vpop.f32.mrf.mxu1 }
 0x2ec   : > { %v6277_v2 = vpop.f32.mrf.mxu0 }
 0x2ed   : > { %v6278_v28 = vadd.f32 %v6277_v2, %v6276_v25  ;;  %v9029_v62 = vadd.f32 %v6659_v15, %v3707_v41  ;;  %v6667_v3 = vpop.f32.mrf.mxu1 }
 0x2ee   : > { %v6279_v9 = vpop.f32.mrf.mxu0 }
 0x2ef   : > { %v3712_v38 = vadd.f32 %v6278_v28, %v8921_v51  ;;  %v3891_v32 = vpop.f32.mrf.mxu1 }
 0x2f0   : > { %v6280_v46 = vpop.f32.mrf.mxu0 }
 0x2f1   : > { %v6281_v12 = vadd.f32 %v6280_v46, %v6279_v9  ;;  %v9034_v27 = vadd.f32 %v3872_v44, %v3712_v38  ;;  %v9036_v34 = vpop.f32.mrf.mxu1 }
 0x2f2   : > { %v6282_v5 = vpop.f32.mrf.mxu0 }
 0x2f3   : > { %v3715_v50 = vadd.f32 %v6281_v12, %v3394_v58  ;;  %v3904_v15 = vpop.f32.mrf.mxu1 }
 0x2f4   : > { %v6283_v18 = vpop.f32.mrf.mxu0 }
 0x2f5   : > { %v6284_v10 = vadd.f32 %v6283_v18, %v6282_v5  ;;  %v9038_v25 = vadd.f32 %v3875_v39, %v3715_v50  ;;  %v9040_v41 = vpop.f32.mrf.mxu1 }
 0x2f6   : > { %v6285_v40 = vpop.f32.mrf.mxu0 }
 0x2f7   : > { %9725 = vst [vmem:[#allocation18_spill] sm:$0xff] %v9038_v25  ;;  %v3720_v51 = vadd.f32 %v6284_v10, %v8916_v6  ;;  %v3907_v28 = vpop.f32.mrf.mxu1 }
 0x2f8   : > { %v6286_v2 = vpop.f32.mrf.mxu0 }
 0x2f9   : > { %v6287_v37 = vadd.f32 %v6286_v2, %v6285_v40  ;;  %v9043_v19 = vadd.f32 %v6662_v48, %v3720_v51  ;;  %v9045_v9 = vpop.f32.mrf.mxu1  ;;  %v3410_v48 = vadd.f32 %v8927_v60, %v8946_v7 }
 0x2fa   : > { %v6288_v44 = vpop.f32.mrf.mxu0 }
 0x2fb   : > { %v3723_v38 = vadd.f32 %v6287_v37, %v8923_v54  ;;  %v9048_v58 = vpop.f32.mrf.mxu1 }
 0x2fc   : > { %v6289_v46 = vpop.f32.mrf.mxu0 }
 0x2fd   : > { %v6290_v39 = vadd.f32 %v6289_v46, %v6288_v44  ;;  %v9050_v12 = vadd.f32 %v6663_v16, %v3723_v38  ;;  %v9052_v50 = vpop.f32.mrf.mxu1 }
 0x2fe   : > { %v6291_v5 = vpop.f32.mrf.mxu0 }
 0x2ff   : > { %9726 = vst [vmem:[#allocation20_spill] sm:$0xff] %v9050_v12  ;;  %v3728_v6 = vadd.f32 %v6290_v39, %v8936_v42  ;;  %v9055_v10 = vpop.f32.mrf.mxu1 }
 0x300   : > { %v6292_v18 = vpop.f32.mrf.mxu0 }
 0x301   : > { %v6293_v40 = vadd.f32 %v6292_v18, %v6291_v5  ;;  %v9059_v51 = vadd.f32 %v3888_v14, %v3728_v6  ;;  %v9061_v2 = vpop.f32.mrf.mxu1 }
 0x302   : > { %v6294_v54 = vpop.f32.mrf.mxu0 }
 0x303   : > { %9727 = vst [vmem:[#allocation19_spill] sm:$0xff] %v9059_v51  ;;  %v3731_v37 = vadd.f32 %v6293_v40, %v3410_v48  ;;  %v9063_v44 = vpop.f32.mrf.mxu1 }
 0x304   : > { %v6295_v16 = vpop.f32.mrf.mxu0 }
 0x305   : > { %v6296_v38 = vadd.f32 %v6295_v16, %v6294_v54  ;;  %v9065_v46 = vadd.f32 %v3891_v32, %v3731_v37  ;;  %v9067_v39 = vpop.f32.mrf.mxu1 }
 0x306   : > { %v6297_v42 = vpop.f32.mrf.mxu0 }
 0x307   : > { %9728 = vst [vmem:[#allocation17_spill] sm:$0xff] %v9065_v46  ;;  %v3736_v25 = vadd.f32 %v6296_v38, %v8934_v33  ;;  %v9070_v60 = vpop.f32.mrf.mxu1 }
 0x308   : > { %v6298_v12 = vpop.f32.mrf.mxu0 }
 0x309   : > { %v6299_v7 = vadd.f32 %v6298_v12, %v6297_v42  ;;  %v9072_v14 = vadd.f32 %v6666_v13, %v3736_v25  ;;  %v9074_v6 = vpop.f32.mrf.mxu1  ;;  %v3426_v13 = vadd.f32 %v8944_v53, %v8966_v56 }
 0x30a   : > { %v6300_v5 = vpop.f32.mrf.mxu0 }
 0x30b   : > { %v3739_v18 = vadd.f32 %v6299_v7, %v8938_v49  ;;  %v9077_v40 = vpop.f32.mrf.mxu1 }
 0x30c   : > { %v6301_v48 = vpop.f32.mrf.mxu0 }
 0x30d   : > { %v6302_v32 = vadd.f32 %v6301_v48, %v6300_v5  ;;  %v9079_v54 = vadd.f32 %v6667_v3, %v3739_v18  ;;  %v9081_v16 = vpop.f32.mrf.mxu1 }
 0x30e   : > { %v6303_v37 = vpop.f32.mrf.mxu0 }
 0x30f   : > { %9729 = vst [vmem:[#allocation16_spill] sm:$0xff] %v9079_v54  ;;  %v3744_v33 = vadd.f32 %v6302_v32, %v8954_v26  ;;  %v9084_v12 = vpop.f32.mrf.mxu1 }
 0x310   : > { %v6304_v38 = vpop.f32.mrf.mxu0 }
 0x311   : > { %v6305_v25 = vadd.f32 %v6304_v38, %v6303_v37  ;;  %v9088_v42 = vadd.f32 %v3904_v15, %v3744_v33  ;;  %v9090_v7 = vpop.f32.mrf.mxu1 }
 0x312   : > { %v6306_v49 = vpop.f32.mrf.mxu0  ;;  %9730 = vst [vmem:[#allocation21_spill] sm:$0xff] %v9090_v7 }
 0x313   : > { %v3747_v5 = vadd.f32 %v6305_v25, %v3426_v13  ;;  %v9092_v18 = vpop.f32.mrf.mxu1 }
 0x314   : > { %v6307_v3 = vpop.f32.mrf.mxu0 }
 0x315   : > { %v6308_v48 = vadd.f32 %v6307_v3, %v6306_v49  ;;  %v9094_v46 = vadd.f32 %v3907_v28, %v3747_v5  ;;  %v9096_v32 = vpop.f32.mrf.mxu1 }
 0x316   : > { %v6309_v26 = vpop.f32.mrf.mxu0  ;;  %9731 = vst [vmem:[#allocation22_spill] sm:$0xff] %v9096_v32 }
 0x317   : > { %v3752_v54 = vadd.f32 %v6308_v48, %v8952_v30  ;;  %v9099_v53 = vpop.f32.mrf.mxu1 }
 0x318   : > { %v6310_v51 = vpop.f32.mrf.mxu0 }
 0x319   : > { %v6311_v56 = vadd.f32 %v6310_v51, %v6309_v26  ;;  %v9102_v15 = vadd.f32 %v9036_v34, %v3752_v54  ;;  %v6400_v33 = vpop.f32.mrf.mxu1  ;;  %v3442_v54 = vadd.f32 %v8961_v35, %v8979_v31 }
 0x31a   : > { %v6312_v37 = vpop.f32.mrf.mxu0 }
 0x31b   : > { %v3755_v38 = vadd.f32 %v6311_v56, %v8956_v47  ;;  %v6401_v25 = vpop.f32.mrf.mxu1 }
 0x31c   : > { %v6313_v13 = vpop.f32.mrf.mxu0  ;;  %v9108_v5 = vadd.f32 %v6401_v25, %v6400_v33 }
 0x31d   : > { %v6314_v28 = vadd.f32 %v6313_v13, %v6312_v37  ;;  %v9106_v49 = vadd.f32 %v9040_v41, %v3755_v38  ;;  %v9110_v3 = vpop.f32.mrf.mxu1 }
 0x31e   : > { %v6315_v30 = vpop.f32.mrf.mxu0 }
 0x31f   : > { %v3760_v51 = vadd.f32 %v6314_v28, %v8971_v24  ;;  %v9113_v34 = vpop.f32.mrf.mxu1 }
 0x320   : > { %v6316_v48 = vpop.f32.mrf.mxu0 }
 0x321   : > { %v6317_v47 = vadd.f32 %v6316_v48, %v6315_v30  ;;  %v9118_v26 = vadd.f32 %v9048_v58, %v3760_v51  ;;  %v9120_v41 = vpop.f32.mrf.mxu1 }
 0x322   : > { %v6318_v56 = vpop.f32.mrf.mxu0 }
 0x323   : > { %v3763_v37 = vadd.f32 %v6317_v47, %v3442_v54  ;;  %v9122_v38 = vpop.f32.mrf.mxu1 }
 0x324   : > { %v6319_v33 = vpop.f32.mrf.mxu0 }
 0x325   : > { %v6320_v13 = vadd.f32 %v6319_v33, %v6318_v56  ;;  %v9125_v24 = vadd.f32 %v9055_v10, %v3763_v37  ;;  %v9127_v28 = vpop.f32.mrf.mxu1 }
 0x326   : > { %v6321_v25 = vpop.f32.mrf.mxu0 }
 0x327   : > { %9732 = vst [vmem:[#allocation23_spill] sm:$0xff] %v9125_v24  ;;  %v3768_v35 = vadd.f32 %v6320_v13, %v8968_v45  ;;  %v9130_v30 = vpop.f32.mrf.mxu1 }
 0x328   : > { %v6322_v31 = vpop.f32.mrf.mxu0 }
 0x329   : > { %v6323_v58 = vadd.f32 %v6322_v31, %v6321_v25  ;;  %v9133_v51 = vadd.f32 %v9045_v9, %v3768_v35  ;;  %v9135_v54 = vpop.f32.mrf.mxu1  ;;  %v3458_v35 = vadd.f32 %v8976_v43, %v8997_v36 }
 0x32a   : > { %v6324_v48 = vpop.f32.mrf.mxu0 }
 0x32b   : > { %v3771_v47 = vadd.f32 %v6323_v58, %v8973_v63  ;;  %v9138_v10 = vpop.f32.mrf.mxu1 }
 0x32c   : > { %v6325_v56 = vpop.f32.mrf.mxu0 }
 0x32d   : > { %v6326_v37 = vadd.f32 %v6325_v56, %v6324_v48  ;;  %v9141_v33 = vadd.f32 %v9052_v50, %v3771_v47  ;;  %v9143_v13 = vpop.f32.mrf.mxu1 }
 0x32e   : > { %v6327_v45 = vpop.f32.mrf.mxu0 }
 0x32f   : > { %v3776_v25 = vadd.f32 %v6326_v37, %v8985_v52  ;;  %v9146_v9 = vpop.f32.mrf.mxu1 }
 0x330   : > { %v6328_v31 = vpop.f32.mrf.mxu0 }
 0x331   : > { %v6329_v32 = vadd.f32 %v6328_v31, %v6327_v45  ;;  %v9151_v63 = vadd.f32 %v9063_v44, %v3776_v25  ;;  %v9153_v48 = vpop.f32.mrf.mxu1 }
 0x332   : > { %v6330_v58 = vpop.f32.mrf.mxu0 }
 0x333   : > { %9733 = vst [vmem:[#allocation24_spill] sm:$0xff] %v9151_v63  ;;  %v3779_v50 = vadd.f32 %v6329_v32, %v3458_v35  ;;  %v9155_v56 = vpop.f32.mrf.mxu1 }
 0x334   : > { %v6331_v47 = vpop.f32.mrf.mxu0 }
 0x335   : > { %v6332_v7 = vadd.f32 %v6331_v47, %v6330_v58  ;;  %v9158_v52 = vadd.f32 %v9070_v60, %v3779_v50  ;;  %v9160_v24 = vpop.f32.mrf.mxu1 }
 0x336   : > { %v6333_v37 = vpop.f32.mrf.mxu0 }
 0x337   : > { %9734 = vst [vmem:[#allocation25_spill] sm:$0xff] %v9158_v52  ;;  %v3784_v43 = vadd.f32 %v6332_v7, %v8983_v55  ;;  %v9163_v45 = vpop.f32.mrf.mxu1 }
 0x338   : > { %v6334_v36 = vpop.f32.mrf.mxu0 }
 0x339   : > { %v6335_v44 = vadd.f32 %v6334_v36, %v6333_v37  ;;  %v9166_v25 = vadd.f32 %v9061_v2, %v3784_v43  ;;  %v9168_v31 = vpop.f32.mrf.mxu1  ;;  %v3474_v43 = vadd.f32 %v8993_v1, %v9006_v0 }
 0x33a   : > { %v6336_v32 = vpop.f32.mrf.mxu0 }
 0x33b   : > { %v3787_v35 = vadd.f32 %v6335_v44, %v8988_v11  ;;  %v9171_v60 = vpop.f32.mrf.mxu1 }
 0x33c   : > { %v6337_v58 = vpop.f32.mrf.mxu0 }
 0x33d   : > { %v6338_v50 = vadd.f32 %v6337_v58, %v6336_v32  ;;  %v9174_v47 = vadd.f32 %v9067_v39, %v3787_v35  ;;  %v9176_v7 = vpop.f32.mrf.mxu1 }
 0x33e   : > { %v6339_v55 = vpop.f32.mrf.mxu0 }
 0x33f   : > { %9735 = vst [vmem:[#allocation26_spill] sm:$0xff] %v9174_v47  ;;  %v3792_v37 = vadd.f32 %v6338_v50, %v9002_v17  ;;  %v9179_v2 = vpop.f32.mrf.mxu1 }
 0x340   : > { %v6340_v36 = vpop.f32.mrf.mxu0 }
 0x341   : > { %v6341_v52 = vadd.f32 %v6340_v36, %v6339_v55  ;;  %v9184_v11 = vadd.f32 %v9077_v40, %v3792_v37  ;;  %v9186_v32 = vpop.f32.mrf.mxu1 }
 0x342   : > { %v6342_v44 = vpop.f32.mrf.mxu0 }
 0x343   : > { %9736 = vst [vmem:[#allocation27_spill] sm:$0xff] %v9184_v11  ;;  %v3795_v39 = vadd.f32 %v6341_v52, %v3474_v43  ;;  %v9188_v58 = vpop.f32.mrf.mxu1 }
 0x344   : > { %v6343_v35 = vpop.f32.mrf.mxu0 }
 0x345   : > { %v6344_v47 = vadd.f32 %v6343_v35, %v6342_v44  ;;  %v9191_v17 = vadd.f32 %v9084_v12, %v3795_v39  ;;  %v9193_v63 = vpop.f32.mrf.mxu1 }
 0x346   : > { %v6345_v50 = vpop.f32.mrf.mxu0 }
 0x347   : > { %9737 = vst [vmem:[#allocation28_spill] sm:$0xff] %v9191_v17  ;;  %v3800_v1 = vadd.f32 %v6344_v47, %v9000_v4  ;;  %v9196_v55 = vpop.f32.mrf.mxu1 }
 0x348   : > { %v6346_v0 = vpop.f32.mrf.mxu0 }
 0x349   : > { %v9199_v40 = vadd.f32 %v9074_v6, %v3800_v1  ;;  %v6347_v37 = vadd.f32 %v6346_v0, %v6345_v50  ;;  %v9201_v36 = vpop.f32.mrf.mxu1  ;;  %v3490_v50 = vadd.f32 %v9008_v20, %v9014_v8  ;;  %v6408_v8 = vadd.f32 %v9122_v38, %v9120_v41 }
 0x34a   : > { %v6348_v52 = vpop.f32.mrf.mxu0 }
 0x34b   : > { %v3803_v43 = vadd.f32 %v6347_v37, %v9004_v21  ;;  %v9204_v12 = vpop.f32.mrf.mxu1 }
 0x34c   : > { %v6349_v44 = vpop.f32.mrf.mxu0 }
 0x34d   : > { %v9207_v39 = vadd.f32 %v9081_v16, %v3803_v43  ;;  %v6350_v35 = vadd.f32 %v6349_v44, %v6348_v52  ;;  %v9209_v47 = vpop.f32.mrf.mxu1 }
 0x34e   : > { %v6351_v4 = vpop.f32.mrf.mxu0 }
 0x34f   : > { %9738 = vst [vmem:[#allocation29_spill] sm:$0xff] %v9207_v39  ;;  %v3808_v17 = vadd.f32 %v6350_v35, %v9010_v59  ;;  %v9212_v1 = vpop.f32.mrf.mxu1 }
 0x350   : > { %v6352_v6 = vpop.f32.mrf.mxu0 }
 0x351   : > { %v9217_v21 = vadd.f32 %v9092_v18, %v3808_v17  ;;  %v6353_v0 = vadd.f32 %v6352_v6, %v6351_v4  ;;  %v9219_v11 = vpop.f32.mrf.mxu1 }
 0x352   : > { %v6354_v37 = vpop.f32.mrf.mxu0 }
 0x353   : > { %v3811_v16 = vadd.f32 %v6353_v0, %v3490_v50  ;;  %v9221_v43 = vpop.f32.mrf.mxu1 }
 0x354   : > { %v6355_v52 = vpop.f32.mrf.mxu0 }
 0x355   : > { %v9224_v44 = vadd.f32 %v9099_v53, %v3811_v16  ;;  %v6356_v59 = vadd.f32 %v6355_v52, %v6354_v37  ;;  %v9226_v39 = vpop.f32.mrf.mxu1  ;;  %v6411_v37 = vadd.f32 %v9130_v30, %v9127_v28  ;;  %v9256_v28 = vld [vmem:[%s9501_s4] ss:$0 sm:$0xff] }
 0x356   : > { %v6357_v35 = vpop.f32.mrf.mxu0 }
 0x357   : > { %v9229_v20 = vadd.f32 %v6356_v59, %v9012_v57  ;;  %v9233_v17 = vpop.f32.mrf.mxu1 }
 0x358   : > { %v6358_v18 = vpop.f32.mrf.mxu0 }
 0x359   : > { %v6359_v4 = vadd.f32 %v6358_v18, %v6357_v35  ;;  %v9235_v50 = vpop.f32.mrf.mxu1  ;;  %v6405_v35 = vadd.f32 %v9113_v34, %v9110_v3 }
 0x35a   : > { %v6706_v6 = vpop.f32.mrf.mxu0 }
 0x35b   : > { %v9238_v53 = vadd.f32 %v6359_v4, %v9016_v61  ;;  %v4700_v0 = vadd.f32 %v6706_v6, %v6408_v8  ;;  %v9242_v57 = vpop.f32.mrf.mxu1  ;;  %v6420_v8 = vadd.f32 %v9155_v56, %v9153_v48 }
 0x35c   : > { %v4691_v16 = vpop.f32.mrf.mxu0 }
 0x35d   : > { %v4692_v52 = vadd.f32 %v9108_v5, %v4691_v16  ;;  %v4820_v41 = vadd.f32 %v4700_v0, %v9026_v23  ;;  %v9246_v59 = vpop.f32.mrf.mxu1 }
 0x35e   : > { %v6707_v38 = vpop.f32.mrf.mxu0 }
 0x35f   : > { %v4818_v61 = vadd.f32 %v4692_v52, %v9021_v22  ;;  %v4703_v18 = vadd.f32 %v6707_v38, %v6411_v37  ;;  %v9258_v30 = vpop.f32.mrf.mxu1  ;;  %v4859_v23 = vadd.f32 %v9256_v28, %v4820_v41  ;;  %v6414_v22 = vadd.f32 %v9138_v10, %v9135_v54 }
 0x360   : > { %v4694_v5 = vpop.f32.mrf.mxu0  ;;  %v6417_v52 = vadd.f32 %v9146_v9, %v9143_v13 }
 0x361   : > { %v4695_v4 = vadd.f32 %v6405_v35, %v4694_v5  ;;  %v4821_v6 = vadd.f32 %v4703_v18, %v9029_v62  ;;  %v9264_v34 = vpop.f32.mrf.mxu1  ;;  %v4857_v48 = vadd.f32 %v9256_v28, %v4818_v61  ;;  %v6423_v62 = vadd.f32 %v9163_v45, %v9160_v24 }
 0x362   : > { %v6710_v3 = vpop.f32.mrf.mxu0  ;;  %v4891_v54 = vmax.f32 %v4859_v23, 0.0  ;;  %v6432_v18 = vadd.f32 %v9188_v58, %v9186_v32  ;;  %v9739_v32 = vld [vmem:[#allocation20_spill] sm:$0xff] }
 0x363   : > { %v4819_v56 = vadd.f32 %v4695_v4, %v9023_v29  ;;  %v4860_v0 = vadd.f32 %v9256_v28, %v4821_v6  ;;  %v4716_v37 = vadd.f32 %v6710_v3, %v6420_v8  ;;  %v9273_v41 = vpop.f32.mrf.mxu1  ;;  %v4889_v5 = vmax.f32 %v4857_v48, 0.0  ;;  %v9740_v48 = vld [vmem:[#allocation18_spill] sm:$0xff] }
 0x364   : > { %v4707_v16 = vpop.f32.mrf.mxu0 }
 0x365   : > { %v4858_v10 = vadd.f32 %v9256_v28, %v4819_v56  ;;  %v4892_v38 = vmax.f32 %v4860_v0, 0.0  ;;  %v4708_v35 = vadd.f32 %v6414_v22, %v4707_v16  ;;  %v4824_v29 = vadd.f32 %v4716_v37, %v9043_v19  ;;  %v9279_v8 = vpop.f32.mrf.mxu1 }
 0x366   : > { %v6711_v61 = vpop.f32.mrf.mxu0  ;;  %v6426_v22 = vadd.f32 %v9171_v60, %v9168_v31 }
 0x367   : > { %v4890_v13 = vmax.f32 %v4858_v10, 0.0  ;;  %v4922_v9 = vpack.c.bf16 %v4892_v38, %v4891_v54  ;;  %v4822_v24 = vadd.f32 %v4708_v35, %v9034_v27  ;;  %v4719_v4 = vadd.f32 %v6711_v61, %v6423_v62  ;;  %v9282_v23 = vpop.f32.mrf.mxu1 }
 0x368   : > { %v4710_v45 = vpop.f32.mrf.mxu0  ;;  %v4863_v56 = vadd.f32 %v9256_v28, %v4824_v29  ;;  %v6429_v38 = vadd.f32 %v9179_v2, %v9176_v7  ;;  %v6438_v7 = vadd.f32 %v9204_v12, %v9201_v36  ;;  %v6441_v36 = vadd.f32 %v9212_v1, %v9209_v47 }
 0x369   : > { %v4711_v6 = vadd.f32 %v6417_v52, %v4710_v45  ;;  %v4921_v3 = vpack.c.bf16 %v4890_v13, %v4889_v5  ;;  %v4825_v58 = vadd.f32 %v4719_v4, %v9739_v32  ;;  %v9288_v0 = vpop.f32.mrf.mxu1  ;;  %v4861_v27 = vadd.f32 %v9256_v28, %v4822_v24  ;;  %v9741_v5 = vld [vmem:[#allocation19_spill] sm:$0xff]  ;;  %v9743_v32 = vld [vmem:[#allocation17_spill] sm:$0xff] }
 0x36a   : > { %v6714_v19 = vpop.f32.mrf.mxu0  ;;  %v6435_v52 = vadd.f32 %v9196_v55, %v9193_v63  ;;  %v4895_v29 = vmax.f32 %v4863_v56, 0.0  ;;  %v6444_v63 = vadd.f32 %v9221_v43, %v9219_v11  ;;  %v6447_v12 = vadd.f32 %v9233_v17, %v9226_v39 }
 0x36b   : > { %v4823_v37 = vadd.f32 %v4711_v6, %v9740_v48  ;;  %6752 = vmatprep.mubr.bf16.mxu0 %v4921_v3  ;;  %v4732_v16 = vadd.f32 %v6714_v19, %v6432_v18  ;;  %v4864_v31 = vadd.f32 %v9256_v28, %v4825_v58  ;;  %v9295_v60 = vpop.f32.mrf.mxu1  ;;  %v9742_v19 = vld [vmem:[#allocation16_spill] sm:$0xff] }
 0x36c   : > { %v4723_v62 = vpop.f32.mrf.mxu0  ;;  %6753 = vmatmul.mubr.bf16.vlgmr.msra.gmra.mxu0 %v4922_v9  ;;  %v4893_v9 = vmax.f32 %v4861_v27, 0.0 }
 0x36d   : > { %v4724_v54 = vadd.f32 %v6426_v22, %v4723_v62  ;;  %v4862_v10 = vadd.f32 %v9256_v28, %v4823_v37  ;;  %v4828_v35 = vadd.f32 %v4732_v16, %v9072_v14  ;;  %v4896_v18 = vmax.f32 %v4864_v31, 0.0  ;;  %v9303_v55 = vpop.f32.mrf.mxu1 }
 0x36e   : > { %v6715_v61 = vpop.f32.mrf.mxu0 }
 0x36f   : > { %v4826_v13 = vadd.f32 %v4724_v54, %v9741_v5  ;;  %v4894_v24 = vmax.f32 %v4862_v10, 0.0  ;;  %v4735_v45 = vadd.f32 %v6715_v61, %v6435_v52  ;;  %v4924_v6 = vpack.c.bf16 %v4896_v18, %v4895_v29  ;;  %v9308_v2 = vpop.f32.mrf.mxu1 }
 0x370   : > { %v4726_v4 = vpop.f32.mrf.mxu0  ;;  %v4867_v22 = vadd.f32 %v9256_v28, %v4828_v35  ;;  %v6456_v61 = vadd.f32 %v9273_v41, %v9264_v34 }
 0x371   : > { %v4923_v14 = vpack.c.bf16 %v4894_v24, %v4893_v9  ;;  %v4727_v3 = vadd.f32 %v6429_v38, %v4726_v4  ;;  %v4829_v11 = vadd.f32 %v4735_v45, %v9742_v19  ;;  %v6466_v56 = vpop.f32.mrf.mxu1  ;;  %v4865_v37 = vadd.f32 %v9256_v28, %v4826_v13 }
 0x372   : > { %v6718_v43 = vpop.f32.mrf.mxu0  ;;  %v4899_v62 = vmax.f32 %v4867_v22, 0.0  ;;  %v6450_v24 = vadd.f32 %v9242_v57, %v9235_v50 }
 0x373   : > { %6756 = vmatprep.mubr.bf16.mxu0 %v4923_v14  ;;  %v4827_v58 = vadd.f32 %v4727_v3, %v9743_v32  ;;  %v4868_v48 = vadd.f32 %v9256_v28, %v4829_v11  ;;  %v4748_v27 = vadd.f32 %v6718_v43, %v6444_v63  ;;  %v6467_v52 = vpop.f32.mrf.mxu1  ;;  %v4897_v63 = vmax.f32 %v4865_v37, 0.0 }
 0x374   : > { %v4739_v16 = vpop.f32.mrf.mxu0  ;;  %6757 = vmatmul.mubr.bf16.gmra.mxu0 %v4924_v6  ;;  %v6468_v32 = vadd.f32 %v6467_v52, %v6466_v56 }
 0x375   : > { %v4900_v31 = vmax.f32 %v4868_v48, 0.0  ;;  %v4740_v54 = vadd.f32 %v6438_v7, %v4739_v16  ;;  %v4866_v10 = vadd.f32 %v9256_v28, %v4827_v58  ;;  %v4832_v35 = vadd.f32 %v4748_v27, %v9102_v15  ;;  %v6469_v29 = vpop.f32.mrf.mxu1 }
 0x376   : > { %v6719_v38 = vpop.f32.mrf.mxu0  ;;  %v6459_v7 = vadd.f32 %v9282_v23, %v9279_v8 }
 0x377   : > { %v4830_v18 = vadd.f32 %v4740_v54, %v9088_v42  ;;  %v4898_v47 = vmax.f32 %v4866_v10, 0.0  ;;  %v4926_v1 = vpack.c.bf16 %v4900_v31, %v4899_v62  ;;  %v4751_v39 = vadd.f32 %v6719_v38, %v6447_v12  ;;  %v6470_v17 = vpop.f32.mrf.mxu1 }
 0x378   : > { %v4742_v5 = vpop.f32.mrf.mxu0  ;;  %v4871_v15 = vadd.f32 %v9256_v28, %v4832_v35 }
 0x379   : > { %v4925_v13 = vpack.c.bf16 %v4898_v47, %v4897_v63  ;;  %v4743_v9 = vadd.f32 %v6441_v36, %v4742_v5  ;;  %v4833_v4 = vadd.f32 %v4751_v39, %v9106_v49  ;;  %v6472_v34 = vpop.f32.mrf.mxu1  ;;  %v4869_v41 = vadd.f32 %v9256_v28, %v4830_v18 }
 0x37a   : > { %v6722_v45 = vpop.f32.mrf.mxu0  ;;  %v6453_v49 = vadd.f32 %v9258_v30, %v9246_v59  ;;  %v4903_v11 = vmax.f32 %v4871_v15, 0.0  ;;  %v6462_v36 = vadd.f32 %v9295_v60, %v9288_v0  ;;  %v6465_v0 = vadd.f32 %v9308_v2, %v9303_v55 }
 0x37b   : > { %6760 = vmatprep.mubr.bf16.mxu0 %v4925_v13  ;;  %v4831_v42 = vadd.f32 %v4743_v9, %v9094_v46  ;;  %v4764_v6 = vadd.f32 %v6722_v45, %v6456_v61  ;;  %v4872_v3 = vadd.f32 %v9256_v28, %v4833_v4  ;;  %v6473_v50 = vpop.f32.mrf.mxu1  ;;  %v4901_v23 = vmax.f32 %v4869_v41, 0.0  ;;  %v9745_v9 = vld [vmem:[#allocation24_spill] sm:$0xff] }
 0x37c   : > { %v4755_v14 = vpop.f32.mrf.mxu0  ;;  %6761 = vmatmul.mubr.bf16.gmra.mxu0 %v4926_v1  ;;  %v6471_v60 = vadd.f32 %v6470_v17, %v6469_v29  ;;  %v6474_v17 = vadd.f32 %v6473_v50, %v6472_v34 }
 0x37d   : > { %v4756_v57 = vadd.f32 %v6450_v24, %v4755_v14  ;;  %v4870_v22 = vadd.f32 %v9256_v28, %v4831_v42  ;;  %v4836_v19 = vadd.f32 %v4764_v6, %v9133_v51  ;;  %v4904_v43 = vmax.f32 %v4872_v3, 0.0  ;;  %v6475_v58 = vpop.f32.mrf.mxu1  ;;  %v9746_v14 = vld [vmem:[#allocation26_spill] sm:$0xff] }
 0x37e   : > { %v6723_v46 = vpop.f32.mrf.mxu0 }
 0x37f   : > { %v4834_v8 = vadd.f32 %v4756_v57, %v9118_v26  ;;  %v4902_v48 = vmax.f32 %v4870_v22, 0.0  ;;  %v4767_v37 = vadd.f32 %v6723_v46, %v6459_v7  ;;  %v4928_v16 = vpack.c.bf16 %v4904_v43, %v4903_v11  ;;  %v6476_v12 = vpop.f32.mrf.mxu1  ;;  %v9744_v26 = vld [vmem:[#allocation23_spill] sm:$0xff] }
 0x380   : > { %v4758_v27 = vpop.f32.mrf.mxu0  ;;  %v4875_v51 = vadd.f32 %v9256_v28, %v4836_v19  ;;  %v6477_v50 = vadd.f32 %v6476_v12, %v6475_v58 }
 0x381   : > { %v4927_v62 = vpack.c.bf16 %v4902_v48, %v4901_v23  ;;  %v4759_v59 = vadd.f32 %v6453_v49, %v4758_v27  ;;  %v4837_v30 = vadd.f32 %v4767_v37, %v9141_v33  ;;  %v4873_v56 = vadd.f32 %v9256_v28, %v4834_v8  ;;  %v6478_v52 = vpop.f32.mrf.mxu1 }
 0x382   : > { %v6726_v31 = vpop.f32.mrf.mxu0  ;;  %v4907_v18 = vmax.f32 %v4875_v51, 0.0 }
 0x383   : > { %6764 = vmatprep.mubr.bf16.mxu0 %v4927_v62  ;;  %v4835_v54 = vadd.f32 %v4759_v59, %v9744_v26  ;;  %v4876_v10 = vadd.f32 %v9256_v28, %v4837_v30  ;;  %v4780_v38 = vadd.f32 %v6726_v31, %v6468_v32  ;;  %v6479_v61 = vpop.f32.mrf.mxu1  ;;  %v4905_v5 = vmax.f32 %v4873_v56, 0.0 }
 0x384   : > { %v4771_v35 = vpop.f32.mrf.mxu0  ;;  %6765 = vmatmul.mubr.bf16.gmra.mxu0 %v4928_v16  ;;  %v6480_v4 = vadd.f32 %v6479_v61, %v6478_v52 }
 0x385   : > { %v4908_v63 = vmax.f32 %v4876_v10, 0.0  ;;  %v4772_v33 = vadd.f32 %v6462_v36, %v4771_v35  ;;  %v4874_v47 = vadd.f32 %v9256_v28, %v4835_v54  ;;  %v4840_v39 = vadd.f32 %v4780_v38, %v9166_v25  ;;  %v6481_v13 = vpop.f32.mrf.mxu1  ;;  %v9747_v25 = vld [vmem:[#allocation25_spill] sm:$0xff]  ;;  %v9748_v36 = vld [vmem:[#allocation27_spill] sm:$0xff] }
 0x386   : > { %v6727_v1 = vpop.f32.mrf.mxu0  ;;  %v9749_v38 = vld [vmem:[#allocation29_spill] sm:$0xff] }
 0x387   : > { %v4838_v24 = vadd.f32 %v4772_v33, %v9745_v9  ;;  %v4906_v45 = vmax.f32 %v4874_v47, 0.0  ;;  %v4930_v15 = vpack.c.bf16 %v4908_v63, %v4907_v18  ;;  %v4783_v41 = vadd.f32 %v6727_v1, %v6471_v60  ;;  %v6482_v55 = vpop.f32.mrf.mxu1  ;;  %v9750_v60 = vld [vmem:[#allocation28_spill] sm:$0xff] }
 0x388   : > { %v4774_v42 = vpop.f32.mrf.mxu0  ;;  %v4879_v7 = vadd.f32 %v9256_v28, %v4840_v39  ;;  %v6483_v46 = vadd.f32 %v6482_v55, %v6481_v13 }
 0x389   : > { %v4929_v2 = vpack.c.bf16 %v4906_v45, %v4905_v5  ;;  %v4775_v29 = vadd.f32 %v6465_v0, %v4774_v42  ;;  %v4841_v3 = vadd.f32 %v4783_v41, %v9746_v14  ;;  %v6484_v57 = vpop.f32.mrf.mxu1  ;;  %v4877_v49 = vadd.f32 %v9256_v28, %v4838_v24 }
 0x38a   : > { %v6730_v6 = vpop.f32.mrf.mxu0  ;;  %v4911_v37 = vmax.f32 %v4879_v7, 0.0 }
 0x38b   : > { %6768 = vmatprep.mubr.bf16.mxu0 %v4929_v2  ;;  %v4839_v22 = vadd.f32 %v4775_v29, %v9747_v25  ;;  %v4796_v19 = vadd.f32 %v6730_v6, %v6480_v4  ;;  %v4880_v43 = vadd.f32 %v9256_v28, %v4841_v3  ;;  %v6485_v32 = vpop.f32.mrf.mxu1  ;;  %v4909_v59 = vmax.f32 %v4877_v49, 0.0  ;;  %v9751_v2 = vld [vmem:[#allocation21_spill] sm:$0xff]  ;;  %v9752_v49 = vld [vmem:[#allocation22_spill] sm:$0xff] }
 0x38c   : > { %v4787_v11 = vpop.f32.mrf.mxu0  ;;  %6769 = vmatmul.mubr.bf16.gmra.mxu0 %v4930_v15  ;;  %v6486_v12 = vadd.f32 %v6485_v32, %v6484_v57  ;;  %v3977_v29 = vadd.f32 %v9751_v2, %v9229_v20 }
 0x38d   : > { %v4788_v8 = vadd.f32 %v6474_v17, %v4787_v11  ;;  %v4878_v34 = vadd.f32 %v9256_v28, %v4839_v22  ;;  %v4844_v23 = vadd.f32 %v4796_v19, %v9199_v40  ;;  %v4912_v27 = vmax.f32 %v4880_v43, 0.0  ;;  %v6487_v16 = vpop.f32.mrf.mxu1 }
 0x38e   : > { %v6731_v48 = vpop.f32.mrf.mxu0  ;;  %v3980_v19 = vadd.f32 %v9752_v49, %v9238_v53  ;;  %v9377_v53 = vld [vmem:[%s9503_s6] ss:$0 sm:$0xff] }
 0x38f   : > { %v4842_v62 = vadd.f32 %v4788_v8, %v9748_v36  ;;  %v4910_v51 = vmax.f32 %v4878_v34, 0.0  ;;  %v4799_v30 = vadd.f32 %v6731_v48, %v6483_v46  ;;  %v4883_v56 = vadd.f32 %v9256_v28, %v4844_v23  ;;  %v6488_v26 = vpop.f32.mrf.mxu1 }
 0x390   : > { %v4790_v31 = vpop.f32.mrf.mxu0  ;;  %v4932_v52 = vpack.c.bf16 %v4912_v27, %v4911_v37  ;;  %v6489_v47 = vadd.f32 %v6488_v26, %v6487_v16  ;;  %v7126_v27 = vld [vmem:[%s7526_s12 + $0x8] sm:$0xff]  }
 0x391   : > { %v4931_v54 = vpack.c.bf16 %v4910_v51, %v4909_v59  ;;  %v4791_v10 = vadd.f32 %v6477_v50, %v4790_v31  ;;  %v4845_v58 = vadd.f32 %v4799_v30, %v9749_v38  ;;  %v4881_v35 = vadd.f32 %v9256_v28, %v4842_v62  ;;  %v6490_v0 = vpop.f32.mrf.mxu1  ;;  %v7127_v62 = vld [vmem:[%s7526_s12] sm:$0xff]  }
 0x392   : > { %v6734_v40 = vpop.f32.mrf.mxu0  ;;  %v4915_v63 = vmax.f32 %v4883_v56, 0.0  ;;  %v5171_v16 = vunpack.c.l.bf16 %v7126_v27  ;;  %v5172_v51 = vunpack.c.h.bf16 %v7126_v27  ;;  %v5170_v31 = vunpack.c.h.bf16 %v7127_v62 }
 0x393   : > { %6772 = vmatprep.mubr.bf16.mxu0 %v4931_v54  ;;  %v4843_v61 = vadd.f32 %v4791_v10, %v9750_v60  ;;  %v4884_v18 = vadd.f32 %v9256_v28, %v4845_v58  ;;  %v6491_v1 = vpop.f32.mrf.mxu1  ;;  %v4913_v24 = vmax.f32 %v4881_v35, 0.0 }
 0x394   : > { %6773 = vmatmul.mubr.bf16.gmra.mxu0 %v4932_v52  ;;  %v4803_v33 = vpop.f32.mrf.mxu0  ;;  %v6492_v9 = vadd.f32 %v6491_v1, %v6490_v0 }
 0x395   : > { %v4916_v5 = vmax.f32 %v4884_v18, 0.0  ;;  %v4882_v39 = vadd.f32 %v9256_v28, %v4843_v61  ;;  %v4804_v13 = vadd.f32 %v6486_v12, %v4803_v33  ;;  %v6493_v15 = vpop.f32.mrf.mxu1  ;;  %v7128_v12 = vld [vmem:[%s7526_s12 + $0x18] sm:$0xff]  }
 0x396   : > { %v6735_v45 = vpop.f32.mrf.mxu0  ;;  %v4812_v41 = vadd.f32 %v6734_v40, %v6492_v9  ;;  %v5175_v40 = vunpack.c.l.bf16 %v7128_v12 }
 0x397   : > { %v4914_v4 = vmax.f32 %v4882_v39, 0.0  ;;  %v4846_v42 = vadd.f32 %v4804_v13, %v9217_v21  ;;  %v4934_v55 = vpack.c.bf16 %v4916_v5, %v4915_v63  ;;  %v6494_v6 = vpop.f32.mrf.mxu1  ;;  %v7129_v63 = vld [vmem:[%s7526_s12 + $0x10] sm:$0xff]  }
 0x398   : > { %v4806_v17 = vpop.f32.mrf.mxu0  ;;  %v4848_v3 = vadd.f32 %v4812_v41, %v3977_v29  ;;  %v6495_v57 = vadd.f32 %v6494_v6, %v6493_v15  ;;  %v5173_v33 = vunpack.c.l.bf16 %v7129_v63 }
 0x399   : > { %v4933_v7 = vpack.c.bf16 %v4914_v4, %v4913_v24  ;;  %v4807_v14 = vadd.f32 %v6489_v47, %v4806_v17  ;;  %v4885_v25 = vadd.f32 %v9256_v28, %v4846_v42  ;;  %v5176_v47 = vunpack.c.h.bf16 %v7128_v12  ;;  %v7130_v17 = vld [vmem:[%s7526_s12 + $0x28] sm:$0xff]  }
 0x39a   : > { %v4815_v21 = vadd.f32 %v6735_v45, %v6495_v57  ;;  %v4887_v20 = vadd.f32 %v9256_v28, %v4848_v3  ;;  %v5174_v4 = vunpack.c.h.bf16 %v7129_v63  ;;  %v5179_v6 = vunpack.c.l.bf16 %v7130_v17 }
 0x39b   : > { %6776 = vmatprep.mubr.bf16.mxu0 %v4933_v7  ;;  %v4847_v22 = vadd.f32 %v4807_v14, %v9224_v44  ;;  %v4917_v43 = vmax.f32 %v4885_v25, 0.0 }
 0x39c   : > { %6777 = vmatmul.mubr.bf16.gmra.mxu0 %v4934_v55  ;;  %v4849_v11 = vadd.f32 %v4815_v21, %v3980_v19  ;;  %v4919_v50 = vmax.f32 %v4887_v20, 0.0  ;;  %v5180_v19 = vunpack.c.h.bf16 %v7130_v17 }
 0x39d   : > { %v4886_v46 = vadd.f32 %v9256_v28, %v4847_v22  ;;  %v7131_v22 = vld [vmem:[%s7526_s12 + $0x20] sm:$0xff]  }
 0x39e   : > { %v4888_v8 = vadd.f32 %v9256_v28, %v4849_v11  ;;  %v5169_v28 = vunpack.c.l.bf16 %v7127_v62  ;;  %v5177_v49 = vunpack.c.l.bf16 %v7131_v22 }
 0x39f   : > { %v4918_v32 = vmax.f32 %v4886_v46, 0.0 }
 0x3a0   : > { %v4920_v23 = vmax.f32 %v4888_v8, 0.0 }
 0x3a1   : > { %v4935_v34 = vpack.c.bf16 %v4918_v32, %v4917_v43 }
 0x3a2   : > { %v4936_v44 = vpack.c.bf16 %v4920_v23, %v4919_v50  ;;  %v5178_v50 = vunpack.c.h.bf16 %v7131_v22 }
 0x3a3   : > { %6780 = vmatprep.mubr.bf16.mxu0 %v4935_v34 }
 0x3a4   : > { %6781 = vmatmul.mubr.bf16.gmra.mxu0 %v4936_v44 }
 0x42c   : > { %v6754_v48 = vpop.f32.mrf.mxu0 }
 0x42d   : > { %v5051_v37 = vadd.f32 %v6754_v48, %v9377_v53 }
 0x42e   : > { %v5042_v36 = vpop.f32.mrf.mxu0 }
 0x42f   : > { %v5043_v59 = vadd.f32 %v9377_v53, %v5042_v36  ;;  %v5203_v56 = vadd.f32 %v5171_v16, %v5051_v37  ;;  %v7132_v16 = vld [vmem:[%s7526_s12 + $0x38] sm:$0xff]  }
 0x430   : > { %v6755_v30 = vpop.f32.mrf.mxu0  ;;  %v5183_v36 = vunpack.c.l.bf16 %v7132_v16 }
 0x431   : > { %v5054_v52 = vadd.f32 %v6755_v30, %v9377_v53  ;;  %v5201_v54 = vadd.f32 %v5169_v28, %v5043_v59  ;;  %v5235_v35 = vmax.f32 %v5203_v56, 0.0 }
 0x432   : > { %v5045_v26 = vpop.f32.mrf.mxu0 }
 0x433   : > { %v5204_v10 = vadd.f32 %v5172_v51, %v5054_v52  ;;  %v5046_v38 = vadd.f32 %v9377_v53, %v5045_v26  ;;  %v5233_v1 = vmax.f32 %v5201_v54, 0.0  ;;  %v5184_v52 = vunpack.c.h.bf16 %v7132_v16 }
 0x434   : > { %v6758_v58 = vpop.f32.mrf.mxu0 }
 0x435   : > { %v5236_v0 = vmax.f32 %v5204_v10, 0.0  ;;  %v5202_v60 = vadd.f32 %v5170_v31, %v5046_v38  ;;  %v5067_v61 = vadd.f32 %v6758_v58, %v9377_v53  ;;  %v7133_v31 = vld [vmem:[%s7526_s12 + $0x30] sm:$0xff]  }
 0x436   : > { %v5058_v18 = vpop.f32.mrf.mxu0  ;;  %v5181_v56 = vunpack.c.l.bf16 %v7133_v31 }
 0x437   : > { %v6001_v5 = vpack.c.bf16 %v5236_v0, %v5235_v35  ;;  %v5234_v39 = vmax.f32 %v5202_v60, 0.0  ;;  %v5059_v13 = vadd.f32 %v9377_v53, %v5058_v18  ;;  %v5207_v45 = vadd.f32 %v5175_v40, %v5067_v61 }
 0x438   : > { %v6759_v9 = vpop.f32.mrf.mxu0  ;;  %v5182_v0 = vunpack.c.h.bf16 %v7133_v31 }
 0x439   : > { %6073 = vst [vmem:[%s9391_s22 + $0x8] sm:$0xff] %v6001_v5   ;;  %v5996_v24 = vpack.c.bf16 %v5234_v39, %v5233_v1  ;;  %v5070_v15 = vadd.f32 %v6759_v9, %v9377_v53  ;;  %v5205_v41 = vadd.f32 %v5173_v33, %v5059_v13  ;;  %v5239_v7 = vmax.f32 %v5207_v45, 0.0 }
 0x43a   : > { %v5061_v42 = vpop.f32.mrf.mxu0 }
 0x43b   : > { %5997 = vst [vmem:[%s9391_s22] sm:$0xff] %v5996_v24   ;;  %v5208_v55 = vadd.f32 %v5176_v47, %v5070_v15  ;;  %v5062_v2 = vadd.f32 %v9377_v53, %v5061_v42  ;;  %v5237_v21 = vmax.f32 %v5205_v41, 0.0  ;;  %v7134_v47 = vld [vmem:[%s7526_s12 + $0x48] sm:$0xff]   ;;  %v7135_v24 = vld [vmem:[%s7526_s12 + $0x40] sm:$0xff]  }
 0x43c   : > { %v6762_v29 = vpop.f32.mrf.mxu0  ;;  %v5187_v1 = vunpack.c.l.bf16 %v7134_v47  ;;  %v5185_v45 = vunpack.c.l.bf16 %v7135_v24  ;;  %v5186_v17 = vunpack.c.h.bf16 %v7135_v24 }
 0x43d   : > { %v5240_v14 = vmax.f32 %v5208_v55, 0.0  ;;  %v5206_v3 = vadd.f32 %v5174_v4, %v5062_v2  ;;  %v5083_v57 = vadd.f32 %v6762_v29, %v9377_v53  ;;  %v5188_v4 = vunpack.c.h.bf16 %v7134_v47 }
 0x43e   : > { %v5074_v25 = vpop.f32.mrf.mxu0 }
 0x43f   : > { %v6011_v46 = vpack.c.bf16 %v5240_v14, %v5239_v7  ;;  %v5238_v20 = vmax.f32 %v5206_v3, 0.0  ;;  %v5075_v11 = vadd.f32 %v9377_v53, %v5074_v25  ;;  %v5211_v8 = vadd.f32 %v5179_v6, %v5083_v57 }
 0x440   : > { %v6763_v43 = vpop.f32.mrf.mxu0 }
 0x441   : > { %6075 = vst [vmem:[%s9391_s22 + $0x18] sm:$0xff] %v6011_v46   ;;  %v6006_v32 = vpack.c.bf16 %v5238_v20, %v5237_v21  ;;  %v5086_v34 = vadd.f32 %v6763_v43, %v9377_v53  ;;  %v5209_v44 = vadd.f32 %v5177_v49, %v5075_v11  ;;  %v5243_v62 = vmax.f32 %v5211_v8, 0.0  ;;  %v7137_v8 = vld [vmem:[%s7526_s12 + $0x50] sm:$0xff]  }
 0x442   : > { %v5077_v23 = vpop.f32.mrf.mxu0 }
 0x443   : > { %6074 = vst [vmem:[%s9391_s22 + $0x10] sm:$0xff] %v6006_v32   ;;  %v5212_v48 = vadd.f32 %v5180_v19, %v5086_v34  ;;  %v5078_v37 = vadd.f32 %v9377_v53, %v5077_v23  ;;  %v5241_v26 = vmax.f32 %v5209_v44, 0.0  ;;  %v7136_v19 = vld [vmem:[%s7526_s12 + $0x58] sm:$0xff]   ;;  %v5189_v34 = vunpack.c.l.bf16 %v7137_v8 }
 0x444   : > { %v6766_v27 = vpop.f32.mrf.mxu0  ;;  %v5191_v21 = vunpack.c.l.bf16 %v7136_v19 }
 0x445   : > { %v5244_v28 = vmax.f32 %v5212_v48, 0.0  ;;  %v5210_v59 = vadd.f32 %v5178_v50, %v5078_v37  ;;  %v5099_v51 = vadd.f32 %v6766_v27, %v9377_v53  ;;  %v5192_v50 = vunpack.c.h.bf16 %v7136_v19 }
 0x446   : > { %v5090_v30 = vpop.f32.mrf.mxu0 }
 0x447   : > { %v6021_v54 = vpack.c.bf16 %v5244_v28, %v5243_v62  ;;  %v5242_v10 = vmax.f32 %v5210_v59, 0.0  ;;  %v5091_v38 = vadd.f32 %v9377_v53, %v5090_v30  ;;  %v5215_v40 = vadd.f32 %v5183_v36, %v5099_v51 }
 0x448   : > { %v6767_v58 = vpop.f32.mrf.mxu0  ;;  %v5190_v28 = vunpack.c.h.bf16 %v7137_v8 }
 0x449   : > { %6077 = vst [vmem:[%s9391_s22 + $0x28] sm:$0xff] %v6021_v54   ;;  %v6016_v12 = vpack.c.bf16 %v5242_v10, %v5241_v26  ;;  %v5102_v35 = vadd.f32 %v6767_v58, %v9377_v53  ;;  %v5213_v61 = vadd.f32 %v5181_v56, %v5091_v38  ;;  %v5247_v5 = vmax.f32 %v5215_v40, 0.0  ;;  %v7139_v40 = vld [vmem:[%s7526_s12 + $0x60] sm:$0xff]  }
 0x44a   : > { %v5093_v60 = vpop.f32.mrf.mxu0 }
 0x44b   : > { %6076 = vst [vmem:[%s9391_s22 + $0x20] sm:$0xff] %v6016_v12   ;;  %v5216_v18 = vadd.f32 %v5184_v52, %v5102_v35  ;;  %v5094_v63 = vadd.f32 %v9377_v53, %v5093_v60  ;;  %v5245_v42 = vmax.f32 %v5213_v61, 0.0  ;;  %v7138_v52 = vld [vmem:[%s7526_s12 + $0x68] sm:$0xff]   ;;  %v5193_v35 = vunpack.c.l.bf16 %v7139_v40 }
 0x44c   : > { %v6770_v33 = vpop.f32.mrf.mxu0  ;;  %v5195_v26 = vunpack.c.l.bf16 %v7138_v52 }
 0x44d   : > { %v5248_v39 = vmax.f32 %v5216_v18, 0.0  ;;  %v5214_v13 = vadd.f32 %v5182_v0, %v5094_v63  ;;  %v5115_v9 = vadd.f32 %v6770_v33, %v9377_v53  ;;  %v5196_v0 = vunpack.c.h.bf16 %v7138_v52 }
 0x44e   : > { %v5106_v15 = vpop.f32.mrf.mxu0 }
 0x44f   : > { %v6031_v41 = vpack.c.bf16 %v5248_v39, %v5247_v5  ;;  %v5246_v55 = vmax.f32 %v5214_v13, 0.0  ;;  %v5107_v2 = vadd.f32 %v9377_v53, %v5106_v15  ;;  %v5219_v7 = vadd.f32 %v5187_v1, %v5115_v9 }
 0x450   : > { %v6771_v29 = vpop.f32.mrf.mxu0  ;;  %v5194_v39 = vunpack.c.h.bf16 %v7139_v40 }
 0x451   : > { %6079 = vst [vmem:[%s9391_s22 + $0x38] sm:$0xff] %v6031_v41   ;;  %v6026_v6 = vpack.c.bf16 %v5246_v55, %v5245_v42  ;;  %v5118_v14 = vadd.f32 %v6771_v29, %v9377_v53  ;;  %v5217_v57 = vadd.f32 %v5185_v45, %v5107_v2  ;;  %v5251_v46 = vmax.f32 %v5219_v7, 0.0  ;;  %v7140_v55 = vld [vmem:[%s7526_s12 + $0x78] sm:$0xff]  }
 0x452   : > { %v5109_v3 = vpop.f32.mrf.mxu0  ;;  %v5199_v2 = vunpack.c.l.bf16 %v7140_v55 }
 0x453   : > { %6078 = vst [vmem:[%s9391_s22 + $0x30] sm:$0xff] %v6026_v6   ;;  %v5220_v25 = vadd.f32 %v5188_v4, %v5118_v14  ;;  %v5110_v22 = vadd.f32 %v9377_v53, %v5109_v3  ;;  %v5249_v23 = vmax.f32 %v5217_v57, 0.0 }
 0x454   : > { %v6774_v49 = vpop.f32.mrf.mxu0 }
 0x455   : > { %v5252_v20 = vmax.f32 %v5220_v25, 0.0  ;;  %v5218_v11 = vadd.f32 %v5186_v17, %v5110_v22  ;;  %v5131_v43 = vadd.f32 %v6774_v49, %v9377_v53  ;;  %v7141_v25 = vld [vmem:[%s7526_s12 + $0x70] sm:$0xff]   ;;  %v5200_v49 = vunpack.c.h.bf16 %v7140_v55  ;;  %s9450_s12 = scalar_lea.hbm %s9504_s7, %s5992_s18 }
 0x456   : > { %v5122_v32 = vpop.f32.mrf.mxu0  ;;  %v5197_v22 = vunpack.c.l.bf16 %v7141_v25 }
 0x457   : > { %v6041_v44 = vpack.c.bf16 %v5252_v20, %v5251_v46  ;;  %v5250_v48 = vmax.f32 %v5218_v11, 0.0  ;;  %v5123_v37 = vadd.f32 %v9377_v53, %v5122_v32  ;;  %v5223_v36 = vadd.f32 %v5191_v21, %v5131_v43 }
 0x458   : > { %v6775_v27 = vpop.f32.mrf.mxu0  ;;  %v5198_v20 = vunpack.c.h.bf16 %v7141_v25 }
 0x459   : > { %6081 = vst [vmem:[%s9391_s22 + $0x48] sm:$0xff] %v6041_v44   ;;  %v6036_v16 = vpack.c.bf16 %v5250_v48, %v5249_v23  ;;  %v5134_v62 = vadd.f32 %v6775_v27, %v9377_v53  ;;  %v5221_v51 = vadd.f32 %v5189_v34, %v5123_v37  ;;  %v5255_v54 = vmax.f32 %v5223_v36, 0.0 }
 0x45a   : > { %v5125_v59 = vpop.f32.mrf.mxu0 }
 0x45b   : > { %6080 = vst [vmem:[%s9391_s22 + $0x40] sm:$0xff] %v6036_v16   ;;  %v5224_v30 = vadd.f32 %v5192_v50, %v5134_v62  ;;  %v5126_v31 = vadd.f32 %v9377_v53, %v5125_v59  ;;  %v5253_v60 = vmax.f32 %v5221_v51, 0.0 }
 0x45c   : > { %v6778_v56 = vpop.f32.mrf.mxu0 }
 0x45d   : > { %v5256_v10 = vmax.f32 %v5224_v30, 0.0  ;;  %v5222_v38 = vadd.f32 %v5190_v28, %v5126_v31  ;;  %v5147_v58 = vadd.f32 %v6778_v56, %v9377_v53 }
 0x45e   : > { %v5138_v12 = vpop.f32.mrf.mxu0 }
 0x45f   : > { %v6051_v61 = vpack.c.bf16 %v5256_v10, %v5255_v54  ;;  %v5254_v18 = vmax.f32 %v5222_v38, 0.0  ;;  %v5139_v63 = vadd.f32 %v9377_v53, %v5138_v12  ;;  %v5227_v1 = vadd.f32 %v5195_v26, %v5147_v58 }
 0x460   : > { %v6779_v33 = vpop.f32.mrf.mxu0 }
 0x461   : > { %6083 = vst [vmem:[%s9391_s22 + $0x58] sm:$0xff] %v6051_v61   ;;  %v6046_v47 = vpack.c.bf16 %v5254_v18, %v5253_v60  ;;  %v5150_v5 = vadd.f32 %v6779_v33, %v9377_v53  ;;  %v5225_v9 = vadd.f32 %v5193_v35, %v5139_v63  ;;  %v5259_v15 = vmax.f32 %v5227_v1, 0.0 }
 0x462   : > { %v5141_v13 = vpop.f32.mrf.mxu0 }
 0x463   : > { %6082 = vst [vmem:[%s9391_s22 + $0x50] sm:$0xff] %v6046_v47   ;;  %v5228_v24 = vadd.f32 %v5196_v0, %v5150_v5  ;;  %v5142_v45 = vadd.f32 %v9377_v53, %v5141_v13  ;;  %v5257_v29 = vmax.f32 %v5225_v9, 0.0 }
 0x464   : > { %v6782_v41 = vpop.f32.mrf.mxu0 }
 0x465   : > { %v5260_v4 = vmax.f32 %v5228_v24, 0.0  ;;  %v5226_v42 = vadd.f32 %v5194_v39, %v5142_v45  ;;  %v5163_v7 = vadd.f32 %v6782_v41, %v9377_v53 }
 0x466   : > { %v5154_v14 = vpop.f32.mrf.mxu0 }
 0x467   : > { %v6061_v17 = vpack.c.bf16 %v5260_v4, %v5259_v15  ;;  %v5258_v6 = vmax.f32 %v5226_v42, 0.0  ;;  %v5155_v57 = vadd.f32 %v9377_v53, %v5154_v14  ;;  %v5231_v21 = vadd.f32 %v5199_v2, %v5163_v7 }
 0x468   : > { %v6783_v19 = vpop.f32.mrf.mxu0 }
 0x469   : > { %6085 = vst [vmem:[%s9391_s22 + $0x68] sm:$0xff] %v6061_v17   ;;  %v6056_v3 = vpack.c.bf16 %v5258_v6, %v5257_v29  ;;  %v5166_v46 = vadd.f32 %v6783_v19, %v9377_v53  ;;  %v5229_v43 = vadd.f32 %v5197_v22, %v5155_v57  ;;  %v5263_v34 = vmax.f32 %v5231_v21, 0.0 }
 0x46a   : > { %v5157_v11 = vpop.f32.mrf.mxu0 }
 0x46b   : > { %6084 = vst [vmem:[%s9391_s22 + $0x60] sm:$0xff] %v6056_v3   ;;  %v5232_v32 = vadd.f32 %v5200_v49, %v5166_v46  ;;  %v5158_v8 = vadd.f32 %v9377_v53, %v5157_v11  ;;  %v5261_v44 = vmax.f32 %v5229_v43, 0.0 }
 0x46d   : > { %v5264_v50 = vmax.f32 %v5232_v32, 0.0  ;;  %v5230_v23 = vadd.f32 %v5198_v20, %v5158_v8 }
 0x46f   : > { %v6071_v48 = vpack.c.bf16 %v5264_v50, %v5263_v34  ;;  %v5262_v37 = vmax.f32 %v5230_v23, 0.0 }
 0x471   : > { %6087 = vst [vmem:[%s9391_s22 + $0x78] sm:$0xff] %v6071_v48   ;;  %v6066_v53 = vpack.c.bf16 %v5262_v37, %v5261_v44 }
 0x473   : > { %6086 = vst [vmem:[%s9391_s22 + $0x70] sm:$0xff] %v6066_v53  }
 0x474   : > { %7261 = shalt.err (!%p7258_p10)
}
 0x475   : > { %s7262_s15 = scalar_lea.hbm %s9450_s12, 2048  ;;  %s7266_s21 = scalar_lea.hbm %s9504_s7, 4096 }
 0x476   : > { %p7263_p6 = scmp.ne.s32.totalorder %s9450_s12, %s7262_s15  ;;  %p7267_p3 = scmp.lt.s32.totalorder %s9450_s12, %s9504_s7 }
 0x477   : > { %p7268_p11 = scmp.lt.s32.totalorder %s7266_s21, %s7262_s15 }
 0x478   : > { %p7264_p4 = pnand %p7263_p6, %p9753_p1 }
 0x479   : > { %p7269_p5 = por %p7268_p11, %p7267_p3 }
 0x47a   : > { %p7265_p8 = pneg %p7264_p4 }
 0x47c   : > { %p7270_p7 = pnand %p7269_p5, %p7265_p8 }
 0x47e   : > { %7273 = shalt.err (!%p7270_p7)
}
 0x47f   : > { %s7331_s1 = smov 64   ;;  %s7332_s16 = smov 4  }
 0x480   : > { %6814 = dma.vmem_to_hbm [thread:$0]  (%p9753_p1), %s9452_s23, 2048, %s9450_s12, %s5426_s30, %s7331_s1, %s7331_s1, %s7332_s16  }
 0x481 PF: > { %s5454_s9 = sand.u32 1, %s7308_s24   ;;  %p9754_p12 = scmp.ne.s32.totalorder %s9529_s8, 0 }
 0x482   : > { %p9755_p9 = scmp.ge.s32.totalorder %s7320_s27, 2  ;;  %s5455_s28 = scalar_lea.sflag [#allocation5], %s5454_s9 }
 0x484   : > { %p6831_p13 = pnand %p9755_p9, %p9754_p12 }
 0x486   : > { %p6832_p0 = pneg %p6831_p13 }
 0x488   : > { %7303 = dma.done.wait (%p6832_p0), %s5455_s28, 2048  }
 0x489   : > { %7305 = vsyncadd (%p6832_p0), %s5455_s28, 4294965248  ;;  %p22_p2 = scmp.ge.s32.totalorder %s7462_s14, 4   ;;  %s9756_s24 = smov %s7312_s25 }
 0x48a   : > { %s9757_s25 = smov %s7316_s26  ;;  %s9758_s26 = smov %s7472_s17 }
 0x48b   : > { %s9759_s27 = smov %s7462_s14  ;;  %24 = sbr.rel (!%p22_p2) target bundleno = 9 (0x9), region = 107 }
 0x490   :  { %5460 = vsyncpa [#allocation4], 1 }
 0x491   :  { %5462 = vsyncpa [#allocation4 + $0x1], 1 }
 0x492   :  { %5463 = vsyncpa [#allocation7], 1 }
 0x493   :  { %5464 = vsyncpa [#allocation10], 1 }
 0x494   :  { %5465 = vsyncpa [#allocation5], 1 }
 0x495   :  { %5467 = vsyncpa [#allocation5 + $0x1], 1 }

// kernel: tpu_custom_call.1
= control target key start
LH: loop header
LB: loop body
LE: loop exit
PB: predicated region body
PF: predicated region fallthrough
CT: control target
= control target key end

     0   :  { %s9497_s0 = inlined_call_operand.hbm [shape: bf16[2,256,128], index: 0, kind: input, shape index: {}]   ;;  %s9498_s1 = inlined_call_operand.hbm [shape: bf16[128,128], index: 1, kind: input, shape index: {}]   ;;  %s9499_s2 = inlined_call_operand.vmem [shape: f32[1,128], index: 2, kind: input, shape index: {}]   ;;  %s9500_s3 = inlined_call_operand.hbm [shape: bf16[3,384,128], index: 3, kind: input, shape index: {}]   ;;  %s9501_s4 = inlined_call_operand.vmem [shape: f32[1,128], index: 4, kind: input, shape index: {}]   ;;  %s9502_s5 = inlined_call_operand.hbm [shape: bf16[128,128], index: 5, kind: input, shape index: {}]   ;;  %s9503_s6 = inlined_call_operand.vmem [shape: f32[1,128], index: 6, kind: input, shape index: {}]   ;;  %s9504_s7 = inlined_call_operand.hbm [shape: bf16[2,256,128], index: 7, kind: output, shape index: {}]  }
   0x1   :  { %9527 = sst [smem:[#allocation30_spill]] %s9498_s1 }
   0x2   :  { %12 = vsyncpa [#allocation4], 0 }
   0x3   :  { %14 = vsyncpa [#allocation4 + $0x1], 0 }
   0x4   :  { %15 = vsyncpa [#allocation7], 0 }
   0x5   :  { %16 = vsyncpa [#allocation10], 0 }
   0x6   :  { %17 = vsyncpa [#allocation5], 0 }
   0x7   :  { %19 = vsyncpa [#allocation5 + $0x1], 0  ;;  %s7373_s24 = smov 0   ;;  %s7375_s25 = smov 0  }
   0x8   :  { %s7377_s26 = smov 0   ;;  %s7379_s27 = smov 0  }
   0x9 LB: > { %s7394_s28 = sadd.s32 4294967295, %s7320_s27   ;;  %s5541_s29 = sadd.s32 4294967294, %s7320_s27   ;;  %s7320_s27 = sphi %s7379_s27, %s9759_s27   ;;  %s7316_s26 = sphi %s7377_s26, %s9758_s26   ;;  %s7312_s25 = sphi %s7375_s25, %s9757_s25   ;;  %s7308_s24 = sphi %s7373_s24, %s9756_s24  }
   0xa   : > { %p45_p0 = scmp.ne.s32.totalorder %s7312_s25, %s7308_s24  ;;  %p9505_p1 = scmp.eq.s32.totalorder %s7394_s28, 0 }
   0xb   : > { %p195_p2 = scmp.eq.s32.totalorder %s7394_s28, 1  ;;  %p201_p3 = scmp.eq.s32.totalorder %s5541_s29, 1 }
   0xc   : > { %p7403_p4 = por %p9505_p1, %p45_p0  ;;  %p5542_p5 = scmp.ge.s32.totalorder %s7320_s27, 1 }
   0xd   : > { %p7408_p6 = por %p201_p3, %p45_p0  ;;  %p208_p7 = scmp.lt.s32.totalorder %s7320_s27, 3 }
   0xe   : > { %s9528_s30 = scalar_select %p7403_p4, 1, 0 }
   0xf   : > { %s9529_s8 = scalar_select %p7408_p6, 1, 0 }
  0x10   : > { %p7413_p8 = pnand %p5542_p5, %p208_p7  ;;  %s7322_s10 = smov [#allocation6]  }
  0x11   : > { %s220_s11 = sshll.u32 %s7322_s10, 4  ;;  %s7323_s13 = smov [#allocation8]   ;;  %s221_s11 = int_to_ptr.vmem [resolvable:$true] %s220_s11 }
  0x12   : > { %s9530_s9 = scalar_select %p7413_p8, 1, 0 }
  0x13   : > { %p6816_p9 = pneg %p7413_p8  ;;  %s236_s14 = sshll.u32 %s7323_s13, 4  ;;  %s237_s14 = int_to_ptr.vmem [resolvable:$true] %s236_s14 }
  0x14   : > { %s7324_s15 = smov [#allocation9]   ;;  %s7153_s17 = scalar_lea.vmem %s221_s11, 1024 }
  0x15   : > { %p7422_p11 = pnand %p6816_p9, %p9505_p1  ;;  %s252_s16 = sshll.u32 %s7324_s15, 4  ;;  %s253_s16 = int_to_ptr.vmem [resolvable:$true] %s252_s16 }
  0x16   : > { %p7154_p13 = scmp.ne.s32.totalorder %s221_s11, %s7153_s17  ;;  %p7161_p5 = scmp.lt.s32.totalorder %s221_s11, %s221_s11 }
  0x17   : > { %p7144_p12 = pneg %p7422_p11  ;;  %p7162_p7 = scmp.lt.s32.totalorder %s7153_s17, %s7153_s17 }
  0x19   : > { %p7156_p0 = pnand %p7154_p13, %p7144_p12  ;;  %p7163_p9 = por %p7162_p7, %p7161_p5 }
  0x1b   : > { %p7157_p3 = pneg %p7156_p0 }
  0x1d   : > { %p7164_p10 = pnand %p7163_p9, %p7157_p3 }
  0x1f   : > { %7167 = shalt.err (!%p7164_p10)
}
  0x20   : > { %s9506_s18 = smov 64   ;;  %s9507_s19 = smov 4  }
  0x21   : > { %s9532_s1 = sld [smem:[#allocation30_spill]]  ;;  %s7179_s22 = scalar_lea.vmem %s237_s14, 9216 }
  0x22   : > { %p7180_p13 = scmp.ne.s32.totalorder %s237_s14, %s7179_s22  ;;  %p7187_p3 = scmp.lt.s32.totalorder %s237_s14, %s237_s14 }
  0x23   : > { %p7188_p10 = scmp.lt.s32.totalorder %s7179_s22, %s7179_s22 }
  0x24   : > { %p7182_p0 = pnand %p7180_p13, %p7144_p12 }
  0x25   : > { %p7189_p7 = por %p7188_p10, %p7187_p3 }
  0x26   : > { %p7183_p5 = pneg %p7182_p0 }
  0x27   : > { %6819 = dma.hbm_to_vmem [thread:$0]  (!%p7422_p11), %s9532_s1, 1024, %s221_s11, [#allocation7], %s9506_s18, %s9506_s18, %s9507_s19  }
  0x28   : > { %p7190_p9 = pnand %p7189_p7, %p7183_p5 }
  0x2a   : > { %7193 = shalt.err (!%p7190_p9)
}
  0x2b   : > { %6822 = dma.hbm_to_vmem [thread:$0]  (!%p7422_p11), %s9500_s3, 9216, %s237_s14, [#allocation7], %s9506_s18, %s9506_s18, %s9507_s19  }
  0x2c   : > { %s7205_s10 = scalar_lea.vmem %s253_s16, 1024  ;;  %p7213_p3 = scmp.lt.s32.totalorder %s253_s16, %s253_s16 }
  0x2d   : > { %p7206_p1 = scmp.ne.s32.totalorder %s253_s16, %s7205_s10  ;;  %p7214_p5 = scmp.lt.s32.totalorder %s7205_s10, %s7205_s10 }
  0x2f   : > { %p7208_p13 = pnand %p7206_p1, %p7144_p12  ;;  %p7215_p10 = por %p7214_p5, %p7213_p3 }
  0x31   : > { %p7209_p0 = pneg %p7208_p13 }
  0x33   : > { %p7216_p7 = pnand %p7215_p10, %p7209_p0 }
  0x35   : > { %7219 = shalt.err (!%p7216_p7)
}
  0x36   : > { %6825 = dma.hbm_to_vmem [thread:$0]  (!%p7422_p11), %s9502_s5, 1024, %s253_s16, [#allocation10], %s9506_s18, %s9506_s18, %s9507_s19  }
  0x37   : > { %s7462_s14 = sadd.s32 1, %s7320_s27   ;;  %s32_s15 = sadd.s32 1, %s7316_s26 }
  0x38   : > { %s29_s12 = ssub.s32 %s7320_s27, %s7462_s14  ;;  %p39_p12 = scmp.ne.s32.totalorder %s7316_s26, %s7312_s25 }
  0x39   : > { %p30_p1 = scmp.eq.s32.totalorder %s29_s12, 0  ;;  %p40_p9 = scmp.eq.s32.totalorder %s7320_s27, 0 }
  0x3a   : > { %p6837_p13 = scmp.lt.s32.totalorder %s7320_s27, 2  ;;  %p7476_p3 = por %p195_p2, %p39_p12 }
  0x3b   : > { %s7472_s17 = scalar_select %p30_p1, %s7316_s26, %s32_s15  }
  0x3c   : > { %p41_p0 = por %p40_p9, %p39_p12  ;;  %s269_s21 = sand.u32 1, %s7316_s26  }
  0x3d   : > { %s9533_s20 = scalar_select %p7476_p3, 1, 0 }
  0x3e   : > { %s5927_s22 = sshll.u32 %s7320_s27, 11  ;;  %s5547_s16 = sshll.u32 %s269_s21, 7 }
  0x3f   : > { %s7485_s10 = scalar_lea.hbm %s9497_s0, %s5927_s22  ;;  %s273_s11 = scalar_lea.vmem [#allocation3], %s5547_s16 }
  0x40   : > { %s280_s13 = sshll.u32 %s273_s11, 4  ;;  %p7487_p11 = pnand %p6837_p13, %p41_p0  ;;  %s7491_s13 = int_to_ptr.vmem [resolvable:$true] %s280_s13 }
  0x41   : > { %s7493_s15 = scalar_lea.sflag [#allocation4], %s269_s21  ;;  %s7220_s18 = scalar_lea.hbm %s7485_s10, 2048 }
  0x42   : > { %p7221_p2 = scmp.ne.s32.totalorder %s7485_s10, %s7220_s18  ;;  %p7222_p5 = pneg %p7487_p11 }
  0x43   : > { %s7225_s16 = scalar_lea.hbm %s9497_s0, 4096  ;;  %p7226_p1 = scmp.lt.s32.totalorder %s7485_s10, %s9497_s0 }
  0x44   : > { %p7223_p10 = pnand %p7222_p5, %p7221_p2  ;;  %p7227_p12 = scmp.lt.s32.totalorder %s7225_s16, %s7220_s18 }
  0x46   : > { %p7224_p7 = pneg %p7223_p10  ;;  %p7228_p9 = por %p7227_p12, %p7226_p1 }
  0x48   : > { %p7229_p13 = pnand %p7228_p9, %p7224_p7 }
  0x4a   : > { %7232 = shalt.err (!%p7229_p13)
}
  0x4b   : > { %s7233_s21 = scalar_lea.vmem %s7491_s13, 2048  ;;  %s7327_s19 = smov [#allocation3]  }
  0x4c   : > { %p7234_p0 = scmp.ne.s32.totalorder %s7491_s13, %s7233_s21  ;;  %s7238_s1 = sshll.u32 %s7327_s19, 4  ;;  %s7239_s1 = int_to_ptr.vmem [resolvable:$false] %s7238_s1 }
  0x4d   : > { %s7240_s22 = scalar_lea.vmem %s7239_s1, 4096  ;;  %p7241_p10 = scmp.lt.s32.totalorder %s7491_s13, %s7239_s1 }
  0x4e   : > { %p7236_p6 = pnand %p7234_p0, %p7222_p5  ;;  %p7242_p3 = scmp.lt.s32.totalorder %s7240_s22, %s7233_s21 }
  0x50   : > { %p7237_p2 = pneg %p7236_p6  ;;  %p7243_p4 = por %p7242_p3, %p7241_p10 }
  0x52   : > { %p7244_p8 = pnand %p7243_p4, %p7237_p2 }
  0x54   : > { %7247 = shalt.err (!%p7244_p8)
}
  0x55   : > { %s9535_s18 = smov 4   ;;  %s9536_s23 = smov 64  }
  0x56   : > { %6829 = dma.hbm_to_vmem [thread:$0]  (!%p7487_p11), %s7485_s10, 2048, %s7491_s13, %s7493_s15, %s9536_s23, %s9536_s23, %s9535_s18  }
  0x57   : > { %p9537_p6 = scmp.ne.s32.totalorder %s9530_s9, 0 }
  0x59   : > { %292 = sbr.rel (%p9537_p6) target bundleno = 1153 (0x481), region = 48 }
  0x5e   : > { %s7520_s19 = sand.u32 1, %s7312_s25   ;;  %p9538_p4 = scmp.ne.s32.totalorder %s9528_s30, 0 }
  0x5f   : > { %s5551_s1 = sshll.u32 %s7520_s19, 7  ;;  %s295_s16 = scalar_lea.sflag [#allocation4], %s7520_s19 }
  0x60   : > { %s7526_s12 = scalar_lea.vmem [#allocation3], %s5551_s1 }
  0x61   : > { %7291 = dma.done.wait (%p9538_p4), %s295_s16, 2048  }
  0x62   : > { %7293 = vsyncadd (%p9538_p4), %s295_s16, 4294965248  ;;  %p9539_p8 = scmp.eq.s32.totalorder %s7394_s28, 0 }
  0x64   : > { %7295 = dma.done.wait (%p9539_p8), [#allocation7], 10240   ;;  %p9540_p3 = pmov %p9539_p8 }
  0x66   : > { %7297 = vsyncadd (%p9540_p3), [#allocation7], 4294957056  ;;  %p9541_p11 = pmov %p9540_p3 }
  0x67   : > { %p9542_p5 = pmov %p9540_p3 }
  0x68   : > { %7299 = dma.done.wait (%p9541_p11), [#allocation10], 1024  }
  0x69   : > { %7301 = vsyncadd (%p9542_p5), [#allocation10], 4294966272  ;;  %v6883_v0 = vld [vmem:[#allocation6 + $0x38] sm:$0xff]   ;;  %v6884_v1 = vld [vmem:[#allocation6 + $0x30] sm:$0xff]   ;;  %vm1525_vm0 = vcmask 1040384   ;;  %vm1528_vm2 = vcmask 1044484   ;;  %v752_v57 = vlaneseq }
  0x6a   : > { %6544 = vmatprep.subr.bf16.mxu0 %v6883_v0  ;;  %6784 = vmatprep.subr.bf16.mxu1 %v6883_v0  ;;  %v6885_v2 = vld [vmem:[#allocation6 + $0x28] sm:$0xff]   ;;  %v6886_v3 = vld [vmem:[#allocation6 + $0x20] sm:$0xff]   ;;  %v6887_v6 = vld [vmem:[#allocation6 + $0x18] sm:$0xff]   ;;  %vm9511_vm1 = vsmask.f32 256  ;;  %v9543_v26 = vmov 0 }
  0x6b   : > { %6545 = vmatpush3.bf16.msra.mxu0 %v6883_v0  ;;  %6792 = vmatpush3.bf16.msra.mxu1 %v6883_v0  ;;  %v344_v4 = vld [vmem:[%s7526_s12] sm:$0xff]   ;;  %v6888_v7 = vld [vmem:[#allocation6 + $0x10] sm:$0xff]   ;;  %v6889_v8 = vld [vmem:[#allocation6 + $0x8] sm:$0xff]   ;;  %vm1529_vm3 = vsmask.f32 4352  ;;  %v7328_v29 = vmov 0  }
  0x6c   : > { %6546 = vmatprep.subr.bf16.mxu0 %v6884_v1  ;;  %6785 = vmatprep.subr.bf16.mxu1 %v6884_v1  ;;  %v360_v5 = vld [vmem:[%s7526_s12 + $0x40] sm:$0xff]   ;;  %v346_v10 = vld [vmem:[%s7526_s12 + $0x8] sm:$0xff]   ;;  %v348_v11 = vld [vmem:[%s7526_s12 + $0x10] sm:$0xff]   ;;  %1521 = vst [vmem:[#allocation2] sm:$0xff] %v7328_v29  ;;  %vm1538_vm7 = vcmask 1043459   ;;  %v9546_v38 = vmov 0 }
  0x6d   : > { %6560 = vmatprep.mubr.bf16.mxu0 %v344_v4  ;;  %6576 = vmatprep.mubr.bf16.mxu1 %v360_v5  ;;  %v6890_v9 = vld [vmem:[#allocation6] sm:$0xff]   ;;  %v362_v12 = vld [vmem:[%s7526_s12 + $0x48] sm:$0xff]   ;;  %v364_v13 = vld [vmem:[%s7526_s12 + $0x50] sm:$0xff]   ;;  %1522 = vst [vmem:[#allocation2 + $0x8] sm:$0xf] %v7328_v29  ;;  %v7577_v58 = vshrl.u32 %v752_v57, 7 }
  0x6e   : > { %v350_v14 = vld [vmem:[%s7526_s12 + $0x18] sm:$0xff]   ;;  %v352_v15 = vld [vmem:[%s7526_s12 + $0x20] sm:$0xff]   ;;  %v354_v18 = vld [vmem:[%s7526_s12 + $0x28] sm:$0xff]   ;;  %1524 = vst [vmem:[#allocation2 + $0x14] sm:$0xf] %v7328_v29  ;;  %vm7329_vm12 = vmmov 1  }
  0x6f   : > { %6547 = vmatpush3.bf16.msra.mxu0 %v6884_v1  ;;  %6793 = vmatpush3.bf16.msra.mxu1 %v6884_v1  ;;  %v366_v16 = vld [vmem:[%s7526_s12 + $0x58] sm:$0xff]   ;;  %v368_v17 = vld [vmem:[%s7526_s12 + $0x60] sm:$0xff]   ;;  %v356_v19 = vld [vmem:[%s7526_s12 + $0x30] sm:$0xff]   ;;  %1551 = vst [vmem:[#allocation2 + $0x198] sm:$0xff] %v7328_v29  ;;  %vm1539_vm8 = vsmask.f32 7950 }
  0x70   : > { %6548 = vmatprep.subr.bf16.mxu0 %v6885_v2  ;;  %6786 = vmatprep.subr.bf16.mxu1 %v6885_v2  ;;  %v370_v20 = vld [vmem:[%s7526_s12 + $0x68] sm:$0xff]   ;;  %v372_v21 = vld [vmem:[%s7526_s12 + $0x70] sm:$0xff]   ;;  %v358_v22 = vld [vmem:[%s7526_s12 + $0x38] sm:$0xff]   ;;  %1552 = vst [vmem:[#allocation2 + $0x1a0] sm:$0xf] %v7328_v29  ;;  %v756_v60 = vadd.s32 24, %v7577_v58 }
  0x71   : > { %v374_v23 = vld [vmem:[%s7526_s12 + $0x78] sm:$0xff]   ;;  %vm7557_vm4 = vmand %vm1525_vm0, %vm9511_vm1  ;;  %v6909_v27 = vld [vmem:[#allocation8 + $0x130] sm:$0xff]   ;;  %1554 = vst [vmem:[#allocation2 + $0x1ac] sm:$0xf] %v7328_v29  ;;  %v755_v61 = vadd.s32 16, %v7577_v58  ;;  %v754_v62 = vadd.s32 8, %v7577_v58 }
  0x72   : > { %v6907_v24 = vld [vmem:[#allocation8 + $0x138] sm:$0xff]   ;;  %v9544_v26 = vsel %vm7557_vm4, 4294967295, %v9543_v26  ;;  %vm1530_vm5 = vmand %vm1528_vm2, %vm1529_vm3  ;;  %v1532_v28 = vld [vmem:[#allocation2 + $0x18] sm:$0x11]  ;;  %9548 = vst [vmem:[#allocation17_spill] sm:$0xff] %v7577_v58  ;;  %v760_v63 = vadd.s32 56, %v7577_v58 }
  0x73   : > { %6549 = vmatpush3.bf16.msra.mxu0 %v6885_v2  ;;  %6794 = vmatpush3.bf16.msra.mxu1 %v6885_v2  ;;  %v6908_v25 = vld [vmem:[#allocation8 + $0xf8] sm:$0xff]   ;;  %9545 = vst [vmem:[#allocation16_spill] sm:$0xff] %v9544_v26  ;;  %vm1531_vm6 = vmor %vm1530_vm5, %vm7557_vm4  ;;  %v6910_v31 = vld [vmem:[#allocation8 + $0xf0] sm:$0xff]   ;;  %v810_v0 = vand.u32 15, %v756_v60  ;;  %v759_v1 = vadd.s32 48, %v7577_v58  ;;  %v758_v2 = vadd.s32 40, %v7577_v58 }
  0x74   : > { %6550 = vmatprep.subr.bf16.mxu0 %v6886_v3  ;;  %6787 = vmatprep.subr.bf16.mxu1 %v6886_v3  ;;  %v1533_v30 = vsel %vm1531_vm6, 0, %v1532_v28  ;;  %v6911_v32 = vld [vmem:[#allocation8 + $0x178] sm:$0xff]   ;;  %v6912_v33 = vld [vmem:[#allocation8 + $0x128] sm:$0xff]   ;;  %v6914_v35 = vld [vmem:[#allocation8 + $0x170] sm:$0xff]   ;;  %v757_v4 = vadd.s32 32, %v7577_v58  ;;  %v796_v5 = vand.u32 15, %v754_v62 }
  0x75   : > { %1534 = vst [vmem:[#allocation2 + $0x18] sm:$0x11] %v1533_v30  ;;  %v6913_v34 = vld [vmem:[#allocation8 + $0xe8] sm:$0xff]   ;;  %v1535_v36 = vld [vmem:[#allocation2 + $0x20] sm:$0x1]  ;;  %vm7571_vm9 = vmand %vm1538_vm7, %vm1539_vm8  ;;  %vm7592_vm10 = vcmp.ne.s32.totalorder %v810_v0, 15 }
  0x76   : > { %v1536_v37 = vsel %vm7557_vm4, 0, %v1535_v36  ;;  %v9547_v38 = vsel %vm7571_vm9, 4294967295, %v9546_v38  ;;  %v1548_v39 = vld [vmem:[#allocation2 + $0x194] sm:$0x8]  ;;  %v6917_v43 = vld [vmem:[#allocation8 + $0x168] sm:$0xff]   ;;  %v6918_v44 = vld [vmem:[#allocation8 + $0x118] sm:$0xff]  }
  0x77   : > { %6551 = vmatpush3.bf16.msra.mxu0 %v6886_v3  ;;  %6795 = vmatpush3.bf16.msra.mxu1 %v6886_v3  ;;  %1537 = vst [vmem:[#allocation2 + $0x20] sm:$0x1] %v1536_v37  ;;  %v1549_v40 = vsel %vm7571_vm9, 0, %v1548_v39  ;;  %v6915_v41 = vld [vmem:[#allocation8 + $0x120] sm:$0xff]   ;;  %v6919_v45 = vld [vmem:[#allocation8 + $0xd8] sm:$0xff]   ;;  %v6921_v47 = vld [vmem:[#allocation8 + $0x110] sm:$0xff]  }
  0x78   : > { %6552 = vmatprep.subr.bf16.mxu0 %v6887_v6  ;;  %6788 = vmatprep.subr.bf16.mxu1 %v6887_v6  ;;  %1550 = vst [vmem:[#allocation2 + $0x194] sm:$0x8] %v1549_v40  ;;  %v6916_v42 = vld [vmem:[#allocation8 + $0xe0] sm:$0xff]   ;;  %v6922_v48 = vld [vmem:[#allocation8 + $0xd0] sm:$0xff]   ;;  %v6923_v49 = vld [vmem:[#allocation8 + $0x158] sm:$0xff]   ;;  %v803_v3 = vand.u32 15, %v755_v61 }
  0x79   : > { %v6920_v46 = vld [vmem:[#allocation8 + $0x160] sm:$0xff]   ;;  %v6924_v50 = vld [vmem:[#allocation8 + $0x108] sm:$0xff]   ;;  %v6926_v52 = vld [vmem:[#allocation8 + $0x150] sm:$0xff]   ;;  %vm7606_vm14 = vcmp.ne.s32.totalorder %v796_v5, 15  ;;  %v765_v30 = vadd.s32 96, %v7577_v58  ;;  %v771_v36 = vadd.s32 144, %v7577_v58 }
  0x7a   : > { %v6925_v51 = vld [vmem:[#allocation8 + $0xc8] sm:$0xff]   ;;  %v6927_v53 = vld [vmem:[#allocation8 + $0x100] sm:$0xff]   ;;  %v7579_v59 = vld [vmem:[#allocation8 + $0xb8] sm:$0xff]   ;;  %vm7597_vm11 = vcmp.ne.s32.totalorder %v803_v3, 0  ;;  %v769_v40 = vadd.s32 128, %v7577_v58  ;;  %v776_v57 = vadd.s32 184, %v7577_v58 }
  0x7b   : > { %6553 = vmatpush3.bf16.msra.mxu0 %v6887_v6  ;;  %6796 = vmatpush3.bf16.msra.mxu1 %v6887_v6  ;;  %v6928_v54 = vld [vmem:[#allocation8 + $0xc0] sm:$0xff]   ;;  %v6929_v55 = vld [vmem:[#allocation8 + $0x148] sm:$0xff]   ;;  %v764_v6 = vadd.s32 88, %v7577_v58  ;;  %vm7602_vm13 = vmpackc.low %vm7329_vm12, %vm7329_vm12  ;;  %v9583_v61 = vmov 0  ;;  %s9391_s22 = scalar_lea.vmem [#allocation11], %s5551_s1  ;;  %s5992_s18 = sshll.u32 %s7394_s28, 11 }
  0x7c   : > { %6554 = vmatprep.subr.bf16.mxu0 %v6888_v7  ;;  %6789 = vmatprep.subr.bf16.mxu1 %v6888_v7  ;;  %v6936_v56 = vld [vmem:[#allocation8 + $0x140] sm:$0xff]   ;;  %vm9579_vm4 = vmpackc.low %vm7592_vm10, %vm7592_vm10  ;;  %s5439_s23 = sshll.u32 %s9391_s22, 4  ;;  %s5426_s30 = scalar_lea.sflag [#allocation5], %s7520_s19  ;;  %s9452_s23 = int_to_ptr.vmem [resolvable:$true] %s5439_s23 }
  0x7d   : > { %v2576_v26 = vld [vmem:[#allocation2 + $0x14] sm:$0x8]  ;;  %s7248_s9 = scalar_lea.vmem %s9452_s23, 2048  ;;  %p9753_p1 = scmp.ne.s32.totalorder %s9533_s20, 0 }
  0x7e   : > { %p7249_p7 = scmp.ne.s32.totalorder %s9452_s23, %s7248_s9  ;;  %s7330_s28 = smov [#allocation11]  }
  0x7f   : > { %6555 = vmatpush3.bf16.msra.mxu0 %v6888_v7  ;;  %6797 = vmatpush3.bf16.msra.mxu1 %v6888_v7  ;;  %v789_v7 = vand.u32 15, %v7577_v58  ;;  %s7252_s10 = sshll.u32 %s7330_s28, 4  ;;  %s7253_s10 = int_to_ptr.vmem [resolvable:$false] %s7252_s10 }
  0x80   : > { %6556 = vmatprep.subr.bf16.mxu0 %v6889_v8  ;;  %6790 = vmatprep.subr.bf16.mxu1 %v6889_v8  ;;  %p7250_p12 = pnand %p7249_p7, %p9753_p1  ;;  %s7254_s13 = scalar_lea.vmem %s7253_s10, 4096 }
  0x81   : > { %vm7614_vm0 = vcmp.ne.s32.totalorder %v789_v7, 0  ;;  %p7255_p13 = scmp.lt.s32.totalorder %s9452_s23, %s7253_s10  ;;  %p7256_p0 = scmp.lt.s32.totalorder %s7254_s13, %s7248_s9 }
  0x82   : > { %p7251_p9 = pneg %p7250_p12 }
  0x83   : > { %6557 = vmatpush3.bf16.msra.mxu0 %v6889_v8  ;;  %6798 = vmatpush3.bf16.msra.mxu1 %v6889_v8  ;;  %v838_v8 = vand.u32 15, %v760_v63  ;;  %p7257_p2 = por %p7256_p0, %p7255_p13 }
  0x84   : > { %6558 = vmatprep.subr.bf16.mxu0 %v6890_v9  ;;  %6791 = vmatprep.subr.bf16.mxu1 %v6890_v9 }
  0x85   : > { %vm7618_vm2 = vcmp.ne.s32.totalorder %v838_v8, 15  ;;  %v950_v8 = vand.u32 15, %v776_v57  ;;  %p7258_p10 = pnand %p7257_p2, %p7251_p9 }
  0x87   : > { %6559 = vmatpush3.bf16.msra.mxu0 %v6890_v9  ;;  %6799 = vmatpush3.bf16.msra.mxu1 %v6890_v9  ;;  %v763_v9 = vadd.s32 80, %v7577_v58 }
  0x88   : > { %6112 = vmatprep.subr.bf16.mxu1 %v6907_v24  ;;  %6592 = vmatprep.subr.bf16.mxu0 %v6911_v32  ;;  %v768_v24 = vadd.s32 120, %v7577_v58 }
  0x8a   : > { %6561 = vmatmul.mubr.bf16.vlgmr.msra.gmra.mxu0 %v346_v10  ;;  %6577 = vmatmul.mubr.bf16.vlgmr.msra.gmra.mxu1 %v362_v12  ;;  %v824_v12 = vand.u32 15, %v758_v2  ;;  %v894_v39 = vand.u32 15, %v768_v24 }
  0x8b   : > { %6564 = vmatprep.mubr.bf16.mxu0 %v348_v11  ;;  %6580 = vmatprep.mubr.bf16.mxu1 %v364_v13  ;;  %v831_v11 = vand.u32 15, %v759_v1  ;;  %v762_v13 = vadd.s32 72, %v7577_v58 }
  0x8c   : > { %6113 = vmatpush3.bf16.msra.mxu1 %v6908_v25  ;;  %6593 = vmatpush3.bf16.msra.mxu0 %v6911_v32  ;;  %vm7630_vm6 = vcmp.ne.s32.totalorder %v824_v12, 15 }
  0x8d   : > { %6114 = vmatprep.subr.bf16.mxu1 %v6909_v27  ;;  %6594 = vmatprep.subr.bf16.mxu0 %v6914_v35  ;;  %vm7626_vm5 = vcmp.ne.s32.totalorder %v831_v11, 0  ;;  %v852_v28 = vand.u32 15, %v762_v13  ;;  %v779_v13 = vadd.s32 208, %v7577_v58 }
  0x8f   : > { %vm7668_vm7 = vcmp.ne.s32.totalorder %v852_v28, 15 }
  0x90   : > { %6115 = vmatpush3.bf16.msra.mxu1 %v6910_v31  ;;  %6595 = vmatpush3.bf16.msra.mxu0 %v6914_v35  ;;  %v971_v31 = vand.u32 15, %v779_v13 }
  0x91   : > { %6116 = vmatprep.subr.bf16.mxu1 %v6912_v33  ;;  %6596 = vmatprep.subr.bf16.mxu0 %v6917_v43  ;;  %v766_v33 = vadd.s32 104, %v7577_v58 }
  0x92   : > { %6565 = vmatmul.mubr.bf16.gmra.mxu0 %v350_v14  ;;  %6581 = vmatmul.mubr.bf16.gmra.mxu1 %v366_v16  ;;  %v761_v16 = vadd.s32 64, %v7577_v58 }
  0x93   : > { %6568 = vmatprep.mubr.bf16.mxu0 %v352_v15  ;;  %6584 = vmatprep.mubr.bf16.mxu1 %v368_v17  ;;  %v817_v15 = vand.u32 15, %v757_v4  ;;  %v780_v4 = vadd.s32 216, %v7577_v58 }
  0x94   : > { %6117 = vmatpush3.bf16.msra.mxu1 %v6913_v34  ;;  %6597 = vmatpush3.bf16.msra.mxu0 %v6917_v43  ;;  %v845_v32 = vand.u32 15, %v761_v16  ;;  %v9567_v34 = vmov 0  ;;  %v770_v43 = vadd.s32 136, %v7577_v58 }
  0x95   : > { %6118 = vmatprep.subr.bf16.mxu1 %v6915_v41  ;;  %6598 = vmatprep.subr.bf16.mxu0 %v6920_v46  ;;  %vm7638_vm8 = vcmp.ne.s32.totalorder %v817_v15, 0  ;;  %v9571_v41 = vmov 0  ;;  %v978_v24 = vand.u32 15, %v780_v4 }
  0x96   : > { %v9572_v41 = vsel %vm7668_vm7, 4294967295, %v9571_v41  ;;  %vm7676_vm3 = vcmp.ne.s32.totalorder %v845_v32, 0  ;;  %vm9582_vm7 = vmpackc.low %vm7597_vm11, %vm7597_vm11 }
  0x97   : > { %v7724_v60 = vsel %vm9582_vm7, 65537, %v7328_v29  ;;  %vm9586_vm11 = vmpackc.low %vm7614_vm0, %vm7614_vm0 }
  0x98   : > { %6119 = vmatpush3.bf16.msra.mxu1 %v6916_v42  ;;  %6599 = vmatpush3.bf16.msra.mxu0 %v6920_v46  ;;  %v873_v42 = vand.u32 15, %v765_v30  ;;  %v772_v46 = vadd.s32 152, %v7577_v58  ;;  %v7747_v0 = vsel %vm9586_vm11, 65537, %v7328_v29  ;;  %vm9595_vm7 = vmpackc.low %vm7618_vm2, %vm7618_vm2 }
  0x99   : > { %6120 = vmatprep.subr.bf16.mxu1 %v6918_v44  ;;  %6600 = vmatprep.subr.bf16.mxu0 %v6923_v49  ;;  %v7793_v14 = vsel %vm9595_vm7, 65537, %v7328_v29  ;;  %vm9597_vm0 = vmpackc.low %vm7630_vm6, %vm7630_vm6 }
  0x9a   : > { %6569 = vmatmul.mubr.bf16.gmra.mxu0 %v354_v18  ;;  %6585 = vmatmul.mubr.bf16.gmra.mxu1 %v370_v20  ;;  %v767_v20 = vadd.s32 112, %v7577_v58  ;;  %vm7713_vm15 = vcmp.ne.s32.totalorder %v873_v42, 0  ;;  %v922_v62 = vand.u32 15, %v772_v46  ;;  %v7809_v16 = vsel %vm9597_vm0, 65537, %v7328_v29 }
  0x9b   : > { %6572 = vmatprep.mubr.bf16.mxu0 %v356_v19  ;;  %6588 = vmatprep.mubr.bf16.mxu1 %v372_v21  ;;  %v866_v19 = vand.u32 15, %v764_v6 }
  0x9c   : > { %6121 = vmatpush3.bf16.msra.mxu1 %v6919_v45  ;;  %6601 = vmatpush3.bf16.msra.mxu0 %v6923_v49  ;;  %v887_v35 = vand.u32 15, %v767_v20  ;;  %v880_v45 = vand.u32 15, %v766_v33  ;;  %v773_v49 = vadd.s32 160, %v7577_v58 }
  0x9d   : > { %6122 = vmatprep.subr.bf16.mxu1 %v6921_v47  ;;  %6602 = vmatprep.subr.bf16.mxu0 %v6926_v52  ;;  %vm7646_vm1 = vcmp.ne.s32.totalorder %v866_v19, 15 }
  0x9e   : > { %v9568_v34 = vsel %vm7646_vm1, 4294967295, %v9567_v34  ;;  %vm7684_vm9 = vcmp.ne.s32.totalorder %v887_v35, 0  ;;  %vm7697_vm1 = vcmp.ne.s32.totalorder %v894_v39, 15  ;;  %vm7729_vm10 = vcmp.ne.s32.totalorder %v880_v45, 15  ;;  %v7952_v45 = vld [vmem:[%s9499_s2] ss:$0 sm:$0xff] }
  0x9f   : > { %v9584_v61 = vsel %vm7729_vm10, 4294967295, %v9583_v61  ;;  %v929_v2 = vand.u32 15, %v773_v49  ;;  %vm9596_vm10 = vmpackc.low %vm7626_vm5, %vm7626_vm5  ;;  %vm9601_vm6 = vnez %v9568_v34 }
  0xa0   : > { %6123 = vmatpush3.bf16.msra.mxu1 %v6922_v48  ;;  %6603 = vmatpush3.bf16.msra.mxu0 %v6926_v52  ;;  %v915_v48 = vand.u32 15, %v771_v36  ;;  %v901_v52 = vand.u32 15, %v769_v40  ;;  %v7801_v15 = vsel %vm9596_vm10, 65537, %v7328_v29  ;;  %vm9600_vm5 = vmpackc.low %vm7638_vm8, %vm7638_vm8  ;;  %vm7868_vm8 = vcmp.ne.s32.totalorder %v950_v8, 15 }
  0xa1   : > { %6124 = vmatprep.subr.bf16.mxu1 %v6924_v50  ;;  %6604 = vmatprep.subr.bf16.mxu0 %v6929_v55  ;;  %v7692_v50 = vsel %vm7602_vm13, 65537, %v7328_v29  ;;  %vm9585_vm13 = vmpackc.low %vm7606_vm14, %vm7606_vm14  ;;  %vm7779_vm14 = vcmp.ne.s32.totalorder %v922_v62, 15  ;;  %vm7814_vm7 = vcmp.ne.s32.totalorder %v929_v2, 0  ;;  %v7824_v18 = vsel %vm9600_vm5, 65537, %v7328_v29 }
  0xa2   : > { %6573 = vmatmul.mubr.bf16.gmra.mxu0 %v358_v22  ;;  %6589 = vmatmul.mubr.bf16.gmra.mxu1 %v374_v23  ;;  %v859_v23 = vand.u32 15, %v763_v9  ;;  %v7739_v63 = vsel %vm9585_vm13, 65537, %v7328_v29  ;;  %vm7761_vm13 = vcmp.ne.s32.totalorder %v901_v52, 0  ;;  %v5598_v6 = vcombine.low %v7724_v60, %v7692_v50  ;;  %vm9602_vm10 = vmpackc.low %vm9601_vm6, %vm9601_vm6 }
  0xa3   : > { %v774_v9 = vadd.s32 168, %v7577_v58  ;;  %v5581_v10 = vcombine.low %v7692_v50, %v7739_v63  ;;  %v5597_v11 = vcombine.low %v7747_v0, %v7692_v50  ;;  %vm1393_vm2 = vmpackc.low %vm7761_vm13, %vm7761_vm13  ;;  %v7832_v19 = vsel %vm9602_vm10, 65537, %v7328_v29 }
  0xa4   : > { %6125 = vmatpush3.bf16.msra.mxu1 %v6925_v51  ;;  %6605 = vmatpush3.bf16.msra.mxu0 %v6929_v55  ;;  %vm7660_vm12 = vcmp.ne.s32.totalorder %v859_v23, 0  ;;  %vm9606_vm6 = vnez %v9572_v41  ;;  %v5584_v27 = vcombine.low %v7692_v50, %v7793_v14  ;;  %vm7972_vm13 = vcmp.ne.s32.totalorder %v971_v31, 0 }
  0xa5   : > { %6126 = vmatprep.subr.bf16.mxu1 %v6927_v53  ;;  %6606 = vmatprep.subr.bf16.mxu0 %v6936_v56  ;;  %v775_v53 = vadd.s32 176, %v7577_v58  ;;  %vm9603_vm0 = vmpackc.low %vm7660_vm12, %vm7660_vm12  ;;  %v936_v25 = vand.u32 15, %v774_v9 }
  0xa6   : > { %v7840_v20 = vsel %vm9603_vm0, 65537, %v7328_v29  ;;  %vm9607_vm10 = vmpackc.low %vm9606_vm6, %vm9606_vm6 }
  0xa7   : > { %v943_v5 = vand.u32 15, %v775_v53  ;;  %v7855_v22 = vsel %vm9607_vm10, 65537, %v7328_v29  ;;  %vm9608_vm12 = vmpackc.low %vm7676_vm3, %vm7676_vm3  ;;  %vm9614_vm3 = vnez %v9584_v61 }
  0xa8   : > { %6127 = vmatpush3.bf16.msra.mxu1 %v6928_v54  ;;  %6607 = vmatpush3.bf16.msra.mxu0 %v6936_v56  ;;  %v7708_v54 = vsel %vm9579_vm4, 65537, %v7328_v29  ;;  %v908_v56 = vand.u32 15, %v770_v43  ;;  %vm7752_vm4 = vcmp.ne.s32.totalorder %v915_v48, 0  ;;  %v7863_v23 = vsel %vm9608_vm12, 65537, %v7328_v29  ;;  %vm1220_vm0 = vmpackc.low %vm7779_vm14, %vm7779_vm14 }
  0xa9   : > { %6640 = vmatprep.subr.bf16.mxu1 %v7579_v59  ;;  %v5582_v3 = vcombine.low %v7692_v50, %v7708_v54  ;;  %vm7845_vm5 = vcmp.ne.s32.totalorder %v943_v5, 0  ;;  %vm9611_vm6 = vmpackc.low %vm7684_vm9, %vm7684_vm9  ;;  %v7943_v43 = vsel %vm1393_vm2, 65537, %v7328_v29  ;;  %v7962_v47 = vsel %vm1220_vm0, 65537, %v7328_v29 }
  0xaa   : > { %vm7770_vm11 = vcmp.ne.s32.totalorder %v908_v56, 15  ;;  %v7893_v35 = vsel %vm9611_vm6, 65537, %v7328_v29  ;;  %vm1399_vm10 = vmpackc.low %vm7845_vm5, %vm7845_vm5  ;;  %vm8001_vm2 = vcmp.ne.s16.totalorder %v5598_v6, 0  ;;  %vm8025_vm0 = vcmp.ne.s16.totalorder %v5581_v10, 0 }
  0xab   : > { %vm9612_vm12 = vmpackc.low %vm7697_vm1, %vm7697_vm1  ;;  %v7987_v53 = vsel %vm1399_vm10, 65537, %v7328_v29  ;;  %vm1196_vm10 = vcmp.ne.s32.totalorder %v978_v24, 15 }
  0xac   : > { %v7908_v39 = vsel %vm9612_vm12, 65537, %v7328_v29  ;;  %vm9613_vm9 = vmpackc.low %vm7713_vm15, %vm7713_vm15  ;;  %vm1635_vm12 = vsmask.f32 4368 }
  0xad   : > { %v7916_v40 = vsel %vm9613_vm9, 65537, %v7328_v29  ;;  %vm1224_vm6 = vmpackc.low %vm7868_vm8, %vm7868_vm8  ;;  %vm7945_vm8 = vcmp.ne.s32.totalorder %v936_v25, 15 }
  0xae   : > { %vm9615_vm1 = vmpackc.low %vm9614_vm3, %vm9614_vm3  ;;  %v7979_v52 = vsel %vm1224_vm6, 65537, %v7328_v29  ;;  %vm8029_vm3 = vcmp.ne.s16.totalorder %v5597_v11, 0  ;;  %vm2221_vm6 = vsmask.f32 3328 }
  0xaf   : > { %v7927_v41 = vsel %vm9615_vm1, 65537, %v7328_v29  ;;  %vm9616_vm15 = vmpackc.low %vm7752_vm4, %vm7752_vm4  ;;  %vm2222_vm1 = vsmask.f32 7440 }
  0xb0   : > { %v7935_v42 = vsel %vm9616_vm15, 65537, %v7328_v29  ;;  %vm9619_vm4 = vmpackc.low %vm7770_vm11, %vm7770_vm11  ;;  %vm7997_vm11 = vcmp.ne.s16.totalorder %v5582_v3, 0  ;;  %vm1957_vm15 = vcmask 1043456  }
  0xb1   : > { %v7970_v48 = vsel %vm9619_vm4, 65537, %v7328_v29  ;;  %vm9622_vm14 = vmpackc.low %vm7814_vm7, %vm7814_vm7  ;;  %vm9634_vm4 = vsmask.f32 256 }
  0xb2   : > { %v7995_v54 = vsel %vm9622_vm14, 65537, %v7328_v29  ;;  %vm1222_vm7 = vmpackc.low %vm7945_vm8, %vm7945_vm8  ;;  %vm1958_vm8 = vsmask.f32 7938 }
  0xb3   : > { %9623 = vst [vmem:[#allocation18_spill] sm:$0xff] %v7995_v54  ;;  %vm1403_vm5 = vmpackc.low %vm7972_vm13, %vm7972_vm13  ;;  %v8047_v11 = vsel %vm1222_vm7, 65537, %v7328_v29 }
  0xb4   : > { %vm1228_vm9 = vmpackc.low %vm1196_vm10, %vm1196_vm10 }
  0xb5   : > { %vm8103_vm13 = vmor %vm9634_vm4, %vm1635_vm12 }
  0xb6   : > { %vm8124_vm14 = vmor %vm2221_vm6, %vm2222_vm1 }
 0x14a   : > { %v6562_v55 = vpop.f32.mrf.mxu0  ;;  %v6578_v1 = vpop.f32.mrf.mxu1 }
 0x14b   : > { %v586_v0 = vadd.f32 %v6562_v55, %v7952_v45  ;;  %v650_v8 = vadd.f32 %v6578_v1, %v7952_v45  ;;  %v8059_v1 = vadd.s32 192, %v7577_v58 }
 0x14c   : > { %v577_v5 = vpop.f32.mrf.mxu0  ;;  %v641_v21 = vpop.f32.mrf.mxu1 }
 0x14d   : > { %v706_v17 = vmax.f32 %v586_v0, 0.0  ;;  %v578_v10 = vadd.f32 %v7952_v45, %v577_v5  ;;  %v722_v31 = vmax.f32 %v650_v8, 0.0  ;;  %v642_v55 = vadd.f32 %v7952_v45, %v641_v21 }
 0x14e   : > { %v6563_v25 = vpop.f32.mrf.mxu0  ;;  %v8056_v0 = vsel %vm1403_vm5, 65537, %v7328_v29  ;;  %v6579_v4 = vpop.f32.mrf.mxu1 }
 0x14f   : > { %9632 = vst [vmem:[#allocation19_spill] sm:$0xff] %v8056_v0  ;;  %v5930_v44 = vpack.c.bf16 %v706_v17, %v706_v17  ;;  %v704_v5 = vmax.f32 %v578_v10, 0.0  ;;  %v589_v13 = vadd.f32 %v6563_v25, %v7952_v45  ;;  %v5946_v21 = vpack.c.bf16 %v722_v31, %v722_v31 }
 0x150   : > { %v580_v8 = vpop.f32.mrf.mxu0  ;;  %v8062_v12 = vmax.f32 %v642_v55, 0.0  ;;  %v653_v9 = vadd.f32 %v6579_v4, %v7952_v45  ;;  %v644_v61 = vpop.f32.mrf.mxu1  ;;  %v8069_v25 = vsel %vm1228_vm9, 65537, %v7328_v29 }
 0x151   : > { %2111 = vst [vmem:[#allocation2 + $0x34] sm:$0xf] %v5930_v44  ;;  %v5928_v63 = vpack.c.bf16 %v704_v5, %v704_v5  ;;  %v707_v3 = vmax.f32 %v589_v13, 0.0  ;;  %v581_v10 = vadd.f32 %v7952_v45, %v580_v8  ;;  %9633 = vst [vmem:[#allocation20_spill] sm:$0xff] %v8069_v25  ;;  %v645_v29 = vadd.f32 %v7952_v45, %v644_v61 }
 0x152   : > { %v6566_v24 = vpop.f32.mrf.mxu0  ;;  %2127 = vst [vmem:[#allocation2 + $0xf4] sm:$0xf] %v5946_v21  ;;  %v5944_v55 = vpack.c.bf16 %v8062_v12, %v8062_v12  ;;  %v723_v60 = vmax.f32 %v653_v9, 0.0 }
 0x153   : > { %2109 = vst [vmem:[#allocation2 + $0x1c] sm:$0xf] %v5928_v63  ;;  %v737_v44 = vpack.c.bf16 %v707_v3, %v706_v17  ;;  %v5931_v13 = vpack.c.bf16 %v707_v3, %v707_v3  ;;  %v705_v8 = vmax.f32 %v581_v10, 0.0  ;;  %v602_v62 = vadd.f32 %v6566_v24, %v7952_v45 }
 0x154   : > { %v593_v21 = vpop.f32.mrf.mxu0  ;;  %2125 = vst [vmem:[#allocation2 + $0xdc] sm:$0xf] %v5944_v55  ;;  %v8078_v46 = vpack.c.bf16 %v723_v60, %v722_v31  ;;  %v5947_v9 = vpack.c.bf16 %v723_v60, %v723_v60  ;;  %v6582_v60 = vpop.f32.mrf.mxu1 }
 0x155   : > { %v1330_v63 = vsel %vm7997_vm11, %v737_v44, 0  ;;  %v1506_v3 = vsel %vm8001_vm2, %v737_v44, 0  ;;  %2112 = vst [vmem:[#allocation2 + $0x40] sm:$0xf] %v5931_v13  ;;  %v736_v17 = vpack.c.bf16 %v705_v8, %v704_v5  ;;  %v5929_v61 = vpack.c.bf16 %v705_v8, %v705_v8  ;;  %vm8130_vm11 = vmand %vm1957_vm15, %vm1958_vm8 }
 0x156   : > { %v5615_v10 = vcombine.low %v1330_v63, %v1330_v63  ;;  %v5616_v24 = vcombine.high %v1330_v63, %v1330_v63  ;;  %v5679_v55 = vcombine.low %v1506_v3, %v1506_v3  ;;  %v5680_v31 = vcombine.high %v1506_v3, %v1506_v3  ;;  %v8086_v49 = vpop.f32.mrf.mxu0  ;;  %2128 = vst [vmem:[#allocation2 + $0x100] sm:$0xf] %v5947_v9 }
 0x157   : > { %v1329_v56 = vsel %vm8025_vm0, %v736_v17, 0  ;;  %v1505_v57 = vsel %vm8029_vm3, %v736_v17, 0  ;;  %2110 = vst [vmem:[#allocation2 + $0x28] sm:$0xf] %v5929_v61  ;;  %v8092_v44 = vmax.f32 %v645_v29, 0.0  ;;  %v8095_v5 = vadd.f32 %v6582_v60, %v7952_v45 }
 0x158   : > { %v1655_v13 = vshrl.u32 %v5615_v10, 16  ;;  %v1658_v8 = vshll.u32 %v5615_v10, 16  ;;  %v1664_v63 = vshrl.u32 %v5616_v24, 16  ;;  %v1667_v3 = vshll.u32 %v5616_v24, 16  ;;  %v8097_v37 = vpop.f32.mrf.mxu0 }
 0x159   : > { %v2244_v4 = vshll.u32 %v5679_v55, 16  ;;  %v2248_v51 = vshrl.u32 %v5679_v55, 16  ;;  %v2254_v9 = vshll.u32 %v5680_v31, 16  ;;  %v2258_v2 = vshrl.u32 %v5680_v31, 16 }
 0x15a   : > { %v1657_v6 = vrot.slane %v1655_v13, 7  ;;  %v8099_v36 = vrot.slane %v1664_v63, 7  ;;  %v5613_v7 = vcombine.low %v1329_v56, %v1329_v56  ;;  %v5614_v17 = vcombine.high %v1329_v56, %v1329_v56  ;;  %v6570_v32 = vpop.f32.mrf.mxu0 }
 0x15b   : > { %v8107_v61 = vrot.slane %v2244_v4, 5  ;;  %v2250_v10 = vrot.slane %v2248_v51, 4  ;;  %v8109_v24 = vrot.slane %v2254_v9, 5  ;;  %v8111_v55 = vrot.slane %v2258_v2, 4 }
 0x15c   : > { %v1662_v31 = vrot.slane %v1657_v6, 4  ;;  %v1669_v60 = vor.u32 %v1667_v3, %v8099_v36  ;;  %v8114_v13 = vmax.f32 %v602_v62, 0.0  ;;  %v594_v56 = vadd.f32 %v7952_v45, %v593_v21 }
 0x15d   : > { %v1660_v63 = vor.u32 %v1658_v8, %v1657_v6  ;;  %v2251_v34 = vor.u32 %v2250_v10, %v8107_v61  ;;  %v1638_v4 = vshrl.u32 %v5613_v7, 16  ;;  %v1641_v62 = vshll.u32 %v5613_v7, 16 }
 0x15e   : > { %v1670_v51 = vsel %vm8103_vm13, %v1662_v31, %v1669_v60  ;;  %v1646_v3 = vshrl.u32 %v5614_v17, 16  ;;  %v5677_v21 = vcombine.low %v1505_v57, %v1505_v57  ;;  %v1649_v6 = vshll.u32 %v5614_v17, 16  ;;  %v1960_v31 = vld [vmem:[#allocation2 + $0x18] sm:$0xf] }
 0x15f   : > { %1965 = vst [vmem:[#allocation2 + $0x3c] sm:$0xf] %v1670_v51  ;;  %v2252_v8 = vrot.slane %v2251_v34, 4  ;;  %v1640_v9 = vrot.slane %v1638_v4, 7  ;;  %v5678_v10 = vcombine.high %v1505_v57, %v1505_v57  ;;  %v5934_v7 = vpack.c.bf16 %v8114_v13, %v8114_v13 }
 0x160   : > { %v1648_v33 = vrot.slane %v1646_v3, 7  ;;  %v2225_v60 = vshll.u32 %v5677_v21, 16  ;;  %v2228_v28 = vshrl.u32 %v5677_v21, 16  ;;  %vm8139_vm2 = vcmp.ne.s16.totalorder %v5584_v27, 0 }
 0x161   : > { %v9643_v57 = vcombine.low %v7801_v15, %v7692_v50  ;;  %v9646_v4 = vcombine.low %v7692_v50, %v7809_v16  ;;  %v2257_v14 = vsel %vm8124_vm14, %v2252_v8, %v8109_v24  ;;  %v1643_v27 = vor.u32 %v1641_v62, %v1640_v9  ;;  %v609_v15 = vpop.f32.mrf.mxu0  ;;  %2115 = vst [vmem:[#allocation2 + $0x64] sm:$0xf] %v5934_v7 }
 0x162   : > { %v1644_v3 = vrot.slane %v1640_v9, 4  ;;  %v2234_v21 = vshll.u32 %v5678_v10, 16  ;;  %2581 = vst [vmem:[#allocation2 + $0x38] sm:$0xf] %v2257_v14  ;;  %v1653_v58 = vrot.slane %v1648_v33, 4  ;;  %v2227_v0 = vrot.slane %v2225_v60, 5 }
 0x163   : > { %vm8146_vm7 = vcmp.ne.s16.totalorder %v9643_v57, 0  ;;  %vm8153_vm5 = vcmp.ne.s16.totalorder %v9646_v4, 0  ;;  %v1651_v57 = vor.u32 %v1649_v6, %v1648_v33  ;;  %v2230_v25 = vrot.slane %v2228_v28, 4 }
 0x164   : > { %v9649_v16 = vcombine.low %v7824_v18, %v7692_v50  ;;  %v1961_v62 = vsel %vm8130_vm11, %v1643_v27, %v1960_v31  ;;  %v2236_v8 = vrot.slane %v2234_v21, 5  ;;  %v2238_v9 = vshrl.u32 %v5678_v10, 16  ;;  %v6571_v31 = vpop.f32.mrf.mxu0 }
 0x165   : > { %v708_v54 = vmax.f32 %v594_v56, 0.0  ;;  %v1652_v6 = vsel %vm8103_vm13, %v1644_v3, %v1651_v57  ;;  %v1661_v28 = vsel %vm8103_vm13, %v1653_v58, %v1660_v63  ;;  %1962 = vst [vmem:[#allocation2 + $0x18] sm:$0xf] %v1961_v62  ;;  %v2231_v33 = vor.u32 %v2230_v25, %v2227_v0 }
 0x166   : > { %vm8163_vm0 = vcmp.ne.s16.totalorder %v9649_v16, 0  ;;  %vm9652_vm3 = vnez %v9547_v38  ;;  %1963 = vst [vmem:[#allocation2 + $0x24] sm:$0xf] %v1652_v6  ;;  %1964 = vst [vmem:[#allocation2 + $0x30] sm:$0xf] %v1661_v28  ;;  %v2240_v60 = vrot.slane %v2238_v9, 4  ;;  %v605_v10 = vadd.f32 %v8086_v49, %v7952_v45 }
 0x167   : > { %v2577_v18 = vsel %vm9652_vm3, %v2227_v0, %v2576_v26  ;;  %v5932_v30 = vpack.c.bf16 %v708_v54, %v708_v54  ;;  %v597_v56 = vadd.f32 %v7952_v45, %v8097_v37  ;;  %v2232_v7 = vrot.slane %v2231_v33, 4 }
 0x168   : > { %2578 = vst [vmem:[#allocation2 + $0x14] sm:$0x8] %v2577_v18  ;;  %v618_v58 = vadd.f32 %v6570_v32, %v7952_v45  ;;  %v610_v25 = vadd.f32 %v7952_v45, %v609_v15  ;;  %v621_v63 = vadd.f32 %v6571_v31, %v7952_v45  ;;  %v1671_v26 = vrot.slane %v8099_v36, 4 }
 0x169   : > { %v2241_v0 = vor.u32 %v2240_v60, %v2236_v8  ;;  %2113 = vst [vmem:[#allocation2 + $0x4c] sm:$0xf] %v5932_v30  ;;  %v711_v14 = vmax.f32 %v605_v10, 0.0  ;;  %v709_v27 = vmax.f32 %v597_v56, 0.0  ;;  %v9653_v49 = vcombine.low %v7692_v50, %v7832_v19  ;;  %v6932_v56 = vld [vmem:[#allocation2 + $0x1c] ss:$12 sps:$4 sm:$0xff]  }
 0x16a   : > { %v2237_v32 = vsel %vm8124_vm14, %v2232_v7, %v2236_v8  ;;  %v714_v37 = vmax.f32 %v618_v58, 0.0  ;;  %v8192_v21 = vmax.f32 %v610_v25, 0.0  ;;  %v8194_v15 = vmax.f32 %v621_v63, 0.0  ;;  %v6944_v25 = vld [vmem:[#allocation8 + $0xb0] sm:$0xff]   ;;  %v6961_v63 = vld [vmem:[#allocation8 + $0x78] sm:$0xff]   ;;  %3211 = vmatprep.mubr.bf16.mxu1 %v6932_v56 }
 0x16b   : > { %vm8186_vm10 = vcmp.ne.s16.totalorder %v9653_v49, 0  ;;  %v2242_v57 = vrot.slane %v2241_v0, 4  ;;  %2579 = vst [vmem:[#allocation2 + $0x20] sm:$0xf] %v2237_v32  ;;  %v739_v16 = vpack.c.bf16 %v711_v14, %v8114_v13  ;;  %v5935_v62 = vpack.c.bf16 %v711_v14, %v711_v14  ;;  %6248 = vmatprep.subr.bf16.mxu0 %v6961_v63 }
 0x16c   : > { %v738_v9 = vpack.c.bf16 %v709_v27, %v708_v54  ;;  %v9656_v19 = vor.u32 %v8111_v55, %v8109_v24  ;;  %v5933_v28 = vpack.c.bf16 %v709_v27, %v709_v27  ;;  %v5938_v33 = vpack.c.bf16 %v714_v37, %v714_v37 }
 0x16d   : > { %v5936_v8 = vpack.c.bf16 %v8192_v21, %v8192_v21  ;;  %v2247_v18 = vsel %vm8124_vm14, %v2242_v57, %v8107_v61  ;;  %v1332_v60 = vsel %vm8139_vm2, %v739_v16, 0  ;;  %v1508_v54 = vsel %vm8146_vm7, %v739_v16, 0  ;;  %2116 = vst [vmem:[#allocation2 + $0x70] sm:$0xf] %v5935_v62  ;;  %v6930_v17 = vld [vmem:[#allocation2 + $0x18] ss:$12 sps:$4 sm:$0xff]  }
 0x16e   : > { %v8200_v6 = vrot.slane %v9656_v19, 4  ;;  %v1331_v24 = vsel %vm8153_vm5, %v738_v9, 0  ;;  %2580 = vst [vmem:[#allocation2 + $0x2c] sm:$0xf] %v2247_v18  ;;  %v5619_v55 = vcombine.low %v1332_v60, %v1332_v60  ;;  %v5620_v13 = vcombine.high %v1332_v60, %v1332_v60  ;;  %2114 = vst [vmem:[#allocation2 + $0x58] sm:$0xf] %v5933_v28  ;;  %v612_v19 = vpop.f32.mrf.mxu0  ;;  %3212 = vmatmul.mubr.bf16.vlgmr.msra.gmra.mxu1 %v6930_v17 }
 0x16f   : > { %v5683_v30 = vcombine.low %v1508_v54, %v1508_v54  ;;  %v5684_v10 = vcombine.high %v1508_v54, %v1508_v54  ;;  %2119 = vst [vmem:[#allocation2 + $0x94] sm:$0xf] %v5938_v33  ;;  %2117 = vst [vmem:[#allocation2 + $0x7c] sm:$0xf] %v5936_v8  ;;  %v9657_v61 = vcombine.low %v7840_v20, %v7692_v50  ;;  %v1507_v51 = vsel %vm8163_vm0, %v738_v9, 0 }
 0x170   : > { %v5617_v31 = vcombine.low %v1331_v24, %v1331_v24  ;;  %v5618_v7 = vcombine.high %v1331_v24, %v1331_v24  ;;  %v741_v58 = vpack.c.bf16 %v8194_v15, %v714_v37  ;;  %v1691_v0 = vshrl.u32 %v5619_v55, 16  ;;  %v6934_v20 = vld [vmem:[#allocation2 + $0x34] ss:$12 sps:$4 sm:$0xff]   ;;  %6641 = vmatpush3.bf16.msra.mxu1 %v7579_v59 }
 0x171   : > { %vm8216_vm12 = vcmp.ne.s16.totalorder %v9657_v61, 0  ;;  %v1694_v14 = vshll.u32 %v5619_v55, 16  ;;  %v1700_v27 = vshrl.u32 %v5620_v13, 16  ;;  %v1703_v49 = vshll.u32 %v5620_v13, 16  ;;  %3219 = vmatprep.mubr.bf16.mxu1 %v6934_v20  ;;  %6642 = vmatprep.subr.bf16.mxu1 %v6944_v25 }
 0x172   : > { %v2284_v32 = vshll.u32 %v5683_v30, 16  ;;  %v2288_v57 = vshrl.u32 %v5683_v30, 16  ;;  %v2294_v16 = vshll.u32 %v5684_v10, 16  ;;  %v2298_v62 = vshrl.u32 %v5684_v10, 16 }
 0x173   : > { %v1693_v4 = vrot.slane %v1691_v0, 7  ;;  %v8223_v9 = vrot.slane %v1700_v27, 7  ;;  %v1673_v28 = vshrl.u32 %v5617_v31, 16  ;;  %v1676_v37 = vshll.u32 %v5617_v31, 16 }
 0x174   : > { %v8226_v33 = vrot.slane %v2284_v32, 5  ;;  %v2290_v8 = vrot.slane %v2288_v57, 4  ;;  %v8228_v18 = vrot.slane %v2294_v16, 5  ;;  %v8230_v60 = vrot.slane %v2298_v62, 4  ;;  %6643 = vmatpush3.bf16.msra.mxu1 %v6944_v25 }
 0x175   : > { %v1698_v54 = vrot.slane %v1693_v4, 4  ;;  %v1705_v24 = vor.u32 %v1703_v49, %v8223_v9  ;;  %v1334_v55 = vsel %vm8186_vm10, %v741_v58, 0  ;;  %v8236_v13 = vadd.f32 %v7952_v45, %v612_v19  ;;  %v6937_v17 = vld [vmem:[#allocation2 + $0x20] ss:$12 sps:$4 sm:$0xff]  }
 0x176   : > { %v1696_v30 = vor.u32 %v1694_v14, %v1693_v4  ;;  %v2291_v59 = vor.u32 %v2290_v8, %v8226_v33  ;;  %v1675_v10 = vrot.slane %v1673_v28, 7  ;;  %v1682_v61 = vshrl.u32 %v5618_v7, 16  ;;  %6608 = vmatprep.mubr.bf16.mxu0 %v6937_v17  ;;  %v6939_v14 = vld [vmem:[#allocation2 + $0x30] ss:$12 sps:$4 sm:$0xff]  }
 0x177   : > { %v1706_v56 = vsel %vm8103_vm13, %v1698_v54, %v1705_v24  ;;  %v1685_v31 = vshll.u32 %v5618_v7, 16  ;;  %v5681_v63 = vcombine.low %v1507_v51, %v1507_v51  ;;  %v5682_v0 = vcombine.high %v1507_v51, %v1507_v51  ;;  %3220 = vmatmul.mubr.bf16.gmra.mxu1 %v6939_v14  ;;  %v6972_v17 = vld [vmem:[#allocation8 + $0xa0] sm:$0xff]  }
 0x178   : > { %1969 = vst [vmem:[#allocation2 + $0x6c] sm:$0xf] %v1706_v56  ;;  %v2292_v27 = vrot.slane %v2291_v59, 4  ;;  %v2301_v3 = vor.u32 %v8230_v60, %v8228_v18  ;;  %v1678_v49 = vor.u32 %v1676_v37, %v1675_v10  ;;  %v1680_v20 = vrot.slane %v1675_v10, 4 }
 0x179   : > { %v1684_v32 = vrot.slane %v1682_v61, 7  ;;  %v2264_v57 = vshll.u32 %v5681_v63, 16  ;;  %v2268_v16 = vshrl.u32 %v5681_v63, 16  ;;  %v2274_v62 = vshll.u32 %v5682_v0, 16 }
 0x17a   : > { %v2297_v7 = vsel %vm8124_vm14, %v2292_v27, %v8228_v18  ;;  %v1679_v51 = vsel %vm8103_vm13, %v1671_v26, %v1678_v49  ;;  %v2278_v25 = vshrl.u32 %v5682_v0, 16  ;;  %v1510_v19 = vsel %vm8216_vm12, %v741_v58, 0 }
 0x17b   : > { %2585 = vst [vmem:[#allocation2 + $0x68] sm:$0xf] %v2297_v7  ;;  %v1687_v4 = vor.u32 %v1685_v31, %v1684_v32  ;;  %v1689_v28 = vrot.slane %v1684_v32, 4  ;;  %1966 = vst [vmem:[#allocation2 + $0x48] sm:$0xf] %v1679_v51  ;;  %v2266_v37 = vrot.slane %v2264_v57, 5  ;;  %v9660_v60 = vcombine.low %v7692_v50, %v7855_v22 }
 0x17c   : > { %v2270_v8 = vrot.slane %v2268_v16, 4  ;;  %v9663_v36 = vcombine.low %v7863_v23, %v7692_v50  ;;  %v2276_v34 = vrot.slane %v2274_v62, 5  ;;  %v2280_v58 = vrot.slane %v2278_v25, 4  ;;  %v6955_v23 = vld [vmem:[#allocation8 + $0xa8] sm:$0xff]  }
 0x17d   : > { %vm8255_vm9 = vcmp.ne.s16.totalorder %v9660_v60, 0  ;;  %v5623_v54 = vcombine.low %v1334_v55, %v1334_v55  ;;  %v5624_v24 = vcombine.high %v1334_v55, %v1334_v55  ;;  %v1688_v59 = vsel %vm8103_vm13, %v1680_v20, %v1687_v4  ;;  %v6574_v20 = vpop.f32.mrf.mxu0  ;;  %6644 = vmatprep.subr.bf16.mxu1 %v6955_v23 }
 0x17e   : > { %vm8262_vm1 = vcmp.ne.s16.totalorder %v9663_v36, 0  ;;  %v1697_v22 = vsel %vm8103_vm13, %v1689_v28, %v1696_v30  ;;  %v2267_v10 = vsel %vm8124_vm14, %v8200_v6, %v2266_v37  ;;  %v2271_v61 = vor.u32 %v2270_v8, %v2266_v37  ;;  %1967 = vst [vmem:[#allocation2 + $0x54] sm:$0xf] %v1688_v59  ;;  %6645 = vmatpush3.bf16.msra.mxu1 %v6955_v23 }
 0x17f   : > { %1968 = vst [vmem:[#allocation2 + $0x60] sm:$0xf] %v1697_v22  ;;  %v2281_v56 = vor.u32 %v2280_v58, %v2276_v34  ;;  %2582 = vst [vmem:[#allocation2 + $0x44] sm:$0xf] %v2267_v10  ;;  %v1727_v31 = vshrl.u32 %v5623_v54, 16  ;;  %v1730_v63 = vshll.u32 %v5623_v54, 16  ;;  %v5939_v49 = vpack.c.bf16 %v8194_v15, %v8194_v15  ;;  %6646 = vmatprep.subr.bf16.mxu1 %v6972_v17  ;;  %v625_v36 = vpop.f32.mrf.mxu0 }
 0x180   : > { %v1736_v55 = vshrl.u32 %v5624_v24, 16  ;;  %v2272_v0 = vrot.slane %v2271_v61, 4  ;;  %v1739_v27 = vshll.u32 %v5624_v24, 16  ;;  %v5687_v30 = vcombine.low %v1510_v19, %v1510_v19  ;;  %v6966_v24 = vld [vmem:[#allocation8 + $0x70] sm:$0xff]  }
 0x181   : > { %v2282_v14 = vrot.slane %v2281_v56, 4  ;;  %v1729_v6 = vrot.slane %v1727_v31, 7  ;;  %v5688_v57 = vcombine.high %v1510_v19, %v1510_v19  ;;  %2120 = vst [vmem:[#allocation2 + $0xa0] sm:$0xf] %v5939_v49  ;;  %v713_v51 = vmax.f32 %v8236_v13, 0.0 }
 0x182   : > { %v8275_v32 = vrot.slane %v1736_v55, 7  ;;  %v2277_v16 = vsel %vm8124_vm14, %v2272_v0, %v2276_v34  ;;  %v2324_v62 = vshll.u32 %v5687_v30, 16  ;;  %v2328_v7 = vshrl.u32 %v5687_v30, 16  ;;  %6647 = vmatpush3.bf16.msra.mxu1 %v6972_v17  ;;  %v6940_v55 = vld [vmem:[#allocation2 + $0x4c] ss:$12 sps:$4 sm:$0xff]   ;;  %v6575_v30 = vpop.f32.mrf.mxu0 }
 0x183   : > { %v1707_v15 = vrot.slane %v8223_v9, 4  ;;  %v2287_v25 = vsel %vm8124_vm14, %v2282_v14, %v8226_v33  ;;  %2583 = vst [vmem:[#allocation2 + $0x50] sm:$0xf] %v2277_v16  ;;  %v1734_v4 = vrot.slane %v1729_v6, 4  ;;  %v8285_v28 = vrot.slane %v2301_v3, 4  ;;  %v6962_v33 = vld [vmem:[#allocation8 + $0x38] sm:$0xff]   ;;  %3227 = vmatprep.mubr.bf16.mxu1 %v6940_v55 }
 0x184   : > { %v1741_v19 = vor.u32 %v1739_v27, %v8275_v32  ;;  %2584 = vst [vmem:[#allocation2 + $0x5c] sm:$0xf] %v2287_v25  ;;  %v8287_v37 = vrot.slane %v2324_v62, 5  ;;  %v2330_v8 = vrot.slane %v2328_v7, 4  ;;  %v2334_v60 = vshll.u32 %v5688_v57, 16  ;;  %v6971_v55 = vld [vmem:[#allocation8 + $0x28] sm:$0xff]  }
 0x185   : > { %v2338_v34 = vshrl.u32 %v5688_v57, 16  ;;  %v740_v58 = vpack.c.bf16 %v713_v51, %v8192_v21  ;;  %v5937_v54 = vpack.c.bf16 %v713_v51, %v713_v51  ;;  %v8292_v59 = vor.u32 %v1730_v63, %v1729_v6  ;;  %v6981_v16 = vld [vmem:[#allocation8 + $0x18] sm:$0xff]  }
 0x186   : > { %v1742_v13 = vsel %vm8103_vm13, %v1734_v4, %v1741_v19  ;;  %v2331_v3 = vor.u32 %v2330_v8, %v8287_v37  ;;  %v8295_v22 = vrot.slane %v2334_v60, 5  ;;  %v634_v10 = vadd.f32 %v6574_v20, %v7952_v45  ;;  %v6938_v21 = vld [vmem:[#allocation2 + $0x38] ss:$12 sps:$4 sm:$0xff]   ;;  %v6945_v20 = vld [vmem:[#allocation2 + $0x48] ss:$12 sps:$4 sm:$0xff]  }
 0x187   : > { %1973 = vst [vmem:[#allocation2 + $0x9c] sm:$0xf] %v1742_v13  ;;  %v9666_v61 = vcombine.low %v7692_v50, %v7962_v47  ;;  %v8305_v56 = vrot.slane %v2338_v34, 4  ;;  %v1333_v17 = vsel %vm8255_vm9, %v740_v58, 0  ;;  %v1509_v31 = vsel %vm8262_vm1, %v740_v58, 0  ;;  %6609 = vmatmul.mubr.bf16.vlgmr.msra.gmra.mxu0 %v6938_v21  ;;  %v6967_v4 = vld [vmem:[#allocation8 + $0x30] sm:$0xff]   ;;  %3228 = vmatmul.mubr.bf16.gmra.mxu1 %v6945_v20 }
 0x188   : > { %2118 = vst [vmem:[#allocation2 + $0x88] sm:$0xf] %v5937_v54  ;;  %v626_v63 = vadd.f32 %v7952_v45, %v625_v36  ;;  %v2332_v0 = vrot.slane %v2331_v3, 4  ;;  %v5621_v27 = vcombine.low %v1333_v17, %v1333_v17  ;;  %v5622_v47 = vcombine.high %v1333_v17, %v1333_v17  ;;  %6249 = vmatpush3.bf16.msra.mxu0 %v6962_v33  ;;  %v6970_v36 = vld [vmem:[#allocation8 + $0x68] sm:$0xff]  }
 0x189   : > { %vm8301_vm8 = vcmp.ne.s16.totalorder %v9666_v61, 0  ;;  %v5685_v49 = vcombine.low %v1509_v31, %v1509_v31  ;;  %v2341_v14 = vor.u32 %v8305_v56, %v8295_v22  ;;  %v5686_v6 = vcombine.high %v1509_v31, %v1509_v31  ;;  %6250 = vmatprep.subr.bf16.mxu0 %v6966_v24 }
 0x18a   : > { %v8314_v18 = vmax.f32 %v634_v10, 0.0  ;;  %v637_v26 = vadd.f32 %v6575_v30, %v7952_v45  ;;  %v9669_v57 = vcombine.low %v7692_v50, %v7908_v39  ;;  %v9672_v62 = vcombine.low %v7893_v35, %v7692_v50  ;;  %v6946_v39 = vld [vmem:[#allocation2 + $0x64] ss:$12 sps:$4 sm:$0xff]   ;;  %v628_v30 = vpop.f32.mrf.mxu0 }
 0x18b   : > { %v9675_v51 = vcombine.low %v7935_v42, %v7692_v50  ;;  %v2337_v19 = vsel %vm8124_vm14, %v2332_v0, %v8295_v22  ;;  %v1709_v35 = vshrl.u32 %v5621_v27, 16  ;;  %v1712_v8 = vshll.u32 %v5621_v27, 16  ;;  %3235 = vmatprep.mubr.bf16.mxu1 %v6946_v39  ;;  %v6942_v61 = vld [vmem:[#allocation2 + $0x50] ss:$12 sps:$4 sm:$0xff]   ;;  %v6991_v0 = vld [vmem:[#allocation8 + $0x98] sm:$0xff]  }
 0x18c   : > { %vm8320_vm4 = vcmp.ne.s16.totalorder %v9669_v57, 0  ;;  %vm8327_vm11 = vcmp.ne.s16.totalorder %v9672_v62, 0  ;;  %v1718_v60 = vshrl.u32 %v5622_v47, 16  ;;  %2589 = vst [vmem:[#allocation2 + $0x98] sm:$0xf] %v2337_v19  ;;  %v1721_v42 = vshll.u32 %v5622_v47, 16  ;;  %6251 = vmatpush3.bf16.msra.mxu0 %v6967_v4  ;;  %6612 = vmatprep.mubr.bf16.mxu0 %v6942_v61 }
 0x18d   : > { %vm8334_vm2 = vcmp.ne.s16.totalorder %v9675_v51, 0  ;;  %v2304_v13 = vshll.u32 %v5685_v49, 16  ;;  %v2308_v34 = vshrl.u32 %v5685_v49, 16  ;;  %v8341_v58 = vmax.f32 %v626_v63, 0.0  ;;  %6252 = vmatprep.subr.bf16.mxu0 %v6970_v36  ;;  %v6976_v51 = vld [vmem:[#allocation8 + $0x60] sm:$0xff]   ;;  %6648 = vmatprep.subr.bf16.mxu1 %v6991_v0 }
 0x18e   : > { %v1711_v54 = vrot.slane %v1709_v35, 7  ;;  %v1720_v33 = vrot.slane %v1718_v60, 7  ;;  %v2314_v3 = vshll.u32 %v5686_v6, 16  ;;  %v2318_v10 = vshrl.u32 %v5686_v6, 16  ;;  %v6950_v60 = vld [vmem:[#allocation2 + $0x60] ss:$12 sps:$4 sm:$0xff]   ;;  %6649 = vmatpush3.bf16.msra.mxu1 %v6991_v0 }
 0x18f   : > { %v2306_v21 = vrot.slane %v2304_v13, 5  ;;  %v2310_v17 = vrot.slane %v2308_v34, 4  ;;  %v5942_v31 = vpack.c.bf16 %v8314_v18, %v8314_v18  ;;  %v5940_v24 = vpack.c.bf16 %v8341_v58, %v8341_v58  ;;  %v6977_v13 = vld [vmem:[#allocation8 + $0x20] sm:$0xff]   ;;  %3236 = vmatmul.mubr.bf16.gmra.mxu1 %v6950_v60  ;;  %v6951_v60 = vld [vmem:[#allocation2 + $0x7c] ss:$12 sps:$4 sm:$0xff]  }
 0x190   : > { %v1714_v27 = vor.u32 %v1712_v8, %v1711_v54  ;;  %v1716_v63 = vrot.slane %v1711_v54, 4  ;;  %v1723_v47 = vor.u32 %v1721_v42, %v1720_v33  ;;  %v1725_v49 = vrot.slane %v1720_v33, 4  ;;  %6253 = vmatpush3.bf16.msra.mxu0 %v6971_v55  ;;  %v6980_v33 = vld [vmem:[#allocation8 + $0x58] sm:$0xff]   ;;  %3243 = vmatprep.mubr.bf16.mxu1 %v6951_v60  ;;  %v6996_v60 = vld [vmem:[#allocation8] sm:$0xff]  }
 0x191   : > { %v9678_v20 = vcombine.low %v7692_v50, %v7927_v41  ;;  %v9681_v57 = vcombine.low %v7916_v40, %v7692_v50  ;;  %v2307_v39 = vsel %vm8124_vm14, %v8285_v28, %v2306_v21  ;;  %v2311_v4 = vor.u32 %v2310_v17, %v2306_v21  ;;  %2123 = vst [vmem:[#allocation2 + $0xc4] sm:$0xf] %v5942_v31 }
 0x192   : > { %v2316_v41 = vrot.slane %v2314_v3, 5  ;;  %v2320_v19 = vrot.slane %v2318_v10, 4  ;;  %2121 = vst [vmem:[#allocation2 + $0xac] sm:$0xf] %v5940_v24  ;;  %v1715_v40 = vsel %vm8103_vm13, %v1707_v15, %v1714_v27  ;;  %v1724_v35 = vsel %vm8103_vm13, %v1716_v63, %v1723_v47  ;;  %2586 = vst [vmem:[#allocation2 + $0x74] sm:$0xf] %v2307_v39  ;;  %6254 = vmatprep.subr.bf16.mxu0 %v6976_v51 }
 0x193   : > { %vm8350_vm7 = vcmp.ne.s16.totalorder %v9678_v20, 0  ;;  %vm8357_vm5 = vcmp.ne.s16.totalorder %v9681_v57, 0  ;;  %v1733_v8 = vsel %vm8103_vm13, %v1725_v49, %v8292_v59  ;;  %v719_v28 = vmax.f32 %v637_v26, 0.0  ;;  %1970 = vst [vmem:[#allocation2 + $0x78] sm:$0xf] %v1715_v40  ;;  %v6986_v51 = vld [vmem:[#allocation8 + $0x10] sm:$0xff]  }
 0x194   : > { %1971 = vst [vmem:[#allocation2 + $0x84] sm:$0xf] %v1724_v35  ;;  %1972 = vst [vmem:[#allocation2 + $0x90] sm:$0xf] %v1733_v8  ;;  %v2312_v36 = vrot.slane %v2311_v4, 4  ;;  %v2321_v42 = vor.u32 %v2320_v19, %v2316_v41  ;;  %v629_v9 = vadd.f32 %v7952_v45, %v628_v30  ;;  %v1338_v15 = vsel %vm8301_vm8, %v8078_v46, 0  ;;  %6255 = vmatpush3.bf16.msra.mxu0 %v6977_v13 }
 0x195   : > { %v1743_v34 = vrot.slane %v8275_v32, 4  ;;  %v743_v59 = vpack.c.bf16 %v719_v28, %v8314_v18  ;;  %v5943_v26 = vpack.c.bf16 %v719_v28, %v719_v28  ;;  %v8379_v54 = vcombine.low %v1338_v15, %v1338_v15  ;;  %6256 = vmatprep.subr.bf16.mxu0 %v6980_v33  ;;  %v6989_v19 = vld [vmem:[#allocation8 + $0x48] sm:$0xff]  }
 0x196   : > { %v8384_v45 = vrot.slane %v2341_v14, 4  ;;  %v2317_v23 = vsel %vm8124_vm14, %v2312_v36, %v2316_v41  ;;  %v2322_v3 = vrot.slane %v2321_v42, 4  ;;  %v717_v10 = vmax.f32 %v629_v9, 0.0 }
 0x197   : > { %2587 = vst [vmem:[#allocation2 + $0x80] sm:$0xf] %v2317_v23  ;;  %v1336_v18 = vsel %vm8320_vm4, %v743_v59, 0  ;;  %v1512_v61 = vsel %vm8327_vm11, %v743_v59, 0  ;;  %2124 = vst [vmem:[#allocation2 + $0xd0] sm:$0xf] %v5943_v26  ;;  %v8416_v6 = vcombine.high %v1338_v15, %v1338_v15 }
 0x198   : > { %v8395_v21 = vsel %vm8334_vm2, %v8078_v46, 0  ;;  %v1799_v22 = vshrl.u32 %v8379_v54, 16  ;;  %v2327_v56 = vsel %vm8124_vm14, %v2322_v3, %v8287_v37  ;;  %v5627_v14 = vcombine.low %v1336_v18, %v1336_v18  ;;  %v6985_v46 = vld [vmem:[#allocation8 + $0x50] sm:$0xff]   ;;  %6257 = vmatpush3.bf16.msra.mxu0 %v6981_v16 }
 0x199   : > { %v5628_v17 = vcombine.high %v1336_v18, %v1336_v18  ;;  %v5691_v31 = vcombine.low %v1512_v61, %v1512_v61  ;;  %2588 = vst [vmem:[#allocation2 + $0x8c] sm:$0xf] %v2327_v56  ;;  %v5692_v7 = vcombine.high %v1512_v61, %v1512_v61  ;;  %v742_v24 = vpack.c.bf16 %v717_v10, %v8341_v58  ;;  %v6943_v57 = vld [vmem:[#allocation2 + $0x68] ss:$12 sps:$4 sm:$0xff]   ;;  %v7000_v15 = vld [vmem:[#allocation8 + $0x90] sm:$0xff]  }
 0x19a   : > { %v5941_v55 = vpack.c.bf16 %v717_v10, %v717_v10  ;;  %v1802_v25 = vshll.u32 %v8379_v54, 16  ;;  %v1763_v0 = vshrl.u32 %v5627_v14, 16  ;;  %v1766_v27 = vshll.u32 %v5627_v14, 16  ;;  %6613 = vmatmul.mubr.bf16.gmra.mxu0 %v6943_v57  ;;  %6258 = vmatprep.subr.bf16.mxu0 %v6985_v46  ;;  %v6957_v23 = vld [vmem:[#allocation2 + $0x94] ss:$12 sps:$4 sm:$0xff]   ;;  %v8443_v57 = vpop.f32.mrf.mxu1 }
 0x19b   : > { %v1772_v63 = vshrl.u32 %v5628_v17, 16  ;;  %v1775_v47 = vshll.u32 %v5628_v17, 16  ;;  %v2364_v49 = vshll.u32 %v5691_v31, 16  ;;  %v2368_v37 = vshrl.u32 %v5691_v31, 16  ;;  %v6956_v62 = vld [vmem:[#allocation2 + $0x78] ss:$12 sps:$4 sm:$0xff]   ;;  %6650 = vmatprep.subr.bf16.mxu1 %v7000_v15 }
 0x19c   : > { %v2374_v30 = vshll.u32 %v5692_v7, 16  ;;  %v2378_v20 = vshrl.u32 %v5692_v7, 16  ;;  %2122 = vst [vmem:[#allocation2 + $0xb8] sm:$0xf] %v5941_v55  ;;  %v1765_v39 = vrot.slane %v1763_v0, 7  ;;  %v1335_v58 = vsel %vm8350_vm7, %v742_v24, 0  ;;  %3244 = vmatmul.mubr.bf16.gmra.mxu1 %v6956_v62  ;;  %6259 = vmatpush3.bf16.msra.mxu0 %v6986_v51 }
 0x19d   : > { %v8403_v4 = vrot.slane %v1772_v63, 7  ;;  %v1511_v41 = vsel %vm8357_vm5, %v742_v24, 0  ;;  %v8409_v40 = vrot.slane %v2364_v49, 5  ;;  %v2370_v35 = vrot.slane %v2368_v37, 4  ;;  %3251 = vmatprep.mubr.bf16.mxu1 %v6957_v23  ;;  %v6990_v24 = vld [vmem:[#allocation8 + $0x8] sm:$0xff]   ;;  %6260 = vmatprep.subr.bf16.mxu0 %v6989_v19 }
 0x19e   : > { %v8411_v8 = vrot.slane %v2374_v30, 5  ;;  %v8413_v28 = vrot.slane %v2378_v20, 4  ;;  %v1770_v36 = vrot.slane %v1765_v39, 4  ;;  %v8418_v9 = vrot.slane %v1799_v22, 7  ;;  %6651 = vmatpush3.bf16.msra.mxu1 %v7000_v15 }
 0x19f   : > { %v1777_v42 = vor.u32 %v1775_v47, %v8403_v4  ;;  %v1768_v13 = vor.u32 %v1766_v27, %v1765_v39  ;;  %v2371_v59 = vor.u32 %v2370_v35, %v8409_v40  ;;  %v5625_v26 = vcombine.low %v1335_v58, %v1335_v58 }
 0x1a0   : > { %v5626_v33 = vcombine.high %v1335_v58, %v1335_v58  ;;  %v1779_v10 = vrot.slane %v8403_v4, 4  ;;  %v5689_v18 = vcombine.low %v1511_v41, %v1511_v41  ;;  %v5690_v61 = vcombine.high %v1511_v41, %v1511_v41  ;;  %v6948_v56 = vld [vmem:[#allocation2 + $0x80] ss:$12 sps:$4 sm:$0xff]   ;;  %6261 = vmatpush3.bf16.msra.mxu0 %v6990_v24 }
 0x1a1   : > { %v1778_v3 = vsel %vm8103_vm13, %v1770_v36, %v1777_v42  ;;  %v2372_v22 = vrot.slane %v2371_v59, 4  ;;  %v2381_v14 = vor.u32 %v8413_v28, %v8411_v8  ;;  %v1745_v17 = vshrl.u32 %v5625_v26, 16  ;;  %6616 = vmatprep.mubr.bf16.mxu0 %v6948_v56  ;;  %v6963_v59 = vld [vmem:[#allocation2 + $0x90] ss:$12 sps:$4 sm:$0xff]  }
 0x1a2   : > { %1977 = vst [vmem:[#allocation2 + $0xcc] sm:$0xf] %v1778_v3  ;;  %v1748_v31 = vshll.u32 %v5625_v26, 16  ;;  %v9684_v16 = vcombine.low %v7692_v50, %v7970_v48  ;;  %v1754_v55 = vshrl.u32 %v5626_v33, 16  ;;  %v1757_v46 = vshll.u32 %v5626_v33, 16  ;;  %v6995_v48 = vld [vmem:[#allocation8 + $0x40] sm:$0xff]  }
 0x1a3   : > { %v2344_v0 = vshll.u32 %v5689_v18, 16  ;;  %v2348_v27 = vshrl.u32 %v5689_v18, 16  ;;  %v9687_v63 = vcombine.low %v7943_v43, %v7692_v50  ;;  %v2377_v49 = vsel %vm8124_vm14, %v2372_v22, %v8411_v8  ;;  %6262 = vmatprep.subr.bf16.mxu0 %v6995_v48  ;;  %v8455_v18 = vpop.f32.mrf.mxu1 }
 0x1a4   : > { %vm8429_vm0 = vcmp.ne.s16.totalorder %v9684_v16, 0  ;;  %v1747_v37 = vrot.slane %v1745_v17, 7  ;;  %v2354_v30 = vshll.u32 %v5690_v61, 16  ;;  %v2358_v20 = vshrl.u32 %v5690_v61, 16  ;;  %2593 = vst [vmem:[#allocation2 + $0xc8] sm:$0xf] %v2377_v49  ;;  %3252 = vmatmul.mubr.bf16.gmra.mxu1 %v6963_v59  ;;  %6263 = vmatpush3.bf16.msra.mxu0 %v6996_v60 }
 0x1a5   : > { %vm8436_vm10 = vcmp.ne.s16.totalorder %v9687_v63, 0  ;;  %v1756_v51 = vrot.slane %v1754_v55, 7  ;;  %v2346_v43 = vrot.slane %v2344_v0, 5  ;;  %v2350_v39 = vrot.slane %v2348_v27, 4 }
 0x1a6   : > { %v1806_v58 = vrot.slane %v8418_v9, 4  ;;  %v1750_v41 = vor.u32 %v1748_v31, %v1747_v37  ;;  %v1752_v19 = vrot.slane %v1747_v37, 4  ;;  %v2356_v35 = vrot.slane %v2354_v30, 5 }
 0x1a7   : > { %v2360_v28 = vrot.slane %v2358_v20, 4  ;;  %v1759_v8 = vor.u32 %v1757_v46, %v1756_v51  ;;  %v1761_v36 = vrot.slane %v1756_v51, 4  ;;  %v2347_v42 = vsel %vm8124_vm14, %v8384_v45, %v2346_v43 }
 0x1a8   : > { %v2351_v62 = vor.u32 %v2350_v39, %v2346_v43  ;;  %v1751_v26 = vsel %vm8103_vm13, %v1743_v34, %v1750_v41  ;;  %2590 = vst [vmem:[#allocation2 + $0xa4] sm:$0xf] %v2347_v42  ;;  %v1808_v23 = vshrl.u32 %v8416_v6, 16  ;;  %v1811_v3 = vshll.u32 %v8416_v6, 16  ;;  %v6964_v42 = vld [vmem:[#allocation2 + $0xac] ss:$12 sps:$4 sm:$0xff]  }
 0x1a9   : > { %v2361_v33 = vor.u32 %v2360_v28, %v2356_v35  ;;  %v1760_v61 = vsel %vm8103_vm13, %v1752_v19, %v1759_v8  ;;  %v1769_v45 = vsel %vm8103_vm13, %v1761_v36, %v1768_v13  ;;  %1974 = vst [vmem:[#allocation2 + $0xa8] sm:$0xf] %v1751_v26  ;;  %v5695_v32 = vcombine.low %v8395_v21, %v8395_v21  ;;  %v7007_v28 = vld [vmem:[#allocation8 + $0x88] sm:$0xff]  }
 0x1aa   : > { %v2352_v56 = vrot.slane %v2351_v62, 4  ;;  %1975 = vst [vmem:[#allocation2 + $0xb4] sm:$0xf] %v1760_v61  ;;  %1976 = vst [vmem:[#allocation2 + $0xc0] sm:$0xf] %v1769_v45  ;;  %v8463_v15 = vrot.slane %v1808_v23, 7  ;;  %v5696_v6 = vcombine.high %v8395_v21, %v8395_v21  ;;  %v744_v22 = vpack.c.bf16 %v8092_v44, %v8062_v12  ;;  %v8479_v12 = vpop.f32.mrf.mxu1  ;;  %6652 = vmatprep.subr.bf16.mxu1 %v7007_v28 }
 0x1ab   : > { %v2362_v34 = vrot.slane %v2361_v33, 4  ;;  %v2404_v17 = vshll.u32 %v5695_v32, 16  ;;  %v2408_v31 = vshrl.u32 %v5695_v32, 16  ;;  %v5945_v16 = vpack.c.bf16 %v8092_v44, %v8092_v44  ;;  %3259 = vmatprep.mubr.bf16.mxu1 %v6964_v42  ;;  %6653 = vmatpush3.bf16.msra.mxu1 %v7007_v28 }
 0x1ac   : > { %v2357_v13 = vsel %vm8124_vm14, %v2352_v56, %v2356_v35  ;;  %v8473_v24 = vrot.slane %v2381_v14, 4  ;;  %v1813_v21 = vor.u32 %v1811_v3, %v8463_v15  ;;  %v2414_v46 = vshll.u32 %v5696_v6, 16  ;;  %v6586_v35 = vpop.f32.mrf.mxu1 }
 0x1ad   : > { %v2367_v55 = vsel %vm8124_vm14, %v2362_v34, %v8409_v40  ;;  %2591 = vst [vmem:[#allocation2 + $0xb0] sm:$0xf] %v2357_v13  ;;  %v8481_v0 = vrot.slane %v2404_v17, 5  ;;  %v2410_v27 = vrot.slane %v2408_v31, 4  ;;  %v2418_v63 = vshrl.u32 %v5696_v6, 16 }
 0x1ae   : > { %2592 = vst [vmem:[#allocation2 + $0xbc] sm:$0xf] %v2367_v55  ;;  %v1337_v44 = vsel %vm8429_vm0, %v744_v22, 0  ;;  %2126 = vst [vmem:[#allocation2 + $0xe8] sm:$0xf] %v5945_v16  ;;  %v1814_v14 = vsel %vm8103_vm13, %v1806_v58, %v1813_v21  ;;  %v8487_v48 = vrot.slane %v2414_v46, 5  ;;  %v1804_v60 = vor.u32 %v1802_v25, %v8418_v9  ;;  %v673_v17 = vpop.f32.mrf.mxu1 }
 0x1af   : > { %v1513_v40 = vsel %vm8436_vm10, %v744_v22, 0  ;;  %v5629_v49 = vcombine.low %v1337_v44, %v1337_v44  ;;  %1981 = vst [vmem:[#allocation2 + $0xfc] sm:$0xf] %v1814_v14  ;;  %v2411_v37 = vor.u32 %v2410_v27, %v8481_v0  ;;  %v8492_v30 = vrot.slane %v2418_v63, 4  ;;  %v6949_v39 = vld [vmem:[#allocation2 + $0x98] ss:$12 sps:$4 sm:$0xff]  }
 0x1b0   : > { %v5630_v20 = vcombine.high %v1337_v44, %v1337_v44  ;;  %v5693_v51 = vcombine.low %v1513_v40, %v1513_v40  ;;  %v9690_v7 = vand.u32 15, %v8059_v1  ;;  %v5694_v19 = vcombine.high %v1513_v40, %v1513_v40  ;;  %6617 = vmatmul.mubr.bf16.gmra.mxu0 %v6949_v39  ;;  %v9702_v21 = vld [vmem:[#allocation18_spill] sm:$0xff] }
 0x1b1   : > { %v1781_v58 = vshrl.u32 %v5629_v49, 16  ;;  %v1784_v41 = vshll.u32 %v5629_v49, 16  ;;  %v8501_v47 = vmax.f32 %v8095_v5, 0.0  ;;  %v2412_v8 = vrot.slane %v2411_v37, 4  ;;  %v6973_v23 = vld [vmem:[#allocation2 + $0xa8] ss:$12 sps:$4 sm:$0xff]  }
 0x1b2   : > { %vm8496_vm12 = vcmp.ne.s32.totalorder %v9690_v7, 0  ;;  %v1790_v36 = vshrl.u32 %v5630_v20, 16  ;;  %v1793_v1 = vshll.u32 %v5630_v20, 16  ;;  %v2384_v59 = vshll.u32 %v5693_v51, 16  ;;  %3260 = vmatmul.mubr.bf16.gmra.mxu1 %v6973_v23  ;;  %v6974_v49 = vld [vmem:[#allocation2 + $0xc4] ss:$12 sps:$4 sm:$0xff]  }
 0x1b3   : > { %v1783_v62 = vrot.slane %v1781_v58, 7  ;;  %v2388_v26 = vshrl.u32 %v5693_v51, 16  ;;  %v2394_v33 = vshll.u32 %v5694_v19, 16  ;;  %v2417_v5 = vsel %vm8124_vm14, %v2412_v8, %v8487_v48  ;;  %3267 = vmatprep.mubr.bf16.mxu1 %v6974_v49  ;;  %vm1401_vm11 = vmpackc.low %vm8496_vm12, %vm8496_vm12 }
 0x1b4   : > { %v2421_v3 = vor.u32 %v8492_v30, %v8487_v48  ;;  %v1792_v54 = vrot.slane %v1790_v36, 7  ;;  %v2398_v25 = vshrl.u32 %v5694_v19, 16  ;;  %v9693_v9 = vcombine.low %v7692_v50, %v7979_v52  ;;  %2597 = vst [vmem:[#allocation2 + $0xf8] sm:$0xf] %v2417_v5  ;;  %v9706_v48 = vld [vmem:[#allocation20_spill] sm:$0xff] }
 0x1b5   : > { %v9696_v45 = vcombine.low %v7987_v53, %v7692_v50  ;;  %v9699_v32 = vcombine.low %v7692_v50, %v8047_v11  ;;  %v1786_v52 = vor.u32 %v1784_v41, %v1783_v62  ;;  %v1788_v6 = vrot.slane %v1783_v62, 4  ;;  %v6953_v27 = vld [vmem:[#allocation2 + $0xb0] ss:$12 sps:$4 sm:$0xff]   ;;  %v6587_v41 = vpop.f32.mrf.mxu1 }
 0x1b6   : > { %vm8514_vm9 = vcmp.ne.s16.totalorder %v9693_v9, 0  ;;  %v2386_v22 = vrot.slane %v2384_v59, 5  ;;  %v2390_v13 = vrot.slane %v2388_v26, 4  ;;  %v1795_v53 = vor.u32 %v1793_v1, %v1792_v54  ;;  %6620 = vmatprep.mubr.bf16.mxu0 %v6953_v27  ;;  %v8582_v9 = vld [vmem:[#allocation2] sm:$0xff] }
 0x1b7   : > { %vm8521_vm1 = vcmp.ne.s16.totalorder %v9696_v45, 0  ;;  %vm8528_vm8 = vcmp.ne.s16.totalorder %v9699_v32, 0  ;;  %v1797_v31 = vrot.slane %v1792_v54, 4  ;;  %v2396_v16 = vrot.slane %v2394_v33, 5 }
 0x1b8   : > { %v2400_v55 = vrot.slane %v2398_v25, 4  ;;  %v9703_v11 = vcombine.low %v9702_v21, %v7692_v50  ;;  %v1787_v63 = vsel %vm8103_vm13, %v1779_v10, %v1786_v52  ;;  %v2387_v44 = vsel %vm8124_vm14, %v8473_v24, %v2386_v22  ;;  %v8555_v10 = vld [vmem:[%s9499_s2] ss:$0 sm:$0xff] }
 0x1b9   : > { %v2391_v14 = vor.u32 %v2390_v13, %v2386_v22  ;;  %v5950_v40 = vpack.c.bf16 %v8501_v47, %v8501_v47  ;;  %v1796_v37 = vsel %vm8103_vm13, %v1788_v6, %v1795_v53  ;;  %v1805_v20 = vsel %vm8103_vm13, %v1797_v31, %v1804_v60  ;;  %1978 = vst [vmem:[#allocation2 + $0xd8] sm:$0xf] %v1787_v63 }
 0x1ba   : > { %vm8535_vm4 = vcmp.ne.s16.totalorder %v9703_v11, 0  ;;  %v2401_v4 = vor.u32 %v2400_v55, %v2396_v16  ;;  %2594 = vst [vmem:[#allocation2 + $0xd4] sm:$0xf] %v2387_v44  ;;  %v658_v24 = vadd.f32 %v8555_v10, %v8443_v57  ;;  %1979 = vst [vmem:[#allocation2 + $0xe4] sm:$0xf] %v1796_v37  ;;  %v669_v7 = vadd.f32 %v8555_v10, %v8455_v18  ;;  %v9710_v44 = vld [vmem:[#allocation19_spill] sm:$0xff] }
 0x1bb   : > { %1980 = vst [vmem:[#allocation2 + $0xf0] sm:$0xf] %v1805_v20  ;;  %v2392_v51 = vrot.slane %v2391_v14, 4  ;;  %2131 = vst [vmem:[#allocation2 + $0x124] sm:$0xf] %v5950_v40  ;;  %v661_v39 = vadd.f32 %v8555_v10, %v8479_v12  ;;  %v682_v58 = vadd.f32 %v8555_v10, %v6586_v35  ;;  %v674_v60 = vadd.f32 %v8555_v10, %v673_v17 }
 0x1bc   : > { %v2402_v19 = vrot.slane %v2401_v4, 4  ;;  %v724_v28 = vmax.f32 %v658_v24, 0.0  ;;  %v685_v57 = vadd.f32 %v8555_v10, %v6587_v41  ;;  %v727_v36 = vmax.f32 %v669_v7, 0.0  ;;  %v6982_v18 = vld [vmem:[#allocation2 + $0xc0] ss:$12 sps:$4 sm:$0xff]  }
 0x1bd   : > { %v2397_v8 = vsel %vm8124_vm14, %v2392_v51, %v2396_v16  ;;  %v725_v1 = vmax.f32 %v661_v39, 0.0  ;;  %v730_v42 = vmax.f32 %v682_v58, 0.0  ;;  %v8574_v62 = vmax.f32 %v674_v60, 0.0  ;;  %3268 = vmatmul.mubr.bf16.gmra.mxu1 %v6982_v18  ;;  %v8619_v16 = vld [vmem:[#allocation2 + $0xdc] ss:$12 sps:$4 sm:$0xff]  }
 0x1be   : > { %v2407_v12 = vsel %vm8124_vm14, %v2402_v19, %v8481_v0  ;;  %2595 = vst [vmem:[#allocation2 + $0xe0] sm:$0xf] %v2397_v8  ;;  %v5948_v35 = vpack.c.bf16 %v724_v28, %v724_v28  ;;  %v8576_v59 = vmax.f32 %v685_v57, 0.0  ;;  %v747_v26 = vpack.c.bf16 %v727_v36, %v8501_v47  ;;  %v6993_v40 = vld [vmem:[#allocation2 + $0xf4] ss:$12 sps:$4 sm:$0xff]   ;;  %3275 = vmatprep.mubr.bf16.mxu1 %v8619_v16 }
 0x1bf   : > { %2596 = vst [vmem:[#allocation2 + $0xec] sm:$0xf] %v2407_v12  ;;  %v5951_v33 = vpack.c.bf16 %v727_v36, %v727_v36  ;;  %v746_v23 = vpack.c.bf16 %v725_v1, %v724_v28  ;;  %v5949_v5 = vpack.c.bf16 %v725_v1, %v725_v1  ;;  %v1815_v54 = vrot.slane %v8463_v15, 4 }
 0x1c0   : > { %2129 = vst [vmem:[#allocation2 + $0x10c] sm:$0xf] %v5948_v35  ;;  %v5954_v25 = vpack.c.bf16 %v730_v42, %v730_v42  ;;  %v5952_v0 = vpack.c.bf16 %v8574_v62, %v8574_v62  ;;  %v8590_v47 = vsel %vm1401_vm11, 65537, %v8582_v9  ;;  %v8595_v45 = vrot.slane %v2421_v3, 4 }
 0x1c1   : > { %v1340_v32 = vsel %vm8514_vm9, %v747_v26, 0  ;;  %v1516_v52 = vsel %vm8521_vm1, %v747_v26, 0  ;;  %2132 = vst [vmem:[#allocation2 + $0x130] sm:$0xf] %v5951_v33  ;;  %v1339_v6 = vsel %vm8528_vm8, %v746_v23, 0  ;;  %v9707_v30 = vcombine.low %v7692_v50, %v9706_v48 }
 0x1c2   : > { %2130 = vst [vmem:[#allocation2 + $0x118] sm:$0xf] %v5949_v5  ;;  %v5635_v43 = vcombine.low %v1340_v32, %v1340_v32  ;;  %v5636_v22 = vcombine.high %v1340_v32, %v1340_v32  ;;  %v5699_v13 = vcombine.low %v1516_v52, %v1516_v52  ;;  %v5700_v17 = vcombine.high %v1516_v52, %v1516_v52  ;;  %v8610_v61 = vld [vmem:[#allocation2 + $0xc8] ss:$12 sps:$4 sm:$0xff]   ;;  %v6992_v55 = vld [vmem:[#allocation2 + $0xd8] ss:$12 sps:$4 sm:$0xff]  }
 0x1c3   : > { %2135 = vst [vmem:[#allocation2 + $0x154] sm:$0xf] %v5954_v25  ;;  %2133 = vst [vmem:[#allocation2 + $0x13c] sm:$0xf] %v5952_v0  ;;  %vm8606_vm2 = vcmp.ne.s16.totalorder %v9707_v30, 0  ;;  %v1515_v56 = vsel %vm8535_vm4, %v746_v23, 0  ;;  %v5633_v34 = vcombine.low %v1339_v6, %v1339_v6  ;;  %v8615_v53 = vpack.c.bf16 %v8576_v59, %v730_v42  ;;  %6621 = vmatmul.mubr.bf16.gmra.mxu0 %v8610_v61 }
 0x1c4   : > { %v5609_v31 = vcombine.low %v8590_v47, %v7692_v50  ;;  %v1835_v21 = vshrl.u32 %v5635_v43, 16  ;;  %v1844_v11 = vshrl.u32 %v5636_v22, 16  ;;  %v1847_v27 = vshll.u32 %v5636_v22, 16  ;;  %v7014_v42 = vld [vmem:[#allocation8 + $0x80] sm:$0xff]  }
 0x1c5   : > { %v5634_v63 = vcombine.high %v1339_v6, %v1339_v6  ;;  %v9711_v14 = vcombine.low %v9710_v44, %v7692_v50  ;;  %v2444_v49 = vshll.u32 %v5699_v13, 16  ;;  %v2448_v37 = vshrl.u32 %v5699_v13, 16  ;;  %3276 = vmatmul.mubr.bf16.gmra.mxu1 %v6992_v55  ;;  %6654 = vmatprep.subr.bf16.mxu1 %v7014_v42  ;;  %v676_v55 = vpop.f32.mrf.mxu1 }
 0x1c6   : > { %v2454_v20 = vshll.u32 %v5700_v17, 16  ;;  %v2458_v4 = vshrl.u32 %v5700_v17, 16  ;;  %v1837_v24 = vrot.slane %v1835_v21, 7  ;;  %v8630_v51 = vrot.slane %v1844_v11, 7  ;;  %v8634_v60 = vld [vmem:[#allocation2 + $0xe0] ss:$12 sps:$4 sm:$0xff]   ;;  %3283 = vmatprep.mubr.bf16.mxu1 %v6993_v40  ;;  %6655 = vmatpush3.bf16.msra.mxu1 %v7014_v42 }
 0x1c7   : > { %vm8624_vm7 = vcmp.ne.s16.totalorder %v9711_v14, 0  ;;  %v1817_v7 = vshrl.u32 %v5633_v34, 16  ;;  %v5697_v39 = vcombine.low %v1515_v56, %v1515_v56  ;;  %v1838_v58 = vshll.u32 %v5635_v43, 16  ;;  %6624 = vmatprep.mubr.bf16.mxu0 %v8634_v60  ;;  %v8655_v21 = vld [vmem:[#allocation2 + $0xf0] ss:$12 sps:$4 sm:$0xff]   ;;  %v6590_v46 = vpop.f32.mrf.mxu1  ;;  %v8677_v42 = vld [vmem:[#allocation8 + $0x238] sm:$0xff]  }
 0x1c8   : > { %v8632_v41 = vrot.slane %v2444_v49, 5  ;;  %v2450_v19 = vrot.slane %v2448_v37, 4  ;;  %v1820_v28 = vshll.u32 %v5633_v34, 16  ;;  %v1842_v57 = vrot.slane %v1837_v24, 4  ;;  %6688 = vmatprep.subr.bf16.mxu0 %v8677_v42 }
 0x1c9   : > { %v1849_v8 = vor.u32 %v1847_v27, %v8630_v51  ;;  %v8637_v36 = vrot.slane %v2454_v20, 5  ;;  %v5698_v1 = vcombine.high %v1515_v56, %v1515_v56  ;;  %v8640_v12 = vrot.slane %v2458_v4, 4 }
 0x1ca   : > { %v2451_v18 = vor.u32 %v2450_v19, %v8632_v41  ;;  %v1819_v35 = vrot.slane %v1817_v7, 7  ;;  %v1826_v26 = vshrl.u32 %v5634_v63, 16  ;;  %v1829_v23 = vshll.u32 %v5634_v63, 16 }
 0x1cb   : > { %v1850_v33 = vsel %vm8103_vm13, %v1842_v57, %v1849_v8  ;;  %v2424_v5 = vshll.u32 %v5697_v39, 16  ;;  %v2428_v25 = vshrl.u32 %v5697_v39, 16  ;;  %v1840_v0 = vor.u32 %v1838_v58, %v1837_v24 }
 0x1cc   : > { %1985 = vst [vmem:[#allocation2 + $0x12c] sm:$0xf] %v1850_v33  ;;  %v2452_v32 = vrot.slane %v2451_v18, 4  ;;  %v1822_v52 = vor.u32 %v1820_v28, %v1819_v35  ;;  %v1824_v6 = vrot.slane %v1819_v35, 4  ;;  %v1828_v43 = vrot.slane %v1826_v26, 7  ;;  %v9714_v35 = vld [vmem:[#allocation17_spill] sm:$0xff] }
 0x1cd   : > { %v2426_v22 = vrot.slane %v2424_v5, 5  ;;  %v2430_v13 = vrot.slane %v2428_v25, 4  ;;  %v2434_v17 = vshll.u32 %v5698_v1, 16  ;;  %v2438_v56 = vshrl.u32 %v5698_v1, 16  ;;  %3284 = vmatmul.mubr.bf16.gmra.mxu1 %v8655_v21  ;;  %v7020_v1 = vld [vmem:[#allocation8 + $0x1f8] sm:$0xff]  }
 0x1ce   : > { %v2457_v48 = vsel %vm8124_vm14, %v2452_v32, %v8637_v36  ;;  %v1823_v30 = vsel %vm8103_vm13, %v1815_v54, %v1822_v52  ;;  %v1342_v34 = vsel %vm8606_vm2, %v8615_v53, 0  ;;  %v1831_v11 = vor.u32 %v1829_v23, %v1828_v43  ;;  %6384 = vmatprep.subr.bf16.mxu1 %v7020_v1 }
 0x1cf   : > { %2601 = vst [vmem:[#allocation2 + $0x128] sm:$0xf] %v2457_v48  ;;  %v1833_v27 = vrot.slane %v1828_v43, 4  ;;  %1982 = vst [vmem:[#allocation2 + $0x108] sm:$0xf] %v1823_v30  ;;  %v2427_v63 = vsel %vm8124_vm14, %v8595_v45, %v2426_v22  ;;  %v2431_v15 = vor.u32 %v2430_v13, %v2426_v22  ;;  %v2436_v44 = vrot.slane %v2434_v17, 5 }
 0x1d0   : > { %v2440_v14 = vrot.slane %v2438_v56, 4  ;;  %2598 = vst [vmem:[#allocation2 + $0x104] sm:$0xf] %v2427_v63  ;;  %v1518_v54 = vsel %vm8624_vm7, %v8615_v53, 0  ;;  %v5639_v3 = vcombine.low %v1342_v34, %v1342_v34  ;;  %v1832_v40 = vsel %vm8103_vm13, %v1824_v6, %v1831_v11 }
 0x1d1   : > { %v1841_v49 = vsel %vm8103_vm13, %v1833_v27, %v1840_v0  ;;  %v2432_v37 = vrot.slane %v2431_v15, 4  ;;  %v5640_v20 = vcombine.high %v1342_v34, %v1342_v34  ;;  %v2461_v45 = vor.u32 %v8640_v12, %v8637_v36  ;;  %1983 = vst [vmem:[#allocation2 + $0x114] sm:$0xf] %v1832_v40  ;;  %v689_v0 = vpop.f32.mrf.mxu1  ;;  %v8707_v34 = vld [vmem:[#allocation2 + $0x10c] ss:$12 sps:$4 sm:$0xff]  }
 0x1d2   : > { %1984 = vst [vmem:[#allocation2 + $0x120] sm:$0xf] %v1841_v49  ;;  %v2441_v4 = vor.u32 %v2440_v14, %v2436_v44  ;;  %v1871_v24 = vshrl.u32 %v5639_v3, 16  ;;  %v5955_v53 = vpack.c.bf16 %v8576_v59, %v8576_v59  ;;  %v5703_v19 = vcombine.low %v1518_v54, %v1518_v54  ;;  %3291 = vmatprep.mubr.bf16.mxu1 %v8707_v34  ;;  %v8720_v40 = vld [vmem:[#allocation2 + $0x124] ss:$12 sps:$4 sm:$0xff]  }
 0x1d3   : > { %v2437_v7 = vsel %vm8124_vm14, %v2432_v37, %v2436_v44  ;;  %v1880_v39 = vshrl.u32 %v5640_v20, 16  ;;  %v1883_v58 = vshll.u32 %v5640_v20, 16  ;;  %v8674_v8 = vcombine.high %v1518_v54, %v1518_v54  ;;  %v6591_v63 = vpop.f32.mrf.mxu1 }
 0x1d4   : > { %v2442_v28 = vrot.slane %v2441_v4, 4  ;;  %2599 = vst [vmem:[#allocation2 + $0x110] sm:$0xf] %v2437_v7  ;;  %v1873_v57 = vrot.slane %v1871_v24, 7  ;;  %2136 = vst [vmem:[#allocation2 + $0x160] sm:$0xf] %v5955_v53  ;;  %v677_v36 = vadd.f32 %v8555_v10, %v676_v55  ;;  %v698_v30 = vadd.f32 %v8555_v10, %v6590_v46 }
 0x1d5   : > { %v8679_v18 = vrot.slane %v1880_v39, 7  ;;  %v2484_v59 = vshll.u32 %v5703_v19, 16  ;;  %v2488_v12 = vshrl.u32 %v5703_v19, 16  ;;  %v778_v26 = vadd.s32 200, %v9714_v35  ;;  %v692_v38 = vpop.f32.mrf.mxu1 }
 0x1d6   : > { %v2447_v33 = vsel %vm8124_vm14, %v2442_v28, %v8632_v41  ;;  %v1878_v23 = vrot.slane %v1873_v57, 4  ;;  %v2494_v5 = vshll.u32 %v8674_v8, 16  ;;  %vm8689_vm5 = vcmp.ne.s16.totalorder %v5609_v31, 0 }
 0x1d7   : > { %2600 = vst [vmem:[#allocation2 + $0x11c] sm:$0xf] %v2447_v33  ;;  %v1874_v32 = vshll.u32 %v5639_v3, 16  ;;  %v1885_v52 = vor.u32 %v1883_v58, %v8679_v18  ;;  %v8695_v6 = vrot.slane %v2484_v59, 5  ;;  %v2490_v41 = vrot.slane %v2488_v12, 4 }
 0x1d8   : > { %v1851_v43 = vrot.slane %v8630_v51, 4  ;;  %v8698_v22 = vrot.slane %v2461_v45, 4  ;;  %v729_v47 = vmax.f32 %v677_v36, 0.0  ;;  %v964_v31 = vand.u32 15, %v778_v26  ;;  %v8700_v13 = vld [vmem:[#allocation2 + $0xf8] ss:$12 sps:$4 sm:$0xff]  }
 0x1d9   : > { %v1886_v17 = vsel %vm8103_vm13, %v1878_v23, %v1885_v52  ;;  %v2491_v48 = vor.u32 %v2490_v41, %v8695_v6  ;;  %v690_v56 = vadd.f32 %v8555_v10, %v689_v0  ;;  %v8709_v55 = vrot.slane %v2494_v5, 5  ;;  %6625 = vmatmul.mubr.bf16.gmra.mxu0 %v8700_v13  ;;  %v8713_v15 = vld [vmem:[#allocation2 + $0x108] ss:$12 sps:$4 sm:$0xff]   ;;  %v8743_v0 = vld [vmem:[#allocation2 + $0x120] ss:$12 sps:$4 sm:$0xff]  }
 0x1da   : > { %1989 = vst [vmem:[#allocation2 + $0x15c] sm:$0xf] %v1886_v17  ;;  %v748_v11 = vpack.c.bf16 %v729_v47, %v8574_v62  ;;  %vm1194_vm0 = vcmp.ne.s32.totalorder %v964_v31, 15  ;;  %v5953_v27 = vpack.c.bf16 %v729_v47, %v729_v47  ;;  %v8715_v44 = vor.u32 %v1874_v32, %v1873_v57  ;;  %3292 = vmatmul.mubr.bf16.gmra.mxu1 %v8713_v15 }
 0x1db   : > { %v2492_v14 = vrot.slane %v2491_v48, 4  ;;  %v2498_v54 = vshrl.u32 %v8674_v8, 16  ;;  %vm1226_vm10 = vmpackc.low %vm1194_vm0, %vm1194_vm0  ;;  %v701_v3 = vadd.f32 %v8555_v10, %v6591_v63  ;;  %v734_v37 = vmax.f32 %v698_v30, 0.0  ;;  %3299 = vmatprep.mubr.bf16.mxu1 %v8720_v40 }
 0x1dc   : > { %v1258_v62 = vsel %vm1226_vm10, 65537, %v8582_v9  ;;  %v1517_v49 = vsel %vm8689_vm5, %v748_v11, 0  ;;  %2134 = vst [vmem:[#allocation2 + $0x148] sm:$0xf] %v5953_v27  ;;  %v8725_v20 = vmax.f32 %v690_v56, 0.0  ;;  %v783_v58 = vadd.s32 240, %v9714_v35 }
 0x1dd   : > { %v2497_v45 = vsel %vm8124_vm14, %v2492_v14, %v8709_v55  ;;  %v5593_v4 = vcombine.low %v7692_v50, %v1258_v62  ;;  %v5701_v24 = vcombine.low %v1517_v49, %v1517_v49  ;;  %v5702_v53 = vcombine.high %v1517_v49, %v1517_v49 }
 0x1de   : > { %2605 = vst [vmem:[#allocation2 + $0x158] sm:$0xf] %v2497_v45  ;;  %v5958_v46 = vpack.c.bf16 %v734_v37, %v734_v37  ;;  %v5956_v7 = vpack.c.bf16 %v8725_v20, %v8725_v20  ;;  %v8735_v39 = vmax.f32 %v701_v3, 0.0  ;;  %v8738_v19 = vld [vmem:[#allocation2 + $0x110] ss:$12 sps:$4 sm:$0xff]   ;;  %v784_v26 = vadd.s32 248, %v9714_v35 }
 0x1df   : > { %vm1325_vm12 = vcmp.ne.s16.totalorder %v5593_v4, 0  ;;  %v2464_v28 = vshll.u32 %v5701_v24, 16  ;;  %v2468_v57 = vshrl.u32 %v5701_v24, 16  ;;  %v2474_v36 = vshll.u32 %v5702_v53, 16  ;;  %6628 = vmatprep.mubr.bf16.mxu0 %v8738_v19 }
 0x1e0   : > { %v1341_v1 = vsel %vm1325_vm12, %v748_v11, 0  ;;  %v2478_v59 = vshrl.u32 %v5702_v53, 16  ;;  %2139 = vst [vmem:[#allocation2 + $0x184] sm:$0xf] %v5958_v46  ;;  %2137 = vst [vmem:[#allocation2 + $0x16c] sm:$0xf] %v5956_v7  ;;  %v751_v12 = vpack.c.bf16 %v8735_v39, %v734_v37 }
 0x1e1   : > { %v5637_v33 = vcombine.low %v1341_v1, %v1341_v1  ;;  %v5638_v23 = vcombine.high %v1341_v1, %v1341_v1  ;;  %v2466_v5 = vrot.slane %v2464_v28, 5  ;;  %v2470_v25 = vrot.slane %v2468_v57, 4  ;;  %v1545_v46 = vld [vmem:[#allocation2 + $0x18c] sm:$0x88] }
 0x1e2   : > { %v2476_v32 = vrot.slane %v2474_v36, 5  ;;  %v2480_v52 = vrot.slane %v2478_v59, 4  ;;  %v999_v41 = vand.u32 15, %v783_v58  ;;  %v1006_v47 = vand.u32 15, %v784_v26  ;;  %3300 = vmatmul.mubr.bf16.gmra.mxu1 %v8743_v0 }
 0x1e3   : > { %v1853_v31 = vshrl.u32 %v5637_v33, 16  ;;  %v1856_v17 = vshll.u32 %v5637_v33, 16  ;;  %v1862_v48 = vshrl.u32 %v5638_v23, 16  ;;  %v1865_v30 = vshll.u32 %v5638_v23, 16 }
 0x1e4   : > { %v2467_v56 = vsel %vm8124_vm14, %v8698_v22, %v2466_v5  ;;  %v2471_v11 = vor.u32 %v2470_v25, %v2466_v5  ;;  %v2481_v27 = vor.u32 %v2480_v52, %v2476_v32  ;;  %vm1200_vm9 = vcmp.ne.s32.totalorder %v1006_v47, 15 }
 0x1e5   : > { %v1855_v63 = vrot.slane %v1853_v31, 7  ;;  %v1864_v14 = vrot.slane %v1862_v48, 7  ;;  %2602 = vst [vmem:[#allocation2 + $0x134] sm:$0xf] %v2467_v56  ;;  %vm1232_vm1 = vmpackc.low %vm1200_vm9, %vm1200_vm9  ;;  %vm8749_vm8 = vcmp.ne.s32.totalorder %v999_v41, 0  ;;  %vm1541_vm4 = vcmask 1047559  }
 0x1e6   : > { %v2472_v62 = vrot.slane %v2471_v11, 4  ;;  %v2482_v49 = vrot.slane %v2481_v27, 4  ;;  %v1264_v37 = vsel %vm1232_vm1, 65537, %v8582_v9  ;;  %vm1407_vm11 = vmpackc.low %vm8749_vm8, %vm8749_vm8  ;;  %vm1542_vm2 = vsmask.f32 7966 }
 0x1e7   : > { %v1858_v22 = vor.u32 %v1856_v17, %v1855_v63  ;;  %v1860_v45 = vrot.slane %v1855_v63, 4  ;;  %v1867_v4 = vor.u32 %v1865_v30, %v1864_v14  ;;  %v1869_v24 = vrot.slane %v1864_v14, 4  ;;  %vm8757_vm7 = vmand %vm1541_vm4, %vm1542_vm2  ;;  %v1994_v30 = vld [vmem:[#allocation2 + $0x198] sm:$0x1] }
 0x1e8   : > { %v2477_v7 = vsel %vm8124_vm14, %v2472_v62, %v2476_v32  ;;  %v2487_v58 = vsel %vm8124_vm14, %v2482_v49, %v8695_v6  ;;  %v5596_v28 = vcombine.low %v7692_v50, %v1264_v37  ;;  %v1439_v57 = vsel %vm1407_vm11, 65537, %v8582_v9  ;;  %vm1544_vm5 = vmor %vm8757_vm7, %vm9652_vm3 }
 0x1e9   : > { %v1859_v36 = vsel %vm8103_vm13, %v1851_v43, %v1858_v22  ;;  %v1868_v1 = vsel %vm8103_vm13, %v1860_v45, %v1867_v4  ;;  %v1877_v6 = vsel %vm8103_vm13, %v1869_v24, %v8715_v44  ;;  %2603 = vst [vmem:[#allocation2 + $0x140] sm:$0xf] %v2477_v7  ;;  %2604 = vst [vmem:[#allocation2 + $0x14c] sm:$0xf] %v2487_v58  ;;  %v1546_v51 = vsel %vm1544_vm5, 0, %v1545_v46 }
 0x1ea   : > { %v5612_v59 = vcombine.low %v1439_v57, %v7692_v50  ;;  %1986 = vst [vmem:[#allocation2 + $0x138] sm:$0xf] %v1859_v36  ;;  %1987 = vst [vmem:[#allocation2 + $0x144] sm:$0xf] %v1868_v1  ;;  %vm1328_vm3 = vcmp.ne.s16.totalorder %v5596_v28, 0  ;;  %v5959_v43 = vpack.c.bf16 %v8735_v39, %v8735_v39  ;;  %v781_v33 = vadd.s32 224, %v9714_v35 }
 0x1eb   : > { %1988 = vst [vmem:[#allocation2 + $0x150] sm:$0xf] %v1877_v6  ;;  %v1344_v26 = vsel %vm1328_vm3, %v751_v12, 0  ;;  %1547 = vst [vmem:[#allocation2 + $0x18c] sm:$0x88] %v1546_v51  ;;  %v782_v44 = vadd.s32 232, %v9714_v35  ;;  %v693_v32 = vadd.f32 %v8555_v10, %v692_v38 }
 0x1ec   : > { %vm1504_vm0 = vcmp.ne.s16.totalorder %v5612_v59, 0  ;;  %v8786_v5 = vcombine.low %v1344_v26, %v1344_v26  ;;  %v5644_v25 = vcombine.high %v1344_v26, %v1344_v26  ;;  %2140 = vst [vmem:[#allocation2 + $0x190] sm:$0xf] %v5959_v43  ;;  %v8789_v52 = vld [vmem:[#allocation2 + $0x128] ss:$12 sps:$4 sm:$0xff]   ;;  %v8793_v41 = vrot.slane %v2498_v54, 4  ;;  %vm8804_vm9 = vmand %vm1957_vm15, %vm2221_vm6 }
 0x1ed   : > { %v1520_v23 = vsel %vm1504_vm0, %v751_v12, 0  ;;  %v992_v31 = vand.u32 15, %v782_v44  ;;  %v985_v12 = vand.u32 15, %v781_v33  ;;  %6629 = vmatmul.mubr.bf16.gmra.mxu0 %v8789_v52  ;;  %v733_v8 = vmax.f32 %v693_v32, 0.0  ;;  %v2611_v7 = vld [vmem:[#allocation2 + $0x194] sm:$0xf] }
 0x1ee   : > { %v5707_v39 = vcombine.low %v1520_v23, %v1520_v23  ;;  %v5708_v47 = vcombine.high %v1520_v23, %v1520_v23  ;;  %v1907_v17 = vshrl.u32 %v8786_v5, 16  ;;  %v1916_v48 = vshrl.u32 %v5644_v25, 16  ;;  %v8809_v28 = vld [vmem:[#allocation2 + $0x13c] ss:$12 sps:$4 sm:$0xff]   ;;  %v9723_v36 = vld [vmem:[#allocation16_spill] sm:$0xff] }
 0x1ef   : > { %v1919_v35 = vshll.u32 %v5644_v25, 16  ;;  %vm1198_vm10 = vcmp.ne.s32.totalorder %v992_v31, 15  ;;  %vm1373_vm1 = vcmp.ne.s32.totalorder %v985_v12, 0  ;;  %vm9724_vm8 = vnez %v9723_v36  ;;  %3307 = vmatprep.mubr.bf16.mxu1 %v8809_v28  ;;  %v8822_v44 = vld [vmem:[#allocation2 + $0x154] ss:$12 sps:$4 sm:$0xff]  }
 0x1f0   : > { %v2524_v56 = vshll.u32 %v5707_v39, 16  ;;  %v2528_v11 = vshrl.u32 %v5707_v39, 16  ;;  %v2534_v10 = vshll.u32 %v5708_v47, 16  ;;  %v2538_v27 = vshrl.u32 %v5708_v47, 16  ;;  %vm1230_vm12 = vmpackc.low %vm1198_vm10, %vm1198_vm10  ;;  %v8799_v4 = vld [vmem:[#allocation2 + $0x140] ss:$12 sps:$4 sm:$0xff]  }
 0x1f1   : > { %v1909_v63 = vrot.slane %v1907_v17, 7  ;;  %v1918_v14 = vrot.slane %v1916_v48, 7  ;;  %v1262_v58 = vsel %vm1230_vm12, 65537, %v8582_v9  ;;  %vm1405_vm4 = vmpackc.low %vm1373_vm1, %vm1373_vm1  ;;  %v5957_v59 = vpack.c.bf16 %v733_v8, %v733_v8  ;;  %6632 = vmatprep.mubr.bf16.mxu0 %v8799_v4  ;;  %v8817_v38 = vld [vmem:[#allocation2 + $0x138] ss:$12 sps:$4 sm:$0xff]  }
 0x1f2   : > { %v8797_v54 = vrot.slane %v2524_v56, 5  ;;  %v2530_v3 = vrot.slane %v2528_v11, 4  ;;  %v2536_v62 = vrot.slane %v2534_v10, 5  ;;  %v2540_v49 = vrot.slane %v2538_v27, 4  ;;  %3308 = vmatmul.mubr.bf16.gmra.mxu1 %v8817_v38 }
 0x1f3   : > { %v1914_v37 = vrot.slane %v1909_v63, 4  ;;  %v1921_v22 = vor.u32 %v1919_v35, %v1918_v14  ;;  %v1923_v45 = vrot.slane %v1918_v14, 4  ;;  %v5595_v6 = vcombine.low %v7692_v50, %v1262_v58  ;;  %2138 = vst [vmem:[#allocation2 + $0x178] sm:$0xf] %v5957_v59  ;;  %3315 = vmatprep.mubr.bf16.mxu1 %v8822_v44 }
 0x1f4   : > { %v2531_v24 = vor.u32 %v2530_v3, %v8797_v54  ;;  %v2541_v53 = vor.u32 %v2540_v49, %v2536_v62  ;;  %v750_v26 = vpack.c.bf16 %v733_v8, %v8725_v20  ;;  %v1437_v33 = vsel %vm1405_vm4, 65537, %v8582_v9  ;;  %v8835_v8 = vld [vmem:[#allocation2 + $0x150] ss:$12 sps:$4 sm:$0xff]  }
 0x1f5   : > { %v1922_v57 = vsel %vm8103_vm13, %v1914_v37, %v1921_v22  ;;  %v1995_v1 = vsel %vm9724_vm8, %v1923_v45, %v1994_v30  ;;  %vm1327_vm6 = vcmp.ne.s16.totalorder %v5595_v6, 0  ;;  %v5611_v23 = vcombine.low %v1437_v33, %v7692_v50 }
 0x1f6   : > { %1993 = vst [vmem:[#allocation2 + $0x18c] sm:$0xf] %v1922_v57  ;;  %1996 = vst [vmem:[#allocation2 + $0x198] sm:$0x1] %v1995_v1  ;;  %v2532_v51 = vrot.slane %v2531_v24, 4  ;;  %v2542_v43 = vrot.slane %v2541_v53, 4  ;;  %v2501_v25 = vor.u32 %v8793_v41, %v8709_v55 }
 0x1f7   : > { %v1343_v39 = vsel %vm1327_vm6, %v750_v26, 0  ;;  %v1910_v47 = vshll.u32 %v8786_v5, 16  ;;  %vm1503_vm15 = vcmp.ne.s16.totalorder %v5611_v23, 0  ;;  %v1887_v12 = vrot.slane %v8679_v18, 4 }
 0x1f8   : > { %v2537_v32 = vsel %vm8124_vm14, %v2532_v51, %v2536_v62  ;;  %v2612_v20 = vsel %vm8804_vm9, %v2542_v43, %v2611_v7  ;;  %v5641_v50 = vcombine.low %v1343_v39, %v1343_v39  ;;  %v5642_v31 = vcombine.high %v1343_v39, %v1343_v39  ;;  %v7019_v39 = vld [vmem:[#allocation2 + $0x8] ss:$12 sps:$4 sm:$0xff]  }
 0x1f9   : > { %2609 = vst [vmem:[#allocation2 + $0x188] sm:$0xf] %v2537_v32  ;;  %2613 = vst [vmem:[#allocation2 + $0x194] sm:$0xf] %v2612_v20  ;;  %v1519_v17 = vsel %vm1503_vm15, %v750_v26, 0  ;;  %v2502_v11 = vrot.slane %v2501_v25, 4  ;;  %v1912_v10 = vor.u32 %v1910_v47, %v1909_v63  ;;  %v5782_v32 = vcombine.high %v8582_v9, %v8582_v9 }
 0x1fa   : > { %v1889_v48 = vshrl.u32 %v5641_v50, 16  ;;  %v1892_v35 = vshll.u32 %v5641_v50, 16  ;;  %v1898_v55 = vshrl.u32 %v5642_v31, 16  ;;  %v1901_v41 = vshll.u32 %v5642_v31, 16  ;;  %3316 = vmatmul.mubr.bf16.gmra.mxu1 %v8835_v8  ;;  %v8851_v29 = vld [vmem:[#allocation2 + $0x16c] ss:$12 sps:$4 sm:$0xff]  }
 0x1fb   : > { %v5705_v30 = vcombine.low %v1519_v17, %v1519_v17  ;;  %v5706_v56 = vcombine.high %v1519_v17, %v1519_v17  ;;  %3323 = vmatprep.mubr.bf16.mxu1 %v8851_v29  ;;  %v8858_v25 = vld [vmem:[#allocation2 + $0x184] ss:$12 sps:$4 sm:$0xff]   ;;  %v5781_v47 = vcombine.low %v8582_v9, %v8582_v9  ;;  %v7021_v50 = vld [vmem:[#allocation8 + $0x1b8] sm:$0xff]   ;;  %v7026_v9 = vld [vmem:[#allocation8 + $0x1a8] sm:$0xff]  }
 0x1fc   : > { %v1891_v27 = vrot.slane %v1889_v48, 7  ;;  %v1900_v14 = vrot.slane %v1898_v55, 7  ;;  %v7023_v31 = vld [vmem:[#allocation8 + $0x1f0] sm:$0xff]  }
 0x1fd   : > { %v2504_v5 = vshll.u32 %v5705_v30, 16  ;;  %v2508_v3 = vshrl.u32 %v5705_v30, 16  ;;  %v2514_v62 = vshll.u32 %v5706_v56, 16  ;;  %v2518_v49 = vshrl.u32 %v5706_v56, 16  ;;  %v7027_v17 = vld [vmem:[#allocation8 + $0x230] sm:$0xff]   ;;  %v7032_v30 = vld [vmem:[#allocation8 + $0x228] sm:$0xff]  }
 0x1fe   : > { %v1894_v37 = vor.u32 %v1892_v35, %v1891_v27  ;;  %v1896_v22 = vrot.slane %v1891_v27, 4  ;;  %v1903_v45 = vor.u32 %v1901_v41, %v1900_v14  ;;  %v1905_v24 = vrot.slane %v1900_v14, 4  ;;  %v7098_v48 = vld [vmem:[#allocation2 + $0x20] ss:$12 sps:$4 sm:$0xff]   ;;  %v7099_v35 = vld [vmem:[#allocation2 + $0x1c] ss:$12 sps:$4 sm:$0xff]  }
 0x1ff   : > { %v2506_v53 = vrot.slane %v2504_v5, 5  ;;  %v2510_v18 = vrot.slane %v2508_v3, 4  ;;  %v2516_v46 = vrot.slane %v2514_v62, 5  ;;  %v2520_v7 = vrot.slane %v2518_v49, 4  ;;  %v7024_v55 = vld [vmem:[#allocation8 + $0x1b0] sm:$0xff]   ;;  %v7028_v56 = vld [vmem:[#allocation8 + $0x1e0] sm:$0xff]  }
 0x200   : > { %v1895_v63 = vsel %vm8103_vm13, %v1887_v12, %v1894_v37  ;;  %v1904_v58 = vsel %vm8103_vm13, %v1896_v22, %v1903_v45  ;;  %v1913_v57 = vsel %vm8103_vm13, %v1905_v24, %v1912_v10  ;;  %v7100_v41 = vld [vmem:[#allocation2 + $0x38] ss:$12 sps:$4 sm:$0xff]   ;;  %v7102_v27 = vld [vmem:[#allocation2 + $0x50] ss:$12 sps:$4 sm:$0xff]   ;;  %v7103_v14 = vld [vmem:[#allocation2 + $0x34] ss:$12 sps:$4 sm:$0xff]  }
 0x201   : > { %1990 = vst [vmem:[#allocation2 + $0x168] sm:$0xf] %v1895_v63  ;;  %1991 = vst [vmem:[#allocation2 + $0x174] sm:$0xf] %v1904_v58  ;;  %v2507_v36 = vsel %vm8124_vm14, %v2502_v11, %v2506_v53  ;;  %v2511_v1 = vor.u32 %v2510_v18, %v2506_v53  ;;  %v2521_v6 = vor.u32 %v2520_v7, %v2516_v46  ;;  %v7025_v12 = vld [vmem:[#allocation8 + $0x1e8] sm:$0xff]   ;;  %v7037_v11 = vld [vmem:[#allocation8 + $0x220] sm:$0xff]  }
 0x202   : > { %1992 = vst [vmem:[#allocation2 + $0x180] sm:$0xf] %v1913_v57  ;;  %2606 = vst [vmem:[#allocation2 + $0x164] sm:$0xf] %v2507_v36  ;;  %v7101_v10 = vld [vmem:[#allocation2 + $0x18] ss:$12 sps:$4 sm:$0xff]  }
 0x203   : > { %v2512_v59 = vrot.slane %v2511_v1, 4  ;;  %v2522_v51 = vrot.slane %v2521_v6, 4  ;;  %v7104_v5 = vld [vmem:[#allocation2 + $0x68] ss:$12 sps:$4 sm:$0xff]   ;;  %v7033_v37 = vld [vmem:[#allocation8 + $0x1d0] sm:$0xff]   ;;  %v7035_v7 = vld [vmem:[#allocation8 + $0x1c8] sm:$0xff]  }
 0x204   : > { %v7030_v3 = vld [vmem:[#allocation8 + $0x1d8] sm:$0xff]   ;;  %v7044_v22 = vld [vmem:[#allocation8 + $0x210] sm:$0xff]   ;;  %v7105_v45 = vld [vmem:[#allocation2 + $0x30] ss:$12 sps:$4 sm:$0xff]  }
 0x205   : > { %v2517_v43 = vsel %vm8124_vm14, %v2512_v59, %v2516_v46  ;;  %v2527_v26 = vsel %vm8124_vm14, %v2522_v51, %v8797_v54  ;;  %v6988_v54 = vld [vmem:[#allocation2 + $0x188] ss:$12 sps:$4 sm:$0xff]   ;;  %v7106_v24 = vld [vmem:[#allocation2 + $0x80] ss:$12 sps:$4 sm:$0xff]   ;;  %v7108_v18 = vld [vmem:[#allocation2 + $0x98] ss:$12 sps:$4 sm:$0xff]  }
 0x206   : > { %2607 = vst [vmem:[#allocation2 + $0x170] sm:$0xf] %v2517_v43  ;;  %2608 = vst [vmem:[#allocation2 + $0x17c] sm:$0xf] %v2527_v26  ;;  %v7038_v62 = vld [vmem:[#allocation8 + $0x218] sm:$0xff]   ;;  %v7034_v46 = vld [vmem:[#allocation8 + $0x190] sm:$0xff]  }
 0x207   : > { %v7031_v49 = vld [vmem:[#allocation8 + $0x198] sm:$0xff]   ;;  %v7045_v63 = vld [vmem:[#allocation8 + $0x208] sm:$0xff]   ;;  %v7039_v57 = vld [vmem:[#allocation8 + $0x1c0] sm:$0xff]  }
 0x208   : > { %v8855_v23 = vld [vmem:[#allocation2 + $0x168] ss:$12 sps:$4 sm:$0xff]   ;;  %v7107_v53 = vld [vmem:[#allocation2 + $0x4c] ss:$12 sps:$4 sm:$0xff]   ;;  %v7110_v6 = vld [vmem:[#allocation2 + $0xb0] ss:$12 sps:$4 sm:$0xff]  }
 0x209   : > { %v8853_v33 = vld [vmem:[#allocation2 + $0x158] ss:$12 sps:$4 sm:$0xff]   ;;  %3324 = vmatmul.mubr.bf16.gmra.mxu1 %v8855_v23  ;;  %v8868_v20 = vld [vmem:[#allocation2 + $0x180] ss:$12 sps:$4 sm:$0xff]   ;;  %v7050_v36 = vld [vmem:[#allocation8 + $0x200] sm:$0xff]  }
 0x20a   : > { %6633 = vmatmul.mubr.bf16.gmra.mxu0 %v8853_v33  ;;  %3331 = vmatprep.mubr.bf16.mxu1 %v8858_v25  ;;  %v7036_v58 = vld [vmem:[#allocation8 + $0x188] sm:$0xff]   ;;  %v7109_v1 = vld [vmem:[#allocation2 + $0x48] ss:$12 sps:$4 sm:$0xff]   ;;  %v7111_v59 = vld [vmem:[#allocation2 + $0x64] ss:$12 sps:$4 sm:$0xff]  }
 0x20b   : > { %v7040_v51 = vld [vmem:[#allocation8 + $0x180] sm:$0xff]   ;;  %v7112_v43 = vld [vmem:[#allocation2 + $0x60] ss:$12 sps:$4 sm:$0xff]  }
 0x20d   : > { %v8863_v2 = vld [vmem:[#allocation2 + $0x170] ss:$12 sps:$4 sm:$0xff]  }
 0x20e   : > { %6636 = vmatprep.mubr.bf16.mxu0 %v8863_v2 }
 0x211   : > { %3332 = vmatmul.mubr.bf16.gmra.mxu1 %v8868_v20 }
 0x212   : > { %6637 = vmatmul.mubr.bf16.gmra.mxu0 %v6988_v54  ;;  %6656 = vmatprep.mubr.bf16.mxu1 %v7019_v39  ;;  %v7113_v54 = vld [vmem:[#allocation2 + $0x7c] ss:$12 sps:$4 sm:$0xff]  }
 0x213   : > { %3693 = vmatprep.mubr.bf16.mxu0 %v5782_v32 }
 0x219   : > { %6657 = vmatmul.mubr.bf16.vlgmr.msra.gmra.mxu1 %v7098_v48  ;;  %v8880_v48 = vld [vmem:[#allocation2 + $0x94] ss:$12 sps:$4 sm:$0xff]  }
 0x21a   : > { %3694 = vmatmul.mubr.bf16.vlgmr.msra.gmra.mxu0 %v5781_v47  ;;  %6385 = vmatpush3.bf16.msra.mxu1 %v7021_v50 }
 0x21b   : > { %3701 = vmatprep.mubr.bf16.mxu0 %v7099_v35  ;;  %6660 = vmatprep.mubr.bf16.mxu1 %v7100_v41 }
 0x21c   : > { %6689 = vmatpush3.bf16.msra.mxu0 %v8677_v42  ;;  %6386 = vmatprep.subr.bf16.mxu1 %v7023_v31  ;;  %v7029_v42 = vld [vmem:[#allocation8 + $0x1a0] sm:$0xff]   ;;  %v7114_v31 = vld [vmem:[#allocation2 + $0x78] ss:$12 sps:$4 sm:$0xff]  }
 0x21d   : > { %6690 = vmatprep.subr.bf16.mxu0 %v7027_v17 }
 0x21e   : > { %6387 = vmatpush3.bf16.msra.mxu1 %v7024_v55 }
 0x21f   : > { %6388 = vmatprep.subr.bf16.mxu1 %v7025_v12  ;;  %v8884_v12 = vld [vmem:[#allocation2 + $0x90] ss:$12 sps:$4 sm:$0xff]  }
 0x220   : > { %6691 = vmatpush3.bf16.msra.mxu0 %v7027_v17 }
 0x221   : > { %6692 = vmatprep.subr.bf16.mxu0 %v7032_v30  ;;  %6661 = vmatmul.mubr.bf16.gmra.mxu1 %v7102_v27 }
 0x222   : > { %3702 = vmatmul.mubr.bf16.gmra.mxu0 %v7101_v10  ;;  %6664 = vmatprep.mubr.bf16.mxu1 %v7104_v5  ;;  %v8894_v10 = vld [vmem:[#allocation2 + $0xa8] ss:$12 sps:$4 sm:$0xff]  }
 0x223   : > { %3709 = vmatprep.mubr.bf16.mxu0 %v7103_v14  ;;  %6389 = vmatpush3.bf16.msra.mxu1 %v7026_v9 }
 0x224   : > { %6693 = vmatpush3.bf16.msra.mxu0 %v7032_v30  ;;  %6390 = vmatprep.subr.bf16.mxu1 %v7028_v56  ;;  %v8888_v30 = vld [vmem:[#allocation2 + $0xac] ss:$12 sps:$4 sm:$0xff]  }
 0x225   : > { %6694 = vmatprep.subr.bf16.mxu0 %v7037_v11 }
 0x227   : > { %6391 = vmatpush3.bf16.msra.mxu1 %v7029_v42 }
 0x228   : > { %6695 = vmatpush3.bf16.msra.mxu0 %v7037_v11  ;;  %6392 = vmatprep.subr.bf16.mxu1 %v7030_v3 }
 0x229   : > { %6696 = vmatprep.subr.bf16.mxu0 %v7038_v62  ;;  %6665 = vmatmul.mubr.bf16.gmra.mxu1 %v7106_v24 }
 0x22a   : > { %3710 = vmatmul.mubr.bf16.gmra.mxu0 %v7105_v45  ;;  %6668 = vmatprep.mubr.bf16.mxu1 %v7108_v18 }
 0x22b   : > { %3717 = vmatprep.mubr.bf16.mxu0 %v7107_v53  ;;  %6393 = vmatpush3.bf16.msra.mxu1 %v7031_v49  ;;  %v7041_v49 = vld [vmem:[#allocation2 + $0x30] ss:$12 sps:$4 sm:$0xff]  }
 0x22c   : > { %6697 = vmatpush3.bf16.msra.mxu0 %v7038_v62  ;;  %6394 = vmatprep.subr.bf16.mxu1 %v7033_v37 }
 0x22d   : > { %6698 = vmatprep.subr.bf16.mxu0 %v7044_v22 }
 0x22e   : > { %v6128_v26 = vpop.f32.mrf.mxu1 }
 0x22f   : > { %6395 = vmatpush3.bf16.msra.mxu1 %v7034_v46 }
 0x230   : > { %6699 = vmatpush3.bf16.msra.mxu0 %v7044_v22  ;;  %6396 = vmatprep.subr.bf16.mxu1 %v7035_v7  ;;  %v6129_v32 = vpop.f32.mrf.mxu1  ;;  %v7049_v22 = vld [vmem:[#allocation2 + $0x4c] ss:$12 sps:$4 sm:$0xff]  }
 0x231   : > { %6700 = vmatprep.subr.bf16.mxu0 %v7045_v63  ;;  %6669 = vmatmul.mubr.bf16.gmra.mxu1 %v7110_v6  ;;  %v6130_v39 = vadd.f32 %v6129_v32, %v6128_v26 }
 0x232   : > { %3718 = vmatmul.mubr.bf16.gmra.mxu0 %v7109_v1  ;;  %6672 = vmatprep.mubr.bf16.mxu1 %v8610_v61  ;;  %v6131_v47 = vpop.f32.mrf.mxu1  ;;  %v8913_v1 = vld [vmem:[#allocation2 + $0xd8] ss:$12 sps:$4 sm:$0xff]  }
 0x233   : > { %3725 = vmatprep.mubr.bf16.mxu0 %v7111_v59  ;;  %6397 = vmatpush3.bf16.msra.mxu1 %v7036_v58  ;;  %v8918_v59 = vld [vmem:[#allocation2 + $0xf4] ss:$12 sps:$4 sm:$0xff]  }
 0x234   : > { %6701 = vmatpush3.bf16.msra.mxu0 %v7045_v63  ;;  %6398 = vmatprep.subr.bf16.mxu1 %v7039_v57  ;;  %v6132_v61 = vpop.f32.mrf.mxu1  ;;  %v7047_v63 = vld [vmem:[#allocation2 + $0x48] ss:$12 sps:$4 sm:$0xff]   ;;  %v7055_v57 = vld [vmem:[#allocation2 + $0x64] ss:$12 sps:$4 sm:$0xff]  }
 0x235   : > { %6702 = vmatprep.subr.bf16.mxu0 %v7050_v36  ;;  %v8877_v50 = vadd.f32 %v6132_v61, %v6131_v47  ;;  %v7053_v47 = vld [vmem:[#allocation2 + $0x60] ss:$12 sps:$4 sm:$0xff]  }
 0x237   : > { %6399 = vmatpush3.bf16.msra.mxu1 %v7040_v51  ;;  %v6134_v17 = vpop.f32.mrf.mxu1 }
 0x238   : > { %6703 = vmatpush3.bf16.msra.mxu0 %v7050_v36 }
 0x239   : > { %6673 = vmatmul.mubr.bf16.gmra.mxu1 %v8634_v60  ;;  %v6135_v60 = vpop.f32.mrf.mxu1 }
 0x23a   : > { %3726 = vmatmul.mubr.bf16.gmra.mxu0 %v7112_v43  ;;  %6676 = vmatprep.mubr.bf16.mxu1 %v8700_v13  ;;  %v6136_v35 = vadd.f32 %v6135_v60, %v6134_v17 }
 0x23b   : > { %3733 = vmatprep.mubr.bf16.mxu0 %v7113_v54  ;;  %v6137_v13 = vpop.f32.mrf.mxu1 }
 0x23d   : > { %v6138_v55 = vpop.f32.mrf.mxu1 }
 0x23e   : > { %v6139_v41 = vadd.f32 %v6138_v55, %v6137_v13 }
 0x241   : > { %6677 = vmatmul.mubr.bf16.gmra.mxu1 %v8738_v19 }
 0x242   : > { %3734 = vmatmul.mubr.bf16.gmra.mxu0 %v7114_v31  ;;  %6680 = vmatprep.mubr.bf16.mxu1 %v8789_v52  ;;  %v7043_v52 = vld [vmem:[#allocation2 + $0x34] ss:$12 sps:$4 sm:$0xff]   ;;  %v7060_v31 = vld [vmem:[#allocation2 + $0x7c] ss:$12 sps:$4 sm:$0xff]  }
 0x243   : > { %3741 = vmatprep.mubr.bf16.mxu0 %v8880_v48 }
 0x247   : > { %v6610_v19 = vpop.f32.mrf.mxu0  ;;  %v6140_v11 = vpop.f32.mrf.mxu1 }
 0x248   : > { %v8892_v9 = vadd.f32 %v6610_v19, %v6136_v35 }
 0x249   : > { %6681 = vmatmul.mubr.bf16.gmra.mxu1 %v8799_v4  ;;  %v3374_v56 = vpop.f32.mrf.mxu0  ;;  %v8900_v4 = vld [vmem:[#allocation2 + $0xc4] ss:$12 sps:$4 sm:$0xff]   ;;  %v6141_v14 = vpop.f32.mrf.mxu1 }
 0x24a   : > { %3742 = vmatmul.mubr.bf16.gmra.mxu0 %v8884_v12  ;;  %6684 = vmatprep.mubr.bf16.mxu1 %v8853_v33  ;;  %v8898_v27 = vadd.f32 %v6130_v39, %v3374_v56  ;;  %v6142_v42 = vadd.f32 %v6141_v14, %v6140_v11 }
 0x24b   : > { %3749 = vmatprep.mubr.bf16.mxu0 %v8888_v30  ;;  %v6611_v33 = vpop.f32.mrf.mxu0  ;;  %v6143_v3 = vpop.f32.mrf.mxu1 }
 0x24c   : > { %v8903_v5 = vadd.f32 %v6611_v33, %v6139_v41  ;;  %v7058_v41 = vld [vmem:[#allocation2 + $0x78] ss:$12 sps:$4 sm:$0xff]  }
 0x24d   : > { %v6144_v62 = vpop.f32.mrf.mxu1  ;;  %v8911_v18 = vpop.f32.mrf.mxu0 }
 0x24e   : > { %v8905_v37 = vadd.f32 %v6144_v62, %v6143_v3 }
 0x24f   : > { %v6146_v45 = vpop.f32.mrf.mxu1 }
 0x251   : > { %6685 = vmatmul.mubr.bf16.gmra.mxu1 %v8863_v2  ;;  %v8907_v2 = vld [vmem:[#allocation2 + $0xc0] ss:$12 sps:$4 sm:$0xff]   ;;  %v6147_v24 = vpop.f32.mrf.mxu1 }
 0x252   : > { %3750 = vmatmul.mubr.bf16.gmra.mxu0 %v8894_v10  ;;  %4528 = vmatprep.mubr.bf16.mxu1 %v7043_v52  ;;  %v6148_v53 = vadd.f32 %v6147_v24, %v6146_v45 }
 0x253   : > { %3757 = vmatprep.mubr.bf16.mxu0 %v8900_v4  ;;  %v6149_v46 = vpop.f32.mrf.mxu1 }
 0x255   : > { %v6150_v7 = vpop.f32.mrf.mxu1 }
 0x256   : > { %v6151_v58 = vadd.f32 %v6150_v7, %v6149_v46 }
 0x259   : > { %4529 = vmatmul.mubr.bf16.vlgmr.msra.gmra.mxu1 %v7041_v49 }
 0x25a   : > { %3758 = vmatmul.mubr.bf16.gmra.mxu0 %v8907_v2  ;;  %4536 = vmatprep.mubr.bf16.mxu1 %v7049_v22  ;;  %v6614_v36 = vpop.f32.mrf.mxu0 }
 0x25b   : > { %3765 = vmatprep.mubr.bf16.mxu0 %v8619_v16  ;;  %v8916_v6 = vadd.f32 %v6614_v36, %v6148_v53 }
 0x25c   : > { %v3390_v16 = vpop.f32.mrf.mxu0  ;;  %v6152_v43 = vpop.f32.mrf.mxu1 }
 0x25d   : > { %v8921_v51 = vadd.f32 %v6142_v42, %v3390_v16 }
 0x25e   : > { %v6615_v26 = vpop.f32.mrf.mxu0  ;;  %v6153_v32 = vpop.f32.mrf.mxu1 }
 0x25f   : > { %v8923_v54 = vadd.f32 %v6615_v26, %v6151_v58  ;;  %v6154_v39 = vadd.f32 %v6153_v32, %v6152_v43 }
 0x260   : > { %v6155_v61 = vpop.f32.mrf.mxu1  ;;  %v8929_v19 = vpop.f32.mrf.mxu0 }
 0x261   : > { %4537 = vmatmul.mubr.bf16.gmra.mxu1 %v7047_v63 }
 0x262   : > { %3766 = vmatmul.mubr.bf16.gmra.mxu0 %v8913_v1  ;;  %4544 = vmatprep.mubr.bf16.mxu1 %v7055_v57  ;;  %v6156_v17 = vpop.f32.mrf.mxu1 }
 0x263   : > { %3773 = vmatprep.mubr.bf16.mxu0 %v8918_v59  ;;  %v8927_v60 = vadd.f32 %v6156_v17, %v6155_v61 }
 0x264   : > { %v6158_v35 = vpop.f32.mrf.mxu1 }
 0x266   : > { %v6159_v13 = vpop.f32.mrf.mxu1 }
 0x267   : > { %v6160_v55 = vadd.f32 %v6159_v13, %v6158_v35 }
 0x268   : > { %v6161_v52 = vpop.f32.mrf.mxu1 }
 0x269   : > { %4545 = vmatmul.mubr.bf16.gmra.mxu1 %v7053_v47 }
 0x26a   : > { %3774 = vmatmul.mubr.bf16.gmra.mxu0 %v8655_v21  ;;  %4552 = vmatprep.mubr.bf16.mxu1 %v7060_v31  ;;  %v6162_v56 = vpop.f32.mrf.mxu1 }
 0x26b   : > { %3781 = vmatprep.mubr.bf16.mxu0 %v8707_v34  ;;  %v6163_v21 = vadd.f32 %v6162_v56, %v6161_v52 }
 0x270   : > { %v6618_v11 = vpop.f32.mrf.mxu0 }
 0x271   : > { %4553 = vmatmul.mubr.bf16.gmra.mxu1 %v7058_v41  ;;  %v8934_v33 = vadd.f32 %v6618_v11, %v6160_v55  ;;  %v7046_v55 = vld [vmem:[#allocation2 + $0x38] ss:$12 sps:$4 sm:$0xff]  }
 0x272   : > { %3782 = vmatmul.mubr.bf16.gmra.mxu0 %v8713_v15  ;;  %4560 = vmatprep.mubr.bf16.mxu1 %v8880_v48  ;;  %v3406_v14 = vpop.f32.mrf.mxu0  ;;  %v6164_v3 = vpop.f32.mrf.mxu1 }
 0x273   : > { %3789 = vmatprep.mubr.bf16.mxu0 %v8720_v40  ;;  %v8936_v42 = vadd.f32 %v6154_v39, %v3406_v14  ;;  %v7051_v14 = vld [vmem:[#allocation2 + $0x50] ss:$12 sps:$4 sm:$0xff]  }
 0x274   : > { %v6619_v62 = vpop.f32.mrf.mxu0  ;;  %v6165_v22 = vpop.f32.mrf.mxu1 }
 0x275   : > { %v8938_v49 = vadd.f32 %v6619_v62, %v6163_v21  ;;  %v6166_v45 = vadd.f32 %v6165_v22, %v6164_v3  ;;  %v7052_v3 = vld [vmem:[#allocation2 + $0x68] ss:$12 sps:$4 sm:$0xff]   ;;  %v7124_v22 = vld [vmem:[#allocation2 + $0xf0] ss:$12 sps:$4 sm:$0xff]  }
 0x276   : > { %v6167_v48 = vpop.f32.mrf.mxu1  ;;  %v8946_v7 = vpop.f32.mrf.mxu0 }
 0x278   : > { %v6168_v24 = vpop.f32.mrf.mxu1 }
 0x279   : > { %4561 = vmatmul.mubr.bf16.gmra.mxu1 %v8884_v12  ;;  %v8944_v53 = vadd.f32 %v6168_v24, %v6167_v48 }
 0x27a   : > { %3790 = vmatmul.mubr.bf16.gmra.mxu0 %v8743_v0  ;;  %4568 = vmatprep.mubr.bf16.mxu1 %v8888_v30 }
 0x27b   : > { %3797 = vmatprep.mubr.bf16.mxu0 %v8809_v28 }
 0x27d   : > { %v6170_v46 = vpop.f32.mrf.mxu1 }
 0x27f   : > { %v6171_v63 = vpop.f32.mrf.mxu1 }
 0x280   : > { %v6172_v58 = vadd.f32 %v6171_v63, %v6170_v46 }
 0x281   : > { %4569 = vmatmul.mubr.bf16.gmra.mxu1 %v8894_v10  ;;  %v6173_v12 = vpop.f32.mrf.mxu1 }
 0x282   : > { %3798 = vmatmul.mubr.bf16.gmra.mxu0 %v8817_v38  ;;  %4576 = vmatprep.mubr.bf16.mxu1 %v8900_v4  ;;  %v7123_v4 = vld [vmem:[#allocation2 + $0xdc] ss:$12 sps:$4 sm:$0xff]  }
 0x283   : > { %3805 = vmatprep.mubr.bf16.mxu0 %v8822_v44  ;;  %v6622_v57 = vpop.f32.mrf.mxu0  ;;  %v6174_v36 = vpop.f32.mrf.mxu1 }
 0x284   : > { %v8952_v30 = vadd.f32 %v6622_v57, %v6172_v58  ;;  %v6175_v43 = vadd.f32 %v6174_v36, %v6173_v12  ;;  %v7056_v57 = vld [vmem:[#allocation2 + $0x80] ss:$12 sps:$4 sm:$0xff]   ;;  %v7057_v36 = vld [vmem:[#allocation2 + $0x98] ss:$12 sps:$4 sm:$0xff]  }
 0x285   : > { %v3422_v16 = vpop.f32.mrf.mxu0  ;;  %v6176_v32 = vpop.f32.mrf.mxu1 }
 0x286   : > { %v8954_v26 = vadd.f32 %v6166_v45, %v3422_v16 }
 0x287   : > { %v6623_v39 = vpop.f32.mrf.mxu0  ;;  %v6177_v61 = vpop.f32.mrf.mxu1 }
 0x288   : > { %v8956_v47 = vadd.f32 %v6623_v39, %v6175_v43  ;;  %v6178_v10 = vadd.f32 %v6177_v61, %v6176_v32 }
 0x289   : > { %4577 = vmatmul.mubr.bf16.gmra.mxu1 %v8907_v2  ;;  %v6179_v31 = vpop.f32.mrf.mxu1  ;;  %v8966_v56 = vpop.f32.mrf.mxu0 }
 0x28a   : > { %3806 = vmatmul.mubr.bf16.gmra.mxu0 %v8835_v8  ;;  %4584 = vmatprep.mubr.bf16.mxu1 %v7123_v4  ;;  %v7062_v4 = vld [vmem:[#allocation2 + $0xc8] ss:$12 sps:$4 sm:$0xff]  }
 0x28b   : > { %3813 = vmatprep.mubr.bf16.mxu0 %v8851_v29  ;;  %v6180_v17 = vpop.f32.mrf.mxu1 }
 0x28c   : > { %v8961_v35 = vadd.f32 %v6180_v17, %v6179_v31 }
 0x28d   : > { %v6182_v13 = vpop.f32.mrf.mxu1 }
 0x28f   : > { %v6183_v41 = vpop.f32.mrf.mxu1 }
 0x290   : > { %v6184_v52 = vadd.f32 %v6183_v41, %v6182_v13  ;;  %v7063_v41 = vld [vmem:[#allocation2 + $0xe0] ss:$12 sps:$4 sm:$0xff]  }
 0x291   : > { %4585 = vmatmul.mubr.bf16.gmra.mxu1 %v8913_v1  ;;  %v6185_v2 = vpop.f32.mrf.mxu1 }
 0x292   : > { %3814 = vmatmul.mubr.bf16.gmra.mxu0 %v8855_v23  ;;  %4592 = vmatprep.mubr.bf16.mxu1 %v8918_v59 }
 0x293   : > { %6704 = vmatprep.mubr.bf16.mxu0 %v7046_v55  ;;  %v6186_v21 = vpop.f32.mrf.mxu1 }
 0x294   : > { %v6187_v11 = vadd.f32 %v6186_v21, %v6185_v2  ;;  %v7064_v2 = vld [vmem:[#allocation2 + $0xf8] ss:$12 sps:$4 sm:$0xff]  }
 0x299   : > { %v6626_v62 = vpop.f32.mrf.mxu0  ;;  %4593 = vmatmul.mubr.bf16.gmra.mxu1 %v7124_v22 }
 0x29a   : > { %6705 = vmatmul.mubr.bf16.vlgmr.msra.gmra.mxu0 %v7051_v14  ;;  %v8968_v45 = vadd.f32 %v6626_v62, %v6184_v52  ;;  %4600 = vmatprep.mubr.bf16.mxu1 %v8707_v34  ;;  %v6188_v1 = vpop.f32.mrf.mxu1  ;;  %v7066_v62 = vld [vmem:[#allocation2 + $0x128] ss:$12 sps:$4 sm:$0xff]  }
 0x29b   : > { %6708 = vmatprep.mubr.bf16.mxu0 %v7052_v3  ;;  %v3438_v48 = vpop.f32.mrf.mxu0 }
 0x29c   : > { %v8971_v24 = vadd.f32 %v6178_v10, %v3438_v48  ;;  %v6189_v46 = vpop.f32.mrf.mxu1  ;;  %v7061_v10 = vld [vmem:[#allocation2 + $0xb0] ss:$12 sps:$4 sm:$0xff]  }
 0x29d   : > { %v6627_v59 = vpop.f32.mrf.mxu0  ;;  %v6190_v58 = vadd.f32 %v6189_v46, %v6188_v1  ;;  %v7067_v46 = vld [vmem:[#allocation2 + $0x140] ss:$12 sps:$4 sm:$0xff]  }
 0x29e   : > { %v8973_v63 = vadd.f32 %v6627_v59, %v6187_v11  ;;  %v6191_v12 = vpop.f32.mrf.mxu1 }
 0x29f   : > { %v8979_v31 = vpop.f32.mrf.mxu0 }
 0x2a0   : > { %v6192_v16 = vpop.f32.mrf.mxu1 }
 0x2a1   : > { %4601 = vmatmul.mubr.bf16.gmra.mxu1 %v8713_v15  ;;  %v8976_v43 = vadd.f32 %v6192_v16, %v6191_v12  ;;  %v7069_v16 = vld [vmem:[#allocation2 + $0x170] ss:$12 sps:$4 sm:$0xff]  }
 0x2a2   : > { %6709 = vmatmul.mubr.bf16.gmra.mxu0 %v7056_v57  ;;  %4608 = vmatprep.mubr.bf16.mxu1 %v8720_v40  ;;  %v6194_v34 = vpop.f32.mrf.mxu1 }
 0x2a3   : > { %6712 = vmatprep.mubr.bf16.mxu0 %v7057_v36 }
 0x2a4   : > { %v6195_v32 = vpop.f32.mrf.mxu1 }
 0x2a5   : > { %v6196_v39 = vadd.f32 %v6195_v32, %v6194_v34  ;;  %v7070_v34 = vld [vmem:[#allocation2 + $0x188] ss:$12 sps:$4 sm:$0xff]   ;;  %v7125_v32 = vld [vmem:[#allocation2] sm:$0xff] }
 0x2a6   : > { %v6197_v61 = vpop.f32.mrf.mxu1 }
 0x2a8   : > { %v6198_v17 = vpop.f32.mrf.mxu1 }
 0x2a9   : > { %4609 = vmatmul.mubr.bf16.gmra.mxu1 %v8743_v0  ;;  %v6199_v13 = vadd.f32 %v6198_v17, %v6197_v61 }
 0x2aa   : > { %6713 = vmatmul.mubr.bf16.gmra.mxu0 %v7061_v10  ;;  %4616 = vmatprep.mubr.bf16.mxu1 %v8809_v28  ;;  %v7065_v28 = vld [vmem:[#allocation2 + $0x110] ss:$12 sps:$4 sm:$0xff]  }
 0x2ab   : > { %6716 = vmatprep.mubr.bf16.mxu0 %v7062_v4 }
 0x2ad   : > { %v6630_v15 = vpop.f32.mrf.mxu0 }
 0x2ae   : > { %v8983_v55 = vadd.f32 %v6630_v15, %v6196_v39 }
 0x2af   : > { %v3454_v40 = vpop.f32.mrf.mxu0 }
 0x2b0   : > { %v8985_v52 = vadd.f32 %v6190_v58, %v3454_v40  ;;  %v7071_v40 = vld [vmem:[#allocation2 + $0x1a0] ss:$12 sps:$4 sm:$0xff]  }
 0x2b1   : > { %v6631_v21 = vpop.f32.mrf.mxu0  ;;  %4617 = vmatmul.mubr.bf16.gmra.mxu1 %v8817_v38 }
 0x2b2   : > { %6717 = vmatmul.mubr.bf16.gmra.mxu0 %v7063_v41  ;;  %v8988_v11 = vadd.f32 %v6631_v21, %v6199_v13  ;;  %4624 = vmatprep.mubr.bf16.mxu1 %v8822_v44  ;;  %v6200_v0 = vpop.f32.mrf.mxu1  ;;  %v7068_v44 = vld [vmem:[#allocation2 + $0x158] ss:$12 sps:$4 sm:$0xff]  }
 0x2b3   : > { %6720 = vmatprep.mubr.bf16.mxu0 %v7064_v2  ;;  %v8997_v36 = vpop.f32.mrf.mxu0  ;;  %v7072_v2 = vld [vmem:[#allocation9 + $0x38] sm:$0xff]  }
 0x2b4   : > { %v6201_v14 = vpop.f32.mrf.mxu1  ;;  %6736 = vmatprep.subr.bf16.mxu0 %v7072_v2 }
 0x2b5   : > { %v6202_v3 = vadd.f32 %v6201_v14, %v6200_v0  ;;  %6737 = vmatpush3.bf16.msra.mxu0 %v7072_v2 }
 0x2b6   : > { %v6203_v22 = vpop.f32.mrf.mxu1 }
 0x2b8   : > { %v6204_v48 = vpop.f32.mrf.mxu1 }
 0x2b9   : > { %4625 = vmatmul.mubr.bf16.gmra.mxu1 %v8835_v8  ;;  %v8993_v1 = vadd.f32 %v6204_v48, %v6203_v22 }
 0x2ba   : > { %6721 = vmatmul.mubr.bf16.gmra.mxu0 %v7065_v28  ;;  %4632 = vmatprep.mubr.bf16.mxu1 %v8851_v29  ;;  %v6206_v38 = vpop.f32.mrf.mxu1  ;;  %v4043_v29 = vld [vmem:[#allocation2 + $0x198] sm:$0xff] }
 0x2bb   : > { %6724 = vmatprep.mubr.bf16.mxu0 %v7066_v62  ;;  %v5854_v39 = vcombine.high %v4043_v29, %v7125_v32  ;;  %v5853_v14 = vcombine.low %v4043_v29, %v7125_v32 }
 0x2bc   : > { %v6207_v59 = vpop.f32.mrf.mxu1 }
 0x2bd   : > { %v6208_v58 = vadd.f32 %v6207_v59, %v6206_v38 }
 0x2be   : > { %v6209_v12 = vpop.f32.mrf.mxu1 }
 0x2c0   : > { %v6210_v57 = vpop.f32.mrf.mxu1 }
 0x2c1   : > { %4633 = vmatmul.mubr.bf16.gmra.mxu1 %v8855_v23  ;;  %v6211_v8 = vadd.f32 %v6210_v57, %v6209_v12  ;;  %v7074_v12 = vld [vmem:[#allocation9 + $0x28] sm:$0xff]  }
 0x2c2   : > { %6725 = vmatmul.mubr.bf16.gmra.mxu0 %v7067_v46  ;;  %4640 = vmatprep.mubr.bf16.mxu1 %v8858_v25 }
 0x2c3   : > { %6728 = vmatprep.mubr.bf16.mxu0 %v7068_v44 }
 0x2c9   : > { %v6212_v10 = vpop.f32.mrf.mxu1  ;;  %4641 = vmatmul.mubr.bf16.gmra.mxu1 %v8868_v20 }
 0x2ca   : > { %v6634_v61 = vpop.f32.mrf.mxu0  ;;  %6729 = vmatmul.mubr.bf16.gmra.mxu0 %v7069_v16  ;;  %4648 = vmatprep.mubr.bf16.mxu1 %v5854_v39  ;;  %v7075_v39 = vld [vmem:[#allocation9 + $0x20] sm:$0xff]  }
 0x2cb   : > { %6732 = vmatprep.mubr.bf16.mxu0 %v7070_v34  ;;  %v9000_v4 = vadd.f32 %v6634_v61, %v6208_v58  ;;  %v6213_v25 = vpop.f32.mrf.mxu1 }
 0x2cc   : > { %v3470_v23 = vpop.f32.mrf.mxu0  ;;  %v6214_v13 = vadd.f32 %v6213_v25, %v6212_v10 }
 0x2cd   : > { %v9002_v17 = vadd.f32 %v6202_v3, %v3470_v23  ;;  %v6215_v41 = vpop.f32.mrf.mxu1  ;;  %v7073_v3 = vld [vmem:[#allocation9 + $0x30] sm:$0xff]  }
 0x2ce   : > { %v6635_v15 = vpop.f32.mrf.mxu0  ;;  %6738 = vmatprep.subr.bf16.mxu0 %v7073_v3 }
 0x2cf   : > { %v9004_v21 = vadd.f32 %v6635_v15, %v6211_v8  ;;  %v6216_v28 = vpop.f32.mrf.mxu1  ;;  %6739 = vmatpush3.bf16.msra.mxu0 %v7073_v3 }
 0x2d0   : > { %v9006_v0 = vpop.f32.mrf.mxu0  ;;  %v9008_v20 = vadd.f32 %v6216_v28, %v6215_v41  ;;  %6740 = vmatprep.subr.bf16.mxu0 %v7074_v12  ;;  %v3378_v28 = vadd.f32 %v8877_v50, %v8911_v18 }
 0x2d1   : > { %v6218_v22 = vpop.f32.mrf.mxu1  ;;  %4649 = vmatmul.mubr.bf16.gmra.mxu1 %v5853_v14 }
 0x2d2   : > { %v6638_v62 = vpop.f32.mrf.mxu0  ;;  %6733 = vmatmul.mubr.bf16.gmra.mxu0 %v7071_v40  ;;  %v7076_v40 = vld [vmem:[#allocation9 + $0x18] sm:$0xff]  }
 0x2d3   : > { %v6219_v38 = vpop.f32.mrf.mxu1  ;;  %6741 = vmatpush3.bf16.msra.mxu0 %v7074_v12 }
 0x2d4   : > { %v3486_v48 = vpop.f32.mrf.mxu0  ;;  %v6220_v46 = vadd.f32 %v6219_v38, %v6218_v22  ;;  %6742 = vmatprep.subr.bf16.mxu0 %v7075_v39  ;;  %v7077_v38 = vld [vmem:[#allocation9 + $0x10] sm:$0xff]  }
 0x2d5   : > { %v9010_v59 = vadd.f32 %v6214_v13, %v3486_v48  ;;  %v6221_v44 = vpop.f32.mrf.mxu1 }
 0x2d6   : > { %v6639_v58 = vpop.f32.mrf.mxu0  ;;  %v9012_v57 = vadd.f32 %v6638_v62, %v6220_v46 }
 0x2d7   : > { %v6222_v29 = vpop.f32.mrf.mxu1  ;;  %6743 = vmatpush3.bf16.msra.mxu0 %v7075_v39 }
 0x2d8   : > { %v9014_v8 = vpop.f32.mrf.mxu0  ;;  %v6223_v16 = vadd.f32 %v6222_v29, %v6221_v44  ;;  %6744 = vmatprep.subr.bf16.mxu0 %v7076_v40 }
 0x2d9   : > { %v6658_v32 = vpop.f32.mrf.mxu1 }
 0x2da   : > { %v6264_v34 = vpop.f32.mrf.mxu0  ;;  %v9016_v61 = vadd.f32 %v6639_v58, %v6223_v16 }
 0x2db   : > { %v3856_v23 = vpop.f32.mrf.mxu1  ;;  %6745 = vmatpush3.bf16.msra.mxu0 %v7076_v40  ;;  %v7079_v40 = vld [vmem:[#allocation9] sm:$0xff]  }
 0x2dc   : > { %v6265_v10 = vpop.f32.mrf.mxu0  ;;  %6746 = vmatprep.subr.bf16.mxu0 %v7077_v38 }
 0x2dd   : > { %v6266_v25 = vadd.f32 %v6265_v10, %v6264_v34  ;;  %v6659_v15 = vpop.f32.mrf.mxu1  ;;  %v7078_v34 = vld [vmem:[#allocation9 + $0x8] sm:$0xff]  }
 0x2de   : > { %v6267_v13 = vpop.f32.mrf.mxu0 }
 0x2df   : > { %v3696_v41 = vadd.f32 %v6266_v25, %v8898_v27  ;;  %v3859_v14 = vpop.f32.mrf.mxu1  ;;  %6747 = vmatpush3.bf16.msra.mxu0 %v7077_v38 }
 0x2e0   : > { %v6268_v2 = vpop.f32.mrf.mxu0  ;;  %6748 = vmatprep.subr.bf16.mxu0 %v7078_v34 }
 0x2e1   : > { %v6269_v62 = vadd.f32 %v6268_v2, %v6267_v13  ;;  %v9021_v22 = vadd.f32 %v3856_v23, %v3696_v41  ;;  %v6662_v48 = vpop.f32.mrf.mxu1 }
 0x2e2   : > { %v6270_v3 = vpop.f32.mrf.mxu0 }
 0x2e3   : > { %v3699_v46 = vadd.f32 %v6269_v62, %v3378_v28  ;;  %v3872_v44 = vpop.f32.mrf.mxu1  ;;  %6749 = vmatpush3.bf16.msra.mxu0 %v7078_v34 }
 0x2e4   : > { %v6271_v58 = vpop.f32.mrf.mxu0  ;;  %6750 = vmatprep.subr.bf16.mxu0 %v7079_v40 }
 0x2e5   : > { %v6272_v12 = vadd.f32 %v6271_v58, %v6270_v3  ;;  %v9023_v29 = vadd.f32 %v3859_v14, %v3699_v46  ;;  %v6663_v16 = vpop.f32.mrf.mxu1  ;;  %v3394_v58 = vadd.f32 %v8905_v37, %v8929_v19 }
 0x2e6   : > { %v6273_v27 = vpop.f32.mrf.mxu0 }
 0x2e7   : > { %v3704_v50 = vadd.f32 %v6272_v12, %v8892_v9  ;;  %v3875_v39 = vpop.f32.mrf.mxu1  ;;  %6751 = vmatpush3.bf16.msra.mxu0 %v7079_v40 }
 0x2e8   : > { %v6274_v18 = vpop.f32.mrf.mxu0 }
 0x2e9   : > { %v6275_v10 = vadd.f32 %v6274_v18, %v6273_v27  ;;  %v9026_v23 = vadd.f32 %v6658_v32, %v3704_v50  ;;  %v6666_v13 = vpop.f32.mrf.mxu1 }
 0x2ea   : > { %v6276_v25 = vpop.f32.mrf.mxu0 }
 0x2eb   : > { %v3707_v41 = vadd.f32 %v6275_v10, %v8903_v5  ;;  %v3888_v14 = vpop.f32.mrf.mxu1 }
 0x2ec   : > { %v6277_v2 = vpop.f32.mrf.mxu0 }
 0x2ed   : > { %v6278_v28 = vadd.f32 %v6277_v2, %v6276_v25  ;;  %v9029_v62 = vadd.f32 %v6659_v15, %v3707_v41  ;;  %v6667_v3 = vpop.f32.mrf.mxu1 }
 0x2ee   : > { %v6279_v9 = vpop.f32.mrf.mxu0 }
 0x2ef   : > { %v3712_v38 = vadd.f32 %v6278_v28, %v8921_v51  ;;  %v3891_v32 = vpop.f32.mrf.mxu1 }
 0x2f0   : > { %v6280_v46 = vpop.f32.mrf.mxu0 }
 0x2f1   : > { %v6281_v12 = vadd.f32 %v6280_v46, %v6279_v9  ;;  %v9034_v27 = vadd.f32 %v3872_v44, %v3712_v38  ;;  %v9036_v34 = vpop.f32.mrf.mxu1 }
 0x2f2   : > { %v6282_v5 = vpop.f32.mrf.mxu0 }
 0x2f3   : > { %v3715_v50 = vadd.f32 %v6281_v12, %v3394_v58  ;;  %v3904_v15 = vpop.f32.mrf.mxu1 }
 0x2f4   : > { %v6283_v18 = vpop.f32.mrf.mxu0 }
 0x2f5   : > { %v6284_v10 = vadd.f32 %v6283_v18, %v6282_v5  ;;  %v9038_v25 = vadd.f32 %v3875_v39, %v3715_v50  ;;  %v9040_v41 = vpop.f32.mrf.mxu1 }
 0x2f6   : > { %v6285_v40 = vpop.f32.mrf.mxu0 }
 0x2f7   : > { %9725 = vst [vmem:[#allocation18_spill] sm:$0xff] %v9038_v25  ;;  %v3720_v51 = vadd.f32 %v6284_v10, %v8916_v6  ;;  %v3907_v28 = vpop.f32.mrf.mxu1 }
 0x2f8   : > { %v6286_v2 = vpop.f32.mrf.mxu0 }
 0x2f9   : > { %v6287_v37 = vadd.f32 %v6286_v2, %v6285_v40  ;;  %v9043_v19 = vadd.f32 %v6662_v48, %v3720_v51  ;;  %v9045_v9 = vpop.f32.mrf.mxu1  ;;  %v3410_v48 = vadd.f32 %v8927_v60, %v8946_v7 }
 0x2fa   : > { %v6288_v44 = vpop.f32.mrf.mxu0 }
 0x2fb   : > { %v3723_v38 = vadd.f32 %v6287_v37, %v8923_v54  ;;  %v9048_v58 = vpop.f32.mrf.mxu1 }
 0x2fc   : > { %v6289_v46 = vpop.f32.mrf.mxu0 }
 0x2fd   : > { %v6290_v39 = vadd.f32 %v6289_v46, %v6288_v44  ;;  %v9050_v12 = vadd.f32 %v6663_v16, %v3723_v38  ;;  %v9052_v50 = vpop.f32.mrf.mxu1 }
 0x2fe   : > { %v6291_v5 = vpop.f32.mrf.mxu0 }
 0x2ff   : > { %9726 = vst [vmem:[#allocation20_spill] sm:$0xff] %v9050_v12  ;;  %v3728_v6 = vadd.f32 %v6290_v39, %v8936_v42  ;;  %v9055_v10 = vpop.f32.mrf.mxu1 }
 0x300   : > { %v6292_v18 = vpop.f32.mrf.mxu0 }
 0x301   : > { %v6293_v40 = vadd.f32 %v6292_v18, %v6291_v5  ;;  %v9059_v51 = vadd.f32 %v3888_v14, %v3728_v6  ;;  %v9061_v2 = vpop.f32.mrf.mxu1 }
 0x302   : > { %v6294_v54 = vpop.f32.mrf.mxu0 }
 0x303   : > { %9727 = vst [vmem:[#allocation19_spill] sm:$0xff] %v9059_v51  ;;  %v3731_v37 = vadd.f32 %v6293_v40, %v3410_v48  ;;  %v9063_v44 = vpop.f32.mrf.mxu1 }
 0x304   : > { %v6295_v16 = vpop.f32.mrf.mxu0 }
 0x305   : > { %v6296_v38 = vadd.f32 %v6295_v16, %v6294_v54  ;;  %v9065_v46 = vadd.f32 %v3891_v32, %v3731_v37  ;;  %v9067_v39 = vpop.f32.mrf.mxu1 }
 0x306   : > { %v6297_v42 = vpop.f32.mrf.mxu0 }
 0x307   : > { %9728 = vst [vmem:[#allocation17_spill] sm:$0xff] %v9065_v46  ;;  %v3736_v25 = vadd.f32 %v6296_v38, %v8934_v33  ;;  %v9070_v60 = vpop.f32.mrf.mxu1 }
 0x308   : > { %v6298_v12 = vpop.f32.mrf.mxu0 }
 0x309   : > { %v6299_v7 = vadd.f32 %v6298_v12, %v6297_v42  ;;  %v9072_v14 = vadd.f32 %v6666_v13, %v3736_v25  ;;  %v9074_v6 = vpop.f32.mrf.mxu1  ;;  %v3426_v13 = vadd.f32 %v8944_v53, %v8966_v56 }
 0x30a   : > { %v6300_v5 = vpop.f32.mrf.mxu0 }
 0x30b   : > { %v3739_v18 = vadd.f32 %v6299_v7, %v8938_v49  ;;  %v9077_v40 = vpop.f32.mrf.mxu1 }
 0x30c   : > { %v6301_v48 = vpop.f32.mrf.mxu0 }
 0x30d   : > { %v6302_v32 = vadd.f32 %v6301_v48, %v6300_v5  ;;  %v9079_v54 = vadd.f32 %v6667_v3, %v3739_v18  ;;  %v9081_v16 = vpop.f32.mrf.mxu1 }
 0x30e   : > { %v6303_v37 = vpop.f32.mrf.mxu0 }
 0x30f   : > { %9729 = vst [vmem:[#allocation16_spill] sm:$0xff] %v9079_v54  ;;  %v3744_v33 = vadd.f32 %v6302_v32, %v8954_v26  ;;  %v9084_v12 = vpop.f32.mrf.mxu1 }
 0x310   : > { %v6304_v38 = vpop.f32.mrf.mxu0 }
 0x311   : > { %v6305_v25 = vadd.f32 %v6304_v38, %v6303_v37  ;;  %v9088_v42 = vadd.f32 %v3904_v15, %v3744_v33  ;;  %v9090_v7 = vpop.f32.mrf.mxu1 }
 0x312   : > { %v6306_v49 = vpop.f32.mrf.mxu0  ;;  %9730 = vst [vmem:[#allocation21_spill] sm:$0xff] %v9090_v7 }
 0x313   : > { %v3747_v5 = vadd.f32 %v6305_v25, %v3426_v13  ;;  %v9092_v18 = vpop.f32.mrf.mxu1 }
 0x314   : > { %v6307_v3 = vpop.f32.mrf.mxu0 }
 0x315   : > { %v6308_v48 = vadd.f32 %v6307_v3, %v6306_v49  ;;  %v9094_v46 = vadd.f32 %v3907_v28, %v3747_v5  ;;  %v9096_v32 = vpop.f32.mrf.mxu1 }
 0x316   : > { %v6309_v26 = vpop.f32.mrf.mxu0  ;;  %9731 = vst [vmem:[#allocation22_spill] sm:$0xff] %v9096_v32 }
 0x317   : > { %v3752_v54 = vadd.f32 %v6308_v48, %v8952_v30  ;;  %v9099_v53 = vpop.f32.mrf.mxu1 }
 0x318   : > { %v6310_v51 = vpop.f32.mrf.mxu0 }
 0x319   : > { %v6311_v56 = vadd.f32 %v6310_v51, %v6309_v26  ;;  %v9102_v15 = vadd.f32 %v9036_v34, %v3752_v54  ;;  %v6400_v33 = vpop.f32.mrf.mxu1  ;;  %v3442_v54 = vadd.f32 %v8961_v35, %v8979_v31 }
 0x31a   : > { %v6312_v37 = vpop.f32.mrf.mxu0 }
 0x31b   : > { %v3755_v38 = vadd.f32 %v6311_v56, %v8956_v47  ;;  %v6401_v25 = vpop.f32.mrf.mxu1 }
 0x31c   : > { %v6313_v13 = vpop.f32.mrf.mxu0  ;;  %v9108_v5 = vadd.f32 %v6401_v25, %v6400_v33 }
 0x31d   : > { %v6314_v28 = vadd.f32 %v6313_v13, %v6312_v37  ;;  %v9106_v49 = vadd.f32 %v9040_v41, %v3755_v38  ;;  %v9110_v3 = vpop.f32.mrf.mxu1 }
 0x31e   : > { %v6315_v30 = vpop.f32.mrf.mxu0 }
 0x31f   : > { %v3760_v51 = vadd.f32 %v6314_v28, %v8971_v24  ;;  %v9113_v34 = vpop.f32.mrf.mxu1 }
 0x320   : > { %v6316_v48 = vpop.f32.mrf.mxu0 }
 0x321   : > { %v6317_v47 = vadd.f32 %v6316_v48, %v6315_v30  ;;  %v9118_v26 = vadd.f32 %v9048_v58, %v3760_v51  ;;  %v9120_v41 = vpop.f32.mrf.mxu1 }
 0x322   : > { %v6318_v56 = vpop.f32.mrf.mxu0 }
 0x323   : > { %v3763_v37 = vadd.f32 %v6317_v47, %v3442_v54  ;;  %v9122_v38 = vpop.f32.mrf.mxu1 }
 0x324   : > { %v6319_v33 = vpop.f32.mrf.mxu0 }
 0x325   : > { %v6320_v13 = vadd.f32 %v6319_v33, %v6318_v56  ;;  %v9125_v24 = vadd.f32 %v9055_v10, %v3763_v37  ;;  %v9127_v28 = vpop.f32.mrf.mxu1 }
 0x326   : > { %v6321_v25 = vpop.f32.mrf.mxu0 }
 0x327   : > { %9732 = vst [vmem:[#allocation23_spill] sm:$0xff] %v9125_v24  ;;  %v3768_v35 = vadd.f32 %v6320_v13, %v8968_v45  ;;  %v9130_v30 = vpop.f32.mrf.mxu1 }
 0x328   : > { %v6322_v31 = vpop.f32.mrf.mxu0 }
 0x329   : > { %v6323_v58 = vadd.f32 %v6322_v31, %v6321_v25  ;;  %v9133_v51 = vadd.f32 %v9045_v9, %v3768_v35  ;;  %v9135_v54 = vpop.f32.mrf.mxu1  ;;  %v3458_v35 = vadd.f32 %v8976_v43, %v8997_v36 }
 0x32a   : > { %v6324_v48 = vpop.f32.mrf.mxu0 }
 0x32b   : > { %v3771_v47 = vadd.f32 %v6323_v58, %v8973_v63  ;;  %v9138_v10 = vpop.f32.mrf.mxu1 }
 0x32c   : > { %v6325_v56 = vpop.f32.mrf.mxu0 }
 0x32d   : > { %v6326_v37 = vadd.f32 %v6325_v56, %v6324_v48  ;;  %v9141_v33 = vadd.f32 %v9052_v50, %v3771_v47  ;;  %v9143_v13 = vpop.f32.mrf.mxu1 }
 0x32e   : > { %v6327_v45 = vpop.f32.mrf.mxu0 }
 0x32f   : > { %v3776_v25 = vadd.f32 %v6326_v37, %v8985_v52  ;;  %v9146_v9 = vpop.f32.mrf.mxu1 }
 0x330   : > { %v6328_v31 = vpop.f32.mrf.mxu0 }
 0x331   : > { %v6329_v32 = vadd.f32 %v6328_v31, %v6327_v45  ;;  %v9151_v63 = vadd.f32 %v9063_v44, %v3776_v25  ;;  %v9153_v48 = vpop.f32.mrf.mxu1 }
 0x332   : > { %v6330_v58 = vpop.f32.mrf.mxu0 }
 0x333   : > { %9733 = vst [vmem:[#allocation24_spill] sm:$0xff] %v9151_v63  ;;  %v3779_v50 = vadd.f32 %v6329_v32, %v3458_v35  ;;  %v9155_v56 = vpop.f32.mrf.mxu1 }
 0x334   : > { %v6331_v47 = vpop.f32.mrf.mxu0 }
 0x335   : > { %v6332_v7 = vadd.f32 %v6331_v47, %v6330_v58  ;;  %v9158_v52 = vadd.f32 %v9070_v60, %v3779_v50  ;;  %v9160_v24 = vpop.f32.mrf.mxu1 }
 0x336   : > { %v6333_v37 = vpop.f32.mrf.mxu0 }
 0x337   : > { %9734 = vst [vmem:[#allocation25_spill] sm:$0xff] %v9158_v52  ;;  %v3784_v43 = vadd.f32 %v6332_v7, %v8983_v55  ;;  %v9163_v45 = vpop.f32.mrf.mxu1 }
 0x338   : > { %v6334_v36 = vpop.f32.mrf.mxu0 }
 0x339   : > { %v6335_v44 = vadd.f32 %v6334_v36, %v6333_v37  ;;  %v9166_v25 = vadd.f32 %v9061_v2, %v3784_v43  ;;  %v9168_v31 = vpop.f32.mrf.mxu1  ;;  %v3474_v43 = vadd.f32 %v8993_v1, %v9006_v0 }
 0x33a   : > { %v6336_v32 = vpop.f32.mrf.mxu0 }
 0x33b   : > { %v3787_v35 = vadd.f32 %v6335_v44, %v8988_v11  ;;  %v9171_v60 = vpop.f32.mrf.mxu1 }
 0x33c   : > { %v6337_v58 = vpop.f32.mrf.mxu0 }
 0x33d   : > { %v6338_v50 = vadd.f32 %v6337_v58, %v6336_v32  ;;  %v9174_v47 = vadd.f32 %v9067_v39, %v3787_v35  ;;  %v9176_v7 = vpop.f32.mrf.mxu1 }
 0x33e   : > { %v6339_v55 = vpop.f32.mrf.mxu0 }
 0x33f   : > { %9735 = vst [vmem:[#allocation26_spill] sm:$0xff] %v9174_v47  ;;  %v3792_v37 = vadd.f32 %v6338_v50, %v9002_v17  ;;  %v9179_v2 = vpop.f32.mrf.mxu1 }
 0x340   : > { %v6340_v36 = vpop.f32.mrf.mxu0 }
 0x341   : > { %v6341_v52 = vadd.f32 %v6340_v36, %v6339_v55  ;;  %v9184_v11 = vadd.f32 %v9077_v40, %v3792_v37  ;;  %v9186_v32 = vpop.f32.mrf.mxu1 }
 0x342   : > { %v6342_v44 = vpop.f32.mrf.mxu0 }
 0x343   : > { %9736 = vst [vmem:[#allocation27_spill] sm:$0xff] %v9184_v11  ;;  %v3795_v39 = vadd.f32 %v6341_v52, %v3474_v43  ;;  %v9188_v58 = vpop.f32.mrf.mxu1 }
 0x344   : > { %v6343_v35 = vpop.f32.mrf.mxu0 }
 0x345   : > { %v6344_v47 = vadd.f32 %v6343_v35, %v6342_v44  ;;  %v9191_v17 = vadd.f32 %v9084_v12, %v3795_v39  ;;  %v9193_v63 = vpop.f32.mrf.mxu1 }
 0x346   : > { %v6345_v50 = vpop.f32.mrf.mxu0 }
 0x347   : > { %9737 = vst [vmem:[#allocation28_spill] sm:$0xff] %v9191_v17  ;;  %v3800_v1 = vadd.f32 %v6344_v47, %v9000_v4  ;;  %v9196_v55 = vpop.f32.mrf.mxu1 }
 0x348   : > { %v6346_v0 = vpop.f32.mrf.mxu0 }
 0x349   : > { %v9199_v40 = vadd.f32 %v9074_v6, %v3800_v1  ;;  %v6347_v37 = vadd.f32 %v6346_v0, %v6345_v50  ;;  %v9201_v36 = vpop.f32.mrf.mxu1  ;;  %v3490_v50 = vadd.f32 %v9008_v20, %v9014_v8  ;;  %v6408_v8 = vadd.f32 %v9122_v38, %v9120_v41 }
 0x34a   : > { %v6348_v52 = vpop.f32.mrf.mxu0 }
 0x34b   : > { %v3803_v43 = vadd.f32 %v6347_v37, %v9004_v21  ;;  %v9204_v12 = vpop.f32.mrf.mxu1 }
 0x34c   : > { %v6349_v44 = vpop.f32.mrf.mxu0 }
 0x34d   : > { %v9207_v39 = vadd.f32 %v9081_v16, %v3803_v43  ;;  %v6350_v35 = vadd.f32 %v6349_v44, %v6348_v52  ;;  %v9209_v47 = vpop.f32.mrf.mxu1 }
 0x34e   : > { %v6351_v4 = vpop.f32.mrf.mxu0 }
 0x34f   : > { %9738 = vst [vmem:[#allocation29_spill] sm:$0xff] %v9207_v39  ;;  %v3808_v17 = vadd.f32 %v6350_v35, %v9010_v59  ;;  %v9212_v1 = vpop.f32.mrf.mxu1 }
 0x350   : > { %v6352_v6 = vpop.f32.mrf.mxu0 }
 0x351   : > { %v9217_v21 = vadd.f32 %v9092_v18, %v3808_v17  ;;  %v6353_v0 = vadd.f32 %v6352_v6, %v6351_v4  ;;  %v9219_v11 = vpop.f32.mrf.mxu1 }
 0x352   : > { %v6354_v37 = vpop.f32.mrf.mxu0 }
 0x353   : > { %v3811_v16 = vadd.f32 %v6353_v0, %v3490_v50  ;;  %v9221_v43 = vpop.f32.mrf.mxu1 }
 0x354   : > { %v6355_v52 = vpop.f32.mrf.mxu0 }
 0x355   : > { %v9224_v44 = vadd.f32 %v9099_v53, %v3811_v16  ;;  %v6356_v59 = vadd.f32 %v6355_v52, %v6354_v37  ;;  %v9226_v39 = vpop.f32.mrf.mxu1  ;;  %v6411_v37 = vadd.f32 %v9130_v30, %v9127_v28  ;;  %v9256_v28 = vld [vmem:[%s9501_s4] ss:$0 sm:$0xff] }
 0x356   : > { %v6357_v35 = vpop.f32.mrf.mxu0 }
 0x357   : > { %v9229_v20 = vadd.f32 %v6356_v59, %v9012_v57  ;;  %v9233_v17 = vpop.f32.mrf.mxu1 }
 0x358   : > { %v6358_v18 = vpop.f32.mrf.mxu0 }
 0x359   : > { %v6359_v4 = vadd.f32 %v6358_v18, %v6357_v35  ;;  %v9235_v50 = vpop.f32.mrf.mxu1  ;;  %v6405_v35 = vadd.f32 %v9113_v34, %v9110_v3 }
 0x35a   : > { %v6706_v6 = vpop.f32.mrf.mxu0 }
 0x35b   : > { %v9238_v53 = vadd.f32 %v6359_v4, %v9016_v61  ;;  %v4700_v0 = vadd.f32 %v6706_v6, %v6408_v8  ;;  %v9242_v57 = vpop.f32.mrf.mxu1  ;;  %v6420_v8 = vadd.f32 %v9155_v56, %v9153_v48 }
 0x35c   : > { %v4691_v16 = vpop.f32.mrf.mxu0 }
 0x35d   : > { %v4692_v52 = vadd.f32 %v9108_v5, %v4691_v16  ;;  %v4820_v41 = vadd.f32 %v4700_v0, %v9026_v23  ;;  %v9246_v59 = vpop.f32.mrf.mxu1 }
 0x35e   : > { %v6707_v38 = vpop.f32.mrf.mxu0 }
 0x35f   : > { %v4818_v61 = vadd.f32 %v4692_v52, %v9021_v22  ;;  %v4703_v18 = vadd.f32 %v6707_v38, %v6411_v37  ;;  %v9258_v30 = vpop.f32.mrf.mxu1  ;;  %v4859_v23 = vadd.f32 %v9256_v28, %v4820_v41  ;;  %v6414_v22 = vadd.f32 %v9138_v10, %v9135_v54 }
 0x360   : > { %v4694_v5 = vpop.f32.mrf.mxu0  ;;  %v6417_v52 = vadd.f32 %v9146_v9, %v9143_v13 }
 0x361   : > { %v4695_v4 = vadd.f32 %v6405_v35, %v4694_v5  ;;  %v4821_v6 = vadd.f32 %v4703_v18, %v9029_v62  ;;  %v9264_v34 = vpop.f32.mrf.mxu1  ;;  %v4857_v48 = vadd.f32 %v9256_v28, %v4818_v61  ;;  %v6423_v62 = vadd.f32 %v9163_v45, %v9160_v24 }
 0x362   : > { %v6710_v3 = vpop.f32.mrf.mxu0  ;;  %v4891_v54 = vmax.f32 %v4859_v23, 0.0  ;;  %v6432_v18 = vadd.f32 %v9188_v58, %v9186_v32  ;;  %v9739_v32 = vld [vmem:[#allocation20_spill] sm:$0xff] }
 0x363   : > { %v4819_v56 = vadd.f32 %v4695_v4, %v9023_v29  ;;  %v4860_v0 = vadd.f32 %v9256_v28, %v4821_v6  ;;  %v4716_v37 = vadd.f32 %v6710_v3, %v6420_v8  ;;  %v9273_v41 = vpop.f32.mrf.mxu1  ;;  %v4889_v5 = vmax.f32 %v4857_v48, 0.0  ;;  %v9740_v48 = vld [vmem:[#allocation18_spill] sm:$0xff] }
 0x364   : > { %v4707_v16 = vpop.f32.mrf.mxu0 }
 0x365   : > { %v4858_v10 = vadd.f32 %v9256_v28, %v4819_v56  ;;  %v4892_v38 = vmax.f32 %v4860_v0, 0.0  ;;  %v4708_v35 = vadd.f32 %v6414_v22, %v4707_v16  ;;  %v4824_v29 = vadd.f32 %v4716_v37, %v9043_v19  ;;  %v9279_v8 = vpop.f32.mrf.mxu1 }
 0x366   : > { %v6711_v61 = vpop.f32.mrf.mxu0  ;;  %v6426_v22 = vadd.f32 %v9171_v60, %v9168_v31 }
 0x367   : > { %v4890_v13 = vmax.f32 %v4858_v10, 0.0  ;;  %v4922_v9 = vpack.c.bf16 %v4892_v38, %v4891_v54  ;;  %v4822_v24 = vadd.f32 %v4708_v35, %v9034_v27  ;;  %v4719_v4 = vadd.f32 %v6711_v61, %v6423_v62  ;;  %v9282_v23 = vpop.f32.mrf.mxu1 }
 0x368   : > { %v4710_v45 = vpop.f32.mrf.mxu0  ;;  %v4863_v56 = vadd.f32 %v9256_v28, %v4824_v29  ;;  %v6429_v38 = vadd.f32 %v9179_v2, %v9176_v7  ;;  %v6438_v7 = vadd.f32 %v9204_v12, %v9201_v36  ;;  %v6441_v36 = vadd.f32 %v9212_v1, %v9209_v47 }
 0x369   : > { %v4711_v6 = vadd.f32 %v6417_v52, %v4710_v45  ;;  %v4921_v3 = vpack.c.bf16 %v4890_v13, %v4889_v5  ;;  %v4825_v58 = vadd.f32 %v4719_v4, %v9739_v32  ;;  %v9288_v0 = vpop.f32.mrf.mxu1  ;;  %v4861_v27 = vadd.f32 %v9256_v28, %v4822_v24  ;;  %v9741_v5 = vld [vmem:[#allocation19_spill] sm:$0xff]  ;;  %v9743_v32 = vld [vmem:[#allocation17_spill] sm:$0xff] }
 0x36a   : > { %v6714_v19 = vpop.f32.mrf.mxu0  ;;  %v6435_v52 = vadd.f32 %v9196_v55, %v9193_v63  ;;  %v4895_v29 = vmax.f32 %v4863_v56, 0.0  ;;  %v6444_v63 = vadd.f32 %v9221_v43, %v9219_v11  ;;  %v6447_v12 = vadd.f32 %v9233_v17, %v9226_v39 }
 0x36b   : > { %v4823_v37 = vadd.f32 %v4711_v6, %v9740_v48  ;;  %6752 = vmatprep.mubr.bf16.mxu0 %v4921_v3  ;;  %v4732_v16 = vadd.f32 %v6714_v19, %v6432_v18  ;;  %v4864_v31 = vadd.f32 %v9256_v28, %v4825_v58  ;;  %v9295_v60 = vpop.f32.mrf.mxu1  ;;  %v9742_v19 = vld [vmem:[#allocation16_spill] sm:$0xff] }
 0x36c   : > { %v4723_v62 = vpop.f32.mrf.mxu0  ;;  %6753 = vmatmul.mubr.bf16.vlgmr.msra.gmra.mxu0 %v4922_v9  ;;  %v4893_v9 = vmax.f32 %v4861_v27, 0.0 }
 0x36d   : > { %v4724_v54 = vadd.f32 %v6426_v22, %v4723_v62  ;;  %v4862_v10 = vadd.f32 %v9256_v28, %v4823_v37  ;;  %v4828_v35 = vadd.f32 %v4732_v16, %v9072_v14  ;;  %v4896_v18 = vmax.f32 %v4864_v31, 0.0  ;;  %v9303_v55 = vpop.f32.mrf.mxu1 }
 0x36e   : > { %v6715_v61 = vpop.f32.mrf.mxu0 }
 0x36f   : > { %v4826_v13 = vadd.f32 %v4724_v54, %v9741_v5  ;;  %v4894_v24 = vmax.f32 %v4862_v10, 0.0  ;;  %v4735_v45 = vadd.f32 %v6715_v61, %v6435_v52  ;;  %v4924_v6 = vpack.c.bf16 %v4896_v18, %v4895_v29  ;;  %v9308_v2 = vpop.f32.mrf.mxu1 }
 0x370   : > { %v4726_v4 = vpop.f32.mrf.mxu0  ;;  %v4867_v22 = vadd.f32 %v9256_v28, %v4828_v35  ;;  %v6456_v61 = vadd.f32 %v9273_v41, %v9264_v34 }
 0x371   : > { %v4923_v14 = vpack.c.bf16 %v4894_v24, %v4893_v9  ;;  %v4727_v3 = vadd.f32 %v6429_v38, %v4726_v4  ;;  %v4829_v11 = vadd.f32 %v4735_v45, %v9742_v19  ;;  %v6466_v56 = vpop.f32.mrf.mxu1  ;;  %v4865_v37 = vadd.f32 %v9256_v28, %v4826_v13 }
 0x372   : > { %v6718_v43 = vpop.f32.mrf.mxu0  ;;  %v4899_v62 = vmax.f32 %v4867_v22, 0.0  ;;  %v6450_v24 = vadd.f32 %v9242_v57, %v9235_v50 }
 0x373   : > { %6756 = vmatprep.mubr.bf16.mxu0 %v4923_v14  ;;  %v4827_v58 = vadd.f32 %v4727_v3, %v9743_v32  ;;  %v4868_v48 = vadd.f32 %v9256_v28, %v4829_v11  ;;  %v4748_v27 = vadd.f32 %v6718_v43, %v6444_v63  ;;  %v6467_v52 = vpop.f32.mrf.mxu1  ;;  %v4897_v63 = vmax.f32 %v4865_v37, 0.0 }
 0x374   : > { %v4739_v16 = vpop.f32.mrf.mxu0  ;;  %6757 = vmatmul.mubr.bf16.gmra.mxu0 %v4924_v6  ;;  %v6468_v32 = vadd.f32 %v6467_v52, %v6466_v56 }
 0x375   : > { %v4900_v31 = vmax.f32 %v4868_v48, 0.0  ;;  %v4740_v54 = vadd.f32 %v6438_v7, %v4739_v16  ;;  %v4866_v10 = vadd.f32 %v9256_v28, %v4827_v58  ;;  %v4832_v35 = vadd.f32 %v4748_v27, %v9102_v15  ;;  %v6469_v29 = vpop.f32.mrf.mxu1 }
 0x376   : > { %v6719_v38 = vpop.f32.mrf.mxu0  ;;  %v6459_v7 = vadd.f32 %v9282_v23, %v9279_v8 }
 0x377   : > { %v4830_v18 = vadd.f32 %v4740_v54, %v9088_v42  ;;  %v4898_v47 = vmax.f32 %v4866_v10, 0.0  ;;  %v4926_v1 = vpack.c.bf16 %v4900_v31, %v4899_v62  ;;  %v4751_v39 = vadd.f32 %v6719_v38, %v6447_v12  ;;  %v6470_v17 = vpop.f32.mrf.mxu1 }
 0x378   : > { %v4742_v5 = vpop.f32.mrf.mxu0  ;;  %v4871_v15 = vadd.f32 %v9256_v28, %v4832_v35 }
 0x379   : > { %v4925_v13 = vpack.c.bf16 %v4898_v47, %v4897_v63  ;;  %v4743_v9 = vadd.f32 %v6441_v36, %v4742_v5  ;;  %v4833_v4 = vadd.f32 %v4751_v39, %v9106_v49  ;;  %v6472_v34 = vpop.f32.mrf.mxu1  ;;  %v4869_v41 = vadd.f32 %v9256_v28, %v4830_v18 }
 0x37a   : > { %v6722_v45 = vpop.f32.mrf.mxu0  ;;  %v6453_v49 = vadd.f32 %v9258_v30, %v9246_v59  ;;  %v4903_v11 = vmax.f32 %v4871_v15, 0.0  ;;  %v6462_v36 = vadd.f32 %v9295_v60, %v9288_v0  ;;  %v6465_v0 = vadd.f32 %v9308_v2, %v9303_v55 }
 0x37b   : > { %6760 = vmatprep.mubr.bf16.mxu0 %v4925_v13  ;;  %v4831_v42 = vadd.f32 %v4743_v9, %v9094_v46  ;;  %v4764_v6 = vadd.f32 %v6722_v45, %v6456_v61  ;;  %v4872_v3 = vadd.f32 %v9256_v28, %v4833_v4  ;;  %v6473_v50 = vpop.f32.mrf.mxu1  ;;  %v4901_v23 = vmax.f32 %v4869_v41, 0.0  ;;  %v9745_v9 = vld [vmem:[#allocation24_spill] sm:$0xff] }
 0x37c   : > { %v4755_v14 = vpop.f32.mrf.mxu0  ;;  %6761 = vmatmul.mubr.bf16.gmra.mxu0 %v4926_v1  ;;  %v6471_v60 = vadd.f32 %v6470_v17, %v6469_v29  ;;  %v6474_v17 = vadd.f32 %v6473_v50, %v6472_v34 }
 0x37d   : > { %v4756_v57 = vadd.f32 %v6450_v24, %v4755_v14  ;;  %v4870_v22 = vadd.f32 %v9256_v28, %v4831_v42  ;;  %v4836_v19 = vadd.f32 %v4764_v6, %v9133_v51  ;;  %v4904_v43 = vmax.f32 %v4872_v3, 0.0  ;;  %v6475_v58 = vpop.f32.mrf.mxu1  ;;  %v9746_v14 = vld [vmem:[#allocation26_spill] sm:$0xff] }
 0x37e   : > { %v6723_v46 = vpop.f32.mrf.mxu0 }
 0x37f   : > { %v4834_v8 = vadd.f32 %v4756_v57, %v9118_v26  ;;  %v4902_v48 = vmax.f32 %v4870_v22, 0.0  ;;  %v4767_v37 = vadd.f32 %v6723_v46, %v6459_v7  ;;  %v4928_v16 = vpack.c.bf16 %v4904_v43, %v4903_v11  ;;  %v6476_v12 = vpop.f32.mrf.mxu1  ;;  %v9744_v26 = vld [vmem:[#allocation23_spill] sm:$0xff] }
 0x380   : > { %v4758_v27 = vpop.f32.mrf.mxu0  ;;  %v4875_v51 = vadd.f32 %v9256_v28, %v4836_v19  ;;  %v6477_v50 = vadd.f32 %v6476_v12, %v6475_v58 }
 0x381   : > { %v4927_v62 = vpack.c.bf16 %v4902_v48, %v4901_v23  ;;  %v4759_v59 = vadd.f32 %v6453_v49, %v4758_v27  ;;  %v4837_v30 = vadd.f32 %v4767_v37, %v9141_v33  ;;  %v4873_v56 = vadd.f32 %v9256_v28, %v4834_v8  ;;  %v6478_v52 = vpop.f32.mrf.mxu1 }
 0x382   : > { %v6726_v31 = vpop.f32.mrf.mxu0  ;;  %v4907_v18 = vmax.f32 %v4875_v51, 0.0 }
 0x383   : > { %6764 = vmatprep.mubr.bf16.mxu0 %v4927_v62  ;;  %v4835_v54 = vadd.f32 %v4759_v59, %v9744_v26  ;;  %v4876_v10 = vadd.f32 %v9256_v28, %v4837_v30  ;;  %v4780_v38 = vadd.f32 %v6726_v31, %v6468_v32  ;;  %v6479_v61 = vpop.f32.mrf.mxu1  ;;  %v4905_v5 = vmax.f32 %v4873_v56, 0.0 }
 0x384   : > { %v4771_v35 = vpop.f32.mrf.mxu0  ;;  %6765 = vmatmul.mubr.bf16.gmra.mxu0 %v4928_v16  ;;  %v6480_v4 = vadd.f32 %v6479_v61, %v6478_v52 }
 0x385   : > { %v4908_v63 = vmax.f32 %v4876_v10, 0.0  ;;  %v4772_v33 = vadd.f32 %v6462_v36, %v4771_v35  ;;  %v4874_v47 = vadd.f32 %v9256_v28, %v4835_v54  ;;  %v4840_v39 = vadd.f32 %v4780_v38, %v9166_v25  ;;  %v6481_v13 = vpop.f32.mrf.mxu1  ;;  %v9747_v25 = vld [vmem:[#allocation25_spill] sm:$0xff]  ;;  %v9748_v36 = vld [vmem:[#allocation27_spill] sm:$0xff] }
 0x386   : > { %v6727_v1 = vpop.f32.mrf.mxu0  ;;  %v9749_v38 = vld [vmem:[#allocation29_spill] sm:$0xff] }
 0x387   : > { %v4838_v24 = vadd.f32 %v4772_v33, %v9745_v9  ;;  %v4906_v45 = vmax.f32 %v4874_v47, 0.0  ;;  %v4930_v15 = vpack.c.bf16 %v4908_v63, %v4907_v18  ;;  %v4783_v41 = vadd.f32 %v6727_v1, %v6471_v60  ;;  %v6482_v55 = vpop.f32.mrf.mxu1  ;;  %v9750_v60 = vld [vmem:[#allocation28_spill] sm:$0xff] }
 0x388   : > { %v4774_v42 = vpop.f32.mrf.mxu0  ;;  %v4879_v7 = vadd.f32 %v9256_v28, %v4840_v39  ;;  %v6483_v46 = vadd.f32 %v6482_v55, %v6481_v13 }
 0x389   : > { %v4929_v2 = vpack.c.bf16 %v4906_v45, %v4905_v5  ;;  %v4775_v29 = vadd.f32 %v6465_v0, %v4774_v42  ;;  %v4841_v3 = vadd.f32 %v4783_v41, %v9746_v14  ;;  %v6484_v57 = vpop.f32.mrf.mxu1  ;;  %v4877_v49 = vadd.f32 %v9256_v28, %v4838_v24 }
 0x38a   : > { %v6730_v6 = vpop.f32.mrf.mxu0  ;;  %v4911_v37 = vmax.f32 %v4879_v7, 0.0 }
 0x38b   : > { %6768 = vmatprep.mubr.bf16.mxu0 %v4929_v2  ;;  %v4839_v22 = vadd.f32 %v4775_v29, %v9747_v25  ;;  %v4796_v19 = vadd.f32 %v6730_v6, %v6480_v4  ;;  %v4880_v43 = vadd.f32 %v9256_v28, %v4841_v3  ;;  %v6485_v32 = vpop.f32.mrf.mxu1  ;;  %v4909_v59 = vmax.f32 %v4877_v49, 0.0  ;;  %v9751_v2 = vld [vmem:[#allocation21_spill] sm:$0xff]  ;;  %v9752_v49 = vld [vmem:[#allocation22_spill] sm:$0xff] }
 0x38c   : > { %v4787_v11 = vpop.f32.mrf.mxu0  ;;  %6769 = vmatmul.mubr.bf16.gmra.mxu0 %v4930_v15  ;;  %v6486_v12 = vadd.f32 %v6485_v32, %v6484_v57  ;;  %v3977_v29 = vadd.f32 %v9751_v2, %v9229_v20 }
 0x38d   : > { %v4788_v8 = vadd.f32 %v6474_v17, %v4787_v11  ;;  %v4878_v34 = vadd.f32 %v9256_v28, %v4839_v22  ;;  %v4844_v23 = vadd.f32 %v4796_v19, %v9199_v40  ;;  %v4912_v27 = vmax.f32 %v4880_v43, 0.0  ;;  %v6487_v16 = vpop.f32.mrf.mxu1 }
 0x38e   : > { %v6731_v48 = vpop.f32.mrf.mxu0  ;;  %v3980_v19 = vadd.f32 %v9752_v49, %v9238_v53  ;;  %v9377_v53 = vld [vmem:[%s9503_s6] ss:$0 sm:$0xff] }
 0x38f   : > { %v4842_v62 = vadd.f32 %v4788_v8, %v9748_v36  ;;  %v4910_v51 = vmax.f32 %v4878_v34, 0.0  ;;  %v4799_v30 = vadd.f32 %v6731_v48, %v6483_v46  ;;  %v4883_v56 = vadd.f32 %v9256_v28, %v4844_v23  ;;  %v6488_v26 = vpop.f32.mrf.mxu1 }
 0x390   : > { %v4790_v31 = vpop.f32.mrf.mxu0  ;;  %v4932_v52 = vpack.c.bf16 %v4912_v27, %v4911_v37  ;;  %v6489_v47 = vadd.f32 %v6488_v26, %v6487_v16  ;;  %v7126_v27 = vld [vmem:[%s7526_s12 + $0x8] sm:$0xff]  }
 0x391   : > { %v4931_v54 = vpack.c.bf16 %v4910_v51, %v4909_v59  ;;  %v4791_v10 = vadd.f32 %v6477_v50, %v4790_v31  ;;  %v4845_v58 = vadd.f32 %v4799_v30, %v9749_v38  ;;  %v4881_v35 = vadd.f32 %v9256_v28, %v4842_v62  ;;  %v6490_v0 = vpop.f32.mrf.mxu1  ;;  %v7127_v62 = vld [vmem:[%s7526_s12] sm:$0xff]  }
 0x392   : > { %v6734_v40 = vpop.f32.mrf.mxu0  ;;  %v4915_v63 = vmax.f32 %v4883_v56, 0.0  ;;  %v5171_v16 = vunpack.c.l.bf16 %v7126_v27  ;;  %v5172_v51 = vunpack.c.h.bf16 %v7126_v27  ;;  %v5170_v31 = vunpack.c.h.bf16 %v7127_v62 }
 0x393   : > { %6772 = vmatprep.mubr.bf16.mxu0 %v4931_v54  ;;  %v4843_v61 = vadd.f32 %v4791_v10, %v9750_v60  ;;  %v4884_v18 = vadd.f32 %v9256_v28, %v4845_v58  ;;  %v6491_v1 = vpop.f32.mrf.mxu1  ;;  %v4913_v24 = vmax.f32 %v4881_v35, 0.0 }
 0x394   : > { %6773 = vmatmul.mubr.bf16.gmra.mxu0 %v4932_v52  ;;  %v4803_v33 = vpop.f32.mrf.mxu0  ;;  %v6492_v9 = vadd.f32 %v6491_v1, %v6490_v0 }
 0x395   : > { %v4916_v5 = vmax.f32 %v4884_v18, 0.0  ;;  %v4882_v39 = vadd.f32 %v9256_v28, %v4843_v61  ;;  %v4804_v13 = vadd.f32 %v6486_v12, %v4803_v33  ;;  %v6493_v15 = vpop.f32.mrf.mxu1  ;;  %v7128_v12 = vld [vmem:[%s7526_s12 + $0x18] sm:$0xff]  }
 0x396   : > { %v6735_v45 = vpop.f32.mrf.mxu0  ;;  %v4812_v41 = vadd.f32 %v6734_v40, %v6492_v9  ;;  %v5175_v40 = vunpack.c.l.bf16 %v7128_v12 }
 0x397   : > { %v4914_v4 = vmax.f32 %v4882_v39, 0.0  ;;  %v4846_v42 = vadd.f32 %v4804_v13, %v9217_v21  ;;  %v4934_v55 = vpack.c.bf16 %v4916_v5, %v4915_v63  ;;  %v6494_v6 = vpop.f32.mrf.mxu1  ;;  %v7129_v63 = vld [vmem:[%s7526_s12 + $0x10] sm:$0xff]  }
 0x398   : > { %v4806_v17 = vpop.f32.mrf.mxu0  ;;  %v4848_v3 = vadd.f32 %v4812_v41, %v3977_v29  ;;  %v6495_v57 = vadd.f32 %v6494_v6, %v6493_v15  ;;  %v5173_v33 = vunpack.c.l.bf16 %v7129_v63 }
 0x399   : > { %v4933_v7 = vpack.c.bf16 %v4914_v4, %v4913_v24  ;;  %v4807_v14 = vadd.f32 %v6489_v47, %v4806_v17  ;;  %v4885_v25 = vadd.f32 %v9256_v28, %v4846_v42  ;;  %v5176_v47 = vunpack.c.h.bf16 %v7128_v12  ;;  %v7130_v17 = vld [vmem:[%s7526_s12 + $0x28] sm:$0xff]  }
 0x39a   : > { %v4815_v21 = vadd.f32 %v6735_v45, %v6495_v57  ;;  %v4887_v20 = vadd.f32 %v9256_v28, %v4848_v3  ;;  %v5174_v4 = vunpack.c.h.bf16 %v7129_v63  ;;  %v5179_v6 = vunpack.c.l.bf16 %v7130_v17 }
 0x39b   : > { %6776 = vmatprep.mubr.bf16.mxu0 %v4933_v7  ;;  %v4847_v22 = vadd.f32 %v4807_v14, %v9224_v44  ;;  %v4917_v43 = vmax.f32 %v4885_v25, 0.0 }
 0x39c   : > { %6777 = vmatmul.mubr.bf16.gmra.mxu0 %v4934_v55  ;;  %v4849_v11 = vadd.f32 %v4815_v21, %v3980_v19  ;;  %v4919_v50 = vmax.f32 %v4887_v20, 0.0  ;;  %v5180_v19 = vunpack.c.h.bf16 %v7130_v17 }
 0x39d   : > { %v4886_v46 = vadd.f32 %v9256_v28, %v4847_v22  ;;  %v7131_v22 = vld [vmem:[%s7526_s12 + $0x20] sm:$0xff]  }
 0x39e   : > { %v4888_v8 = vadd.f32 %v9256_v28, %v4849_v11  ;;  %v5169_v28 = vunpack.c.l.bf16 %v7127_v62  ;;  %v5177_v49 = vunpack.c.l.bf16 %v7131_v22 }
 0x39f   : > { %v4918_v32 = vmax.f32 %v4886_v46, 0.0 }
 0x3a0   : > { %v4920_v23 = vmax.f32 %v4888_v8, 0.0 }
 0x3a1   : > { %v4935_v34 = vpack.c.bf16 %v4918_v32, %v4917_v43 }
 0x3a2   : > { %v4936_v44 = vpack.c.bf16 %v4920_v23, %v4919_v50  ;;  %v5178_v50 = vunpack.c.h.bf16 %v7131_v22 }
 0x3a3   : > { %6780 = vmatprep.mubr.bf16.mxu0 %v4935_v34 }
 0x3a4   : > { %6781 = vmatmul.mubr.bf16.gmra.mxu0 %v4936_v44 }
 0x42c   : > { %v6754_v48 = vpop.f32.mrf.mxu0 }
 0x42d   : > { %v5051_v37 = vadd.f32 %v6754_v48, %v9377_v53 }
 0x42e   : > { %v5042_v36 = vpop.f32.mrf.mxu0 }
 0x42f   : > { %v5043_v59 = vadd.f32 %v9377_v53, %v5042_v36  ;;  %v5203_v56 = vadd.f32 %v5171_v16, %v5051_v37  ;;  %v7132_v16 = vld [vmem:[%s7526_s12 + $0x38] sm:$0xff]  }
 0x430   : > { %v6755_v30 = vpop.f32.mrf.mxu0  ;;  %v5183_v36 = vunpack.c.l.bf16 %v7132_v16 }
 0x431   : > { %v5054_v52 = vadd.f32 %v6755_v30, %v9377_v53  ;;  %v5201_v54 = vadd.f32 %v5169_v28, %v5043_v59  ;;  %v5235_v35 = vmax.f32 %v5203_v56, 0.0 }
 0x432   : > { %v5045_v26 = vpop.f32.mrf.mxu0 }
 0x433   : > { %v5204_v10 = vadd.f32 %v5172_v51, %v5054_v52  ;;  %v5046_v38 = vadd.f32 %v9377_v53, %v5045_v26  ;;  %v5233_v1 = vmax.f32 %v5201_v54, 0.0  ;;  %v5184_v52 = vunpack.c.h.bf16 %v7132_v16 }
 0x434   : > { %v6758_v58 = vpop.f32.mrf.mxu0 }
 0x435   : > { %v5236_v0 = vmax.f32 %v5204_v10, 0.0  ;;  %v5202_v60 = vadd.f32 %v5170_v31, %v5046_v38  ;;  %v5067_v61 = vadd.f32 %v6758_v58, %v9377_v53  ;;  %v7133_v31 = vld [vmem:[%s7526_s12 + $0x30] sm:$0xff]  }
 0x436   : > { %v5058_v18 = vpop.f32.mrf.mxu0  ;;  %v5181_v56 = vunpack.c.l.bf16 %v7133_v31 }
 0x437   : > { %v6001_v5 = vpack.c.bf16 %v5236_v0, %v5235_v35  ;;  %v5234_v39 = vmax.f32 %v5202_v60, 0.0  ;;  %v5059_v13 = vadd.f32 %v9377_v53, %v5058_v18  ;;  %v5207_v45 = vadd.f32 %v5175_v40, %v5067_v61 }
 0x438   : > { %v6759_v9 = vpop.f32.mrf.mxu0  ;;  %v5182_v0 = vunpack.c.h.bf16 %v7133_v31 }
 0x439   : > { %6073 = vst [vmem:[%s9391_s22 + $0x8] sm:$0xff] %v6001_v5   ;;  %v5996_v24 = vpack.c.bf16 %v5234_v39, %v5233_v1  ;;  %v5070_v15 = vadd.f32 %v6759_v9, %v9377_v53  ;;  %v5205_v41 = vadd.f32 %v5173_v33, %v5059_v13  ;;  %v5239_v7 = vmax.f32 %v5207_v45, 0.0 }
 0x43a   : > { %v5061_v42 = vpop.f32.mrf.mxu0 }
 0x43b   : > { %5997 = vst [vmem:[%s9391_s22] sm:$0xff] %v5996_v24   ;;  %v5208_v55 = vadd.f32 %v5176_v47, %v5070_v15  ;;  %v5062_v2 = vadd.f32 %v9377_v53, %v5061_v42  ;;  %v5237_v21 = vmax.f32 %v5205_v41, 0.0  ;;  %v7134_v47 = vld [vmem:[%s7526_s12 + $0x48] sm:$0xff]   ;;  %v7135_v24 = vld [vmem:[%s7526_s12 + $0x40] sm:$0xff]  }
 0x43c   : > { %v6762_v29 = vpop.f32.mrf.mxu0  ;;  %v5187_v1 = vunpack.c.l.bf16 %v7134_v47  ;;  %v5185_v45 = vunpack.c.l.bf16 %v7135_v24  ;;  %v5186_v17 = vunpack.c.h.bf16 %v7135_v24 }
 0x43d   : > { %v5240_v14 = vmax.f32 %v5208_v55, 0.0  ;;  %v5206_v3 = vadd.f32 %v5174_v4, %v5062_v2  ;;  %v5083_v57 = vadd.f32 %v6762_v29, %v9377_v53  ;;  %v5188_v4 = vunpack.c.h.bf16 %v7134_v47 }
 0x43e   : > { %v5074_v25 = vpop.f32.mrf.mxu0 }
 0x43f   : > { %v6011_v46 = vpack.c.bf16 %v5240_v14, %v5239_v7  ;;  %v5238_v20 = vmax.f32 %v5206_v3, 0.0  ;;  %v5075_v11 = vadd.f32 %v9377_v53, %v5074_v25  ;;  %v5211_v8 = vadd.f32 %v5179_v6, %v5083_v57 }
 0x440   : > { %v6763_v43 = vpop.f32.mrf.mxu0 }
 0x441   : > { %6075 = vst [vmem:[%s9391_s22 + $0x18] sm:$0xff] %v6011_v46   ;;  %v6006_v32 = vpack.c.bf16 %v5238_v20, %v5237_v21  ;;  %v5086_v34 = vadd.f32 %v6763_v43, %v9377_v53  ;;  %v5209_v44 = vadd.f32 %v5177_v49, %v5075_v11  ;;  %v5243_v62 = vmax.f32 %v5211_v8, 0.0  ;;  %v7137_v8 = vld [vmem:[%s7526_s12 + $0x50] sm:$0xff]  }
 0x442   : > { %v5077_v23 = vpop.f32.mrf.mxu0 }
 0x443   : > { %6074 = vst [vmem:[%s9391_s22 + $0x10] sm:$0xff] %v6006_v32   ;;  %v5212_v48 = vadd.f32 %v5180_v19, %v5086_v34  ;;  %v5078_v37 = vadd.f32 %v9377_v53, %v5077_v23  ;;  %v5241_v26 = vmax.f32 %v5209_v44, 0.0  ;;  %v7136_v19 = vld [vmem:[%s7526_s12 + $0x58] sm:$0xff]   ;;  %v5189_v34 = vunpack.c.l.bf16 %v7137_v8 }
 0x444   : > { %v6766_v27 = vpop.f32.mrf.mxu0  ;;  %v5191_v21 = vunpack.c.l.bf16 %v7136_v19 }
 0x445   : > { %v5244_v28 = vmax.f32 %v5212_v48, 0.0  ;;  %v5210_v59 = vadd.f32 %v5178_v50, %v5078_v37  ;;  %v5099_v51 = vadd.f32 %v6766_v27, %v9377_v53  ;;  %v5192_v50 = vunpack.c.h.bf16 %v7136_v19 }
 0x446   : > { %v5090_v30 = vpop.f32.mrf.mxu0 }
 0x447   : > { %v6021_v54 = vpack.c.bf16 %v5244_v28, %v5243_v62  ;;  %v5242_v10 = vmax.f32 %v5210_v59, 0.0  ;;  %v5091_v38 = vadd.f32 %v9377_v53, %v5090_v30  ;;  %v5215_v40 = vadd.f32 %v5183_v36, %v5099_v51 }
 0x448   : > { %v6767_v58 = vpop.f32.mrf.mxu0  ;;  %v5190_v28 = vunpack.c.h.bf16 %v7137_v8 }
 0x449   : > { %6077 = vst [vmem:[%s9391_s22 + $0x28] sm:$0xff] %v6021_v54   ;;  %v6016_v12 = vpack.c.bf16 %v5242_v10, %v5241_v26  ;;  %v5102_v35 = vadd.f32 %v6767_v58, %v9377_v53  ;;  %v5213_v61 = vadd.f32 %v5181_v56, %v5091_v38  ;;  %v5247_v5 = vmax.f32 %v5215_v40, 0.0  ;;  %v7139_v40 = vld [vmem:[%s7526_s12 + $0x60] sm:$0xff]  }
 0x44a   : > { %v5093_v60 = vpop.f32.mrf.mxu0 }
 0x44b   : > { %6076 = vst [vmem:[%s9391_s22 + $0x20] sm:$0xff] %v6016_v12   ;;  %v5216_v18 = vadd.f32 %v5184_v52, %v5102_v35  ;;  %v5094_v63 = vadd.f32 %v9377_v53, %v5093_v60  ;;  %v5245_v42 = vmax.f32 %v5213_v61, 0.0  ;;  %v7138_v52 = vld [vmem:[%s7526_s12 + $0x68] sm:$0xff]   ;;  %v5193_v35 = vunpack.c.l.bf16 %v7139_v40 }
 0x44c   : > { %v6770_v33 = vpop.f32.mrf.mxu0  ;;  %v5195_v26 = vunpack.c.l.bf16 %v7138_v52 }
 0x44d   : > { %v5248_v39 = vmax.f32 %v5216_v18, 0.0  ;;  %v5214_v13 = vadd.f32 %v5182_v0, %v5094_v63  ;;  %v5115_v9 = vadd.f32 %v6770_v33, %v9377_v53  ;;  %v5196_v0 = vunpack.c.h.bf16 %v7138_v52 }
 0x44e   : > { %v5106_v15 = vpop.f32.mrf.mxu0 }
 0x44f   : > { %v6031_v41 = vpack.c.bf16 %v5248_v39, %v5247_v5  ;;  %v5246_v55 = vmax.f32 %v5214_v13, 0.0  ;;  %v5107_v2 = vadd.f32 %v9377_v53, %v5106_v15  ;;  %v5219_v7 = vadd.f32 %v5187_v1, %v5115_v9 }
 0x450   : > { %v6771_v29 = vpop.f32.mrf.mxu0  ;;  %v5194_v39 = vunpack.c.h.bf16 %v7139_v40 }
 0x451   : > { %6079 = vst [vmem:[%s9391_s22 + $0x38] sm:$0xff] %v6031_v41   ;;  %v6026_v6 = vpack.c.bf16 %v5246_v55, %v5245_v42  ;;  %v5118_v14 = vadd.f32 %v6771_v29, %v9377_v53  ;;  %v5217_v57 = vadd.f32 %v5185_v45, %v5107_v2  ;;  %v5251_v46 = vmax.f32 %v5219_v7, 0.0  ;;  %v7140_v55 = vld [vmem:[%s7526_s12 + $0x78] sm:$0xff]  }
 0x452   : > { %v5109_v3 = vpop.f32.mrf.mxu0  ;;  %v5199_v2 = vunpack.c.l.bf16 %v7140_v55 }
 0x453   : > { %6078 = vst [vmem:[%s9391_s22 + $0x30] sm:$0xff] %v6026_v6   ;;  %v5220_v25 = vadd.f32 %v5188_v4, %v5118_v14  ;;  %v5110_v22 = vadd.f32 %v9377_v53, %v5109_v3  ;;  %v5249_v23 = vmax.f32 %v5217_v57, 0.0 }
 0x454   : > { %v6774_v49 = vpop.f32.mrf.mxu0 }
 0x455   : > { %v5252_v20 = vmax.f32 %v5220_v25, 0.0  ;;  %v5218_v11 = vadd.f32 %v5186_v17, %v5110_v22  ;;  %v5131_v43 = vadd.f32 %v6774_v49, %v9377_v53  ;;  %v7141_v25 = vld [vmem:[%s7526_s12 + $0x70] sm:$0xff]   ;;  %v5200_v49 = vunpack.c.h.bf16 %v7140_v55  ;;  %s9450_s12 = scalar_lea.hbm %s9504_s7, %s5992_s18 }
 0x456   : > { %v5122_v32 = vpop.f32.mrf.mxu0  ;;  %v5197_v22 = vunpack.c.l.bf16 %v7141_v25 }
 0x457   : > { %v6041_v44 = vpack.c.bf16 %v5252_v20, %v5251_v46  ;;  %v5250_v48 = vmax.f32 %v5218_v11, 0.0  ;;  %v5123_v37 = vadd.f32 %v9377_v53, %v5122_v32  ;;  %v5223_v36 = vadd.f32 %v5191_v21, %v5131_v43 }
 0x458   : > { %v6775_v27 = vpop.f32.mrf.mxu0  ;;  %v5198_v20 = vunpack.c.h.bf16 %v7141_v25 }
 0x459   : > { %6081 = vst [vmem:[%s9391_s22 + $0x48] sm:$0xff] %v6041_v44   ;;  %v6036_v16 = vpack.c.bf16 %v5250_v48, %v5249_v23  ;;  %v5134_v62 = vadd.f32 %v6775_v27, %v9377_v53  ;;  %v5221_v51 = vadd.f32 %v5189_v34, %v5123_v37  ;;  %v5255_v54 = vmax.f32 %v5223_v36, 0.0 }
 0x45a   : > { %v5125_v59 = vpop.f32.mrf.mxu0 }
 0x45b   : > { %6080 = vst [vmem:[%s9391_s22 + $0x40] sm:$0xff] %v6036_v16   ;;  %v5224_v30 = vadd.f32 %v5192_v50, %v5134_v62  ;;  %v5126_v31 = vadd.f32 %v9377_v53, %v5125_v59  ;;  %v5253_v60 = vmax.f32 %v5221_v51, 0.0 }
 0x45c   : > { %v6778_v56 = vpop.f32.mrf.mxu0 }
 0x45d   : > { %v5256_v10 = vmax.f32 %v5224_v30, 0.0  ;;  %v5222_v38 = vadd.f32 %v5190_v28, %v5126_v31  ;;  %v5147_v58 = vadd.f32 %v6778_v56, %v9377_v53 }
 0x45e   : > { %v5138_v12 = vpop.f32.mrf.mxu0 }
 0x45f   : > { %v6051_v61 = vpack.c.bf16 %v5256_v10, %v5255_v54  ;;  %v5254_v18 = vmax.f32 %v5222_v38, 0.0  ;;  %v5139_v63 = vadd.f32 %v9377_v53, %v5138_v12  ;;  %v5227_v1 = vadd.f32 %v5195_v26, %v5147_v58 }
 0x460   : > { %v6779_v33 = vpop.f32.mrf.mxu0 }
 0x461   : > { %6083 = vst [vmem:[%s9391_s22 + $0x58] sm:$0xff] %v6051_v61   ;;  %v6046_v47 = vpack.c.bf16 %v5254_v18, %v5253_v60  ;;  %v5150_v5 = vadd.f32 %v6779_v33, %v9377_v53  ;;  %v5225_v9 = vadd.f32 %v5193_v35, %v5139_v63  ;;  %v5259_v15 = vmax.f32 %v5227_v1, 0.0 }
 0x462   : > { %v5141_v13 = vpop.f32.mrf.mxu0 }
 0x463   : > { %6082 = vst [vmem:[%s9391_s22 + $0x50] sm:$0xff] %v6046_v47   ;;  %v5228_v24 = vadd.f32 %v5196_v0, %v5150_v5  ;;  %v5142_v45 = vadd.f32 %v9377_v53, %v5141_v13  ;;  %v5257_v29 = vmax.f32 %v5225_v9, 0.0 }
 0x464   : > { %v6782_v41 = vpop.f32.mrf.mxu0 }
 0x465   : > { %v5260_v4 = vmax.f32 %v5228_v24, 0.0  ;;  %v5226_v42 = vadd.f32 %v5194_v39, %v5142_v45  ;;  %v5163_v7 = vadd.f32 %v6782_v41, %v9377_v53 }
 0x466   : > { %v5154_v14 = vpop.f32.mrf.mxu0 }
 0x467   : > { %v6061_v17 = vpack.c.bf16 %v5260_v4, %v5259_v15  ;;  %v5258_v6 = vmax.f32 %v5226_v42, 0.0  ;;  %v5155_v57 = vadd.f32 %v9377_v53, %v5154_v14  ;;  %v5231_v21 = vadd.f32 %v5199_v2, %v5163_v7 }
 0x468   : > { %v6783_v19 = vpop.f32.mrf.mxu0 }
 0x469   : > { %6085 = vst [vmem:[%s9391_s22 + $0x68] sm:$0xff] %v6061_v17   ;;  %v6056_v3 = vpack.c.bf16 %v5258_v6, %v5257_v29  ;;  %v5166_v46 = vadd.f32 %v6783_v19, %v9377_v53  ;;  %v5229_v43 = vadd.f32 %v5197_v22, %v5155_v57  ;;  %v5263_v34 = vmax.f32 %v5231_v21, 0.0 }
 0x46a   : > { %v5157_v11 = vpop.f32.mrf.mxu0 }
 0x46b   : > { %6084 = vst [vmem:[%s9391_s22 + $0x60] sm:$0xff] %v6056_v3   ;;  %v5232_v32 = vadd.f32 %v5200_v49, %v5166_v46  ;;  %v5158_v8 = vadd.f32 %v9377_v53, %v5157_v11  ;;  %v5261_v44 = vmax.f32 %v5229_v43, 0.0 }
 0x46d   : > { %v5264_v50 = vmax.f32 %v5232_v32, 0.0  ;;  %v5230_v23 = vadd.f32 %v5198_v20, %v5158_v8 }
 0x46f   : > { %v6071_v48 = vpack.c.bf16 %v5264_v50, %v5263_v34  ;;  %v5262_v37 = vmax.f32 %v5230_v23, 0.0 }
 0x471   : > { %6087 = vst [vmem:[%s9391_s22 + $0x78] sm:$0xff] %v6071_v48   ;;  %v6066_v53 = vpack.c.bf16 %v5262_v37, %v5261_v44 }
 0x473   : > { %6086 = vst [vmem:[%s9391_s22 + $0x70] sm:$0xff] %v6066_v53  }
 0x474   : > { %7261 = shalt.err (!%p7258_p10)
}
 0x475   : > { %s7262_s15 = scalar_lea.hbm %s9450_s12, 2048  ;;  %s7266_s21 = scalar_lea.hbm %s9504_s7, 4096 }
 0x476   : > { %p7263_p6 = scmp.ne.s32.totalorder %s9450_s12, %s7262_s15  ;;  %p7267_p3 = scmp.lt.s32.totalorder %s9450_s12, %s9504_s7 }
 0x477   : > { %p7268_p11 = scmp.lt.s32.totalorder %s7266_s21, %s7262_s15 }
 0x478   : > { %p7264_p4 = pnand %p7263_p6, %p9753_p1 }
 0x479   : > { %p7269_p5 = por %p7268_p11, %p7267_p3 }
 0x47a   : > { %p7265_p8 = pneg %p7264_p4 }
 0x47c   : > { %p7270_p7 = pnand %p7269_p5, %p7265_p8 }
 0x47e   : > { %7273 = shalt.err (!%p7270_p7)
}
 0x47f   : > { %s7331_s1 = smov 64   ;;  %s7332_s16 = smov 4  }
 0x480   : > { %6814 = dma.vmem_to_hbm [thread:$0]  (%p9753_p1), %s9452_s23, 2048, %s9450_s12, %s5426_s30, %s7331_s1, %s7331_s1, %s7332_s16  }
 0x481 PF: > { %s5454_s9 = sand.u32 1, %s7308_s24   ;;  %p9754_p12 = scmp.ne.s32.totalorder %s9529_s8, 0 }
 0x482   : > { %p9755_p9 = scmp.ge.s32.totalorder %s7320_s27, 2  ;;  %s5455_s28 = scalar_lea.sflag [#allocation5], %s5454_s9 }
 0x484   : > { %p6831_p13 = pnand %p9755_p9, %p9754_p12 }
 0x486   : > { %p6832_p0 = pneg %p6831_p13 }
 0x488   : > { %7303 = dma.done.wait (%p6832_p0), %s5455_s28, 2048  }
 0x489   : > { %7305 = vsyncadd (%p6832_p0), %s5455_s28, 4294965248  ;;  %p22_p2 = scmp.ge.s32.totalorder %s7462_s14, 4   ;;  %s9756_s24 = smov %s7312_s25 }
 0x48a   : > { %s9757_s25 = smov %s7316_s26  ;;  %s9758_s26 = smov %s7472_s17 }
 0x48b   : > { %s9759_s27 = smov %s7462_s14  ;;  %24 = sbr.rel (!%p22_p2) target bundleno = 9 (0x9), region = 107 }
 0x490   :  { %5460 = vsyncpa [#allocation4], 1 }
 0x491   :  { %5462 = vsyncpa [#allocation4 + $0x1], 1 }
 0x492   :  { %5463 = vsyncpa [#allocation7], 1 }
 0x493   :  { %5464 = vsyncpa [#allocation10], 1 }
 0x494   :  { %5465 = vsyncpa [#allocation5], 1 }
 0x495   :  { %5467 = vsyncpa [#allocation5 + $0x1], 1 }

</bundles_post_ra>
